<compile_context>
chip_gen: v5e
topology: v5e:2x2
jax: 0.10.0
libtpu: 0.0.40
codegen_flags: <defaults>
</compile_context>

<pallas_src>
import functools
import math

import jax
import jax.numpy as jnp
import numpy as np
from jax.experimental import pallas as pl
from jax.experimental.pallas import tpu as pltpu

MIN_BIN_WIDTH = 1e-3
MIN_BIN_HEIGHT = 1e-3
MIN_DERIVATIVE = 1e-3
_DERIV_CONST = math.log(math.exp(1.0 - MIN_DERIVATIVE) - 1.0)


# ----------------------------- in-kernel helpers -----------------------------

def _elu(x):
    # PyTorch nn.ELU (alpha=1): x if x>0 else exp(x)-1 (clamp exp arg for safety)
    return jnp.where(x > 0, x, jnp.exp(jnp.minimum(x, 0.0)) - 1.0)


def _softplus(x):
    return jnp.maximum(x, 0.0) + jnp.log(1.0 + jnp.exp(-jnp.abs(x)))


def _bins(un_list, min_bin, K, B):
    """softmax + min-bin floor -> bin sizes and knot positions in [-B, B]."""
    m = un_list[0]
    for u in un_list[1:]:
        m = jnp.maximum(m, u)
    e = [jnp.exp(u - m) for u in un_list]
    s = e[0]
    for v in e[1:]:
        s = s + v
    inv_s = pl.reciprocal(s, approx=False)          # exact: normalizer error amplifies over K knots
    p = [min_bin + (1.0 - min_bin * K) * (v * inv_s) for v in e]
    knots = [jnp.full_like(m, -B)]                  # left endpoint forced to -B
    acc = jnp.zeros_like(m)
    for t in range(K - 1):
        acc = acc + p[t]
        knots.append(2.0 * B * acc - B)
    knots.append(jnp.full_like(m, B))               # right endpoint forced to B
    sizes = [knots[t + 1] - knots[t] for t in range(K)]
    return sizes, knots


def _rq_spline_forward(x2, theta, d2, K, B, band):
    """Unconstrained rational-quadratic spline (Durkan et al.), forward direction.

    x2:    (d2, TB)           feature-major
    theta: (band*(3K-1), TB)  each parameter group occupies an 8-aligned `band` row block
    """
    w_un = [theta[t * band:t * band + d2, :] for t in range(K)]
    h_un = [theta[(K + t) * band:(K + t) * band + d2, :] for t in range(K)]
    d_un = [theta[(2 * K + t) * band:(2 * K + t) * band + d2, :] for t in range(K - 1)]

    widths, knots_w = _bins(w_un, MIN_BIN_WIDTH, K, B)
    heights, knots_h = _bins(h_un, MIN_BIN_HEIGHT, K, B)

    # derivatives: edge padding constant satisfies MIN_DERIVATIVE + softplus(c) == 1.0
    derivs = ([jnp.ones_like(x2)]
              + [MIN_DERIVATIVE + _softplus(d) for d in d_un]
              + [jnp.ones_like(x2)])

    inside = jnp.logical_and(x2 >= -B, x2 <= B)     # identity tails outside [-B, B]
    xi = jnp.clip(x2, -B, B)

    # fused searchsorted + one-hot select: sel_t = [xi >= knot_t] - [xi >= knot_{t+1}]
    # (xi >= knot_0 = -B always; xi >= knot_K + 1e-6 = B + 1e-6 never)
    ge = [jnp.ones_like(x2)]
    for t in range(1, K):
        ge.append((xi >= knots_w[t]).astype(jnp.float32))
    ge.append(jnp.zeros_like(x2))

    z = jnp.zeros_like(x2)
    in_cw, in_w, in_ch, in_h, in_d, in_dp1 = z, z, z, z, z, z
    for t in range(K):
        sel = ge[t] - ge[t + 1]
        in_cw = in_cw + sel * knots_w[t]
        in_w = in_w + sel * widths[t]
        in_ch = in_ch + sel * knots_h[t]
        in_h = in_h + sel * heights[t]
        in_d = in_d + sel * derivs[t]
        in_dp1 = in_dp1 + sel * derivs[t + 1]

    inv_w = pl.reciprocal(in_w, approx=False)
    in_delta = in_h * inv_w
    th = (xi - in_cw) * inv_w
    omth = 1.0 - th
    tomt = th * omth
    num = in_h * (in_delta * th * th + in_d * tomt)
    den = in_delta + (in_d + in_dp1 - 2.0 * in_delta) * tomt
    inv_den = pl.reciprocal(den, approx=False)
    out = in_ch + num * inv_den
    dnum = in_delta * in_delta * (in_dp1 * th * th + 2.0 * in_delta * tomt + in_d * omth * omth)
    lad = jnp.log(dnum * inv_den * inv_den)          # fused: one log instead of log(dnum)-2log(den)

    x2_new = jnp.where(inside, out, x2)
    ld = jnp.where(inside, lad, 0.0)
    return x2_new, ld


# ----------------------------- the fused Pallas kernel ------------------------

def _flow_kernel(x_ref, w1_ref, b1_ref, w2_ref, b2_ref, w3_ref, b3_ref,
                 w4_ref, b4_ref, p11_ref, p12_ref, p21_ref, p22_ref,
                 y_ref, ld_ref, *, dim, K, B, n_layers, band):
    d1 = dim // 2
    d2 = dim - d1

    x = x_ref[...]                                   # (dim, TB): features on sublanes, batch on lanes
    x1 = x[:d1, :]                                   # identity half (conditioner input, nc=0)
    x2 = x[d1:, :]                                   # transformed half
    ld_acc = jnp.zeros((d2, x.shape[1]), jnp.float32)

    for l in range(n_layers):                        # static unroll: layers are tiny
        # conditioner FCN (transposed): Linear+ELU x3, final Linear
        # TODO(synk): cast conditioner weights/activations to bf16 if hidden_dim ever scales up.
        h = _elu(jnp.dot(w1_ref[l], x1, preferred_element_type=jnp.float32) + b1_ref[l])
        h = _elu(jnp.dot(w2_ref[l], h, preferred_element_type=jnp.float32) + b2_ref[l])
        h = _elu(jnp.dot(w3_ref[l], h, preferred_element_type=jnp.float32) + b3_ref[l])
        theta = jnp.dot(w4_ref[l], h, preferred_element_type=jnp.float32) + b4_ref[l]

        x2_new, ld = _rq_spline_forward(x2, theta, d2, K, B, band)
        ld_acc = ld_acc + ld                         # permutation contributes 0 to log|det|

        if l < n_layers - 1:
            # InvertiblePermutation fused as a feature-major one-hot matmul, pre-split into
            # 4 blocks so both halves come out directly (no sublane-offset slicing) and the
            # lane-axis concat of [x1 | x2_new] is absorbed.
            x1_next = (jnp.dot(p11_ref[l], x1, preferred_element_type=jnp.float32) +
                       jnp.dot(p12_ref[l], x2_new, preferred_element_type=jnp.float32))
            x2 = (jnp.dot(p21_ref[l], x1, preferred_element_type=jnp.float32) +
                  jnp.dot(p22_ref[l], x2_new, preferred_element_type=jnp.float32))
            x1 = x1_next
        else:
            # last layer has no permutation: the "concat" is the output store itself
            y_ref[:d1, :] = x1
            y_ref[d1:, :] = x2_new

    ld_ref[...] = jnp.sum(ld_acc, axis=0, keepdims=True)   # single sublane reduce, lane-dense store


# ----------------------------- wrappers (glue) --------------------------------

def _round_up(a, b):
    return (a + b - 1) // b * b


def prepare_flow_params(params, perms, K, dim):
    """One-time parameter prep: transpose/stack per-layer weights, band-pad + regroup W4,
    and pre-split the permutation one-hot matrices into their four d1/d2 blocks."""
    d1 = dim // 2
    d2 = dim - d1
    n_groups = 3 * K - 1
    band = _round_up(d2, 8)                          # 8-aligned row band per parameter group
    n_layers = len(params)

    w1, b1, w2, b2, w3, b3, w4, b4 = [], [], [], [], [], [], [], []
    for layer in params:
        ws = [np.asarray(w, np.float32) for w in layer["ws"]]
        bs = [np.asarray(b, np.float32) for b in layer["bs"]]
        w1.append(ws[0].T); b1.append(bs[0][:, None])
        w2.append(ws[1].T); b2.append(bs[1][:, None])
        w3.append(ws[2].T); b3.append(bs[2][:, None])
        # final linear: torch flat column j*(3K-1)+g  ->  kernel theta row g*band + j
        rows = band * n_groups
        w4t = np.zeros((rows, ws[3].shape[0]), np.float32)
        b4t = np.zeros((rows, 1), np.float32)
        for g in range(n_groups):
            for j in range(d2):
                w4t[g * band + j, :] = ws[3][:, j * n_groups + g]
                b4t[g * band + j, 0] = bs[3][j * n_groups + g]
        w4.append(w4t); b4.append(b4t)

    # permutation one-hot matrices (feature-major): x_perm = G @ x with G = I[perm, :]
    eye = np.eye(dim, dtype=np.float32)
    if n_layers > 1:
        gmats = [eye[np.asarray(p), :] for p in perms[:n_layers - 1]]
    else:
        gmats = [eye]                                # dummy, never read in-kernel
    p11 = np.stack([g[:d1, :d1] for g in gmats])
    p12 = np.stack([g[:d1, d1:] for g in gmats])
    p21 = np.stack([g[d1:, :d1] for g in gmats])
    p22 = np.stack([g[d1:, d1:] for g in gmats])

    stk = lambda lst: jnp.asarray(np.stack(lst))
    return dict(w1=stk(w1), b1=stk(b1), w2=stk(w2), b2=stk(b2),
                w3=stk(w3), b3=stk(b3), w4=stk(w4), b4=stk(b4),
                p11=jnp.asarray(p11), p12=jnp.asarray(p12),
                p21=jnp.asarray(p21), p22=jnp.asarray(p22),
                n_layers=n_layers, band=band)


def neural_spline_flow_forward(z, prepared, K, B, *, max_block_batch=1024):
    """Full NeuralSplineFlow.forward in ONE pallas_call. z: (N, dim) f32."""
    N, dim = z.shape
    L = prepared["n_layers"]
    band = prepared["band"]

    # batch on lanes: pad to a multiple of 128; aim for >= 2 grid blocks (v7x megacore)
    np0 = _round_up(N, 128)
    if np0 >= 256:
        TB = min(max_block_batch, _round_up(pl.cdiv(np0, 2), 128))
    else:
        TB = np0
    Np = _round_up(np0, TB)

    zT = jnp.transpose(z).astype(jnp.float32)        # (dim, N) feature-major
    if Np != N:
        zT = jnp.pad(zT, ((0, 0), (0, Np - N)))
    grid = (Np // TB,)

    kernel = functools.partial(_flow_kernel, dim=dim, K=K, B=float(B),
                               n_layers=L, band=band)

    def _full(arr):
        nd = arr.ndim
        return pl.BlockSpec(arr.shape, lambda i, _nd=nd: (0,) * _nd)

    yT, ldT = pl.pallas_call(
        kernel,
        grid=grid,
        in_specs=[
            pl.BlockSpec((dim, TB), lambda i: (0, i)),
            _full(prepared["w1"]), _full(prepared["b1"]),
            _full(prepared["w2"]), _full(prepared["b2"]),
            _full(prepared["w3"]), _full(prepared["b3"]),
            _full(prepared["w4"]), _full(prepared["b4"]),
            _full(prepared["p11"]), _full(prepared["p12"]),
            _full(prepared["p21"]), _full(prepared["p22"]),
        ],
        out_specs=[pl.BlockSpec((dim, TB), lambda i: (0, i)),   # lane-dense y
                   pl.BlockSpec((1, TB), lambda i: (0, i))],    # lane-dense logdet
        out_shape=(jax.ShapeDtypeStruct((dim, Np), jnp.float32),
                   jax.ShapeDtypeStruct((1, Np), jnp.float32)),
        compiler_params=pltpu.CompilerParams(
            dimension_semantics=("parallel",),
            vmem_limit_bytes=32 * 1024 * 1024),       # tiles are tiny; safe on v5e/v6e/v7x
    )(zT, prepared["w1"], prepared["b1"], prepared["w2"], prepared["b2"],
      prepared["w3"], prepared["b3"], prepared["w4"], prepared["b4"],
      prepared["p11"], prepared["p12"], prepared["p21"], prepared["p22"])

    return jnp.transpose(yT)[:N], ldT[0, :N]


# ----------------------------- pure-JAX reference ------------------------------

def _ref_unconstrained_rqs(x2, Wun, Hun, Dun, B, K):
    widths = jax.nn.softmax(Wun, axis=-1)
    widths = MIN_BIN_WIDTH + (1 - MIN_BIN_WIDTH * K) * widths
    cw = jnp.cumsum(widths, axis=-1)
    cw = jnp.concatenate([jnp.zeros_like(cw[..., :1]), cw], axis=-1)
    cw = 2 * B * cw - B
    cw = cw.at[..., 0].set(-B).at[..., -1].set(B)
    widths = cw[..., 1:] - cw[..., :-1]

    Dpad = jnp.concatenate([jnp.full_like(Dun[..., :1], _DERIV_CONST), Dun,
                            jnp.full_like(Dun[..., :1], _DERIV_CONST)], axis=-1)
    derivs = MIN_DERIVATIVE + jax.nn.softplus(Dpad)

    heights = jax.nn.softmax(Hun, axis=-1)
    heights = MIN_BIN_HEIGHT + (1 - MIN_BIN_HEIGHT * K) * heights
    ch = jnp.cumsum(heights, axis=-1)
    ch = jnp.concatenate([jnp.zeros_like(ch[..., :1]), ch], axis=-1)
    ch = 2 * B * ch - B
    ch = ch.at[..., 0].set(-B).at[..., -1].set(B)
    heights = ch[..., 1:] - ch[..., :-1]

    inside = (x2 >= -B) & (x2 <= B)
    xi = jnp.clip(x2, -B, B)
    locs = cw.at[..., -1].add(1e-6)
    bin_idx = jnp.sum((xi[..., None] >= locs).astype(jnp.int32), axis=-1) - 1

    take = lambda a: jnp.take_along_axis(a, bin_idx[..., None], axis=-1)[..., 0]
    in_cw, in_w = take(cw), take(widths)
    in_ch, in_h = take(ch), take(heights)
    in_delta = take(heights / widths)
    in_d, in_dp1 = take(derivs), take(derivs[..., 1:])

    th = (xi - in_cw) / in_w
    tomt = th * (1 - th)
    num = in_h * (in_delta * th ** 2 + in_d * tomt)
    den = in_delta + (in_d + in_dp1 - 2 * in_delta) * tomt
    out = in_ch + num / den
    dnum = in_delta ** 2 * (in_dp1 * th ** 2 + 2 * in_delta * tomt + in_d * (1 - th) ** 2)
    lad = jnp.log(dnum) - 2 * jnp.log(den)
    return jnp.where(inside, out, x2), jnp.where(inside, lad, 0.0)


def neural_spline_flow_reference(z, params, perms, K, B):
    x = z
    sum_ld = jnp.zeros((z.shape[0],), jnp.float32)
    for i, layer in enumerate(params):
        dim = x.shape[1]
        d1, d2 = dim // 2, dim - dim // 2
        x1, x2 = x[:, :d1], x[:, d1:]
        ws, bs = layer["ws"], layer["bs"]
        h = x1
        for wi, bi in zip(ws[:-1], bs[:-1]):
            h = jax.nn.elu(h @ wi + bi)
        out = (h @ ws[-1] + bs[-1]).reshape(-1, d2, 3 * K - 1)
        Wun, Hun, Dun = out[..., :K], out[..., K:2 * K], out[..., 2 * K:]
        x2n, ld = _ref_unconstrained_rqs(x2, Wun, Hun, Dun, B, K)
        x = jnp.concatenate([x1, x2n], axis=1)
        sum_ld = sum_ld + jnp.sum(ld, axis=1)
        if i < len(params) - 1:
            x = x[:, perms[i]]                       # InvertiblePermutation.forward, logdet 0
    return x, sum_ld


# ----------------------------- deterministic init ------------------------------

def _init_linear(key, fan_in, fan_out):
    k1, k2 = jax.random.split(key)
    bound = 1.0 / math.sqrt(fan_in)
    w = jax.random.uniform(k1, (fan_in, fan_out), jnp.float32, -bound, bound)
    b = jax.random.uniform(k2, (fan_out,), jnp.float32, -bound, bound)
    return w, b


def init_flow_params(key, nin, nc, n_layers, K, hidden_dim):
    d1 = nin // 2
    d2 = nin - d1
    sizes = [d1 + nc, hidden_dim, hidden_dim, hidden_dim, (3 * K - 1) * d2]
    params = []
    for _ in range(n_layers):
        ws, bs = [], []
        for fi, fo in zip(sizes, sizes[1:]):
            key, sub = jax.random.split(key)
            w, b = _init_linear(sub, fi, fo)
            ws.append(w)
            bs.append(b)
        params.append({"ws": ws, "bs": bs})
    perms = []
    for _ in range(n_layers - 1):
        key, sub = jax.random.split(key)
        perms.append(jax.random.permutation(sub, nin))
    return params, perms, key


# ----------------------------------- main --------------------------------------

if __name__ == "__main__":
    nin, nc, n_layers, K, B, hidden_dim = 8, 0, 5, 5, 3, 8

    key = jax.random.PRNGKey(0)
    params, perms, key = init_flow_params(key, nin, nc, n_layers, K, hidden_dim)
    prepared = prepare_flow_params(params, perms, K, nin)    # one-time param prep

    for batch in (8, 300):        # small single-block case + multi-block / padded-batch case
        key, kz = jax.random.split(key)
        z = jax.random.normal(kz, (batch, nin), dtype=jnp.float32)

        y, logdet = neural_spline_flow_forward(z, prepared, K, float(B))
        jax.block_until_ready((y, logdet))

        y_ref, ld_ref = neural_spline_flow_reference(z, params, perms, K, float(B))
        assert y.shape == (batch, nin) and logdet.shape == (batch,)
        np.testing.assert_allclose(np.asarray(y), np.asarray(y_ref), rtol=1e-2, atol=1e-2)
        np.testing.assert_allclose(np.asarray(logdet), np.asarray(ld_ref), rtol=1e-2, atol=1e-2)

    print("KERNEL_OK")
</pallas_src>

<mosaic_0001>
module attributes {stable_mosaic.version = 11 : i64} {
  func.func @_flow_kernel(%arg0: i32, %arg1: memref<8x128xf32, #tpu.memory_space<vmem>>, %arg2: memref<5x8x4xf32, #tpu.memory_space<vmem>>, %arg3: memref<5x8x1xf32, #tpu.memory_space<vmem>>, %arg4: memref<5x8x8xf32, #tpu.memory_space<vmem>>, %arg5: memref<5x8x1xf32, #tpu.memory_space<vmem>>, %arg6: memref<5x8x8xf32, #tpu.memory_space<vmem>>, %arg7: memref<5x8x1xf32, #tpu.memory_space<vmem>>, %arg8: memref<5x112x8xf32, #tpu.memory_space<vmem>>, %arg9: memref<5x112x1xf32, #tpu.memory_space<vmem>>, %arg10: memref<4x4x4xf32, #tpu.memory_space<vmem>>, %arg11: memref<4x4x4xf32, #tpu.memory_space<vmem>>, %arg12: memref<4x4x4xf32, #tpu.memory_space<vmem>>, %arg13: memref<4x4x4xf32, #tpu.memory_space<vmem>>, %arg14: memref<8x128xf32, #tpu.memory_space<vmem>>, %arg15: memref<1x128xf32, #tpu.memory_space<vmem>>) attributes {dimension_semantics = [#tpu.dimension_semantics<parallel>], iteration_bounds = array<i64: 1>, scalar_prefetch = 0 : i64, scratch_operands = 0 : i64, tpu.core_type = #tpu.core_type<tc>, window_params = [{transform_indices = @transform_0, window_bounds = array<i64: 8, 128>}, {pipeline_mode = #tpu.pipeline_mode<synchronous>, transform_indices = @transform_1, window_bounds = array<i64: 5, 8, 4>}, {pipeline_mode = #tpu.pipeline_mode<synchronous>, transform_indices = @transform_2, window_bounds = array<i64: 5, 8, 1>}, {pipeline_mode = #tpu.pipeline_mode<synchronous>, transform_indices = @transform_3, window_bounds = array<i64: 5, 8, 8>}, {pipeline_mode = #tpu.pipeline_mode<synchronous>, transform_indices = @transform_4, window_bounds = array<i64: 5, 8, 1>}, {pipeline_mode = #tpu.pipeline_mode<synchronous>, transform_indices = @transform_5, window_bounds = array<i64: 5, 8, 8>}, {pipeline_mode = #tpu.pipeline_mode<synchronous>, transform_indices = @transform_6, window_bounds = array<i64: 5, 8, 1>}, {pipeline_mode = #tpu.pipeline_mode<synchronous>, transform_indices = @transform_7, window_bounds = array<i64: 5, 112, 8>}, {pipeline_mode = #tpu.pipeline_mode<synchronous>, transform_indices = @transform_8, window_bounds = array<i64: 5, 112, 1>}, {pipeline_mode = #tpu.pipeline_mode<synchronous>, transform_indices = @transform_9, window_bounds = array<i64: 4, 4, 4>}, {pipeline_mode = #tpu.pipeline_mode<synchronous>, transform_indices = @transform_10, window_bounds = array<i64: 4, 4, 4>}, {pipeline_mode = #tpu.pipeline_mode<synchronous>, transform_indices = @transform_11, window_bounds = array<i64: 4, 4, 4>}, {pipeline_mode = #tpu.pipeline_mode<synchronous>, transform_indices = @transform_12, window_bounds = array<i64: 4, 4, 4>}, {transform_indices = @transform_13, window_bounds = array<i64: 8, 128>}, {transform_indices = @transform_14, window_bounds = array<i64: 1, 128>}]} {
    %c0 = arith.constant 0 : index
    %c0_0 = arith.constant 0 : index
    %0 = vector.load %arg1[%c0, %c0_0] : memref<8x128xf32, #tpu.memory_space<vmem>>, vector<8x128xf32>
    %1 = vector.extract_strided_slice %0 {offsets = [0, 0], sizes = [4, 128], strides = [1, 1]} : vector<8x128xf32> to vector<4x128xf32>
    %2 = vector.extract_strided_slice %0 {offsets = [4, 0], sizes = [4, 128], strides = [1, 1]} : vector<8x128xf32> to vector<4x128xf32>
    %cst = arith.constant 0.000000e+00 : f32
    %3 = vector.broadcast %cst : f32 to vector<4x128xf32>
    %c0_1 = arith.constant 0 : index
    %c0_2 = arith.constant 0 : index
    %c0_3 = arith.constant 0 : index
    %4 = vector.load %arg2[%c0_1, %c0_2, %c0_3] : memref<5x8x4xf32, #tpu.memory_space<vmem>>, vector<1x8x4xf32>
    %5 = vector.shape_cast %4 : vector<1x8x4xf32> to vector<8x4xf32>
    %cst_4 = arith.constant dense<0.000000e+00> : vector<8x128xf32>
    %6 = tpu.matmul %5, %1, %cst_4 {dimension_numbers = #tpu.dot_dimension_numbers<[1], [0], [0], [1], [0, 0, 1, 1], [], []>} : vector<8x4xf32>, vector<4x128xf32>, vector<8x128xf32> -> vector<8x128xf32>
    %c0_5 = arith.constant 0 : index
    %c0_6 = arith.constant 0 : index
    %c0_7 = arith.constant 0 : index
    %7 = vector.load %arg3[%c0_5, %c0_6, %c0_7] : memref<5x8x1xf32, #tpu.memory_space<vmem>>, vector<1x8x1xf32>
    %8 = vector.shape_cast %7 : vector<1x8x1xf32> to vector<8x1xf32>
    %9 = vector.broadcast %8 : vector<8x1xf32> to vector<8x128xf32>
    %10 = arith.addf %6, %9 : vector<8x128xf32>
    %cst_8 = arith.constant 0.000000e+00 : f32
    %11 = vector.broadcast %cst_8 : f32 to vector<8x128xf32>
    %12 = arith.cmpf ogt, %10, %11 : vector<8x128xf32>
    %cst_9 = arith.constant 0.000000e+00 : f32
    %13 = vector.broadcast %cst_9 : f32 to vector<8x128xf32>
    %14 = arith.minimumf %10, %13 : vector<8x128xf32>
    %15 = math.exp %14 : vector<8x128xf32>
    %cst_10 = arith.constant 1.000000e+00 : f32
    %16 = vector.broadcast %cst_10 : f32 to vector<8x128xf32>
    %17 = arith.subf %15, %16 : vector<8x128xf32>
    %18 = arith.select %12, %10, %17 : vector<8x128xi1>, vector<8x128xf32>
    %c0_11 = arith.constant 0 : index
    %c0_12 = arith.constant 0 : index
    %c0_13 = arith.constant 0 : index
    %19 = vector.load %arg4[%c0_11, %c0_12, %c0_13] : memref<5x8x8xf32, #tpu.memory_space<vmem>>, vector<1x8x8xf32>
    %20 = vector.shape_cast %19 : vector<1x8x8xf32> to vector<8x8xf32>
    %cst_14 = arith.constant dense<0.000000e+00> : vector<8x128xf32>
    %21 = tpu.matmul %20, %18, %cst_14 {dimension_numbers = #tpu.dot_dimension_numbers<[1], [0], [0], [1], [0, 0, 1, 1], [], []>} : vector<8x8xf32>, vector<8x128xf32>, vector<8x128xf32> -> vector<8x128xf32>
    %c0_15 = arith.constant 0 : index
    %c0_16 = arith.constant 0 : index
    %c0_17 = arith.constant 0 : index
    %22 = vector.load %arg5[%c0_15, %c0_16, %c0_17] : memref<5x8x1xf32, #tpu.memory_space<vmem>>, vector<1x8x1xf32>
    %23 = vector.shape_cast %22 : vector<1x8x1xf32> to vector<8x1xf32>
    %24 = vector.broadcast %23 : vector<8x1xf32> to vector<8x128xf32>
    %25 = arith.addf %21, %24 : vector<8x128xf32>
    %cst_18 = arith.constant 0.000000e+00 : f32
    %26 = vector.broadcast %cst_18 : f32 to vector<8x128xf32>
    %27 = arith.cmpf ogt, %25, %26 : vector<8x128xf32>
    %cst_19 = arith.constant 0.000000e+00 : f32
    %28 = vector.broadcast %cst_19 : f32 to vector<8x128xf32>
    %29 = arith.minimumf %25, %28 : vector<8x128xf32>
    %30 = math.exp %29 : vector<8x128xf32>
    %cst_20 = arith.constant 1.000000e+00 : f32
    %31 = vector.broadcast %cst_20 : f32 to vector<8x128xf32>
    %32 = arith.subf %30, %31 : vector<8x128xf32>
    %33 = arith.select %27, %25, %32 : vector<8x128xi1>, vector<8x128xf32>
    %c0_21 = arith.constant 0 : index
    %c0_22 = arith.constant 0 : index
    %c0_23 = arith.constant 0 : index
    %34 = vector.load %arg6[%c0_21, %c0_22, %c0_23] : memref<5x8x8xf32, #tpu.memory_space<vmem>>, vector<1x8x8xf32>
    %35 = vector.shape_cast %34 : vector<1x8x8xf32> to vector<8x8xf32>
    %cst_24 = arith.constant dense<0.000000e+00> : vector<8x128xf32>
    %36 = tpu.matmul %35, %33, %cst_24 {dimension_numbers = #tpu.dot_dimension_numbers<[1], [0], [0], [1], [0, 0, 1, 1], [], []>} : vector<8x8xf32>, vector<8x128xf32>, vector<8x128xf32> -> vector<8x128xf32>
    %c0_25 = arith.constant 0 : index
    %c0_26 = arith.constant 0 : index
    %c0_27 = arith.constant 0 : index
    %37 = vector.load %arg7[%c0_25, %c0_26, %c0_27] : memref<5x8x1xf32, #tpu.memory_space<vmem>>, vector<1x8x1xf32>
    %38 = vector.shape_cast %37 : vector<1x8x1xf32> to vector<8x1xf32>
    %39 = vector.broadcast %38 : vector<8x1xf32> to vector<8x128xf32>
    %40 = arith.addf %36, %39 : vector<8x128xf32>
    %cst_28 = arith.constant 0.000000e+00 : f32
    %41 = vector.broadcast %cst_28 : f32 to vector<8x128xf32>
    %42 = arith.cmpf ogt, %40, %41 : vector<8x128xf32>
    %cst_29 = arith.constant 0.000000e+00 : f32
    %43 = vector.broadcast %cst_29 : f32 to vector<8x128xf32>
    %44 = arith.minimumf %40, %43 : vector<8x128xf32>
    %45 = math.exp %44 : vector<8x128xf32>
    %cst_30 = arith.constant 1.000000e+00 : f32
    %46 = vector.broadcast %cst_30 : f32 to vector<8x128xf32>
    %47 = arith.subf %45, %46 : vector<8x128xf32>
    %48 = arith.select %42, %40, %47 : vector<8x128xi1>, vector<8x128xf32>
    %c0_31 = arith.constant 0 : index
    %c0_32 = arith.constant 0 : index
    %c0_33 = arith.constant 0 : index
    %49 = vector.load %arg8[%c0_31, %c0_32, %c0_33] : memref<5x112x8xf32, #tpu.memory_space<vmem>>, vector<1x112x8xf32>
    %50 = vector.shape_cast %49 : vector<1x112x8xf32> to vector<112x8xf32>
    %cst_34 = arith.constant dense<0.000000e+00> : vector<112x128xf32>
    %51 = tpu.matmul %50, %48, %cst_34 {dimension_numbers = #tpu.dot_dimension_numbers<[1], [0], [0], [1], [0, 0, 1, 1], [], []>} : vector<112x8xf32>, vector<8x128xf32>, vector<112x128xf32> -> vector<112x128xf32>
    %c0_35 = arith.constant 0 : index
    %c0_36 = arith.constant 0 : index
    %c0_37 = arith.constant 0 : index
    %52 = vector.load %arg9[%c0_35, %c0_36, %c0_37] : memref<5x112x1xf32, #tpu.memory_space<vmem>>, vector<1x112x1xf32>
    %53 = vector.shape_cast %52 : vector<1x112x1xf32> to vector<112x1xf32>
    %54 = vector.broadcast %53 : vector<112x1xf32> to vector<112x128xf32>
    %55 = arith.addf %51, %54 : vector<112x128xf32>
    %56 = vector.extract_strided_slice %55 {offsets = [0, 0], sizes = [4, 128], strides = [1, 1]} : vector<112x128xf32> to vector<4x128xf32>
    %57 = vector.extract_strided_slice %55 {offsets = [8, 0], sizes = [4, 128], strides = [1, 1]} : vector<112x128xf32> to vector<4x128xf32>
    %58 = vector.extract_strided_slice %55 {offsets = [16, 0], sizes = [4, 128], strides = [1, 1]} : vector<112x128xf32> to vector<4x128xf32>
    %59 = vector.extract_strided_slice %55 {offsets = [24, 0], sizes = [4, 128], strides = [1, 1]} : vector<112x128xf32> to vector<4x128xf32>
    %60 = vector.extract_strided_slice %55 {offsets = [32, 0], sizes = [4, 128], strides = [1, 1]} : vector<112x128xf32> to vector<4x128xf32>
    %61 = vector.extract_strided_slice %55 {offsets = [40, 0], sizes = [4, 128], strides = [1, 1]} : vector<112x128xf32> to vector<4x128xf32>
    %62 = vector.extract_strided_slice %55 {offsets = [48, 0], sizes = [4, 128], strides = [1, 1]} : vector<112x128xf32> to vector<4x128xf32>
    %63 = vector.extract_strided_slice %55 {offsets = [56, 0], sizes = [4, 128], strides = [1, 1]} : vector<112x128xf32> to vector<4x128xf32>
    %64 = vector.extract_strided_slice %55 {offsets = [64, 0], sizes = [4, 128], strides = [1, 1]} : vector<112x128xf32> to vector<4x128xf32>
    %65 = vector.extract_strided_slice %55 {offsets = [72, 0], sizes = [4, 128], strides = [1, 1]} : vector<112x128xf32> to vector<4x128xf32>
    %66 = vector.extract_strided_slice %55 {offsets = [80, 0], sizes = [4, 128], strides = [1, 1]} : vector<112x128xf32> to vector<4x128xf32>
    %67 = vector.extract_strided_slice %55 {offsets = [88, 0], sizes = [4, 128], strides = [1, 1]} : vector<112x128xf32> to vector<4x128xf32>
    %68 = vector.extract_strided_slice %55 {offsets = [96, 0], sizes = [4, 128], strides = [1, 1]} : vector<112x128xf32> to vector<4x128xf32>
    %69 = vector.extract_strided_slice %55 {offsets = [104, 0], sizes = [4, 128], strides = [1, 1]} : vector<112x128xf32> to vector<4x128xf32>
    %70 = arith.maximumf %56, %57 : vector<4x128xf32>
    %71 = arith.maximumf %70, %58 : vector<4x128xf32>
    %72 = arith.maximumf %71, %59 : vector<4x128xf32>
    %73 = arith.maximumf %72, %60 : vector<4x128xf32>
    %74 = arith.subf %56, %73 : vector<4x128xf32>
    %75 = math.exp %74 : vector<4x128xf32>
    %76 = arith.subf %57, %73 : vector<4x128xf32>
    %77 = math.exp %76 : vector<4x128xf32>
    %78 = arith.subf %58, %73 : vector<4x128xf32>
    %79 = math.exp %78 : vector<4x128xf32>
    %80 = arith.subf %59, %73 : vector<4x128xf32>
    %81 = math.exp %80 : vector<4x128xf32>
    %82 = arith.subf %60, %73 : vector<4x128xf32>
    %83 = math.exp %82 : vector<4x128xf32>
    %84 = arith.addf %75, %77 : vector<4x128xf32>
    %85 = arith.addf %84, %79 : vector<4x128xf32>
    %86 = arith.addf %85, %81 : vector<4x128xf32>
    %87 = arith.addf %86, %83 : vector<4x128xf32>
    %88 = tpu.reciprocal %87 : vector<4x128xf32> -> vector<4x128xf32>
    %89 = arith.mulf %75, %88 : vector<4x128xf32>
    %cst_38 = arith.constant 9.950000e-01 : f32
    %90 = vector.broadcast %cst_38 : f32 to vector<4x128xf32>
    %91 = arith.mulf %90, %89 : vector<4x128xf32>
    %cst_39 = arith.constant 1.000000e-03 : f32
    %92 = vector.broadcast %cst_39 : f32 to vector<4x128xf32>
    %93 = arith.addf %92, %91 : vector<4x128xf32>
    %94 = arith.mulf %77, %88 : vector<4x128xf32>
    %cst_40 = arith.constant 9.950000e-01 : f32
    %95 = vector.broadcast %cst_40 : f32 to vector<4x128xf32>
    %96 = arith.mulf %95, %94 : vector<4x128xf32>
    %cst_41 = arith.constant 1.000000e-03 : f32
    %97 = vector.broadcast %cst_41 : f32 to vector<4x128xf32>
    %98 = arith.addf %97, %96 : vector<4x128xf32>
    %99 = arith.mulf %79, %88 : vector<4x128xf32>
    %cst_42 = arith.constant 9.950000e-01 : f32
    %100 = vector.broadcast %cst_42 : f32 to vector<4x128xf32>
    %101 = arith.mulf %100, %99 : vector<4x128xf32>
    %cst_43 = arith.constant 1.000000e-03 : f32
    %102 = vector.broadcast %cst_43 : f32 to vector<4x128xf32>
    %103 = arith.addf %102, %101 : vector<4x128xf32>
    %104 = arith.mulf %81, %88 : vector<4x128xf32>
    %cst_44 = arith.constant 9.950000e-01 : f32
    %105 = vector.broadcast %cst_44 : f32 to vector<4x128xf32>
    %106 = arith.mulf %105, %104 : vector<4x128xf32>
    %cst_45 = arith.constant 1.000000e-03 : f32
    %107 = vector.broadcast %cst_45 : f32 to vector<4x128xf32>
    %108 = arith.addf %107, %106 : vector<4x128xf32>
    %cst_46 = arith.constant -3.000000e+00 : f32
    %109 = vector.broadcast %cst_46 : f32 to vector<4x128xf32>
    %cst_47 = arith.constant 0.000000e+00 : f32
    %110 = vector.broadcast %cst_47 : f32 to vector<4x128xf32>
    %111 = arith.addf %110, %93 : vector<4x128xf32>
    %cst_48 = arith.constant 6.000000e+00 : f32
    %112 = vector.broadcast %cst_48 : f32 to vector<4x128xf32>
    %113 = arith.mulf %112, %111 : vector<4x128xf32>
    %cst_49 = arith.constant 3.000000e+00 : f32
    %114 = vector.broadcast %cst_49 : f32 to vector<4x128xf32>
    %115 = arith.subf %113, %114 : vector<4x128xf32>
    %116 = arith.addf %111, %98 : vector<4x128xf32>
    %cst_50 = arith.constant 6.000000e+00 : f32
    %117 = vector.broadcast %cst_50 : f32 to vector<4x128xf32>
    %118 = arith.mulf %117, %116 : vector<4x128xf32>
    %cst_51 = arith.constant 3.000000e+00 : f32
    %119 = vector.broadcast %cst_51 : f32 to vector<4x128xf32>
    %120 = arith.subf %118, %119 : vector<4x128xf32>
    %121 = arith.addf %116, %103 : vector<4x128xf32>
    %cst_52 = arith.constant 6.000000e+00 : f32
    %122 = vector.broadcast %cst_52 : f32 to vector<4x128xf32>
    %123 = arith.mulf %122, %121 : vector<4x128xf32>
    %cst_53 = arith.constant 3.000000e+00 : f32
    %124 = vector.broadcast %cst_53 : f32 to vector<4x128xf32>
    %125 = arith.subf %123, %124 : vector<4x128xf32>
    %126 = arith.addf %121, %108 : vector<4x128xf32>
    %cst_54 = arith.constant 6.000000e+00 : f32
    %127 = vector.broadcast %cst_54 : f32 to vector<4x128xf32>
    %128 = arith.mulf %127, %126 : vector<4x128xf32>
    %cst_55 = arith.constant 3.000000e+00 : f32
    %129 = vector.broadcast %cst_55 : f32 to vector<4x128xf32>
    %130 = arith.subf %128, %129 : vector<4x128xf32>
    %cst_56 = arith.constant 3.000000e+00 : f32
    %131 = vector.broadcast %cst_56 : f32 to vector<4x128xf32>
    %132 = arith.subf %115, %109 : vector<4x128xf32>
    %133 = arith.subf %120, %115 : vector<4x128xf32>
    %134 = arith.subf %125, %120 : vector<4x128xf32>
    %135 = arith.subf %130, %125 : vector<4x128xf32>
    %136 = arith.subf %131, %130 : vector<4x128xf32>
    %137 = arith.maximumf %61, %62 : vector<4x128xf32>
    %138 = arith.maximumf %137, %63 : vector<4x128xf32>
    %139 = arith.maximumf %138, %64 : vector<4x128xf32>
    %140 = arith.maximumf %139, %65 : vector<4x128xf32>
    %141 = arith.subf %61, %140 : vector<4x128xf32>
    %142 = math.exp %141 : vector<4x128xf32>
    %143 = arith.subf %62, %140 : vector<4x128xf32>
    %144 = math.exp %143 : vector<4x128xf32>
    %145 = arith.subf %63, %140 : vector<4x128xf32>
    %146 = math.exp %145 : vector<4x128xf32>
    %147 = arith.subf %64, %140 : vector<4x128xf32>
    %148 = math.exp %147 : vector<4x128xf32>
    %149 = arith.subf %65, %140 : vector<4x128xf32>
    %150 = math.exp %149 : vector<4x128xf32>
    %151 = arith.addf %142, %144 : vector<4x128xf32>
    %152 = arith.addf %151, %146 : vector<4x128xf32>
    %153 = arith.addf %152, %148 : vector<4x128xf32>
    %154 = arith.addf %153, %150 : vector<4x128xf32>
    %155 = tpu.reciprocal %154 : vector<4x128xf32> -> vector<4x128xf32>
    %156 = arith.mulf %142, %155 : vector<4x128xf32>
    %cst_57 = arith.constant 9.950000e-01 : f32
    %157 = vector.broadcast %cst_57 : f32 to vector<4x128xf32>
    %158 = arith.mulf %157, %156 : vector<4x128xf32>
    %cst_58 = arith.constant 1.000000e-03 : f32
    %159 = vector.broadcast %cst_58 : f32 to vector<4x128xf32>
    %160 = arith.addf %159, %158 : vector<4x128xf32>
    %161 = arith.mulf %144, %155 : vector<4x128xf32>
    %cst_59 = arith.constant 9.950000e-01 : f32
    %162 = vector.broadcast %cst_59 : f32 to vector<4x128xf32>
    %163 = arith.mulf %162, %161 : vector<4x128xf32>
    %cst_60 = arith.constant 1.000000e-03 : f32
    %164 = vector.broadcast %cst_60 : f32 to vector<4x128xf32>
    %165 = arith.addf %164, %163 : vector<4x128xf32>
    %166 = arith.mulf %146, %155 : vector<4x128xf32>
    %cst_61 = arith.constant 9.950000e-01 : f32
    %167 = vector.broadcast %cst_61 : f32 to vector<4x128xf32>
    %168 = arith.mulf %167, %166 : vector<4x128xf32>
    %cst_62 = arith.constant 1.000000e-03 : f32
    %169 = vector.broadcast %cst_62 : f32 to vector<4x128xf32>
    %170 = arith.addf %169, %168 : vector<4x128xf32>
    %171 = arith.mulf %148, %155 : vector<4x128xf32>
    %cst_63 = arith.constant 9.950000e-01 : f32
    %172 = vector.broadcast %cst_63 : f32 to vector<4x128xf32>
    %173 = arith.mulf %172, %171 : vector<4x128xf32>
    %cst_64 = arith.constant 1.000000e-03 : f32
    %174 = vector.broadcast %cst_64 : f32 to vector<4x128xf32>
    %175 = arith.addf %174, %173 : vector<4x128xf32>
    %cst_65 = arith.constant -3.000000e+00 : f32
    %176 = vector.broadcast %cst_65 : f32 to vector<4x128xf32>
    %cst_66 = arith.constant 0.000000e+00 : f32
    %177 = vector.broadcast %cst_66 : f32 to vector<4x128xf32>
    %178 = arith.addf %177, %160 : vector<4x128xf32>
    %cst_67 = arith.constant 6.000000e+00 : f32
    %179 = vector.broadcast %cst_67 : f32 to vector<4x128xf32>
    %180 = arith.mulf %179, %178 : vector<4x128xf32>
    %cst_68 = arith.constant 3.000000e+00 : f32
    %181 = vector.broadcast %cst_68 : f32 to vector<4x128xf32>
    %182 = arith.subf %180, %181 : vector<4x128xf32>
    %183 = arith.addf %178, %165 : vector<4x128xf32>
    %cst_69 = arith.constant 6.000000e+00 : f32
    %184 = vector.broadcast %cst_69 : f32 to vector<4x128xf32>
    %185 = arith.mulf %184, %183 : vector<4x128xf32>
    %cst_70 = arith.constant 3.000000e+00 : f32
    %186 = vector.broadcast %cst_70 : f32 to vector<4x128xf32>
    %187 = arith.subf %185, %186 : vector<4x128xf32>
    %188 = arith.addf %183, %170 : vector<4x128xf32>
    %cst_71 = arith.constant 6.000000e+00 : f32
    %189 = vector.broadcast %cst_71 : f32 to vector<4x128xf32>
    %190 = arith.mulf %189, %188 : vector<4x128xf32>
    %cst_72 = arith.constant 3.000000e+00 : f32
    %191 = vector.broadcast %cst_72 : f32 to vector<4x128xf32>
    %192 = arith.subf %190, %191 : vector<4x128xf32>
    %193 = arith.addf %188, %175 : vector<4x128xf32>
    %cst_73 = arith.constant 6.000000e+00 : f32
    %194 = vector.broadcast %cst_73 : f32 to vector<4x128xf32>
    %195 = arith.mulf %194, %193 : vector<4x128xf32>
    %cst_74 = arith.constant 3.000000e+00 : f32
    %196 = vector.broadcast %cst_74 : f32 to vector<4x128xf32>
    %197 = arith.subf %195, %196 : vector<4x128xf32>
    %cst_75 = arith.constant 3.000000e+00 : f32
    %198 = vector.broadcast %cst_75 : f32 to vector<4x128xf32>
    %199 = arith.subf %182, %176 : vector<4x128xf32>
    %200 = arith.subf %187, %182 : vector<4x128xf32>
    %201 = arith.subf %192, %187 : vector<4x128xf32>
    %202 = arith.subf %197, %192 : vector<4x128xf32>
    %203 = arith.subf %198, %197 : vector<4x128xf32>
    %cst_76 = arith.constant 1.000000e+00 : f32
    %204 = vector.broadcast %cst_76 : f32 to vector<4x128xf32>
    %cst_77 = arith.constant 0.000000e+00 : f32
    %205 = vector.broadcast %cst_77 : f32 to vector<4x128xf32>
    %206 = arith.maximumf %66, %205 : vector<4x128xf32>
    %207 = math.absf %66 : vector<4x128xf32>
    %cst_78 = arith.constant 0.000000e+00 : f32
    %208 = vector.broadcast %cst_78 : f32 to vector<4x128xf32>
    %209 = arith.subf %208, %207 : vector<4x128xf32>
    %210 = math.exp %209 : vector<4x128xf32>
    %cst_79 = arith.constant 1.000000e+00 : f32
    %211 = vector.broadcast %cst_79 : f32 to vector<4x128xf32>
    %212 = arith.addf %211, %210 : vector<4x128xf32>
    %213 = math.log %212 : vector<4x128xf32>
    %214 = arith.addf %206, %213 : vector<4x128xf32>
    %cst_80 = arith.constant 1.000000e-03 : f32
    %215 = vector.broadcast %cst_80 : f32 to vector<4x128xf32>
    %216 = arith.addf %215, %214 : vector<4x128xf32>
    %cst_81 = arith.constant 0.000000e+00 : f32
    %217 = vector.broadcast %cst_81 : f32 to vector<4x128xf32>
    %218 = arith.maximumf %67, %217 : vector<4x128xf32>
    %219 = math.absf %67 : vector<4x128xf32>
    %cst_82 = arith.constant 0.000000e+00 : f32
    %220 = vector.broadcast %cst_82 : f32 to vector<4x128xf32>
    %221 = arith.subf %220, %219 : vector<4x128xf32>
    %222 = math.exp %221 : vector<4x128xf32>
    %cst_83 = arith.constant 1.000000e+00 : f32
    %223 = vector.broadcast %cst_83 : f32 to vector<4x128xf32>
    %224 = arith.addf %223, %222 : vector<4x128xf32>
    %225 = math.log %224 : vector<4x128xf32>
    %226 = arith.addf %218, %225 : vector<4x128xf32>
    %cst_84 = arith.constant 1.000000e-03 : f32
    %227 = vector.broadcast %cst_84 : f32 to vector<4x128xf32>
    %228 = arith.addf %227, %226 : vector<4x128xf32>
    %cst_85 = arith.constant 0.000000e+00 : f32
    %229 = vector.broadcast %cst_85 : f32 to vector<4x128xf32>
    %230 = arith.maximumf %68, %229 : vector<4x128xf32>
    %231 = math.absf %68 : vector<4x128xf32>
    %cst_86 = arith.constant 0.000000e+00 : f32
    %232 = vector.broadcast %cst_86 : f32 to vector<4x128xf32>
    %233 = arith.subf %232, %231 : vector<4x128xf32>
    %234 = math.exp %233 : vector<4x128xf32>
    %cst_87 = arith.constant 1.000000e+00 : f32
    %235 = vector.broadcast %cst_87 : f32 to vector<4x128xf32>
    %236 = arith.addf %235, %234 : vector<4x128xf32>
    %237 = math.log %236 : vector<4x128xf32>
    %238 = arith.addf %230, %237 : vector<4x128xf32>
    %cst_88 = arith.constant 1.000000e-03 : f32
    %239 = vector.broadcast %cst_88 : f32 to vector<4x128xf32>
    %240 = arith.addf %239, %238 : vector<4x128xf32>
    %cst_89 = arith.constant 0.000000e+00 : f32
    %241 = vector.broadcast %cst_89 : f32 to vector<4x128xf32>
    %242 = arith.maximumf %69, %241 : vector<4x128xf32>
    %243 = math.absf %69 : vector<4x128xf32>
    %cst_90 = arith.constant 0.000000e+00 : f32
    %244 = vector.broadcast %cst_90 : f32 to vector<4x128xf32>
    %245 = arith.subf %244, %243 : vector<4x128xf32>
    %246 = math.exp %245 : vector<4x128xf32>
    %cst_91 = arith.constant 1.000000e+00 : f32
    %247 = vector.broadcast %cst_91 : f32 to vector<4x128xf32>
    %248 = arith.addf %247, %246 : vector<4x128xf32>
    %249 = math.log %248 : vector<4x128xf32>
    %250 = arith.addf %242, %249 : vector<4x128xf32>
    %cst_92 = arith.constant 1.000000e-03 : f32
    %251 = vector.broadcast %cst_92 : f32 to vector<4x128xf32>
    %252 = arith.addf %251, %250 : vector<4x128xf32>
    %cst_93 = arith.constant 1.000000e+00 : f32
    %253 = vector.broadcast %cst_93 : f32 to vector<4x128xf32>
    %cst_94 = arith.constant -3.000000e+00 : f32
    %254 = vector.broadcast %cst_94 : f32 to vector<4x128xf32>
    %255 = arith.cmpf oge, %2, %254 : vector<4x128xf32>
    %cst_95 = arith.constant 3.000000e+00 : f32
    %256 = vector.broadcast %cst_95 : f32 to vector<4x128xf32>
    %257 = arith.cmpf ole, %2, %256 : vector<4x128xf32>
    %258 = arith.andi %255, %257 : vector<4x128xi1>
    %cst_96 = arith.constant -3.000000e+00 : f32
    %cst_97 = arith.constant 3.000000e+00 : f32
    %259 = vector.broadcast %cst_96 : f32 to vector<4x128xf32>
    %260 = arith.maximumf %259, %2 : vector<4x128xf32>
    %261 = vector.broadcast %cst_97 : f32 to vector<4x128xf32>
    %262 = arith.minimumf %261, %260 : vector<4x128xf32>
    %cst_98 = arith.constant 1.000000e+00 : f32
    %263 = vector.broadcast %cst_98 : f32 to vector<4x128xf32>
    %264 = arith.cmpf oge, %262, %115 : vector<4x128xf32>
    %265 = arith.extui %264 : vector<4x128xi1> to vector<4x128xi32>
    %266 = arith.sitofp %265 : vector<4x128xi32> to vector<4x128xf32>
    %267 = arith.cmpf oge, %262, %120 : vector<4x128xf32>
    %268 = arith.extui %267 : vector<4x128xi1> to vector<4x128xi32>
    %269 = arith.sitofp %268 : vector<4x128xi32> to vector<4x128xf32>
    %270 = arith.cmpf oge, %262, %125 : vector<4x128xf32>
    %271 = arith.extui %270 : vector<4x128xi1> to vector<4x128xi32>
    %272 = arith.sitofp %271 : vector<4x128xi32> to vector<4x128xf32>
    %273 = arith.cmpf oge, %262, %130 : vector<4x128xf32>
    %274 = arith.extui %273 : vector<4x128xi1> to vector<4x128xi32>
    %275 = arith.sitofp %274 : vector<4x128xi32> to vector<4x128xf32>
    %cst_99 = arith.constant 0.000000e+00 : f32
    %276 = vector.broadcast %cst_99 : f32 to vector<4x128xf32>
    %cst_100 = arith.constant 0.000000e+00 : f32
    %277 = vector.broadcast %cst_100 : f32 to vector<4x128xf32>
    %278 = arith.subf %263, %266 : vector<4x128xf32>
    %279 = arith.mulf %278, %109 : vector<4x128xf32>
    %280 = arith.addf %277, %279 : vector<4x128xf32>
    %281 = arith.mulf %278, %132 : vector<4x128xf32>
    %282 = arith.addf %277, %281 : vector<4x128xf32>
    %283 = arith.mulf %278, %176 : vector<4x128xf32>
    %284 = arith.addf %277, %283 : vector<4x128xf32>
    %285 = arith.mulf %278, %199 : vector<4x128xf32>
    %286 = arith.addf %277, %285 : vector<4x128xf32>
    %287 = arith.mulf %278, %204 : vector<4x128xf32>
    %288 = arith.addf %277, %287 : vector<4x128xf32>
    %289 = arith.mulf %278, %216 : vector<4x128xf32>
    %290 = arith.addf %277, %289 : vector<4x128xf32>
    %291 = arith.subf %266, %269 : vector<4x128xf32>
    %292 = arith.mulf %291, %115 : vector<4x128xf32>
    %293 = arith.addf %280, %292 : vector<4x128xf32>
    %294 = arith.mulf %291, %133 : vector<4x128xf32>
    %295 = arith.addf %282, %294 : vector<4x128xf32>
    %296 = arith.mulf %291, %182 : vector<4x128xf32>
    %297 = arith.addf %284, %296 : vector<4x128xf32>
    %298 = arith.mulf %291, %200 : vector<4x128xf32>
    %299 = arith.addf %286, %298 : vector<4x128xf32>
    %300 = arith.mulf %291, %216 : vector<4x128xf32>
    %301 = arith.addf %288, %300 : vector<4x128xf32>
    %302 = arith.mulf %291, %228 : vector<4x128xf32>
    %303 = arith.addf %290, %302 : vector<4x128xf32>
    %304 = arith.subf %269, %272 : vector<4x128xf32>
    %305 = arith.mulf %304, %120 : vector<4x128xf32>
    %306 = arith.addf %293, %305 : vector<4x128xf32>
    %307 = arith.mulf %304, %134 : vector<4x128xf32>
    %308 = arith.addf %295, %307 : vector<4x128xf32>
    %309 = arith.mulf %304, %187 : vector<4x128xf32>
    %310 = arith.addf %297, %309 : vector<4x128xf32>
    %311 = arith.mulf %304, %201 : vector<4x128xf32>
    %312 = arith.addf %299, %311 : vector<4x128xf32>
    %313 = arith.mulf %304, %228 : vector<4x128xf32>
    %314 = arith.addf %301, %313 : vector<4x128xf32>
    %315 = arith.mulf %304, %240 : vector<4x128xf32>
    %316 = arith.addf %303, %315 : vector<4x128xf32>
    %317 = arith.subf %272, %275 : vector<4x128xf32>
    %318 = arith.mulf %317, %125 : vector<4x128xf32>
    %319 = arith.addf %306, %318 : vector<4x128xf32>
    %320 = arith.mulf %317, %135 : vector<4x128xf32>
    %321 = arith.addf %308, %320 : vector<4x128xf32>
    %322 = arith.mulf %317, %192 : vector<4x128xf32>
    %323 = arith.addf %310, %322 : vector<4x128xf32>
    %324 = arith.mulf %317, %202 : vector<4x128xf32>
    %325 = arith.addf %312, %324 : vector<4x128xf32>
    %326 = arith.mulf %317, %240 : vector<4x128xf32>
    %327 = arith.addf %314, %326 : vector<4x128xf32>
    %328 = arith.mulf %317, %252 : vector<4x128xf32>
    %329 = arith.addf %316, %328 : vector<4x128xf32>
    %330 = arith.subf %275, %276 : vector<4x128xf32>
    %331 = arith.mulf %330, %130 : vector<4x128xf32>
    %332 = arith.addf %319, %331 : vector<4x128xf32>
    %333 = arith.mulf %330, %136 : vector<4x128xf32>
    %334 = arith.addf %321, %333 : vector<4x128xf32>
    %335 = arith.mulf %330, %197 : vector<4x128xf32>
    %336 = arith.addf %323, %335 : vector<4x128xf32>
    %337 = arith.mulf %330, %203 : vector<4x128xf32>
    %338 = arith.addf %325, %337 : vector<4x128xf32>
    %339 = arith.mulf %330, %252 : vector<4x128xf32>
    %340 = arith.addf %327, %339 : vector<4x128xf32>
    %341 = arith.mulf %330, %253 : vector<4x128xf32>
    %342 = arith.addf %329, %341 : vector<4x128xf32>
    %343 = tpu.reciprocal %334 : vector<4x128xf32> -> vector<4x128xf32>
    %344 = arith.mulf %338, %343 : vector<4x128xf32>
    %345 = arith.subf %262, %332 : vector<4x128xf32>
    %346 = arith.mulf %345, %343 : vector<4x128xf32>
    %cst_101 = arith.constant 1.000000e+00 : f32
    %347 = vector.broadcast %cst_101 : f32 to vector<4x128xf32>
    %348 = arith.subf %347, %346 : vector<4x128xf32>
    %349 = arith.mulf %346, %348 : vector<4x128xf32>
    %350 = arith.mulf %344, %346 : vector<4x128xf32>
    %351 = arith.mulf %350, %346 : vector<4x128xf32>
    %352 = arith.mulf %340, %349 : vector<4x128xf32>
    %353 = arith.addf %351, %352 : vector<4x128xf32>
    %354 = arith.mulf %338, %353 : vector<4x128xf32>
    %355 = arith.addf %340, %342 : vector<4x128xf32>
    %cst_102 = arith.constant 2.000000e+00 : f32
    %356 = vector.broadcast %cst_102 : f32 to vector<4x128xf32>
    %357 = arith.mulf %356, %344 : vector<4x128xf32>
    %358 = arith.subf %355, %357 : vector<4x128xf32>
    %359 = arith.mulf %358, %349 : vector<4x128xf32>
    %360 = arith.addf %344, %359 : vector<4x128xf32>
    %361 = tpu.reciprocal %360 : vector<4x128xf32> -> vector<4x128xf32>
    %362 = arith.mulf %354, %361 : vector<4x128xf32>
    %363 = arith.addf %336, %362 : vector<4x128xf32>
    %364 = arith.mulf %344, %344 : vector<4x128xf32>
    %365 = arith.mulf %342, %346 : vector<4x128xf32>
    %366 = arith.mulf %365, %346 : vector<4x128xf32>
    %cst_103 = arith.constant 2.000000e+00 : f32
    %367 = vector.broadcast %cst_103 : f32 to vector<4x128xf32>
    %368 = arith.mulf %367, %344 : vector<4x128xf32>
    %369 = arith.mulf %368, %349 : vector<4x128xf32>
    %370 = arith.addf %366, %369 : vector<4x128xf32>
    %371 = arith.mulf %340, %348 : vector<4x128xf32>
    %372 = arith.mulf %371, %348 : vector<4x128xf32>
    %373 = arith.addf %370, %372 : vector<4x128xf32>
    %374 = arith.mulf %364, %373 : vector<4x128xf32>
    %375 = arith.mulf %374, %361 : vector<4x128xf32>
    %376 = arith.mulf %375, %361 : vector<4x128xf32>
    %377 = math.log %376 : vector<4x128xf32>
    %378 = arith.select %258, %363, %2 : vector<4x128xi1>, vector<4x128xf32>
    %cst_104 = arith.constant 0.000000e+00 : f32
    %379 = vector.broadcast %cst_104 : f32 to vector<4x128xf32>
    %380 = arith.select %258, %377, %379 : vector<4x128xi1>, vector<4x128xf32>
    %381 = arith.addf %3, %380 : vector<4x128xf32>
    %c0_105 = arith.constant 0 : index
    %c0_106 = arith.constant 0 : index
    %c0_107 = arith.constant 0 : index
    %382 = vector.load %arg10[%c0_105, %c0_106, %c0_107] : memref<4x4x4xf32, #tpu.memory_space<vmem>>, vector<1x4x4xf32>
    %383 = vector.shape_cast %382 : vector<1x4x4xf32> to vector<4x4xf32>
    %cst_108 = arith.constant dense<0.000000e+00> : vector<4x128xf32>
    %384 = tpu.matmul %383, %1, %cst_108 {dimension_numbers = #tpu.dot_dimension_numbers<[1], [0], [0], [1], [0, 0, 1, 1], [], []>} : vector<4x4xf32>, vector<4x128xf32>, vector<4x128xf32> -> vector<4x128xf32>
    %c0_109 = arith.constant 0 : index
    %c0_110 = arith.constant 0 : index
    %c0_111 = arith.constant 0 : index
    %385 = vector.load %arg11[%c0_109, %c0_110, %c0_111] : memref<4x4x4xf32, #tpu.memory_space<vmem>>, vector<1x4x4xf32>
    %386 = vector.shape_cast %385 : vector<1x4x4xf32> to vector<4x4xf32>
    %cst_112 = arith.constant dense<0.000000e+00> : vector<4x128xf32>
    %387 = tpu.matmul %386, %378, %cst_112 {dimension_numbers = #tpu.dot_dimension_numbers<[1], [0], [0], [1], [0, 0, 1, 1], [], []>} : vector<4x4xf32>, vector<4x128xf32>, vector<4x128xf32> -> vector<4x128xf32>
    %388 = arith.addf %384, %387 : vector<4x128xf32>
    %c0_113 = arith.constant 0 : index
    %c0_114 = arith.constant 0 : index
    %c0_115 = arith.constant 0 : index
    %389 = vector.load %arg12[%c0_113, %c0_114, %c0_115] : memref<4x4x4xf32, #tpu.memory_space<vmem>>, vector<1x4x4xf32>
    %390 = vector.shape_cast %389 : vector<1x4x4xf32> to vector<4x4xf32>
    %cst_116 = arith.constant dense<0.000000e+00> : vector<4x128xf32>
    %391 = tpu.matmul %390, %1, %cst_116 {dimension_numbers = #tpu.dot_dimension_numbers<[1], [0], [0], [1], [0, 0, 1, 1], [], []>} : vector<4x4xf32>, vector<4x128xf32>, vector<4x128xf32> -> vector<4x128xf32>
    %c0_117 = arith.constant 0 : index
    %c0_118 = arith.constant 0 : index
    %c0_119 = arith.constant 0 : index
    %392 = vector.load %arg13[%c0_117, %c0_118, %c0_119] : memref<4x4x4xf32, #tpu.memory_space<vmem>>, vector<1x4x4xf32>
    %393 = vector.shape_cast %392 : vector<1x4x4xf32> to vector<4x4xf32>
    %cst_120 = arith.constant dense<0.000000e+00> : vector<4x128xf32>
    %394 = tpu.matmul %393, %378, %cst_120 {dimension_numbers = #tpu.dot_dimension_numbers<[1], [0], [0], [1], [0, 0, 1, 1], [], []>} : vector<4x4xf32>, vector<4x128xf32>, vector<4x128xf32> -> vector<4x128xf32>
    %395 = arith.addf %391, %394 : vector<4x128xf32>
    %c1 = arith.constant 1 : index
    %c0_121 = arith.constant 0 : index
    %c0_122 = arith.constant 0 : index
    %396 = vector.load %arg2[%c1, %c0_121, %c0_122] : memref<5x8x4xf32, #tpu.memory_space<vmem>>, vector<1x8x4xf32>
    %397 = vector.shape_cast %396 : vector<1x8x4xf32> to vector<8x4xf32>
    %cst_123 = arith.constant dense<0.000000e+00> : vector<8x128xf32>
    %398 = tpu.matmul %397, %388, %cst_123 {dimension_numbers = #tpu.dot_dimension_numbers<[1], [0], [0], [1], [0, 0, 1, 1], [], []>} : vector<8x4xf32>, vector<4x128xf32>, vector<8x128xf32> -> vector<8x128xf32>
    %c1_124 = arith.constant 1 : index
    %c0_125 = arith.constant 0 : index
    %c0_126 = arith.constant 0 : index
    %399 = vector.load %arg3[%c1_124, %c0_125, %c0_126] : memref<5x8x1xf32, #tpu.memory_space<vmem>>, vector<1x8x1xf32>
    %400 = vector.shape_cast %399 : vector<1x8x1xf32> to vector<8x1xf32>
    %401 = vector.broadcast %400 : vector<8x1xf32> to vector<8x128xf32>
    %402 = arith.addf %398, %401 : vector<8x128xf32>
    %cst_127 = arith.constant 0.000000e+00 : f32
    %403 = vector.broadcast %cst_127 : f32 to vector<8x128xf32>
    %404 = arith.cmpf ogt, %402, %403 : vector<8x128xf32>
    %cst_128 = arith.constant 0.000000e+00 : f32
    %405 = vector.broadcast %cst_128 : f32 to vector<8x128xf32>
    %406 = arith.minimumf %402, %405 : vector<8x128xf32>
    %407 = math.exp %406 : vector<8x128xf32>
    %cst_129 = arith.constant 1.000000e+00 : f32
    %408 = vector.broadcast %cst_129 : f32 to vector<8x128xf32>
    %409 = arith.subf %407, %408 : vector<8x128xf32>
    %410 = arith.select %404, %402, %409 : vector<8x128xi1>, vector<8x128xf32>
    %c1_130 = arith.constant 1 : index
    %c0_131 = arith.constant 0 : index
    %c0_132 = arith.constant 0 : index
    %411 = vector.load %arg4[%c1_130, %c0_131, %c0_132] : memref<5x8x8xf32, #tpu.memory_space<vmem>>, vector<1x8x8xf32>
    %412 = vector.shape_cast %411 : vector<1x8x8xf32> to vector<8x8xf32>
    %cst_133 = arith.constant dense<0.000000e+00> : vector<8x128xf32>
    %413 = tpu.matmul %412, %410, %cst_133 {dimension_numbers = #tpu.dot_dimension_numbers<[1], [0], [0], [1], [0, 0, 1, 1], [], []>} : vector<8x8xf32>, vector<8x128xf32>, vector<8x128xf32> -> vector<8x128xf32>
    %c1_134 = arith.constant 1 : index
    %c0_135 = arith.constant 0 : index
    %c0_136 = arith.constant 0 : index
    %414 = vector.load %arg5[%c1_134, %c0_135, %c0_136] : memref<5x8x1xf32, #tpu.memory_space<vmem>>, vector<1x8x1xf32>
    %415 = vector.shape_cast %414 : vector<1x8x1xf32> to vector<8x1xf32>
    %416 = vector.broadcast %415 : vector<8x1xf32> to vector<8x128xf32>
    %417 = arith.addf %413, %416 : vector<8x128xf32>
    %cst_137 = arith.constant 0.000000e+00 : f32
    %418 = vector.broadcast %cst_137 : f32 to vector<8x128xf32>
    %419 = arith.cmpf ogt, %417, %418 : vector<8x128xf32>
    %cst_138 = arith.constant 0.000000e+00 : f32
    %420 = vector.broadcast %cst_138 : f32 to vector<8x128xf32>
    %421 = arith.minimumf %417, %420 : vector<8x128xf32>
    %422 = math.exp %421 : vector<8x128xf32>
    %cst_139 = arith.constant 1.000000e+00 : f32
    %423 = vector.broadcast %cst_139 : f32 to vector<8x128xf32>
    %424 = arith.subf %422, %423 : vector<8x128xf32>
    %425 = arith.select %419, %417, %424 : vector<8x128xi1>, vector<8x128xf32>
    %c1_140 = arith.constant 1 : index
    %c0_141 = arith.constant 0 : index
    %c0_142 = arith.constant 0 : index
    %426 = vector.load %arg6[%c1_140, %c0_141, %c0_142] : memref<5x8x8xf32, #tpu.memory_space<vmem>>, vector<1x8x8xf32>
    %427 = vector.shape_cast %426 : vector<1x8x8xf32> to vector<8x8xf32>
    %cst_143 = arith.constant dense<0.000000e+00> : vector<8x128xf32>
    %428 = tpu.matmul %427, %425, %cst_143 {dimension_numbers = #tpu.dot_dimension_numbers<[1], [0], [0], [1], [0, 0, 1, 1], [], []>} : vector<8x8xf32>, vector<8x128xf32>, vector<8x128xf32> -> vector<8x128xf32>
    %c1_144 = arith.constant 1 : index
    %c0_145 = arith.constant 0 : index
    %c0_146 = arith.constant 0 : index
    %429 = vector.load %arg7[%c1_144, %c0_145, %c0_146] : memref<5x8x1xf32, #tpu.memory_space<vmem>>, vector<1x8x1xf32>
    %430 = vector.shape_cast %429 : vector<1x8x1xf32> to vector<8x1xf32>
    %431 = vector.broadcast %430 : vector<8x1xf32> to vector<8x128xf32>
    %432 = arith.addf %428, %431 : vector<8x128xf32>
    %cst_147 = arith.constant 0.000000e+00 : f32
    %433 = vector.broadcast %cst_147 : f32 to vector<8x128xf32>
    %434 = arith.cmpf ogt, %432, %433 : vector<8x128xf32>
    %cst_148 = arith.constant 0.000000e+00 : f32
    %435 = vector.broadcast %cst_148 : f32 to vector<8x128xf32>
    %436 = arith.minimumf %432, %435 : vector<8x128xf32>
    %437 = math.exp %436 : vector<8x128xf32>
    %cst_149 = arith.constant 1.000000e+00 : f32
    %438 = vector.broadcast %cst_149 : f32 to vector<8x128xf32>
    %439 = arith.subf %437, %438 : vector<8x128xf32>
    %440 = arith.select %434, %432, %439 : vector<8x128xi1>, vector<8x128xf32>
    %c1_150 = arith.constant 1 : index
    %c0_151 = arith.constant 0 : index
    %c0_152 = arith.constant 0 : index
    %441 = vector.load %arg8[%c1_150, %c0_151, %c0_152] : memref<5x112x8xf32, #tpu.memory_space<vmem>>, vector<1x112x8xf32>
    %442 = vector.shape_cast %441 : vector<1x112x8xf32> to vector<112x8xf32>
    %cst_153 = arith.constant dense<0.000000e+00> : vector<112x128xf32>
    %443 = tpu.matmul %442, %440, %cst_153 {dimension_numbers = #tpu.dot_dimension_numbers<[1], [0], [0], [1], [0, 0, 1, 1], [], []>} : vector<112x8xf32>, vector<8x128xf32>, vector<112x128xf32> -> vector<112x128xf32>
    %c1_154 = arith.constant 1 : index
    %c0_155 = arith.constant 0 : index
    %c0_156 = arith.constant 0 : index
    %444 = vector.load %arg9[%c1_154, %c0_155, %c0_156] : memref<5x112x1xf32, #tpu.memory_space<vmem>>, vector<1x112x1xf32>
    %445 = vector.shape_cast %444 : vector<1x112x1xf32> to vector<112x1xf32>
    %446 = vector.broadcast %445 : vector<112x1xf32> to vector<112x128xf32>
    %447 = arith.addf %443, %446 : vector<112x128xf32>
    %448 = vector.extract_strided_slice %447 {offsets = [0, 0], sizes = [4, 128], strides = [1, 1]} : vector<112x128xf32> to vector<4x128xf32>
    %449 = vector.extract_strided_slice %447 {offsets = [8, 0], sizes = [4, 128], strides = [1, 1]} : vector<112x128xf32> to vector<4x128xf32>
    %450 = vector.extract_strided_slice %447 {offsets = [16, 0], sizes = [4, 128], strides = [1, 1]} : vector<112x128xf32> to vector<4x128xf32>
    %451 = vector.extract_strided_slice %447 {offsets = [24, 0], sizes = [4, 128], strides = [1, 1]} : vector<112x128xf32> to vector<4x128xf32>
    %452 = vector.extract_strided_slice %447 {offsets = [32, 0], sizes = [4, 128], strides = [1, 1]} : vector<112x128xf32> to vector<4x128xf32>
    %453 = vector.extract_strided_slice %447 {offsets = [40, 0], sizes = [4, 128], strides = [1, 1]} : vector<112x128xf32> to vector<4x128xf32>
    %454 = vector.extract_strided_slice %447 {offsets = [48, 0], sizes = [4, 128], strides = [1, 1]} : vector<112x128xf32> to vector<4x128xf32>
    %455 = vector.extract_strided_slice %447 {offsets = [56, 0], sizes = [4, 128], strides = [1, 1]} : vector<112x128xf32> to vector<4x128xf32>
    %456 = vector.extract_strided_slice %447 {offsets = [64, 0], sizes = [4, 128], strides = [1, 1]} : vector<112x128xf32> to vector<4x128xf32>
    %457 = vector.extract_strided_slice %447 {offsets = [72, 0], sizes = [4, 128], strides = [1, 1]} : vector<112x128xf32> to vector<4x128xf32>
    %458 = vector.extract_strided_slice %447 {offsets = [80, 0], sizes = [4, 128], strides = [1, 1]} : vector<112x128xf32> to vector<4x128xf32>
    %459 = vector.extract_strided_slice %447 {offsets = [88, 0], sizes = [4, 128], strides = [1, 1]} : vector<112x128xf32> to vector<4x128xf32>
    %460 = vector.extract_strided_slice %447 {offsets = [96, 0], sizes = [4, 128], strides = [1, 1]} : vector<112x128xf32> to vector<4x128xf32>
    %461 = vector.extract_strided_slice %447 {offsets = [104, 0], sizes = [4, 128], strides = [1, 1]} : vector<112x128xf32> to vector<4x128xf32>
    %462 = arith.maximumf %448, %449 : vector<4x128xf32>
    %463 = arith.maximumf %462, %450 : vector<4x128xf32>
    %464 = arith.maximumf %463, %451 : vector<4x128xf32>
    %465 = arith.maximumf %464, %452 : vector<4x128xf32>
    %466 = arith.subf %448, %465 : vector<4x128xf32>
    %467 = math.exp %466 : vector<4x128xf32>
    %468 = arith.subf %449, %465 : vector<4x128xf32>
    %469 = math.exp %468 : vector<4x128xf32>
    %470 = arith.subf %450, %465 : vector<4x128xf32>
    %471 = math.exp %470 : vector<4x128xf32>
    %472 = arith.subf %451, %465 : vector<4x128xf32>
    %473 = math.exp %472 : vector<4x128xf32>
    %474 = arith.subf %452, %465 : vector<4x128xf32>
    %475 = math.exp %474 : vector<4x128xf32>
    %476 = arith.addf %467, %469 : vector<4x128xf32>
    %477 = arith.addf %476, %471 : vector<4x128xf32>
    %478 = arith.addf %477, %473 : vector<4x128xf32>
    %479 = arith.addf %478, %475 : vector<4x128xf32>
    %480 = tpu.reciprocal %479 : vector<4x128xf32> -> vector<4x128xf32>
    %481 = arith.mulf %467, %480 : vector<4x128xf32>
    %cst_157 = arith.constant 9.950000e-01 : f32
    %482 = vector.broadcast %cst_157 : f32 to vector<4x128xf32>
    %483 = arith.mulf %482, %481 : vector<4x128xf32>
    %cst_158 = arith.constant 1.000000e-03 : f32
    %484 = vector.broadcast %cst_158 : f32 to vector<4x128xf32>
    %485 = arith.addf %484, %483 : vector<4x128xf32>
    %486 = arith.mulf %469, %480 : vector<4x128xf32>
    %cst_159 = arith.constant 9.950000e-01 : f32
    %487 = vector.broadcast %cst_159 : f32 to vector<4x128xf32>
    %488 = arith.mulf %487, %486 : vector<4x128xf32>
    %cst_160 = arith.constant 1.000000e-03 : f32
    %489 = vector.broadcast %cst_160 : f32 to vector<4x128xf32>
    %490 = arith.addf %489, %488 : vector<4x128xf32>
    %491 = arith.mulf %471, %480 : vector<4x128xf32>
    %cst_161 = arith.constant 9.950000e-01 : f32
    %492 = vector.broadcast %cst_161 : f32 to vector<4x128xf32>
    %493 = arith.mulf %492, %491 : vector<4x128xf32>
    %cst_162 = arith.constant 1.000000e-03 : f32
    %494 = vector.broadcast %cst_162 : f32 to vector<4x128xf32>
    %495 = arith.addf %494, %493 : vector<4x128xf32>
    %496 = arith.mulf %473, %480 : vector<4x128xf32>
    %cst_163 = arith.constant 9.950000e-01 : f32
    %497 = vector.broadcast %cst_163 : f32 to vector<4x128xf32>
    %498 = arith.mulf %497, %496 : vector<4x128xf32>
    %cst_164 = arith.constant 1.000000e-03 : f32
    %499 = vector.broadcast %cst_164 : f32 to vector<4x128xf32>
    %500 = arith.addf %499, %498 : vector<4x128xf32>
    %cst_165 = arith.constant -3.000000e+00 : f32
    %501 = vector.broadcast %cst_165 : f32 to vector<4x128xf32>
    %cst_166 = arith.constant 0.000000e+00 : f32
    %502 = vector.broadcast %cst_166 : f32 to vector<4x128xf32>
    %503 = arith.addf %502, %485 : vector<4x128xf32>
    %cst_167 = arith.constant 6.000000e+00 : f32
    %504 = vector.broadcast %cst_167 : f32 to vector<4x128xf32>
    %505 = arith.mulf %504, %503 : vector<4x128xf32>
    %cst_168 = arith.constant 3.000000e+00 : f32
    %506 = vector.broadcast %cst_168 : f32 to vector<4x128xf32>
    %507 = arith.subf %505, %506 : vector<4x128xf32>
    %508 = arith.addf %503, %490 : vector<4x128xf32>
    %cst_169 = arith.constant 6.000000e+00 : f32
    %509 = vector.broadcast %cst_169 : f32 to vector<4x128xf32>
    %510 = arith.mulf %509, %508 : vector<4x128xf32>
    %cst_170 = arith.constant 3.000000e+00 : f32
    %511 = vector.broadcast %cst_170 : f32 to vector<4x128xf32>
    %512 = arith.subf %510, %511 : vector<4x128xf32>
    %513 = arith.addf %508, %495 : vector<4x128xf32>
    %cst_171 = arith.constant 6.000000e+00 : f32
    %514 = vector.broadcast %cst_171 : f32 to vector<4x128xf32>
    %515 = arith.mulf %514, %513 : vector<4x128xf32>
    %cst_172 = arith.constant 3.000000e+00 : f32
    %516 = vector.broadcast %cst_172 : f32 to vector<4x128xf32>
    %517 = arith.subf %515, %516 : vector<4x128xf32>
    %518 = arith.addf %513, %500 : vector<4x128xf32>
    %cst_173 = arith.constant 6.000000e+00 : f32
    %519 = vector.broadcast %cst_173 : f32 to vector<4x128xf32>
    %520 = arith.mulf %519, %518 : vector<4x128xf32>
    %cst_174 = arith.constant 3.000000e+00 : f32
    %521 = vector.broadcast %cst_174 : f32 to vector<4x128xf32>
    %522 = arith.subf %520, %521 : vector<4x128xf32>
    %cst_175 = arith.constant 3.000000e+00 : f32
    %523 = vector.broadcast %cst_175 : f32 to vector<4x128xf32>
    %524 = arith.subf %507, %501 : vector<4x128xf32>
    %525 = arith.subf %512, %507 : vector<4x128xf32>
    %526 = arith.subf %517, %512 : vector<4x128xf32>
    %527 = arith.subf %522, %517 : vector<4x128xf32>
    %528 = arith.subf %523, %522 : vector<4x128xf32>
    %529 = arith.maximumf %453, %454 : vector<4x128xf32>
    %530 = arith.maximumf %529, %455 : vector<4x128xf32>
    %531 = arith.maximumf %530, %456 : vector<4x128xf32>
    %532 = arith.maximumf %531, %457 : vector<4x128xf32>
    %533 = arith.subf %453, %532 : vector<4x128xf32>
    %534 = math.exp %533 : vector<4x128xf32>
    %535 = arith.subf %454, %532 : vector<4x128xf32>
    %536 = math.exp %535 : vector<4x128xf32>
    %537 = arith.subf %455, %532 : vector<4x128xf32>
    %538 = math.exp %537 : vector<4x128xf32>
    %539 = arith.subf %456, %532 : vector<4x128xf32>
    %540 = math.exp %539 : vector<4x128xf32>
    %541 = arith.subf %457, %532 : vector<4x128xf32>
    %542 = math.exp %541 : vector<4x128xf32>
    %543 = arith.addf %534, %536 : vector<4x128xf32>
    %544 = arith.addf %543, %538 : vector<4x128xf32>
    %545 = arith.addf %544, %540 : vector<4x128xf32>
    %546 = arith.addf %545, %542 : vector<4x128xf32>
    %547 = tpu.reciprocal %546 : vector<4x128xf32> -> vector<4x128xf32>
    %548 = arith.mulf %534, %547 : vector<4x128xf32>
    %cst_176 = arith.constant 9.950000e-01 : f32
    %549 = vector.broadcast %cst_176 : f32 to vector<4x128xf32>
    %550 = arith.mulf %549, %548 : vector<4x128xf32>
    %cst_177 = arith.constant 1.000000e-03 : f32
    %551 = vector.broadcast %cst_177 : f32 to vector<4x128xf32>
    %552 = arith.addf %551, %550 : vector<4x128xf32>
    %553 = arith.mulf %536, %547 : vector<4x128xf32>
    %cst_178 = arith.constant 9.950000e-01 : f32
    %554 = vector.broadcast %cst_178 : f32 to vector<4x128xf32>
    %555 = arith.mulf %554, %553 : vector<4x128xf32>
    %cst_179 = arith.constant 1.000000e-03 : f32
    %556 = vector.broadcast %cst_179 : f32 to vector<4x128xf32>
    %557 = arith.addf %556, %555 : vector<4x128xf32>
    %558 = arith.mulf %538, %547 : vector<4x128xf32>
    %cst_180 = arith.constant 9.950000e-01 : f32
    %559 = vector.broadcast %cst_180 : f32 to vector<4x128xf32>
    %560 = arith.mulf %559, %558 : vector<4x128xf32>
    %cst_181 = arith.constant 1.000000e-03 : f32
    %561 = vector.broadcast %cst_181 : f32 to vector<4x128xf32>
    %562 = arith.addf %561, %560 : vector<4x128xf32>
    %563 = arith.mulf %540, %547 : vector<4x128xf32>
    %cst_182 = arith.constant 9.950000e-01 : f32
    %564 = vector.broadcast %cst_182 : f32 to vector<4x128xf32>
    %565 = arith.mulf %564, %563 : vector<4x128xf32>
    %cst_183 = arith.constant 1.000000e-03 : f32
    %566 = vector.broadcast %cst_183 : f32 to vector<4x128xf32>
    %567 = arith.addf %566, %565 : vector<4x128xf32>
    %cst_184 = arith.constant -3.000000e+00 : f32
    %568 = vector.broadcast %cst_184 : f32 to vector<4x128xf32>
    %cst_185 = arith.constant 0.000000e+00 : f32
    %569 = vector.broadcast %cst_185 : f32 to vector<4x128xf32>
    %570 = arith.addf %569, %552 : vector<4x128xf32>
    %cst_186 = arith.constant 6.000000e+00 : f32
    %571 = vector.broadcast %cst_186 : f32 to vector<4x128xf32>
    %572 = arith.mulf %571, %570 : vector<4x128xf32>
    %cst_187 = arith.constant 3.000000e+00 : f32
    %573 = vector.broadcast %cst_187 : f32 to vector<4x128xf32>
    %574 = arith.subf %572, %573 : vector<4x128xf32>
    %575 = arith.addf %570, %557 : vector<4x128xf32>
    %cst_188 = arith.constant 6.000000e+00 : f32
    %576 = vector.broadcast %cst_188 : f32 to vector<4x128xf32>
    %577 = arith.mulf %576, %575 : vector<4x128xf32>
    %cst_189 = arith.constant 3.000000e+00 : f32
    %578 = vector.broadcast %cst_189 : f32 to vector<4x128xf32>
    %579 = arith.subf %577, %578 : vector<4x128xf32>
    %580 = arith.addf %575, %562 : vector<4x128xf32>
    %cst_190 = arith.constant 6.000000e+00 : f32
    %581 = vector.broadcast %cst_190 : f32 to vector<4x128xf32>
    %582 = arith.mulf %581, %580 : vector<4x128xf32>
    %cst_191 = arith.constant 3.000000e+00 : f32
    %583 = vector.broadcast %cst_191 : f32 to vector<4x128xf32>
    %584 = arith.subf %582, %583 : vector<4x128xf32>
    %585 = arith.addf %580, %567 : vector<4x128xf32>
    %cst_192 = arith.constant 6.000000e+00 : f32
    %586 = vector.broadcast %cst_192 : f32 to vector<4x128xf32>
    %587 = arith.mulf %586, %585 : vector<4x128xf32>
    %cst_193 = arith.constant 3.000000e+00 : f32
    %588 = vector.broadcast %cst_193 : f32 to vector<4x128xf32>
    %589 = arith.subf %587, %588 : vector<4x128xf32>
    %cst_194 = arith.constant 3.000000e+00 : f32
    %590 = vector.broadcast %cst_194 : f32 to vector<4x128xf32>
    %591 = arith.subf %574, %568 : vector<4x128xf32>
    %592 = arith.subf %579, %574 : vector<4x128xf32>
    %593 = arith.subf %584, %579 : vector<4x128xf32>
    %594 = arith.subf %589, %584 : vector<4x128xf32>
    %595 = arith.subf %590, %589 : vector<4x128xf32>
    %cst_195 = arith.constant 1.000000e+00 : f32
    %596 = vector.broadcast %cst_195 : f32 to vector<4x128xf32>
    %cst_196 = arith.constant 0.000000e+00 : f32
    %597 = vector.broadcast %cst_196 : f32 to vector<4x128xf32>
    %598 = arith.maximumf %458, %597 : vector<4x128xf32>
    %599 = math.absf %458 : vector<4x128xf32>
    %cst_197 = arith.constant 0.000000e+00 : f32
    %600 = vector.broadcast %cst_197 : f32 to vector<4x128xf32>
    %601 = arith.subf %600, %599 : vector<4x128xf32>
    %602 = math.exp %601 : vector<4x128xf32>
    %cst_198 = arith.constant 1.000000e+00 : f32
    %603 = vector.broadcast %cst_198 : f32 to vector<4x128xf32>
    %604 = arith.addf %603, %602 : vector<4x128xf32>
    %605 = math.log %604 : vector<4x128xf32>
    %606 = arith.addf %598, %605 : vector<4x128xf32>
    %cst_199 = arith.constant 1.000000e-03 : f32
    %607 = vector.broadcast %cst_199 : f32 to vector<4x128xf32>
    %608 = arith.addf %607, %606 : vector<4x128xf32>
    %cst_200 = arith.constant 0.000000e+00 : f32
    %609 = vector.broadcast %cst_200 : f32 to vector<4x128xf32>
    %610 = arith.maximumf %459, %609 : vector<4x128xf32>
    %611 = math.absf %459 : vector<4x128xf32>
    %cst_201 = arith.constant 0.000000e+00 : f32
    %612 = vector.broadcast %cst_201 : f32 to vector<4x128xf32>
    %613 = arith.subf %612, %611 : vector<4x128xf32>
    %614 = math.exp %613 : vector<4x128xf32>
    %cst_202 = arith.constant 1.000000e+00 : f32
    %615 = vector.broadcast %cst_202 : f32 to vector<4x128xf32>
    %616 = arith.addf %615, %614 : vector<4x128xf32>
    %617 = math.log %616 : vector<4x128xf32>
    %618 = arith.addf %610, %617 : vector<4x128xf32>
    %cst_203 = arith.constant 1.000000e-03 : f32
    %619 = vector.broadcast %cst_203 : f32 to vector<4x128xf32>
    %620 = arith.addf %619, %618 : vector<4x128xf32>
    %cst_204 = arith.constant 0.000000e+00 : f32
    %621 = vector.broadcast %cst_204 : f32 to vector<4x128xf32>
    %622 = arith.maximumf %460, %621 : vector<4x128xf32>
    %623 = math.absf %460 : vector<4x128xf32>
    %cst_205 = arith.constant 0.000000e+00 : f32
    %624 = vector.broadcast %cst_205 : f32 to vector<4x128xf32>
    %625 = arith.subf %624, %623 : vector<4x128xf32>
    %626 = math.exp %625 : vector<4x128xf32>
    %cst_206 = arith.constant 1.000000e+00 : f32
    %627 = vector.broadcast %cst_206 : f32 to vector<4x128xf32>
    %628 = arith.addf %627, %626 : vector<4x128xf32>
    %629 = math.log %628 : vector<4x128xf32>
    %630 = arith.addf %622, %629 : vector<4x128xf32>
    %cst_207 = arith.constant 1.000000e-03 : f32
    %631 = vector.broadcast %cst_207 : f32 to vector<4x128xf32>
    %632 = arith.addf %631, %630 : vector<4x128xf32>
    %cst_208 = arith.constant 0.000000e+00 : f32
    %633 = vector.broadcast %cst_208 : f32 to vector<4x128xf32>
    %634 = arith.maximumf %461, %633 : vector<4x128xf32>
    %635 = math.absf %461 : vector<4x128xf32>
    %cst_209 = arith.constant 0.000000e+00 : f32
    %636 = vector.broadcast %cst_209 : f32 to vector<4x128xf32>
    %637 = arith.subf %636, %635 : vector<4x128xf32>
    %638 = math.exp %637 : vector<4x128xf32>
    %cst_210 = arith.constant 1.000000e+00 : f32
    %639 = vector.broadcast %cst_210 : f32 to vector<4x128xf32>
    %640 = arith.addf %639, %638 : vector<4x128xf32>
    %641 = math.log %640 : vector<4x128xf32>
    %642 = arith.addf %634, %641 : vector<4x128xf32>
    %cst_211 = arith.constant 1.000000e-03 : f32
    %643 = vector.broadcast %cst_211 : f32 to vector<4x128xf32>
    %644 = arith.addf %643, %642 : vector<4x128xf32>
    %cst_212 = arith.constant 1.000000e+00 : f32
    %645 = vector.broadcast %cst_212 : f32 to vector<4x128xf32>
    %cst_213 = arith.constant -3.000000e+00 : f32
    %646 = vector.broadcast %cst_213 : f32 to vector<4x128xf32>
    %647 = arith.cmpf oge, %395, %646 : vector<4x128xf32>
    %cst_214 = arith.constant 3.000000e+00 : f32
    %648 = vector.broadcast %cst_214 : f32 to vector<4x128xf32>
    %649 = arith.cmpf ole, %395, %648 : vector<4x128xf32>
    %650 = arith.andi %647, %649 : vector<4x128xi1>
    %cst_215 = arith.constant -3.000000e+00 : f32
    %cst_216 = arith.constant 3.000000e+00 : f32
    %651 = vector.broadcast %cst_215 : f32 to vector<4x128xf32>
    %652 = arith.maximumf %651, %395 : vector<4x128xf32>
    %653 = vector.broadcast %cst_216 : f32 to vector<4x128xf32>
    %654 = arith.minimumf %653, %652 : vector<4x128xf32>
    %cst_217 = arith.constant 1.000000e+00 : f32
    %655 = vector.broadcast %cst_217 : f32 to vector<4x128xf32>
    %656 = arith.cmpf oge, %654, %507 : vector<4x128xf32>
    %657 = arith.extui %656 : vector<4x128xi1> to vector<4x128xi32>
    %658 = arith.sitofp %657 : vector<4x128xi32> to vector<4x128xf32>
    %659 = arith.cmpf oge, %654, %512 : vector<4x128xf32>
    %660 = arith.extui %659 : vector<4x128xi1> to vector<4x128xi32>
    %661 = arith.sitofp %660 : vector<4x128xi32> to vector<4x128xf32>
    %662 = arith.cmpf oge, %654, %517 : vector<4x128xf32>
    %663 = arith.extui %662 : vector<4x128xi1> to vector<4x128xi32>
    %664 = arith.sitofp %663 : vector<4x128xi32> to vector<4x128xf32>
    %665 = arith.cmpf oge, %654, %522 : vector<4x128xf32>
    %666 = arith.extui %665 : vector<4x128xi1> to vector<4x128xi32>
    %667 = arith.sitofp %666 : vector<4x128xi32> to vector<4x128xf32>
    %cst_218 = arith.constant 0.000000e+00 : f32
    %668 = vector.broadcast %cst_218 : f32 to vector<4x128xf32>
    %cst_219 = arith.constant 0.000000e+00 : f32
    %669 = vector.broadcast %cst_219 : f32 to vector<4x128xf32>
    %670 = arith.subf %655, %658 : vector<4x128xf32>
    %671 = arith.mulf %670, %501 : vector<4x128xf32>
    %672 = arith.addf %669, %671 : vector<4x128xf32>
    %673 = arith.mulf %670, %524 : vector<4x128xf32>
    %674 = arith.addf %669, %673 : vector<4x128xf32>
    %675 = arith.mulf %670, %568 : vector<4x128xf32>
    %676 = arith.addf %669, %675 : vector<4x128xf32>
    %677 = arith.mulf %670, %591 : vector<4x128xf32>
    %678 = arith.addf %669, %677 : vector<4x128xf32>
    %679 = arith.mulf %670, %596 : vector<4x128xf32>
    %680 = arith.addf %669, %679 : vector<4x128xf32>
    %681 = arith.mulf %670, %608 : vector<4x128xf32>
    %682 = arith.addf %669, %681 : vector<4x128xf32>
    %683 = arith.subf %658, %661 : vector<4x128xf32>
    %684 = arith.mulf %683, %507 : vector<4x128xf32>
    %685 = arith.addf %672, %684 : vector<4x128xf32>
    %686 = arith.mulf %683, %525 : vector<4x128xf32>
    %687 = arith.addf %674, %686 : vector<4x128xf32>
    %688 = arith.mulf %683, %574 : vector<4x128xf32>
    %689 = arith.addf %676, %688 : vector<4x128xf32>
    %690 = arith.mulf %683, %592 : vector<4x128xf32>
    %691 = arith.addf %678, %690 : vector<4x128xf32>
    %692 = arith.mulf %683, %608 : vector<4x128xf32>
    %693 = arith.addf %680, %692 : vector<4x128xf32>
    %694 = arith.mulf %683, %620 : vector<4x128xf32>
    %695 = arith.addf %682, %694 : vector<4x128xf32>
    %696 = arith.subf %661, %664 : vector<4x128xf32>
    %697 = arith.mulf %696, %512 : vector<4x128xf32>
    %698 = arith.addf %685, %697 : vector<4x128xf32>
    %699 = arith.mulf %696, %526 : vector<4x128xf32>
    %700 = arith.addf %687, %699 : vector<4x128xf32>
    %701 = arith.mulf %696, %579 : vector<4x128xf32>
    %702 = arith.addf %689, %701 : vector<4x128xf32>
    %703 = arith.mulf %696, %593 : vector<4x128xf32>
    %704 = arith.addf %691, %703 : vector<4x128xf32>
    %705 = arith.mulf %696, %620 : vector<4x128xf32>
    %706 = arith.addf %693, %705 : vector<4x128xf32>
    %707 = arith.mulf %696, %632 : vector<4x128xf32>
    %708 = arith.addf %695, %707 : vector<4x128xf32>
    %709 = arith.subf %664, %667 : vector<4x128xf32>
    %710 = arith.mulf %709, %517 : vector<4x128xf32>
    %711 = arith.addf %698, %710 : vector<4x128xf32>
    %712 = arith.mulf %709, %527 : vector<4x128xf32>
    %713 = arith.addf %700, %712 : vector<4x128xf32>
    %714 = arith.mulf %709, %584 : vector<4x128xf32>
    %715 = arith.addf %702, %714 : vector<4x128xf32>
    %716 = arith.mulf %709, %594 : vector<4x128xf32>
    %717 = arith.addf %704, %716 : vector<4x128xf32>
    %718 = arith.mulf %709, %632 : vector<4x128xf32>
    %719 = arith.addf %706, %718 : vector<4x128xf32>
    %720 = arith.mulf %709, %644 : vector<4x128xf32>
    %721 = arith.addf %708, %720 : vector<4x128xf32>
    %722 = arith.subf %667, %668 : vector<4x128xf32>
    %723 = arith.mulf %722, %522 : vector<4x128xf32>
    %724 = arith.addf %711, %723 : vector<4x128xf32>
    %725 = arith.mulf %722, %528 : vector<4x128xf32>
    %726 = arith.addf %713, %725 : vector<4x128xf32>
    %727 = arith.mulf %722, %589 : vector<4x128xf32>
    %728 = arith.addf %715, %727 : vector<4x128xf32>
    %729 = arith.mulf %722, %595 : vector<4x128xf32>
    %730 = arith.addf %717, %729 : vector<4x128xf32>
    %731 = arith.mulf %722, %644 : vector<4x128xf32>
    %732 = arith.addf %719, %731 : vector<4x128xf32>
    %733 = arith.mulf %722, %645 : vector<4x128xf32>
    %734 = arith.addf %721, %733 : vector<4x128xf32>
    %735 = tpu.reciprocal %726 : vector<4x128xf32> -> vector<4x128xf32>
    %736 = arith.mulf %730, %735 : vector<4x128xf32>
    %737 = arith.subf %654, %724 : vector<4x128xf32>
    %738 = arith.mulf %737, %735 : vector<4x128xf32>
    %cst_220 = arith.constant 1.000000e+00 : f32
    %739 = vector.broadcast %cst_220 : f32 to vector<4x128xf32>
    %740 = arith.subf %739, %738 : vector<4x128xf32>
    %741 = arith.mulf %738, %740 : vector<4x128xf32>
    %742 = arith.mulf %736, %738 : vector<4x128xf32>
    %743 = arith.mulf %742, %738 : vector<4x128xf32>
    %744 = arith.mulf %732, %741 : vector<4x128xf32>
    %745 = arith.addf %743, %744 : vector<4x128xf32>
    %746 = arith.mulf %730, %745 : vector<4x128xf32>
    %747 = arith.addf %732, %734 : vector<4x128xf32>
    %cst_221 = arith.constant 2.000000e+00 : f32
    %748 = vector.broadcast %cst_221 : f32 to vector<4x128xf32>
    %749 = arith.mulf %748, %736 : vector<4x128xf32>
    %750 = arith.subf %747, %749 : vector<4x128xf32>
    %751 = arith.mulf %750, %741 : vector<4x128xf32>
    %752 = arith.addf %736, %751 : vector<4x128xf32>
    %753 = tpu.reciprocal %752 : vector<4x128xf32> -> vector<4x128xf32>
    %754 = arith.mulf %746, %753 : vector<4x128xf32>
    %755 = arith.addf %728, %754 : vector<4x128xf32>
    %756 = arith.mulf %736, %736 : vector<4x128xf32>
    %757 = arith.mulf %734, %738 : vector<4x128xf32>
    %758 = arith.mulf %757, %738 : vector<4x128xf32>
    %cst_222 = arith.constant 2.000000e+00 : f32
    %759 = vector.broadcast %cst_222 : f32 to vector<4x128xf32>
    %760 = arith.mulf %759, %736 : vector<4x128xf32>
    %761 = arith.mulf %760, %741 : vector<4x128xf32>
    %762 = arith.addf %758, %761 : vector<4x128xf32>
    %763 = arith.mulf %732, %740 : vector<4x128xf32>
    %764 = arith.mulf %763, %740 : vector<4x128xf32>
    %765 = arith.addf %762, %764 : vector<4x128xf32>
    %766 = arith.mulf %756, %765 : vector<4x128xf32>
    %767 = arith.mulf %766, %753 : vector<4x128xf32>
    %768 = arith.mulf %767, %753 : vector<4x128xf32>
    %769 = math.log %768 : vector<4x128xf32>
    %770 = arith.select %650, %755, %395 : vector<4x128xi1>, vector<4x128xf32>
    %cst_223 = arith.constant 0.000000e+00 : f32
    %771 = vector.broadcast %cst_223 : f32 to vector<4x128xf32>
    %772 = arith.select %650, %769, %771 : vector<4x128xi1>, vector<4x128xf32>
    %773 = arith.addf %381, %772 : vector<4x128xf32>
    %c1_224 = arith.constant 1 : index
    %c0_225 = arith.constant 0 : index
    %c0_226 = arith.constant 0 : index
    %774 = vector.load %arg10[%c1_224, %c0_225, %c0_226] : memref<4x4x4xf32, #tpu.memory_space<vmem>>, vector<1x4x4xf32>
    %775 = vector.shape_cast %774 : vector<1x4x4xf32> to vector<4x4xf32>
    %cst_227 = arith.constant dense<0.000000e+00> : vector<4x128xf32>
    %776 = tpu.matmul %775, %388, %cst_227 {dimension_numbers = #tpu.dot_dimension_numbers<[1], [0], [0], [1], [0, 0, 1, 1], [], []>} : vector<4x4xf32>, vector<4x128xf32>, vector<4x128xf32> -> vector<4x128xf32>
    %c1_228 = arith.constant 1 : index
    %c0_229 = arith.constant 0 : index
    %c0_230 = arith.constant 0 : index
    %777 = vector.load %arg11[%c1_228, %c0_229, %c0_230] : memref<4x4x4xf32, #tpu.memory_space<vmem>>, vector<1x4x4xf32>
    %778 = vector.shape_cast %777 : vector<1x4x4xf32> to vector<4x4xf32>
    %cst_231 = arith.constant dense<0.000000e+00> : vector<4x128xf32>
    %779 = tpu.matmul %778, %770, %cst_231 {dimension_numbers = #tpu.dot_dimension_numbers<[1], [0], [0], [1], [0, 0, 1, 1], [], []>} : vector<4x4xf32>, vector<4x128xf32>, vector<4x128xf32> -> vector<4x128xf32>
    %780 = arith.addf %776, %779 : vector<4x128xf32>
    %c1_232 = arith.constant 1 : index
    %c0_233 = arith.constant 0 : index
    %c0_234 = arith.constant 0 : index
    %781 = vector.load %arg12[%c1_232, %c0_233, %c0_234] : memref<4x4x4xf32, #tpu.memory_space<vmem>>, vector<1x4x4xf32>
    %782 = vector.shape_cast %781 : vector<1x4x4xf32> to vector<4x4xf32>
    %cst_235 = arith.constant dense<0.000000e+00> : vector<4x128xf32>
    %783 = tpu.matmul %782, %388, %cst_235 {dimension_numbers = #tpu.dot_dimension_numbers<[1], [0], [0], [1], [0, 0, 1, 1], [], []>} : vector<4x4xf32>, vector<4x128xf32>, vector<4x128xf32> -> vector<4x128xf32>
    %c1_236 = arith.constant 1 : index
    %c0_237 = arith.constant 0 : index
    %c0_238 = arith.constant 0 : index
    %784 = vector.load %arg13[%c1_236, %c0_237, %c0_238] : memref<4x4x4xf32, #tpu.memory_space<vmem>>, vector<1x4x4xf32>
    %785 = vector.shape_cast %784 : vector<1x4x4xf32> to vector<4x4xf32>
    %cst_239 = arith.constant dense<0.000000e+00> : vector<4x128xf32>
    %786 = tpu.matmul %785, %770, %cst_239 {dimension_numbers = #tpu.dot_dimension_numbers<[1], [0], [0], [1], [0, 0, 1, 1], [], []>} : vector<4x4xf32>, vector<4x128xf32>, vector<4x128xf32> -> vector<4x128xf32>
    %787 = arith.addf %783, %786 : vector<4x128xf32>
    %c2 = arith.constant 2 : index
    %c0_240 = arith.constant 0 : index
    %c0_241 = arith.constant 0 : index
    %788 = vector.load %arg2[%c2, %c0_240, %c0_241] : memref<5x8x4xf32, #tpu.memory_space<vmem>>, vector<1x8x4xf32>
    %789 = vector.shape_cast %788 : vector<1x8x4xf32> to vector<8x4xf32>
    %cst_242 = arith.constant dense<0.000000e+00> : vector<8x128xf32>
    %790 = tpu.matmul %789, %780, %cst_242 {dimension_numbers = #tpu.dot_dimension_numbers<[1], [0], [0], [1], [0, 0, 1, 1], [], []>} : vector<8x4xf32>, vector<4x128xf32>, vector<8x128xf32> -> vector<8x128xf32>
    %c2_243 = arith.constant 2 : index
    %c0_244 = arith.constant 0 : index
    %c0_245 = arith.constant 0 : index
    %791 = vector.load %arg3[%c2_243, %c0_244, %c0_245] : memref<5x8x1xf32, #tpu.memory_space<vmem>>, vector<1x8x1xf32>
    %792 = vector.shape_cast %791 : vector<1x8x1xf32> to vector<8x1xf32>
    %793 = vector.broadcast %792 : vector<8x1xf32> to vector<8x128xf32>
    %794 = arith.addf %790, %793 : vector<8x128xf32>
    %cst_246 = arith.constant 0.000000e+00 : f32
    %795 = vector.broadcast %cst_246 : f32 to vector<8x128xf32>
    %796 = arith.cmpf ogt, %794, %795 : vector<8x128xf32>
    %cst_247 = arith.constant 0.000000e+00 : f32
    %797 = vector.broadcast %cst_247 : f32 to vector<8x128xf32>
    %798 = arith.minimumf %794, %797 : vector<8x128xf32>
    %799 = math.exp %798 : vector<8x128xf32>
    %cst_248 = arith.constant 1.000000e+00 : f32
    %800 = vector.broadcast %cst_248 : f32 to vector<8x128xf32>
    %801 = arith.subf %799, %800 : vector<8x128xf32>
    %802 = arith.select %796, %794, %801 : vector<8x128xi1>, vector<8x128xf32>
    %c2_249 = arith.constant 2 : index
    %c0_250 = arith.constant 0 : index
    %c0_251 = arith.constant 0 : index
    %803 = vector.load %arg4[%c2_249, %c0_250, %c0_251] : memref<5x8x8xf32, #tpu.memory_space<vmem>>, vector<1x8x8xf32>
    %804 = vector.shape_cast %803 : vector<1x8x8xf32> to vector<8x8xf32>
    %cst_252 = arith.constant dense<0.000000e+00> : vector<8x128xf32>
    %805 = tpu.matmul %804, %802, %cst_252 {dimension_numbers = #tpu.dot_dimension_numbers<[1], [0], [0], [1], [0, 0, 1, 1], [], []>} : vector<8x8xf32>, vector<8x128xf32>, vector<8x128xf32> -> vector<8x128xf32>
    %c2_253 = arith.constant 2 : index
    %c0_254 = arith.constant 0 : index
    %c0_255 = arith.constant 0 : index
    %806 = vector.load %arg5[%c2_253, %c0_254, %c0_255] : memref<5x8x1xf32, #tpu.memory_space<vmem>>, vector<1x8x1xf32>
    %807 = vector.shape_cast %806 : vector<1x8x1xf32> to vector<8x1xf32>
    %808 = vector.broadcast %807 : vector<8x1xf32> to vector<8x128xf32>
    %809 = arith.addf %805, %808 : vector<8x128xf32>
    %cst_256 = arith.constant 0.000000e+00 : f32
    %810 = vector.broadcast %cst_256 : f32 to vector<8x128xf32>
    %811 = arith.cmpf ogt, %809, %810 : vector<8x128xf32>
    %cst_257 = arith.constant 0.000000e+00 : f32
    %812 = vector.broadcast %cst_257 : f32 to vector<8x128xf32>
    %813 = arith.minimumf %809, %812 : vector<8x128xf32>
    %814 = math.exp %813 : vector<8x128xf32>
    %cst_258 = arith.constant 1.000000e+00 : f32
    %815 = vector.broadcast %cst_258 : f32 to vector<8x128xf32>
    %816 = arith.subf %814, %815 : vector<8x128xf32>
    %817 = arith.select %811, %809, %816 : vector<8x128xi1>, vector<8x128xf32>
    %c2_259 = arith.constant 2 : index
    %c0_260 = arith.constant 0 : index
    %c0_261 = arith.constant 0 : index
    %818 = vector.load %arg6[%c2_259, %c0_260, %c0_261] : memref<5x8x8xf32, #tpu.memory_space<vmem>>, vector<1x8x8xf32>
    %819 = vector.shape_cast %818 : vector<1x8x8xf32> to vector<8x8xf32>
    %cst_262 = arith.constant dense<0.000000e+00> : vector<8x128xf32>
    %820 = tpu.matmul %819, %817, %cst_262 {dimension_numbers = #tpu.dot_dimension_numbers<[1], [0], [0], [1], [0, 0, 1, 1], [], []>} : vector<8x8xf32>, vector<8x128xf32>, vector<8x128xf32> -> vector<8x128xf32>
    %c2_263 = arith.constant 2 : index
    %c0_264 = arith.constant 0 : index
    %c0_265 = arith.constant 0 : index
    %821 = vector.load %arg7[%c2_263, %c0_264, %c0_265] : memref<5x8x1xf32, #tpu.memory_space<vmem>>, vector<1x8x1xf32>
    %822 = vector.shape_cast %821 : vector<1x8x1xf32> to vector<8x1xf32>
    %823 = vector.broadcast %822 : vector<8x1xf32> to vector<8x128xf32>
    %824 = arith.addf %820, %823 : vector<8x128xf32>
    %cst_266 = arith.constant 0.000000e+00 : f32
    %825 = vector.broadcast %cst_266 : f32 to vector<8x128xf32>
    %826 = arith.cmpf ogt, %824, %825 : vector<8x128xf32>
    %cst_267 = arith.constant 0.000000e+00 : f32
    %827 = vector.broadcast %cst_267 : f32 to vector<8x128xf32>
    %828 = arith.minimumf %824, %827 : vector<8x128xf32>
    %829 = math.exp %828 : vector<8x128xf32>
    %cst_268 = arith.constant 1.000000e+00 : f32
    %830 = vector.broadcast %cst_268 : f32 to vector<8x128xf32>
    %831 = arith.subf %829, %830 : vector<8x128xf32>
    %832 = arith.select %826, %824, %831 : vector<8x128xi1>, vector<8x128xf32>
    %c2_269 = arith.constant 2 : index
    %c0_270 = arith.constant 0 : index
    %c0_271 = arith.constant 0 : index
    %833 = vector.load %arg8[%c2_269, %c0_270, %c0_271] : memref<5x112x8xf32, #tpu.memory_space<vmem>>, vector<1x112x8xf32>
    %834 = vector.shape_cast %833 : vector<1x112x8xf32> to vector<112x8xf32>
    %cst_272 = arith.constant dense<0.000000e+00> : vector<112x128xf32>
    %835 = tpu.matmul %834, %832, %cst_272 {dimension_numbers = #tpu.dot_dimension_numbers<[1], [0], [0], [1], [0, 0, 1, 1], [], []>} : vector<112x8xf32>, vector<8x128xf32>, vector<112x128xf32> -> vector<112x128xf32>
    %c2_273 = arith.constant 2 : index
    %c0_274 = arith.constant 0 : index
    %c0_275 = arith.constant 0 : index
    %836 = vector.load %arg9[%c2_273, %c0_274, %c0_275] : memref<5x112x1xf32, #tpu.memory_space<vmem>>, vector<1x112x1xf32>
    %837 = vector.shape_cast %836 : vector<1x112x1xf32> to vector<112x1xf32>
    %838 = vector.broadcast %837 : vector<112x1xf32> to vector<112x128xf32>
    %839 = arith.addf %835, %838 : vector<112x128xf32>
    %840 = vector.extract_strided_slice %839 {offsets = [0, 0], sizes = [4, 128], strides = [1, 1]} : vector<112x128xf32> to vector<4x128xf32>
    %841 = vector.extract_strided_slice %839 {offsets = [8, 0], sizes = [4, 128], strides = [1, 1]} : vector<112x128xf32> to vector<4x128xf32>
    %842 = vector.extract_strided_slice %839 {offsets = [16, 0], sizes = [4, 128], strides = [1, 1]} : vector<112x128xf32> to vector<4x128xf32>
    %843 = vector.extract_strided_slice %839 {offsets = [24, 0], sizes = [4, 128], strides = [1, 1]} : vector<112x128xf32> to vector<4x128xf32>
    %844 = vector.extract_strided_slice %839 {offsets = [32, 0], sizes = [4, 128], strides = [1, 1]} : vector<112x128xf32> to vector<4x128xf32>
    %845 = vector.extract_strided_slice %839 {offsets = [40, 0], sizes = [4, 128], strides = [1, 1]} : vector<112x128xf32> to vector<4x128xf32>
    %846 = vector.extract_strided_slice %839 {offsets = [48, 0], sizes = [4, 128], strides = [1, 1]} : vector<112x128xf32> to vector<4x128xf32>
    %847 = vector.extract_strided_slice %839 {offsets = [56, 0], sizes = [4, 128], strides = [1, 1]} : vector<112x128xf32> to vector<4x128xf32>
    %848 = vector.extract_strided_slice %839 {offsets = [64, 0], sizes = [4, 128], strides = [1, 1]} : vector<112x128xf32> to vector<4x128xf32>
    %849 = vector.extract_strided_slice %839 {offsets = [72, 0], sizes = [4, 128], strides = [1, 1]} : vector<112x128xf32> to vector<4x128xf32>
    %850 = vector.extract_strided_slice %839 {offsets = [80, 0], sizes = [4, 128], strides = [1, 1]} : vector<112x128xf32> to vector<4x128xf32>
    %851 = vector.extract_strided_slice %839 {offsets = [88, 0], sizes = [4, 128], strides = [1, 1]} : vector<112x128xf32> to vector<4x128xf32>
    %852 = vector.extract_strided_slice %839 {offsets = [96, 0], sizes = [4, 128], strides = [1, 1]} : vector<112x128xf32> to vector<4x128xf32>
    %853 = vector.extract_strided_slice %839 {offsets = [104, 0], sizes = [4, 128], strides = [1, 1]} : vector<112x128xf32> to vector<4x128xf32>
    %854 = arith.maximumf %840, %841 : vector<4x128xf32>
    %855 = arith.maximumf %854, %842 : vector<4x128xf32>
    %856 = arith.maximumf %855, %843 : vector<4x128xf32>
    %857 = arith.maximumf %856, %844 : vector<4x128xf32>
    %858 = arith.subf %840, %857 : vector<4x128xf32>
    %859 = math.exp %858 : vector<4x128xf32>
    %860 = arith.subf %841, %857 : vector<4x128xf32>
    %861 = math.exp %860 : vector<4x128xf32>
    %862 = arith.subf %842, %857 : vector<4x128xf32>
    %863 = math.exp %862 : vector<4x128xf32>
    %864 = arith.subf %843, %857 : vector<4x128xf32>
    %865 = math.exp %864 : vector<4x128xf32>
    %866 = arith.subf %844, %857 : vector<4x128xf32>
    %867 = math.exp %866 : vector<4x128xf32>
    %868 = arith.addf %859, %861 : vector<4x128xf32>
    %869 = arith.addf %868, %863 : vector<4x128xf32>
    %870 = arith.addf %869, %865 : vector<4x128xf32>
    %871 = arith.addf %870, %867 : vector<4x128xf32>
    %872 = tpu.reciprocal %871 : vector<4x128xf32> -> vector<4x128xf32>
    %873 = arith.mulf %859, %872 : vector<4x128xf32>
    %cst_276 = arith.constant 9.950000e-01 : f32
    %874 = vector.broadcast %cst_276 : f32 to vector<4x128xf32>
    %875 = arith.mulf %874, %873 : vector<4x128xf32>
    %cst_277 = arith.constant 1.000000e-03 : f32
    %876 = vector.broadcast %cst_277 : f32 to vector<4x128xf32>
    %877 = arith.addf %876, %875 : vector<4x128xf32>
    %878 = arith.mulf %861, %872 : vector<4x128xf32>
    %cst_278 = arith.constant 9.950000e-01 : f32
    %879 = vector.broadcast %cst_278 : f32 to vector<4x128xf32>
    %880 = arith.mulf %879, %878 : vector<4x128xf32>
    %cst_279 = arith.constant 1.000000e-03 : f32
    %881 = vector.broadcast %cst_279 : f32 to vector<4x128xf32>
    %882 = arith.addf %881, %880 : vector<4x128xf32>
    %883 = arith.mulf %863, %872 : vector<4x128xf32>
    %cst_280 = arith.constant 9.950000e-01 : f32
    %884 = vector.broadcast %cst_280 : f32 to vector<4x128xf32>
    %885 = arith.mulf %884, %883 : vector<4x128xf32>
    %cst_281 = arith.constant 1.000000e-03 : f32
    %886 = vector.broadcast %cst_281 : f32 to vector<4x128xf32>
    %887 = arith.addf %886, %885 : vector<4x128xf32>
    %888 = arith.mulf %865, %872 : vector<4x128xf32>
    %cst_282 = arith.constant 9.950000e-01 : f32
    %889 = vector.broadcast %cst_282 : f32 to vector<4x128xf32>
    %890 = arith.mulf %889, %888 : vector<4x128xf32>
    %cst_283 = arith.constant 1.000000e-03 : f32
    %891 = vector.broadcast %cst_283 : f32 to vector<4x128xf32>
    %892 = arith.addf %891, %890 : vector<4x128xf32>
    %cst_284 = arith.constant -3.000000e+00 : f32
    %893 = vector.broadcast %cst_284 : f32 to vector<4x128xf32>
    %cst_285 = arith.constant 0.000000e+00 : f32
    %894 = vector.broadcast %cst_285 : f32 to vector<4x128xf32>
    %895 = arith.addf %894, %877 : vector<4x128xf32>
    %cst_286 = arith.constant 6.000000e+00 : f32
    %896 = vector.broadcast %cst_286 : f32 to vector<4x128xf32>
    %897 = arith.mulf %896, %895 : vector<4x128xf32>
    %cst_287 = arith.constant 3.000000e+00 : f32
    %898 = vector.broadcast %cst_287 : f32 to vector<4x128xf32>
    %899 = arith.subf %897, %898 : vector<4x128xf32>
    %900 = arith.addf %895, %882 : vector<4x128xf32>
    %cst_288 = arith.constant 6.000000e+00 : f32
    %901 = vector.broadcast %cst_288 : f32 to vector<4x128xf32>
    %902 = arith.mulf %901, %900 : vector<4x128xf32>
    %cst_289 = arith.constant 3.000000e+00 : f32
    %903 = vector.broadcast %cst_289 : f32 to vector<4x128xf32>
    %904 = arith.subf %902, %903 : vector<4x128xf32>
    %905 = arith.addf %900, %887 : vector<4x128xf32>
    %cst_290 = arith.constant 6.000000e+00 : f32
    %906 = vector.broadcast %cst_290 : f32 to vector<4x128xf32>
    %907 = arith.mulf %906, %905 : vector<4x128xf32>
    %cst_291 = arith.constant 3.000000e+00 : f32
    %908 = vector.broadcast %cst_291 : f32 to vector<4x128xf32>
    %909 = arith.subf %907, %908 : vector<4x128xf32>
    %910 = arith.addf %905, %892 : vector<4x128xf32>
    %cst_292 = arith.constant 6.000000e+00 : f32
    %911 = vector.broadcast %cst_292 : f32 to vector<4x128xf32>
    %912 = arith.mulf %911, %910 : vector<4x128xf32>
    %cst_293 = arith.constant 3.000000e+00 : f32
    %913 = vector.broadcast %cst_293 : f32 to vector<4x128xf32>
    %914 = arith.subf %912, %913 : vector<4x128xf32>
    %cst_294 = arith.constant 3.000000e+00 : f32
    %915 = vector.broadcast %cst_294 : f32 to vector<4x128xf32>
    %916 = arith.subf %899, %893 : vector<4x128xf32>
    %917 = arith.subf %904, %899 : vector<4x128xf32>
    %918 = arith.subf %909, %904 : vector<4x128xf32>
    %919 = arith.subf %914, %909 : vector<4x128xf32>
    %920 = arith.subf %915, %914 : vector<4x128xf32>
    %921 = arith.maximumf %845, %846 : vector<4x128xf32>
    %922 = arith.maximumf %921, %847 : vector<4x128xf32>
    %923 = arith.maximumf %922, %848 : vector<4x128xf32>
    %924 = arith.maximumf %923, %849 : vector<4x128xf32>
    %925 = arith.subf %845, %924 : vector<4x128xf32>
    %926 = math.exp %925 : vector<4x128xf32>
    %927 = arith.subf %846, %924 : vector<4x128xf32>
    %928 = math.exp %927 : vector<4x128xf32>
    %929 = arith.subf %847, %924 : vector<4x128xf32>
    %930 = math.exp %929 : vector<4x128xf32>
    %931 = arith.subf %848, %924 : vector<4x128xf32>
    %932 = math.exp %931 : vector<4x128xf32>
    %933 = arith.subf %849, %924 : vector<4x128xf32>
    %934 = math.exp %933 : vector<4x128xf32>
    %935 = arith.addf %926, %928 : vector<4x128xf32>
    %936 = arith.addf %935, %930 : vector<4x128xf32>
    %937 = arith.addf %936, %932 : vector<4x128xf32>
    %938 = arith.addf %937, %934 : vector<4x128xf32>
    %939 = tpu.reciprocal %938 : vector<4x128xf32> -> vector<4x128xf32>
    %940 = arith.mulf %926, %939 : vector<4x128xf32>
    %cst_295 = arith.constant 9.950000e-01 : f32
    %941 = vector.broadcast %cst_295 : f32 to vector<4x128xf32>
    %942 = arith.mulf %941, %940 : vector<4x128xf32>
    %cst_296 = arith.constant 1.000000e-03 : f32
    %943 = vector.broadcast %cst_296 : f32 to vector<4x128xf32>
    %944 = arith.addf %943, %942 : vector<4x128xf32>
    %945 = arith.mulf %928, %939 : vector<4x128xf32>
    %cst_297 = arith.constant 9.950000e-01 : f32
    %946 = vector.broadcast %cst_297 : f32 to vector<4x128xf32>
    %947 = arith.mulf %946, %945 : vector<4x128xf32>
    %cst_298 = arith.constant 1.000000e-03 : f32
    %948 = vector.broadcast %cst_298 : f32 to vector<4x128xf32>
    %949 = arith.addf %948, %947 : vector<4x128xf32>
    %950 = arith.mulf %930, %939 : vector<4x128xf32>
    %cst_299 = arith.constant 9.950000e-01 : f32
    %951 = vector.broadcast %cst_299 : f32 to vector<4x128xf32>
    %952 = arith.mulf %951, %950 : vector<4x128xf32>
    %cst_300 = arith.constant 1.000000e-03 : f32
    %953 = vector.broadcast %cst_300 : f32 to vector<4x128xf32>
    %954 = arith.addf %953, %952 : vector<4x128xf32>
    %955 = arith.mulf %932, %939 : vector<4x128xf32>
    %cst_301 = arith.constant 9.950000e-01 : f32
    %956 = vector.broadcast %cst_301 : f32 to vector<4x128xf32>
    %957 = arith.mulf %956, %955 : vector<4x128xf32>
    %cst_302 = arith.constant 1.000000e-03 : f32
    %958 = vector.broadcast %cst_302 : f32 to vector<4x128xf32>
    %959 = arith.addf %958, %957 : vector<4x128xf32>
    %cst_303 = arith.constant -3.000000e+00 : f32
    %960 = vector.broadcast %cst_303 : f32 to vector<4x128xf32>
    %cst_304 = arith.constant 0.000000e+00 : f32
    %961 = vector.broadcast %cst_304 : f32 to vector<4x128xf32>
    %962 = arith.addf %961, %944 : vector<4x128xf32>
    %cst_305 = arith.constant 6.000000e+00 : f32
    %963 = vector.broadcast %cst_305 : f32 to vector<4x128xf32>
    %964 = arith.mulf %963, %962 : vector<4x128xf32>
    %cst_306 = arith.constant 3.000000e+00 : f32
    %965 = vector.broadcast %cst_306 : f32 to vector<4x128xf32>
    %966 = arith.subf %964, %965 : vector<4x128xf32>
    %967 = arith.addf %962, %949 : vector<4x128xf32>
    %cst_307 = arith.constant 6.000000e+00 : f32
    %968 = vector.broadcast %cst_307 : f32 to vector<4x128xf32>
    %969 = arith.mulf %968, %967 : vector<4x128xf32>
    %cst_308 = arith.constant 3.000000e+00 : f32
    %970 = vector.broadcast %cst_308 : f32 to vector<4x128xf32>
    %971 = arith.subf %969, %970 : vector<4x128xf32>
    %972 = arith.addf %967, %954 : vector<4x128xf32>
    %cst_309 = arith.constant 6.000000e+00 : f32
    %973 = vector.broadcast %cst_309 : f32 to vector<4x128xf32>
    %974 = arith.mulf %973, %972 : vector<4x128xf32>
    %cst_310 = arith.constant 3.000000e+00 : f32
    %975 = vector.broadcast %cst_310 : f32 to vector<4x128xf32>
    %976 = arith.subf %974, %975 : vector<4x128xf32>
    %977 = arith.addf %972, %959 : vector<4x128xf32>
    %cst_311 = arith.constant 6.000000e+00 : f32
    %978 = vector.broadcast %cst_311 : f32 to vector<4x128xf32>
    %979 = arith.mulf %978, %977 : vector<4x128xf32>
    %cst_312 = arith.constant 3.000000e+00 : f32
    %980 = vector.broadcast %cst_312 : f32 to vector<4x128xf32>
    %981 = arith.subf %979, %980 : vector<4x128xf32>
    %cst_313 = arith.constant 3.000000e+00 : f32
    %982 = vector.broadcast %cst_313 : f32 to vector<4x128xf32>
    %983 = arith.subf %966, %960 : vector<4x128xf32>
    %984 = arith.subf %971, %966 : vector<4x128xf32>
    %985 = arith.subf %976, %971 : vector<4x128xf32>
    %986 = arith.subf %981, %976 : vector<4x128xf32>
    %987 = arith.subf %982, %981 : vector<4x128xf32>
    %cst_314 = arith.constant 1.000000e+00 : f32
    %988 = vector.broadcast %cst_314 : f32 to vector<4x128xf32>
    %cst_315 = arith.constant 0.000000e+00 : f32
    %989 = vector.broadcast %cst_315 : f32 to vector<4x128xf32>
    %990 = arith.maximumf %850, %989 : vector<4x128xf32>
    %991 = math.absf %850 : vector<4x128xf32>
    %cst_316 = arith.constant 0.000000e+00 : f32
    %992 = vector.broadcast %cst_316 : f32 to vector<4x128xf32>
    %993 = arith.subf %992, %991 : vector<4x128xf32>
    %994 = math.exp %993 : vector<4x128xf32>
    %cst_317 = arith.constant 1.000000e+00 : f32
    %995 = vector.broadcast %cst_317 : f32 to vector<4x128xf32>
    %996 = arith.addf %995, %994 : vector<4x128xf32>
    %997 = math.log %996 : vector<4x128xf32>
    %998 = arith.addf %990, %997 : vector<4x128xf32>
    %cst_318 = arith.constant 1.000000e-03 : f32
    %999 = vector.broadcast %cst_318 : f32 to vector<4x128xf32>
    %1000 = arith.addf %999, %998 : vector<4x128xf32>
    %cst_319 = arith.constant 0.000000e+00 : f32
    %1001 = vector.broadcast %cst_319 : f32 to vector<4x128xf32>
    %1002 = arith.maximumf %851, %1001 : vector<4x128xf32>
    %1003 = math.absf %851 : vector<4x128xf32>
    %cst_320 = arith.constant 0.000000e+00 : f32
    %1004 = vector.broadcast %cst_320 : f32 to vector<4x128xf32>
    %1005 = arith.subf %1004, %1003 : vector<4x128xf32>
    %1006 = math.exp %1005 : vector<4x128xf32>
    %cst_321 = arith.constant 1.000000e+00 : f32
    %1007 = vector.broadcast %cst_321 : f32 to vector<4x128xf32>
    %1008 = arith.addf %1007, %1006 : vector<4x128xf32>
    %1009 = math.log %1008 : vector<4x128xf32>
    %1010 = arith.addf %1002, %1009 : vector<4x128xf32>
    %cst_322 = arith.constant 1.000000e-03 : f32
    %1011 = vector.broadcast %cst_322 : f32 to vector<4x128xf32>
    %1012 = arith.addf %1011, %1010 : vector<4x128xf32>
    %cst_323 = arith.constant 0.000000e+00 : f32
    %1013 = vector.broadcast %cst_323 : f32 to vector<4x128xf32>
    %1014 = arith.maximumf %852, %1013 : vector<4x128xf32>
    %1015 = math.absf %852 : vector<4x128xf32>
    %cst_324 = arith.constant 0.000000e+00 : f32
    %1016 = vector.broadcast %cst_324 : f32 to vector<4x128xf32>
    %1017 = arith.subf %1016, %1015 : vector<4x128xf32>
    %1018 = math.exp %1017 : vector<4x128xf32>
    %cst_325 = arith.constant 1.000000e+00 : f32
    %1019 = vector.broadcast %cst_325 : f32 to vector<4x128xf32>
    %1020 = arith.addf %1019, %1018 : vector<4x128xf32>
    %1021 = math.log %1020 : vector<4x128xf32>
    %1022 = arith.addf %1014, %1021 : vector<4x128xf32>
    %cst_326 = arith.constant 1.000000e-03 : f32
    %1023 = vector.broadcast %cst_326 : f32 to vector<4x128xf32>
    %1024 = arith.addf %1023, %1022 : vector<4x128xf32>
    %cst_327 = arith.constant 0.000000e+00 : f32
    %1025 = vector.broadcast %cst_327 : f32 to vector<4x128xf32>
    %1026 = arith.maximumf %853, %1025 : vector<4x128xf32>
    %1027 = math.absf %853 : vector<4x128xf32>
    %cst_328 = arith.constant 0.000000e+00 : f32
    %1028 = vector.broadcast %cst_328 : f32 to vector<4x128xf32>
    %1029 = arith.subf %1028, %1027 : vector<4x128xf32>
    %1030 = math.exp %1029 : vector<4x128xf32>
    %cst_329 = arith.constant 1.000000e+00 : f32
    %1031 = vector.broadcast %cst_329 : f32 to vector<4x128xf32>
    %1032 = arith.addf %1031, %1030 : vector<4x128xf32>
    %1033 = math.log %1032 : vector<4x128xf32>
    %1034 = arith.addf %1026, %1033 : vector<4x128xf32>
    %cst_330 = arith.constant 1.000000e-03 : f32
    %1035 = vector.broadcast %cst_330 : f32 to vector<4x128xf32>
    %1036 = arith.addf %1035, %1034 : vector<4x128xf32>
    %cst_331 = arith.constant 1.000000e+00 : f32
    %1037 = vector.broadcast %cst_331 : f32 to vector<4x128xf32>
    %cst_332 = arith.constant -3.000000e+00 : f32
    %1038 = vector.broadcast %cst_332 : f32 to vector<4x128xf32>
    %1039 = arith.cmpf oge, %787, %1038 : vector<4x128xf32>
    %cst_333 = arith.constant 3.000000e+00 : f32
    %1040 = vector.broadcast %cst_333 : f32 to vector<4x128xf32>
    %1041 = arith.cmpf ole, %787, %1040 : vector<4x128xf32>
    %1042 = arith.andi %1039, %1041 : vector<4x128xi1>
    %cst_334 = arith.constant -3.000000e+00 : f32
    %cst_335 = arith.constant 3.000000e+00 : f32
    %1043 = vector.broadcast %cst_334 : f32 to vector<4x128xf32>
    %1044 = arith.maximumf %1043, %787 : vector<4x128xf32>
    %1045 = vector.broadcast %cst_335 : f32 to vector<4x128xf32>
    %1046 = arith.minimumf %1045, %1044 : vector<4x128xf32>
    %cst_336 = arith.constant 1.000000e+00 : f32
    %1047 = vector.broadcast %cst_336 : f32 to vector<4x128xf32>
    %1048 = arith.cmpf oge, %1046, %899 : vector<4x128xf32>
    %1049 = arith.extui %1048 : vector<4x128xi1> to vector<4x128xi32>
    %1050 = arith.sitofp %1049 : vector<4x128xi32> to vector<4x128xf32>
    %1051 = arith.cmpf oge, %1046, %904 : vector<4x128xf32>
    %1052 = arith.extui %1051 : vector<4x128xi1> to vector<4x128xi32>
    %1053 = arith.sitofp %1052 : vector<4x128xi32> to vector<4x128xf32>
    %1054 = arith.cmpf oge, %1046, %909 : vector<4x128xf32>
    %1055 = arith.extui %1054 : vector<4x128xi1> to vector<4x128xi32>
    %1056 = arith.sitofp %1055 : vector<4x128xi32> to vector<4x128xf32>
    %1057 = arith.cmpf oge, %1046, %914 : vector<4x128xf32>
    %1058 = arith.extui %1057 : vector<4x128xi1> to vector<4x128xi32>
    %1059 = arith.sitofp %1058 : vector<4x128xi32> to vector<4x128xf32>
    %cst_337 = arith.constant 0.000000e+00 : f32
    %1060 = vector.broadcast %cst_337 : f32 to vector<4x128xf32>
    %cst_338 = arith.constant 0.000000e+00 : f32
    %1061 = vector.broadcast %cst_338 : f32 to vector<4x128xf32>
    %1062 = arith.subf %1047, %1050 : vector<4x128xf32>
    %1063 = arith.mulf %1062, %893 : vector<4x128xf32>
    %1064 = arith.addf %1061, %1063 : vector<4x128xf32>
    %1065 = arith.mulf %1062, %916 : vector<4x128xf32>
    %1066 = arith.addf %1061, %1065 : vector<4x128xf32>
    %1067 = arith.mulf %1062, %960 : vector<4x128xf32>
    %1068 = arith.addf %1061, %1067 : vector<4x128xf32>
    %1069 = arith.mulf %1062, %983 : vector<4x128xf32>
    %1070 = arith.addf %1061, %1069 : vector<4x128xf32>
    %1071 = arith.mulf %1062, %988 : vector<4x128xf32>
    %1072 = arith.addf %1061, %1071 : vector<4x128xf32>
    %1073 = arith.mulf %1062, %1000 : vector<4x128xf32>
    %1074 = arith.addf %1061, %1073 : vector<4x128xf32>
    %1075 = arith.subf %1050, %1053 : vector<4x128xf32>
    %1076 = arith.mulf %1075, %899 : vector<4x128xf32>
    %1077 = arith.addf %1064, %1076 : vector<4x128xf32>
    %1078 = arith.mulf %1075, %917 : vector<4x128xf32>
    %1079 = arith.addf %1066, %1078 : vector<4x128xf32>
    %1080 = arith.mulf %1075, %966 : vector<4x128xf32>
    %1081 = arith.addf %1068, %1080 : vector<4x128xf32>
    %1082 = arith.mulf %1075, %984 : vector<4x128xf32>
    %1083 = arith.addf %1070, %1082 : vector<4x128xf32>
    %1084 = arith.mulf %1075, %1000 : vector<4x128xf32>
    %1085 = arith.addf %1072, %1084 : vector<4x128xf32>
    %1086 = arith.mulf %1075, %1012 : vector<4x128xf32>
    %1087 = arith.addf %1074, %1086 : vector<4x128xf32>
    %1088 = arith.subf %1053, %1056 : vector<4x128xf32>
    %1089 = arith.mulf %1088, %904 : vector<4x128xf32>
    %1090 = arith.addf %1077, %1089 : vector<4x128xf32>
    %1091 = arith.mulf %1088, %918 : vector<4x128xf32>
    %1092 = arith.addf %1079, %1091 : vector<4x128xf32>
    %1093 = arith.mulf %1088, %971 : vector<4x128xf32>
    %1094 = arith.addf %1081, %1093 : vector<4x128xf32>
    %1095 = arith.mulf %1088, %985 : vector<4x128xf32>
    %1096 = arith.addf %1083, %1095 : vector<4x128xf32>
    %1097 = arith.mulf %1088, %1012 : vector<4x128xf32>
    %1098 = arith.addf %1085, %1097 : vector<4x128xf32>
    %1099 = arith.mulf %1088, %1024 : vector<4x128xf32>
    %1100 = arith.addf %1087, %1099 : vector<4x128xf32>
    %1101 = arith.subf %1056, %1059 : vector<4x128xf32>
    %1102 = arith.mulf %1101, %909 : vector<4x128xf32>
    %1103 = arith.addf %1090, %1102 : vector<4x128xf32>
    %1104 = arith.mulf %1101, %919 : vector<4x128xf32>
    %1105 = arith.addf %1092, %1104 : vector<4x128xf32>
    %1106 = arith.mulf %1101, %976 : vector<4x128xf32>
    %1107 = arith.addf %1094, %1106 : vector<4x128xf32>
    %1108 = arith.mulf %1101, %986 : vector<4x128xf32>
    %1109 = arith.addf %1096, %1108 : vector<4x128xf32>
    %1110 = arith.mulf %1101, %1024 : vector<4x128xf32>
    %1111 = arith.addf %1098, %1110 : vector<4x128xf32>
    %1112 = arith.mulf %1101, %1036 : vector<4x128xf32>
    %1113 = arith.addf %1100, %1112 : vector<4x128xf32>
    %1114 = arith.subf %1059, %1060 : vector<4x128xf32>
    %1115 = arith.mulf %1114, %914 : vector<4x128xf32>
    %1116 = arith.addf %1103, %1115 : vector<4x128xf32>
    %1117 = arith.mulf %1114, %920 : vector<4x128xf32>
    %1118 = arith.addf %1105, %1117 : vector<4x128xf32>
    %1119 = arith.mulf %1114, %981 : vector<4x128xf32>
    %1120 = arith.addf %1107, %1119 : vector<4x128xf32>
    %1121 = arith.mulf %1114, %987 : vector<4x128xf32>
    %1122 = arith.addf %1109, %1121 : vector<4x128xf32>
    %1123 = arith.mulf %1114, %1036 : vector<4x128xf32>
    %1124 = arith.addf %1111, %1123 : vector<4x128xf32>
    %1125 = arith.mulf %1114, %1037 : vector<4x128xf32>
    %1126 = arith.addf %1113, %1125 : vector<4x128xf32>
    %1127 = tpu.reciprocal %1118 : vector<4x128xf32> -> vector<4x128xf32>
    %1128 = arith.mulf %1122, %1127 : vector<4x128xf32>
    %1129 = arith.subf %1046, %1116 : vector<4x128xf32>
    %1130 = arith.mulf %1129, %1127 : vector<4x128xf32>
    %cst_339 = arith.constant 1.000000e+00 : f32
    %1131 = vector.broadcast %cst_339 : f32 to vector<4x128xf32>
    %1132 = arith.subf %1131, %1130 : vector<4x128xf32>
    %1133 = arith.mulf %1130, %1132 : vector<4x128xf32>
    %1134 = arith.mulf %1128, %1130 : vector<4x128xf32>
    %1135 = arith.mulf %1134, %1130 : vector<4x128xf32>
    %1136 = arith.mulf %1124, %1133 : vector<4x128xf32>
    %1137 = arith.addf %1135, %1136 : vector<4x128xf32>
    %1138 = arith.mulf %1122, %1137 : vector<4x128xf32>
    %1139 = arith.addf %1124, %1126 : vector<4x128xf32>
    %cst_340 = arith.constant 2.000000e+00 : f32
    %1140 = vector.broadcast %cst_340 : f32 to vector<4x128xf32>
    %1141 = arith.mulf %1140, %1128 : vector<4x128xf32>
    %1142 = arith.subf %1139, %1141 : vector<4x128xf32>
    %1143 = arith.mulf %1142, %1133 : vector<4x128xf32>
    %1144 = arith.addf %1128, %1143 : vector<4x128xf32>
    %1145 = tpu.reciprocal %1144 : vector<4x128xf32> -> vector<4x128xf32>
    %1146 = arith.mulf %1138, %1145 : vector<4x128xf32>
    %1147 = arith.addf %1120, %1146 : vector<4x128xf32>
    %1148 = arith.mulf %1128, %1128 : vector<4x128xf32>
    %1149 = arith.mulf %1126, %1130 : vector<4x128xf32>
    %1150 = arith.mulf %1149, %1130 : vector<4x128xf32>
    %cst_341 = arith.constant 2.000000e+00 : f32
    %1151 = vector.broadcast %cst_341 : f32 to vector<4x128xf32>
    %1152 = arith.mulf %1151, %1128 : vector<4x128xf32>
    %1153 = arith.mulf %1152, %1133 : vector<4x128xf32>
    %1154 = arith.addf %1150, %1153 : vector<4x128xf32>
    %1155 = arith.mulf %1124, %1132 : vector<4x128xf32>
    %1156 = arith.mulf %1155, %1132 : vector<4x128xf32>
    %1157 = arith.addf %1154, %1156 : vector<4x128xf32>
    %1158 = arith.mulf %1148, %1157 : vector<4x128xf32>
    %1159 = arith.mulf %1158, %1145 : vector<4x128xf32>
    %1160 = arith.mulf %1159, %1145 : vector<4x128xf32>
    %1161 = math.log %1160 : vector<4x128xf32>
    %1162 = arith.select %1042, %1147, %787 : vector<4x128xi1>, vector<4x128xf32>
    %cst_342 = arith.constant 0.000000e+00 : f32
    %1163 = vector.broadcast %cst_342 : f32 to vector<4x128xf32>
    %1164 = arith.select %1042, %1161, %1163 : vector<4x128xi1>, vector<4x128xf32>
    %1165 = arith.addf %773, %1164 : vector<4x128xf32>
    %c2_343 = arith.constant 2 : index
    %c0_344 = arith.constant 0 : index
    %c0_345 = arith.constant 0 : index
    %1166 = vector.load %arg10[%c2_343, %c0_344, %c0_345] : memref<4x4x4xf32, #tpu.memory_space<vmem>>, vector<1x4x4xf32>
    %1167 = vector.shape_cast %1166 : vector<1x4x4xf32> to vector<4x4xf32>
    %cst_346 = arith.constant dense<0.000000e+00> : vector<4x128xf32>
    %1168 = tpu.matmul %1167, %780, %cst_346 {dimension_numbers = #tpu.dot_dimension_numbers<[1], [0], [0], [1], [0, 0, 1, 1], [], []>} : vector<4x4xf32>, vector<4x128xf32>, vector<4x128xf32> -> vector<4x128xf32>
    %c2_347 = arith.constant 2 : index
    %c0_348 = arith.constant 0 : index
    %c0_349 = arith.constant 0 : index
    %1169 = vector.load %arg11[%c2_347, %c0_348, %c0_349] : memref<4x4x4xf32, #tpu.memory_space<vmem>>, vector<1x4x4xf32>
    %1170 = vector.shape_cast %1169 : vector<1x4x4xf32> to vector<4x4xf32>
    %cst_350 = arith.constant dense<0.000000e+00> : vector<4x128xf32>
    %1171 = tpu.matmul %1170, %1162, %cst_350 {dimension_numbers = #tpu.dot_dimension_numbers<[1], [0], [0], [1], [0, 0, 1, 1], [], []>} : vector<4x4xf32>, vector<4x128xf32>, vector<4x128xf32> -> vector<4x128xf32>
    %1172 = arith.addf %1168, %1171 : vector<4x128xf32>
    %c2_351 = arith.constant 2 : index
    %c0_352 = arith.constant 0 : index
    %c0_353 = arith.constant 0 : index
    %1173 = vector.load %arg12[%c2_351, %c0_352, %c0_353] : memref<4x4x4xf32, #tpu.memory_space<vmem>>, vector<1x4x4xf32>
    %1174 = vector.shape_cast %1173 : vector<1x4x4xf32> to vector<4x4xf32>
    %cst_354 = arith.constant dense<0.000000e+00> : vector<4x128xf32>
    %1175 = tpu.matmul %1174, %780, %cst_354 {dimension_numbers = #tpu.dot_dimension_numbers<[1], [0], [0], [1], [0, 0, 1, 1], [], []>} : vector<4x4xf32>, vector<4x128xf32>, vector<4x128xf32> -> vector<4x128xf32>
    %c2_355 = arith.constant 2 : index
    %c0_356 = arith.constant 0 : index
    %c0_357 = arith.constant 0 : index
    %1176 = vector.load %arg13[%c2_355, %c0_356, %c0_357] : memref<4x4x4xf32, #tpu.memory_space<vmem>>, vector<1x4x4xf32>
    %1177 = vector.shape_cast %1176 : vector<1x4x4xf32> to vector<4x4xf32>
    %cst_358 = arith.constant dense<0.000000e+00> : vector<4x128xf32>
    %1178 = tpu.matmul %1177, %1162, %cst_358 {dimension_numbers = #tpu.dot_dimension_numbers<[1], [0], [0], [1], [0, 0, 1, 1], [], []>} : vector<4x4xf32>, vector<4x128xf32>, vector<4x128xf32> -> vector<4x128xf32>
    %1179 = arith.addf %1175, %1178 : vector<4x128xf32>
    %c3 = arith.constant 3 : index
    %c0_359 = arith.constant 0 : index
    %c0_360 = arith.constant 0 : index
    %1180 = vector.load %arg2[%c3, %c0_359, %c0_360] : memref<5x8x4xf32, #tpu.memory_space<vmem>>, vector<1x8x4xf32>
    %1181 = vector.shape_cast %1180 : vector<1x8x4xf32> to vector<8x4xf32>
    %cst_361 = arith.constant dense<0.000000e+00> : vector<8x128xf32>
    %1182 = tpu.matmul %1181, %1172, %cst_361 {dimension_numbers = #tpu.dot_dimension_numbers<[1], [0], [0], [1], [0, 0, 1, 1], [], []>} : vector<8x4xf32>, vector<4x128xf32>, vector<8x128xf32> -> vector<8x128xf32>
    %c3_362 = arith.constant 3 : index
    %c0_363 = arith.constant 0 : index
    %c0_364 = arith.constant 0 : index
    %1183 = vector.load %arg3[%c3_362, %c0_363, %c0_364] : memref<5x8x1xf32, #tpu.memory_space<vmem>>, vector<1x8x1xf32>
    %1184 = vector.shape_cast %1183 : vector<1x8x1xf32> to vector<8x1xf32>
    %1185 = vector.broadcast %1184 : vector<8x1xf32> to vector<8x128xf32>
    %1186 = arith.addf %1182, %1185 : vector<8x128xf32>
    %cst_365 = arith.constant 0.000000e+00 : f32
    %1187 = vector.broadcast %cst_365 : f32 to vector<8x128xf32>
    %1188 = arith.cmpf ogt, %1186, %1187 : vector<8x128xf32>
    %cst_366 = arith.constant 0.000000e+00 : f32
    %1189 = vector.broadcast %cst_366 : f32 to vector<8x128xf32>
    %1190 = arith.minimumf %1186, %1189 : vector<8x128xf32>
    %1191 = math.exp %1190 : vector<8x128xf32>
    %cst_367 = arith.constant 1.000000e+00 : f32
    %1192 = vector.broadcast %cst_367 : f32 to vector<8x128xf32>
    %1193 = arith.subf %1191, %1192 : vector<8x128xf32>
    %1194 = arith.select %1188, %1186, %1193 : vector<8x128xi1>, vector<8x128xf32>
    %c3_368 = arith.constant 3 : index
    %c0_369 = arith.constant 0 : index
    %c0_370 = arith.constant 0 : index
    %1195 = vector.load %arg4[%c3_368, %c0_369, %c0_370] : memref<5x8x8xf32, #tpu.memory_space<vmem>>, vector<1x8x8xf32>
    %1196 = vector.shape_cast %1195 : vector<1x8x8xf32> to vector<8x8xf32>
    %cst_371 = arith.constant dense<0.000000e+00> : vector<8x128xf32>
    %1197 = tpu.matmul %1196, %1194, %cst_371 {dimension_numbers = #tpu.dot_dimension_numbers<[1], [0], [0], [1], [0, 0, 1, 1], [], []>} : vector<8x8xf32>, vector<8x128xf32>, vector<8x128xf32> -> vector<8x128xf32>
    %c3_372 = arith.constant 3 : index
    %c0_373 = arith.constant 0 : index
    %c0_374 = arith.constant 0 : index
    %1198 = vector.load %arg5[%c3_372, %c0_373, %c0_374] : memref<5x8x1xf32, #tpu.memory_space<vmem>>, vector<1x8x1xf32>
    %1199 = vector.shape_cast %1198 : vector<1x8x1xf32> to vector<8x1xf32>
    %1200 = vector.broadcast %1199 : vector<8x1xf32> to vector<8x128xf32>
    %1201 = arith.addf %1197, %1200 : vector<8x128xf32>
    %cst_375 = arith.constant 0.000000e+00 : f32
    %1202 = vector.broadcast %cst_375 : f32 to vector<8x128xf32>
    %1203 = arith.cmpf ogt, %1201, %1202 : vector<8x128xf32>
    %cst_376 = arith.constant 0.000000e+00 : f32
    %1204 = vector.broadcast %cst_376 : f32 to vector<8x128xf32>
    %1205 = arith.minimumf %1201, %1204 : vector<8x128xf32>
    %1206 = math.exp %1205 : vector<8x128xf32>
    %cst_377 = arith.constant 1.000000e+00 : f32
    %1207 = vector.broadcast %cst_377 : f32 to vector<8x128xf32>
    %1208 = arith.subf %1206, %1207 : vector<8x128xf32>
    %1209 = arith.select %1203, %1201, %1208 : vector<8x128xi1>, vector<8x128xf32>
    %c3_378 = arith.constant 3 : index
    %c0_379 = arith.constant 0 : index
    %c0_380 = arith.constant 0 : index
    %1210 = vector.load %arg6[%c3_378, %c0_379, %c0_380] : memref<5x8x8xf32, #tpu.memory_space<vmem>>, vector<1x8x8xf32>
    %1211 = vector.shape_cast %1210 : vector<1x8x8xf32> to vector<8x8xf32>
    %cst_381 = arith.constant dense<0.000000e+00> : vector<8x128xf32>
    %1212 = tpu.matmul %1211, %1209, %cst_381 {dimension_numbers = #tpu.dot_dimension_numbers<[1], [0], [0], [1], [0, 0, 1, 1], [], []>} : vector<8x8xf32>, vector<8x128xf32>, vector<8x128xf32> -> vector<8x128xf32>
    %c3_382 = arith.constant 3 : index
    %c0_383 = arith.constant 0 : index
    %c0_384 = arith.constant 0 : index
    %1213 = vector.load %arg7[%c3_382, %c0_383, %c0_384] : memref<5x8x1xf32, #tpu.memory_space<vmem>>, vector<1x8x1xf32>
    %1214 = vector.shape_cast %1213 : vector<1x8x1xf32> to vector<8x1xf32>
    %1215 = vector.broadcast %1214 : vector<8x1xf32> to vector<8x128xf32>
    %1216 = arith.addf %1212, %1215 : vector<8x128xf32>
    %cst_385 = arith.constant 0.000000e+00 : f32
    %1217 = vector.broadcast %cst_385 : f32 to vector<8x128xf32>
    %1218 = arith.cmpf ogt, %1216, %1217 : vector<8x128xf32>
    %cst_386 = arith.constant 0.000000e+00 : f32
    %1219 = vector.broadcast %cst_386 : f32 to vector<8x128xf32>
    %1220 = arith.minimumf %1216, %1219 : vector<8x128xf32>
    %1221 = math.exp %1220 : vector<8x128xf32>
    %cst_387 = arith.constant 1.000000e+00 : f32
    %1222 = vector.broadcast %cst_387 : f32 to vector<8x128xf32>
    %1223 = arith.subf %1221, %1222 : vector<8x128xf32>
    %1224 = arith.select %1218, %1216, %1223 : vector<8x128xi1>, vector<8x128xf32>
    %c3_388 = arith.constant 3 : index
    %c0_389 = arith.constant 0 : index
    %c0_390 = arith.constant 0 : index
    %1225 = vector.load %arg8[%c3_388, %c0_389, %c0_390] : memref<5x112x8xf32, #tpu.memory_space<vmem>>, vector<1x112x8xf32>
    %1226 = vector.shape_cast %1225 : vector<1x112x8xf32> to vector<112x8xf32>
    %cst_391 = arith.constant dense<0.000000e+00> : vector<112x128xf32>
    %1227 = tpu.matmul %1226, %1224, %cst_391 {dimension_numbers = #tpu.dot_dimension_numbers<[1], [0], [0], [1], [0, 0, 1, 1], [], []>} : vector<112x8xf32>, vector<8x128xf32>, vector<112x128xf32> -> vector<112x128xf32>
    %c3_392 = arith.constant 3 : index
    %c0_393 = arith.constant 0 : index
    %c0_394 = arith.constant 0 : index
    %1228 = vector.load %arg9[%c3_392, %c0_393, %c0_394] : memref<5x112x1xf32, #tpu.memory_space<vmem>>, vector<1x112x1xf32>
    %1229 = vector.shape_cast %1228 : vector<1x112x1xf32> to vector<112x1xf32>
    %1230 = vector.broadcast %1229 : vector<112x1xf32> to vector<112x128xf32>
    %1231 = arith.addf %1227, %1230 : vector<112x128xf32>
    %1232 = vector.extract_strided_slice %1231 {offsets = [0, 0], sizes = [4, 128], strides = [1, 1]} : vector<112x128xf32> to vector<4x128xf32>
    %1233 = vector.extract_strided_slice %1231 {offsets = [8, 0], sizes = [4, 128], strides = [1, 1]} : vector<112x128xf32> to vector<4x128xf32>
    %1234 = vector.extract_strided_slice %1231 {offsets = [16, 0], sizes = [4, 128], strides = [1, 1]} : vector<112x128xf32> to vector<4x128xf32>
    %1235 = vector.extract_strided_slice %1231 {offsets = [24, 0], sizes = [4, 128], strides = [1, 1]} : vector<112x128xf32> to vector<4x128xf32>
    %1236 = vector.extract_strided_slice %1231 {offsets = [32, 0], sizes = [4, 128], strides = [1, 1]} : vector<112x128xf32> to vector<4x128xf32>
    %1237 = vector.extract_strided_slice %1231 {offsets = [40, 0], sizes = [4, 128], strides = [1, 1]} : vector<112x128xf32> to vector<4x128xf32>
    %1238 = vector.extract_strided_slice %1231 {offsets = [48, 0], sizes = [4, 128], strides = [1, 1]} : vector<112x128xf32> to vector<4x128xf32>
    %1239 = vector.extract_strided_slice %1231 {offsets = [56, 0], sizes = [4, 128], strides = [1, 1]} : vector<112x128xf32> to vector<4x128xf32>
    %1240 = vector.extract_strided_slice %1231 {offsets = [64, 0], sizes = [4, 128], strides = [1, 1]} : vector<112x128xf32> to vector<4x128xf32>
    %1241 = vector.extract_strided_slice %1231 {offsets = [72, 0], sizes = [4, 128], strides = [1, 1]} : vector<112x128xf32> to vector<4x128xf32>
    %1242 = vector.extract_strided_slice %1231 {offsets = [80, 0], sizes = [4, 128], strides = [1, 1]} : vector<112x128xf32> to vector<4x128xf32>
    %1243 = vector.extract_strided_slice %1231 {offsets = [88, 0], sizes = [4, 128], strides = [1, 1]} : vector<112x128xf32> to vector<4x128xf32>
    %1244 = vector.extract_strided_slice %1231 {offsets = [96, 0], sizes = [4, 128], strides = [1, 1]} : vector<112x128xf32> to vector<4x128xf32>
    %1245 = vector.extract_strided_slice %1231 {offsets = [104, 0], sizes = [4, 128], strides = [1, 1]} : vector<112x128xf32> to vector<4x128xf32>
    %1246 = arith.maximumf %1232, %1233 : vector<4x128xf32>
    %1247 = arith.maximumf %1246, %1234 : vector<4x128xf32>
    %1248 = arith.maximumf %1247, %1235 : vector<4x128xf32>
    %1249 = arith.maximumf %1248, %1236 : vector<4x128xf32>
    %1250 = arith.subf %1232, %1249 : vector<4x128xf32>
    %1251 = math.exp %1250 : vector<4x128xf32>
    %1252 = arith.subf %1233, %1249 : vector<4x128xf32>
    %1253 = math.exp %1252 : vector<4x128xf32>
    %1254 = arith.subf %1234, %1249 : vector<4x128xf32>
    %1255 = math.exp %1254 : vector<4x128xf32>
    %1256 = arith.subf %1235, %1249 : vector<4x128xf32>
    %1257 = math.exp %1256 : vector<4x128xf32>
    %1258 = arith.subf %1236, %1249 : vector<4x128xf32>
    %1259 = math.exp %1258 : vector<4x128xf32>
    %1260 = arith.addf %1251, %1253 : vector<4x128xf32>
    %1261 = arith.addf %1260, %1255 : vector<4x128xf32>
    %1262 = arith.addf %1261, %1257 : vector<4x128xf32>
    %1263 = arith.addf %1262, %1259 : vector<4x128xf32>
    %1264 = tpu.reciprocal %1263 : vector<4x128xf32> -> vector<4x128xf32>
    %1265 = arith.mulf %1251, %1264 : vector<4x128xf32>
    %cst_395 = arith.constant 9.950000e-01 : f32
    %1266 = vector.broadcast %cst_395 : f32 to vector<4x128xf32>
    %1267 = arith.mulf %1266, %1265 : vector<4x128xf32>
    %cst_396 = arith.constant 1.000000e-03 : f32
    %1268 = vector.broadcast %cst_396 : f32 to vector<4x128xf32>
    %1269 = arith.addf %1268, %1267 : vector<4x128xf32>
    %1270 = arith.mulf %1253, %1264 : vector<4x128xf32>
    %cst_397 = arith.constant 9.950000e-01 : f32
    %1271 = vector.broadcast %cst_397 : f32 to vector<4x128xf32>
    %1272 = arith.mulf %1271, %1270 : vector<4x128xf32>
    %cst_398 = arith.constant 1.000000e-03 : f32
    %1273 = vector.broadcast %cst_398 : f32 to vector<4x128xf32>
    %1274 = arith.addf %1273, %1272 : vector<4x128xf32>
    %1275 = arith.mulf %1255, %1264 : vector<4x128xf32>
    %cst_399 = arith.constant 9.950000e-01 : f32
    %1276 = vector.broadcast %cst_399 : f32 to vector<4x128xf32>
    %1277 = arith.mulf %1276, %1275 : vector<4x128xf32>
    %cst_400 = arith.constant 1.000000e-03 : f32
    %1278 = vector.broadcast %cst_400 : f32 to vector<4x128xf32>
    %1279 = arith.addf %1278, %1277 : vector<4x128xf32>
    %1280 = arith.mulf %1257, %1264 : vector<4x128xf32>
    %cst_401 = arith.constant 9.950000e-01 : f32
    %1281 = vector.broadcast %cst_401 : f32 to vector<4x128xf32>
    %1282 = arith.mulf %1281, %1280 : vector<4x128xf32>
    %cst_402 = arith.constant 1.000000e-03 : f32
    %1283 = vector.broadcast %cst_402 : f32 to vector<4x128xf32>
    %1284 = arith.addf %1283, %1282 : vector<4x128xf32>
    %cst_403 = arith.constant -3.000000e+00 : f32
    %1285 = vector.broadcast %cst_403 : f32 to vector<4x128xf32>
    %cst_404 = arith.constant 0.000000e+00 : f32
    %1286 = vector.broadcast %cst_404 : f32 to vector<4x128xf32>
    %1287 = arith.addf %1286, %1269 : vector<4x128xf32>
    %cst_405 = arith.constant 6.000000e+00 : f32
    %1288 = vector.broadcast %cst_405 : f32 to vector<4x128xf32>
    %1289 = arith.mulf %1288, %1287 : vector<4x128xf32>
    %cst_406 = arith.constant 3.000000e+00 : f32
    %1290 = vector.broadcast %cst_406 : f32 to vector<4x128xf32>
    %1291 = arith.subf %1289, %1290 : vector<4x128xf32>
    %1292 = arith.addf %1287, %1274 : vector<4x128xf32>
    %cst_407 = arith.constant 6.000000e+00 : f32
    %1293 = vector.broadcast %cst_407 : f32 to vector<4x128xf32>
    %1294 = arith.mulf %1293, %1292 : vector<4x128xf32>
    %cst_408 = arith.constant 3.000000e+00 : f32
    %1295 = vector.broadcast %cst_408 : f32 to vector<4x128xf32>
    %1296 = arith.subf %1294, %1295 : vector<4x128xf32>
    %1297 = arith.addf %1292, %1279 : vector<4x128xf32>
    %cst_409 = arith.constant 6.000000e+00 : f32
    %1298 = vector.broadcast %cst_409 : f32 to vector<4x128xf32>
    %1299 = arith.mulf %1298, %1297 : vector<4x128xf32>
    %cst_410 = arith.constant 3.000000e+00 : f32
    %1300 = vector.broadcast %cst_410 : f32 to vector<4x128xf32>
    %1301 = arith.subf %1299, %1300 : vector<4x128xf32>
    %1302 = arith.addf %1297, %1284 : vector<4x128xf32>
    %cst_411 = arith.constant 6.000000e+00 : f32
    %1303 = vector.broadcast %cst_411 : f32 to vector<4x128xf32>
    %1304 = arith.mulf %1303, %1302 : vector<4x128xf32>
    %cst_412 = arith.constant 3.000000e+00 : f32
    %1305 = vector.broadcast %cst_412 : f32 to vector<4x128xf32>
    %1306 = arith.subf %1304, %1305 : vector<4x128xf32>
    %cst_413 = arith.constant 3.000000e+00 : f32
    %1307 = vector.broadcast %cst_413 : f32 to vector<4x128xf32>
    %1308 = arith.subf %1291, %1285 : vector<4x128xf32>
    %1309 = arith.subf %1296, %1291 : vector<4x128xf32>
    %1310 = arith.subf %1301, %1296 : vector<4x128xf32>
    %1311 = arith.subf %1306, %1301 : vector<4x128xf32>
    %1312 = arith.subf %1307, %1306 : vector<4x128xf32>
    %1313 = arith.maximumf %1237, %1238 : vector<4x128xf32>
    %1314 = arith.maximumf %1313, %1239 : vector<4x128xf32>
    %1315 = arith.maximumf %1314, %1240 : vector<4x128xf32>
    %1316 = arith.maximumf %1315, %1241 : vector<4x128xf32>
    %1317 = arith.subf %1237, %1316 : vector<4x128xf32>
    %1318 = math.exp %1317 : vector<4x128xf32>
    %1319 = arith.subf %1238, %1316 : vector<4x128xf32>
    %1320 = math.exp %1319 : vector<4x128xf32>
    %1321 = arith.subf %1239, %1316 : vector<4x128xf32>
    %1322 = math.exp %1321 : vector<4x128xf32>
    %1323 = arith.subf %1240, %1316 : vector<4x128xf32>
    %1324 = math.exp %1323 : vector<4x128xf32>
    %1325 = arith.subf %1241, %1316 : vector<4x128xf32>
    %1326 = math.exp %1325 : vector<4x128xf32>
    %1327 = arith.addf %1318, %1320 : vector<4x128xf32>
    %1328 = arith.addf %1327, %1322 : vector<4x128xf32>
    %1329 = arith.addf %1328, %1324 : vector<4x128xf32>
    %1330 = arith.addf %1329, %1326 : vector<4x128xf32>
    %1331 = tpu.reciprocal %1330 : vector<4x128xf32> -> vector<4x128xf32>
    %1332 = arith.mulf %1318, %1331 : vector<4x128xf32>
    %cst_414 = arith.constant 9.950000e-01 : f32
    %1333 = vector.broadcast %cst_414 : f32 to vector<4x128xf32>
    %1334 = arith.mulf %1333, %1332 : vector<4x128xf32>
    %cst_415 = arith.constant 1.000000e-03 : f32
    %1335 = vector.broadcast %cst_415 : f32 to vector<4x128xf32>
    %1336 = arith.addf %1335, %1334 : vector<4x128xf32>
    %1337 = arith.mulf %1320, %1331 : vector<4x128xf32>
    %cst_416 = arith.constant 9.950000e-01 : f32
    %1338 = vector.broadcast %cst_416 : f32 to vector<4x128xf32>
    %1339 = arith.mulf %1338, %1337 : vector<4x128xf32>
    %cst_417 = arith.constant 1.000000e-03 : f32
    %1340 = vector.broadcast %cst_417 : f32 to vector<4x128xf32>
    %1341 = arith.addf %1340, %1339 : vector<4x128xf32>
    %1342 = arith.mulf %1322, %1331 : vector<4x128xf32>
    %cst_418 = arith.constant 9.950000e-01 : f32
    %1343 = vector.broadcast %cst_418 : f32 to vector<4x128xf32>
    %1344 = arith.mulf %1343, %1342 : vector<4x128xf32>
    %cst_419 = arith.constant 1.000000e-03 : f32
    %1345 = vector.broadcast %cst_419 : f32 to vector<4x128xf32>
    %1346 = arith.addf %1345, %1344 : vector<4x128xf32>
    %1347 = arith.mulf %1324, %1331 : vector<4x128xf32>
    %cst_420 = arith.constant 9.950000e-01 : f32
    %1348 = vector.broadcast %cst_420 : f32 to vector<4x128xf32>
    %1349 = arith.mulf %1348, %1347 : vector<4x128xf32>
    %cst_421 = arith.constant 1.000000e-03 : f32
    %1350 = vector.broadcast %cst_421 : f32 to vector<4x128xf32>
    %1351 = arith.addf %1350, %1349 : vector<4x128xf32>
    %cst_422 = arith.constant -3.000000e+00 : f32
    %1352 = vector.broadcast %cst_422 : f32 to vector<4x128xf32>
    %cst_423 = arith.constant 0.000000e+00 : f32
    %1353 = vector.broadcast %cst_423 : f32 to vector<4x128xf32>
    %1354 = arith.addf %1353, %1336 : vector<4x128xf32>
    %cst_424 = arith.constant 6.000000e+00 : f32
    %1355 = vector.broadcast %cst_424 : f32 to vector<4x128xf32>
    %1356 = arith.mulf %1355, %1354 : vector<4x128xf32>
    %cst_425 = arith.constant 3.000000e+00 : f32
    %1357 = vector.broadcast %cst_425 : f32 to vector<4x128xf32>
    %1358 = arith.subf %1356, %1357 : vector<4x128xf32>
    %1359 = arith.addf %1354, %1341 : vector<4x128xf32>
    %cst_426 = arith.constant 6.000000e+00 : f32
    %1360 = vector.broadcast %cst_426 : f32 to vector<4x128xf32>
    %1361 = arith.mulf %1360, %1359 : vector<4x128xf32>
    %cst_427 = arith.constant 3.000000e+00 : f32
    %1362 = vector.broadcast %cst_427 : f32 to vector<4x128xf32>
    %1363 = arith.subf %1361, %1362 : vector<4x128xf32>
    %1364 = arith.addf %1359, %1346 : vector<4x128xf32>
    %cst_428 = arith.constant 6.000000e+00 : f32
    %1365 = vector.broadcast %cst_428 : f32 to vector<4x128xf32>
    %1366 = arith.mulf %1365, %1364 : vector<4x128xf32>
    %cst_429 = arith.constant 3.000000e+00 : f32
    %1367 = vector.broadcast %cst_429 : f32 to vector<4x128xf32>
    %1368 = arith.subf %1366, %1367 : vector<4x128xf32>
    %1369 = arith.addf %1364, %1351 : vector<4x128xf32>
    %cst_430 = arith.constant 6.000000e+00 : f32
    %1370 = vector.broadcast %cst_430 : f32 to vector<4x128xf32>
    %1371 = arith.mulf %1370, %1369 : vector<4x128xf32>
    %cst_431 = arith.constant 3.000000e+00 : f32
    %1372 = vector.broadcast %cst_431 : f32 to vector<4x128xf32>
    %1373 = arith.subf %1371, %1372 : vector<4x128xf32>
    %cst_432 = arith.constant 3.000000e+00 : f32
    %1374 = vector.broadcast %cst_432 : f32 to vector<4x128xf32>
    %1375 = arith.subf %1358, %1352 : vector<4x128xf32>
    %1376 = arith.subf %1363, %1358 : vector<4x128xf32>
    %1377 = arith.subf %1368, %1363 : vector<4x128xf32>
    %1378 = arith.subf %1373, %1368 : vector<4x128xf32>
    %1379 = arith.subf %1374, %1373 : vector<4x128xf32>
    %cst_433 = arith.constant 1.000000e+00 : f32
    %1380 = vector.broadcast %cst_433 : f32 to vector<4x128xf32>
    %cst_434 = arith.constant 0.000000e+00 : f32
    %1381 = vector.broadcast %cst_434 : f32 to vector<4x128xf32>
    %1382 = arith.maximumf %1242, %1381 : vector<4x128xf32>
    %1383 = math.absf %1242 : vector<4x128xf32>
    %cst_435 = arith.constant 0.000000e+00 : f32
    %1384 = vector.broadcast %cst_435 : f32 to vector<4x128xf32>
    %1385 = arith.subf %1384, %1383 : vector<4x128xf32>
    %1386 = math.exp %1385 : vector<4x128xf32>
    %cst_436 = arith.constant 1.000000e+00 : f32
    %1387 = vector.broadcast %cst_436 : f32 to vector<4x128xf32>
    %1388 = arith.addf %1387, %1386 : vector<4x128xf32>
    %1389 = math.log %1388 : vector<4x128xf32>
    %1390 = arith.addf %1382, %1389 : vector<4x128xf32>
    %cst_437 = arith.constant 1.000000e-03 : f32
    %1391 = vector.broadcast %cst_437 : f32 to vector<4x128xf32>
    %1392 = arith.addf %1391, %1390 : vector<4x128xf32>
    %cst_438 = arith.constant 0.000000e+00 : f32
    %1393 = vector.broadcast %cst_438 : f32 to vector<4x128xf32>
    %1394 = arith.maximumf %1243, %1393 : vector<4x128xf32>
    %1395 = math.absf %1243 : vector<4x128xf32>
    %cst_439 = arith.constant 0.000000e+00 : f32
    %1396 = vector.broadcast %cst_439 : f32 to vector<4x128xf32>
    %1397 = arith.subf %1396, %1395 : vector<4x128xf32>
    %1398 = math.exp %1397 : vector<4x128xf32>
    %cst_440 = arith.constant 1.000000e+00 : f32
    %1399 = vector.broadcast %cst_440 : f32 to vector<4x128xf32>
    %1400 = arith.addf %1399, %1398 : vector<4x128xf32>
    %1401 = math.log %1400 : vector<4x128xf32>
    %1402 = arith.addf %1394, %1401 : vector<4x128xf32>
    %cst_441 = arith.constant 1.000000e-03 : f32
    %1403 = vector.broadcast %cst_441 : f32 to vector<4x128xf32>
    %1404 = arith.addf %1403, %1402 : vector<4x128xf32>
    %cst_442 = arith.constant 0.000000e+00 : f32
    %1405 = vector.broadcast %cst_442 : f32 to vector<4x128xf32>
    %1406 = arith.maximumf %1244, %1405 : vector<4x128xf32>
    %1407 = math.absf %1244 : vector<4x128xf32>
    %cst_443 = arith.constant 0.000000e+00 : f32
    %1408 = vector.broadcast %cst_443 : f32 to vector<4x128xf32>
    %1409 = arith.subf %1408, %1407 : vector<4x128xf32>
    %1410 = math.exp %1409 : vector<4x128xf32>
    %cst_444 = arith.constant 1.000000e+00 : f32
    %1411 = vector.broadcast %cst_444 : f32 to vector<4x128xf32>
    %1412 = arith.addf %1411, %1410 : vector<4x128xf32>
    %1413 = math.log %1412 : vector<4x128xf32>
    %1414 = arith.addf %1406, %1413 : vector<4x128xf32>
    %cst_445 = arith.constant 1.000000e-03 : f32
    %1415 = vector.broadcast %cst_445 : f32 to vector<4x128xf32>
    %1416 = arith.addf %1415, %1414 : vector<4x128xf32>
    %cst_446 = arith.constant 0.000000e+00 : f32
    %1417 = vector.broadcast %cst_446 : f32 to vector<4x128xf32>
    %1418 = arith.maximumf %1245, %1417 : vector<4x128xf32>
    %1419 = math.absf %1245 : vector<4x128xf32>
    %cst_447 = arith.constant 0.000000e+00 : f32
    %1420 = vector.broadcast %cst_447 : f32 to vector<4x128xf32>
    %1421 = arith.subf %1420, %1419 : vector<4x128xf32>
    %1422 = math.exp %1421 : vector<4x128xf32>
    %cst_448 = arith.constant 1.000000e+00 : f32
    %1423 = vector.broadcast %cst_448 : f32 to vector<4x128xf32>
    %1424 = arith.addf %1423, %1422 : vector<4x128xf32>
    %1425 = math.log %1424 : vector<4x128xf32>
    %1426 = arith.addf %1418, %1425 : vector<4x128xf32>
    %cst_449 = arith.constant 1.000000e-03 : f32
    %1427 = vector.broadcast %cst_449 : f32 to vector<4x128xf32>
    %1428 = arith.addf %1427, %1426 : vector<4x128xf32>
    %cst_450 = arith.constant 1.000000e+00 : f32
    %1429 = vector.broadcast %cst_450 : f32 to vector<4x128xf32>
    %cst_451 = arith.constant -3.000000e+00 : f32
    %1430 = vector.broadcast %cst_451 : f32 to vector<4x128xf32>
    %1431 = arith.cmpf oge, %1179, %1430 : vector<4x128xf32>
    %cst_452 = arith.constant 3.000000e+00 : f32
    %1432 = vector.broadcast %cst_452 : f32 to vector<4x128xf32>
    %1433 = arith.cmpf ole, %1179, %1432 : vector<4x128xf32>
    %1434 = arith.andi %1431, %1433 : vector<4x128xi1>
    %cst_453 = arith.constant -3.000000e+00 : f32
    %cst_454 = arith.constant 3.000000e+00 : f32
    %1435 = vector.broadcast %cst_453 : f32 to vector<4x128xf32>
    %1436 = arith.maximumf %1435, %1179 : vector<4x128xf32>
    %1437 = vector.broadcast %cst_454 : f32 to vector<4x128xf32>
    %1438 = arith.minimumf %1437, %1436 : vector<4x128xf32>
    %cst_455 = arith.constant 1.000000e+00 : f32
    %1439 = vector.broadcast %cst_455 : f32 to vector<4x128xf32>
    %1440 = arith.cmpf oge, %1438, %1291 : vector<4x128xf32>
    %1441 = arith.extui %1440 : vector<4x128xi1> to vector<4x128xi32>
    %1442 = arith.sitofp %1441 : vector<4x128xi32> to vector<4x128xf32>
    %1443 = arith.cmpf oge, %1438, %1296 : vector<4x128xf32>
    %1444 = arith.extui %1443 : vector<4x128xi1> to vector<4x128xi32>
    %1445 = arith.sitofp %1444 : vector<4x128xi32> to vector<4x128xf32>
    %1446 = arith.cmpf oge, %1438, %1301 : vector<4x128xf32>
    %1447 = arith.extui %1446 : vector<4x128xi1> to vector<4x128xi32>
    %1448 = arith.sitofp %1447 : vector<4x128xi32> to vector<4x128xf32>
    %1449 = arith.cmpf oge, %1438, %1306 : vector<4x128xf32>
    %1450 = arith.extui %1449 : vector<4x128xi1> to vector<4x128xi32>
    %1451 = arith.sitofp %1450 : vector<4x128xi32> to vector<4x128xf32>
    %cst_456 = arith.constant 0.000000e+00 : f32
    %1452 = vector.broadcast %cst_456 : f32 to vector<4x128xf32>
    %cst_457 = arith.constant 0.000000e+00 : f32
    %1453 = vector.broadcast %cst_457 : f32 to vector<4x128xf32>
    %1454 = arith.subf %1439, %1442 : vector<4x128xf32>
    %1455 = arith.mulf %1454, %1285 : vector<4x128xf32>
    %1456 = arith.addf %1453, %1455 : vector<4x128xf32>
    %1457 = arith.mulf %1454, %1308 : vector<4x128xf32>
    %1458 = arith.addf %1453, %1457 : vector<4x128xf32>
    %1459 = arith.mulf %1454, %1352 : vector<4x128xf32>
    %1460 = arith.addf %1453, %1459 : vector<4x128xf32>
    %1461 = arith.mulf %1454, %1375 : vector<4x128xf32>
    %1462 = arith.addf %1453, %1461 : vector<4x128xf32>
    %1463 = arith.mulf %1454, %1380 : vector<4x128xf32>
    %1464 = arith.addf %1453, %1463 : vector<4x128xf32>
    %1465 = arith.mulf %1454, %1392 : vector<4x128xf32>
    %1466 = arith.addf %1453, %1465 : vector<4x128xf32>
    %1467 = arith.subf %1442, %1445 : vector<4x128xf32>
    %1468 = arith.mulf %1467, %1291 : vector<4x128xf32>
    %1469 = arith.addf %1456, %1468 : vector<4x128xf32>
    %1470 = arith.mulf %1467, %1309 : vector<4x128xf32>
    %1471 = arith.addf %1458, %1470 : vector<4x128xf32>
    %1472 = arith.mulf %1467, %1358 : vector<4x128xf32>
    %1473 = arith.addf %1460, %1472 : vector<4x128xf32>
    %1474 = arith.mulf %1467, %1376 : vector<4x128xf32>
    %1475 = arith.addf %1462, %1474 : vector<4x128xf32>
    %1476 = arith.mulf %1467, %1392 : vector<4x128xf32>
    %1477 = arith.addf %1464, %1476 : vector<4x128xf32>
    %1478 = arith.mulf %1467, %1404 : vector<4x128xf32>
    %1479 = arith.addf %1466, %1478 : vector<4x128xf32>
    %1480 = arith.subf %1445, %1448 : vector<4x128xf32>
    %1481 = arith.mulf %1480, %1296 : vector<4x128xf32>
    %1482 = arith.addf %1469, %1481 : vector<4x128xf32>
    %1483 = arith.mulf %1480, %1310 : vector<4x128xf32>
    %1484 = arith.addf %1471, %1483 : vector<4x128xf32>
    %1485 = arith.mulf %1480, %1363 : vector<4x128xf32>
    %1486 = arith.addf %1473, %1485 : vector<4x128xf32>
    %1487 = arith.mulf %1480, %1377 : vector<4x128xf32>
    %1488 = arith.addf %1475, %1487 : vector<4x128xf32>
    %1489 = arith.mulf %1480, %1404 : vector<4x128xf32>
    %1490 = arith.addf %1477, %1489 : vector<4x128xf32>
    %1491 = arith.mulf %1480, %1416 : vector<4x128xf32>
    %1492 = arith.addf %1479, %1491 : vector<4x128xf32>
    %1493 = arith.subf %1448, %1451 : vector<4x128xf32>
    %1494 = arith.mulf %1493, %1301 : vector<4x128xf32>
    %1495 = arith.addf %1482, %1494 : vector<4x128xf32>
    %1496 = arith.mulf %1493, %1311 : vector<4x128xf32>
    %1497 = arith.addf %1484, %1496 : vector<4x128xf32>
    %1498 = arith.mulf %1493, %1368 : vector<4x128xf32>
    %1499 = arith.addf %1486, %1498 : vector<4x128xf32>
    %1500 = arith.mulf %1493, %1378 : vector<4x128xf32>
    %1501 = arith.addf %1488, %1500 : vector<4x128xf32>
    %1502 = arith.mulf %1493, %1416 : vector<4x128xf32>
    %1503 = arith.addf %1490, %1502 : vector<4x128xf32>
    %1504 = arith.mulf %1493, %1428 : vector<4x128xf32>
    %1505 = arith.addf %1492, %1504 : vector<4x128xf32>
    %1506 = arith.subf %1451, %1452 : vector<4x128xf32>
    %1507 = arith.mulf %1506, %1306 : vector<4x128xf32>
    %1508 = arith.addf %1495, %1507 : vector<4x128xf32>
    %1509 = arith.mulf %1506, %1312 : vector<4x128xf32>
    %1510 = arith.addf %1497, %1509 : vector<4x128xf32>
    %1511 = arith.mulf %1506, %1373 : vector<4x128xf32>
    %1512 = arith.addf %1499, %1511 : vector<4x128xf32>
    %1513 = arith.mulf %1506, %1379 : vector<4x128xf32>
    %1514 = arith.addf %1501, %1513 : vector<4x128xf32>
    %1515 = arith.mulf %1506, %1428 : vector<4x128xf32>
    %1516 = arith.addf %1503, %1515 : vector<4x128xf32>
    %1517 = arith.mulf %1506, %1429 : vector<4x128xf32>
    %1518 = arith.addf %1505, %1517 : vector<4x128xf32>
    %1519 = tpu.reciprocal %1510 : vector<4x128xf32> -> vector<4x128xf32>
    %1520 = arith.mulf %1514, %1519 : vector<4x128xf32>
    %1521 = arith.subf %1438, %1508 : vector<4x128xf32>
    %1522 = arith.mulf %1521, %1519 : vector<4x128xf32>
    %cst_458 = arith.constant 1.000000e+00 : f32
    %1523 = vector.broadcast %cst_458 : f32 to vector<4x128xf32>
    %1524 = arith.subf %1523, %1522 : vector<4x128xf32>
    %1525 = arith.mulf %1522, %1524 : vector<4x128xf32>
    %1526 = arith.mulf %1520, %1522 : vector<4x128xf32>
    %1527 = arith.mulf %1526, %1522 : vector<4x128xf32>
    %1528 = arith.mulf %1516, %1525 : vector<4x128xf32>
    %1529 = arith.addf %1527, %1528 : vector<4x128xf32>
    %1530 = arith.mulf %1514, %1529 : vector<4x128xf32>
    %1531 = arith.addf %1516, %1518 : vector<4x128xf32>
    %cst_459 = arith.constant 2.000000e+00 : f32
    %1532 = vector.broadcast %cst_459 : f32 to vector<4x128xf32>
    %1533 = arith.mulf %1532, %1520 : vector<4x128xf32>
    %1534 = arith.subf %1531, %1533 : vector<4x128xf32>
    %1535 = arith.mulf %1534, %1525 : vector<4x128xf32>
    %1536 = arith.addf %1520, %1535 : vector<4x128xf32>
    %1537 = tpu.reciprocal %1536 : vector<4x128xf32> -> vector<4x128xf32>
    %1538 = arith.mulf %1530, %1537 : vector<4x128xf32>
    %1539 = arith.addf %1512, %1538 : vector<4x128xf32>
    %1540 = arith.mulf %1520, %1520 : vector<4x128xf32>
    %1541 = arith.mulf %1518, %1522 : vector<4x128xf32>
    %1542 = arith.mulf %1541, %1522 : vector<4x128xf32>
    %cst_460 = arith.constant 2.000000e+00 : f32
    %1543 = vector.broadcast %cst_460 : f32 to vector<4x128xf32>
    %1544 = arith.mulf %1543, %1520 : vector<4x128xf32>
    %1545 = arith.mulf %1544, %1525 : vector<4x128xf32>
    %1546 = arith.addf %1542, %1545 : vector<4x128xf32>
    %1547 = arith.mulf %1516, %1524 : vector<4x128xf32>
    %1548 = arith.mulf %1547, %1524 : vector<4x128xf32>
    %1549 = arith.addf %1546, %1548 : vector<4x128xf32>
    %1550 = arith.mulf %1540, %1549 : vector<4x128xf32>
    %1551 = arith.mulf %1550, %1537 : vector<4x128xf32>
    %1552 = arith.mulf %1551, %1537 : vector<4x128xf32>
    %1553 = math.log %1552 : vector<4x128xf32>
    %1554 = arith.select %1434, %1539, %1179 : vector<4x128xi1>, vector<4x128xf32>
    %cst_461 = arith.constant 0.000000e+00 : f32
    %1555 = vector.broadcast %cst_461 : f32 to vector<4x128xf32>
    %1556 = arith.select %1434, %1553, %1555 : vector<4x128xi1>, vector<4x128xf32>
    %1557 = arith.addf %1165, %1556 : vector<4x128xf32>
    %c3_462 = arith.constant 3 : index
    %c0_463 = arith.constant 0 : index
    %c0_464 = arith.constant 0 : index
    %1558 = vector.load %arg10[%c3_462, %c0_463, %c0_464] : memref<4x4x4xf32, #tpu.memory_space<vmem>>, vector<1x4x4xf32>
    %1559 = vector.shape_cast %1558 : vector<1x4x4xf32> to vector<4x4xf32>
    %cst_465 = arith.constant dense<0.000000e+00> : vector<4x128xf32>
    %1560 = tpu.matmul %1559, %1172, %cst_465 {dimension_numbers = #tpu.dot_dimension_numbers<[1], [0], [0], [1], [0, 0, 1, 1], [], []>} : vector<4x4xf32>, vector<4x128xf32>, vector<4x128xf32> -> vector<4x128xf32>
    %c3_466 = arith.constant 3 : index
    %c0_467 = arith.constant 0 : index
    %c0_468 = arith.constant 0 : index
    %1561 = vector.load %arg11[%c3_466, %c0_467, %c0_468] : memref<4x4x4xf32, #tpu.memory_space<vmem>>, vector<1x4x4xf32>
    %1562 = vector.shape_cast %1561 : vector<1x4x4xf32> to vector<4x4xf32>
    %cst_469 = arith.constant dense<0.000000e+00> : vector<4x128xf32>
    %1563 = tpu.matmul %1562, %1554, %cst_469 {dimension_numbers = #tpu.dot_dimension_numbers<[1], [0], [0], [1], [0, 0, 1, 1], [], []>} : vector<4x4xf32>, vector<4x128xf32>, vector<4x128xf32> -> vector<4x128xf32>
    %1564 = arith.addf %1560, %1563 : vector<4x128xf32>
    %c3_470 = arith.constant 3 : index
    %c0_471 = arith.constant 0 : index
    %c0_472 = arith.constant 0 : index
    %1565 = vector.load %arg12[%c3_470, %c0_471, %c0_472] : memref<4x4x4xf32, #tpu.memory_space<vmem>>, vector<1x4x4xf32>
    %1566 = vector.shape_cast %1565 : vector<1x4x4xf32> to vector<4x4xf32>
    %cst_473 = arith.constant dense<0.000000e+00> : vector<4x128xf32>
    %1567 = tpu.matmul %1566, %1172, %cst_473 {dimension_numbers = #tpu.dot_dimension_numbers<[1], [0], [0], [1], [0, 0, 1, 1], [], []>} : vector<4x4xf32>, vector<4x128xf32>, vector<4x128xf32> -> vector<4x128xf32>
    %c3_474 = arith.constant 3 : index
    %c0_475 = arith.constant 0 : index
    %c0_476 = arith.constant 0 : index
    %1568 = vector.load %arg13[%c3_474, %c0_475, %c0_476] : memref<4x4x4xf32, #tpu.memory_space<vmem>>, vector<1x4x4xf32>
    %1569 = vector.shape_cast %1568 : vector<1x4x4xf32> to vector<4x4xf32>
    %cst_477 = arith.constant dense<0.000000e+00> : vector<4x128xf32>
    %1570 = tpu.matmul %1569, %1554, %cst_477 {dimension_numbers = #tpu.dot_dimension_numbers<[1], [0], [0], [1], [0, 0, 1, 1], [], []>} : vector<4x4xf32>, vector<4x128xf32>, vector<4x128xf32> -> vector<4x128xf32>
    %1571 = arith.addf %1567, %1570 : vector<4x128xf32>
    %c4 = arith.constant 4 : index
    %c0_478 = arith.constant 0 : index
    %c0_479 = arith.constant 0 : index
    %1572 = vector.load %arg2[%c4, %c0_478, %c0_479] : memref<5x8x4xf32, #tpu.memory_space<vmem>>, vector<1x8x4xf32>
    %1573 = vector.shape_cast %1572 : vector<1x8x4xf32> to vector<8x4xf32>
    %cst_480 = arith.constant dense<0.000000e+00> : vector<8x128xf32>
    %1574 = tpu.matmul %1573, %1564, %cst_480 {dimension_numbers = #tpu.dot_dimension_numbers<[1], [0], [0], [1], [0, 0, 1, 1], [], []>} : vector<8x4xf32>, vector<4x128xf32>, vector<8x128xf32> -> vector<8x128xf32>
    %c4_481 = arith.constant 4 : index
    %c0_482 = arith.constant 0 : index
    %c0_483 = arith.constant 0 : index
    %1575 = vector.load %arg3[%c4_481, %c0_482, %c0_483] : memref<5x8x1xf32, #tpu.memory_space<vmem>>, vector<1x8x1xf32>
    %1576 = vector.shape_cast %1575 : vector<1x8x1xf32> to vector<8x1xf32>
    %1577 = vector.broadcast %1576 : vector<8x1xf32> to vector<8x128xf32>
    %1578 = arith.addf %1574, %1577 : vector<8x128xf32>
    %cst_484 = arith.constant 0.000000e+00 : f32
    %1579 = vector.broadcast %cst_484 : f32 to vector<8x128xf32>
    %1580 = arith.cmpf ogt, %1578, %1579 : vector<8x128xf32>
    %cst_485 = arith.constant 0.000000e+00 : f32
    %1581 = vector.broadcast %cst_485 : f32 to vector<8x128xf32>
    %1582 = arith.minimumf %1578, %1581 : vector<8x128xf32>
    %1583 = math.exp %1582 : vector<8x128xf32>
    %cst_486 = arith.constant 1.000000e+00 : f32
    %1584 = vector.broadcast %cst_486 : f32 to vector<8x128xf32>
    %1585 = arith.subf %1583, %1584 : vector<8x128xf32>
    %1586 = arith.select %1580, %1578, %1585 : vector<8x128xi1>, vector<8x128xf32>
    %c4_487 = arith.constant 4 : index
    %c0_488 = arith.constant 0 : index
    %c0_489 = arith.constant 0 : index
    %1587 = vector.load %arg4[%c4_487, %c0_488, %c0_489] : memref<5x8x8xf32, #tpu.memory_space<vmem>>, vector<1x8x8xf32>
    %1588 = vector.shape_cast %1587 : vector<1x8x8xf32> to vector<8x8xf32>
    %cst_490 = arith.constant dense<0.000000e+00> : vector<8x128xf32>
    %1589 = tpu.matmul %1588, %1586, %cst_490 {dimension_numbers = #tpu.dot_dimension_numbers<[1], [0], [0], [1], [0, 0, 1, 1], [], []>} : vector<8x8xf32>, vector<8x128xf32>, vector<8x128xf32> -> vector<8x128xf32>
    %c4_491 = arith.constant 4 : index
    %c0_492 = arith.constant 0 : index
    %c0_493 = arith.constant 0 : index
    %1590 = vector.load %arg5[%c4_491, %c0_492, %c0_493] : memref<5x8x1xf32, #tpu.memory_space<vmem>>, vector<1x8x1xf32>
    %1591 = vector.shape_cast %1590 : vector<1x8x1xf32> to vector<8x1xf32>
    %1592 = vector.broadcast %1591 : vector<8x1xf32> to vector<8x128xf32>
    %1593 = arith.addf %1589, %1592 : vector<8x128xf32>
    %cst_494 = arith.constant 0.000000e+00 : f32
    %1594 = vector.broadcast %cst_494 : f32 to vector<8x128xf32>
    %1595 = arith.cmpf ogt, %1593, %1594 : vector<8x128xf32>
    %cst_495 = arith.constant 0.000000e+00 : f32
    %1596 = vector.broadcast %cst_495 : f32 to vector<8x128xf32>
    %1597 = arith.minimumf %1593, %1596 : vector<8x128xf32>
    %1598 = math.exp %1597 : vector<8x128xf32>
    %cst_496 = arith.constant 1.000000e+00 : f32
    %1599 = vector.broadcast %cst_496 : f32 to vector<8x128xf32>
    %1600 = arith.subf %1598, %1599 : vector<8x128xf32>
    %1601 = arith.select %1595, %1593, %1600 : vector<8x128xi1>, vector<8x128xf32>
    %c4_497 = arith.constant 4 : index
    %c0_498 = arith.constant 0 : index
    %c0_499 = arith.constant 0 : index
    %1602 = vector.load %arg6[%c4_497, %c0_498, %c0_499] : memref<5x8x8xf32, #tpu.memory_space<vmem>>, vector<1x8x8xf32>
    %1603 = vector.shape_cast %1602 : vector<1x8x8xf32> to vector<8x8xf32>
    %cst_500 = arith.constant dense<0.000000e+00> : vector<8x128xf32>
    %1604 = tpu.matmul %1603, %1601, %cst_500 {dimension_numbers = #tpu.dot_dimension_numbers<[1], [0], [0], [1], [0, 0, 1, 1], [], []>} : vector<8x8xf32>, vector<8x128xf32>, vector<8x128xf32> -> vector<8x128xf32>
    %c4_501 = arith.constant 4 : index
    %c0_502 = arith.constant 0 : index
    %c0_503 = arith.constant 0 : index
    %1605 = vector.load %arg7[%c4_501, %c0_502, %c0_503] : memref<5x8x1xf32, #tpu.memory_space<vmem>>, vector<1x8x1xf32>
    %1606 = vector.shape_cast %1605 : vector<1x8x1xf32> to vector<8x1xf32>
    %1607 = vector.broadcast %1606 : vector<8x1xf32> to vector<8x128xf32>
    %1608 = arith.addf %1604, %1607 : vector<8x128xf32>
    %cst_504 = arith.constant 0.000000e+00 : f32
    %1609 = vector.broadcast %cst_504 : f32 to vector<8x128xf32>
    %1610 = arith.cmpf ogt, %1608, %1609 : vector<8x128xf32>
    %cst_505 = arith.constant 0.000000e+00 : f32
    %1611 = vector.broadcast %cst_505 : f32 to vector<8x128xf32>
    %1612 = arith.minimumf %1608, %1611 : vector<8x128xf32>
    %1613 = math.exp %1612 : vector<8x128xf32>
    %cst_506 = arith.constant 1.000000e+00 : f32
    %1614 = vector.broadcast %cst_506 : f32 to vector<8x128xf32>
    %1615 = arith.subf %1613, %1614 : vector<8x128xf32>
    %1616 = arith.select %1610, %1608, %1615 : vector<8x128xi1>, vector<8x128xf32>
    %c4_507 = arith.constant 4 : index
    %c0_508 = arith.constant 0 : index
    %c0_509 = arith.constant 0 : index
    %1617 = vector.load %arg8[%c4_507, %c0_508, %c0_509] : memref<5x112x8xf32, #tpu.memory_space<vmem>>, vector<1x112x8xf32>
    %1618 = vector.shape_cast %1617 : vector<1x112x8xf32> to vector<112x8xf32>
    %cst_510 = arith.constant dense<0.000000e+00> : vector<112x128xf32>
    %1619 = tpu.matmul %1618, %1616, %cst_510 {dimension_numbers = #tpu.dot_dimension_numbers<[1], [0], [0], [1], [0, 0, 1, 1], [], []>} : vector<112x8xf32>, vector<8x128xf32>, vector<112x128xf32> -> vector<112x128xf32>
    %c4_511 = arith.constant 4 : index
    %c0_512 = arith.constant 0 : index
    %c0_513 = arith.constant 0 : index
    %1620 = vector.load %arg9[%c4_511, %c0_512, %c0_513] : memref<5x112x1xf32, #tpu.memory_space<vmem>>, vector<1x112x1xf32>
    %1621 = vector.shape_cast %1620 : vector<1x112x1xf32> to vector<112x1xf32>
    %1622 = vector.broadcast %1621 : vector<112x1xf32> to vector<112x128xf32>
    %1623 = arith.addf %1619, %1622 : vector<112x128xf32>
    %1624 = vector.extract_strided_slice %1623 {offsets = [0, 0], sizes = [4, 128], strides = [1, 1]} : vector<112x128xf32> to vector<4x128xf32>
    %1625 = vector.extract_strided_slice %1623 {offsets = [8, 0], sizes = [4, 128], strides = [1, 1]} : vector<112x128xf32> to vector<4x128xf32>
    %1626 = vector.extract_strided_slice %1623 {offsets = [16, 0], sizes = [4, 128], strides = [1, 1]} : vector<112x128xf32> to vector<4x128xf32>
    %1627 = vector.extract_strided_slice %1623 {offsets = [24, 0], sizes = [4, 128], strides = [1, 1]} : vector<112x128xf32> to vector<4x128xf32>
    %1628 = vector.extract_strided_slice %1623 {offsets = [32, 0], sizes = [4, 128], strides = [1, 1]} : vector<112x128xf32> to vector<4x128xf32>
    %1629 = vector.extract_strided_slice %1623 {offsets = [40, 0], sizes = [4, 128], strides = [1, 1]} : vector<112x128xf32> to vector<4x128xf32>
    %1630 = vector.extract_strided_slice %1623 {offsets = [48, 0], sizes = [4, 128], strides = [1, 1]} : vector<112x128xf32> to vector<4x128xf32>
    %1631 = vector.extract_strided_slice %1623 {offsets = [56, 0], sizes = [4, 128], strides = [1, 1]} : vector<112x128xf32> to vector<4x128xf32>
    %1632 = vector.extract_strided_slice %1623 {offsets = [64, 0], sizes = [4, 128], strides = [1, 1]} : vector<112x128xf32> to vector<4x128xf32>
    %1633 = vector.extract_strided_slice %1623 {offsets = [72, 0], sizes = [4, 128], strides = [1, 1]} : vector<112x128xf32> to vector<4x128xf32>
    %1634 = vector.extract_strided_slice %1623 {offsets = [80, 0], sizes = [4, 128], strides = [1, 1]} : vector<112x128xf32> to vector<4x128xf32>
    %1635 = vector.extract_strided_slice %1623 {offsets = [88, 0], sizes = [4, 128], strides = [1, 1]} : vector<112x128xf32> to vector<4x128xf32>
    %1636 = vector.extract_strided_slice %1623 {offsets = [96, 0], sizes = [4, 128], strides = [1, 1]} : vector<112x128xf32> to vector<4x128xf32>
    %1637 = vector.extract_strided_slice %1623 {offsets = [104, 0], sizes = [4, 128], strides = [1, 1]} : vector<112x128xf32> to vector<4x128xf32>
    %1638 = arith.maximumf %1624, %1625 : vector<4x128xf32>
    %1639 = arith.maximumf %1638, %1626 : vector<4x128xf32>
    %1640 = arith.maximumf %1639, %1627 : vector<4x128xf32>
    %1641 = arith.maximumf %1640, %1628 : vector<4x128xf32>
    %1642 = arith.subf %1624, %1641 : vector<4x128xf32>
    %1643 = math.exp %1642 : vector<4x128xf32>
    %1644 = arith.subf %1625, %1641 : vector<4x128xf32>
    %1645 = math.exp %1644 : vector<4x128xf32>
    %1646 = arith.subf %1626, %1641 : vector<4x128xf32>
    %1647 = math.exp %1646 : vector<4x128xf32>
    %1648 = arith.subf %1627, %1641 : vector<4x128xf32>
    %1649 = math.exp %1648 : vector<4x128xf32>
    %1650 = arith.subf %1628, %1641 : vector<4x128xf32>
    %1651 = math.exp %1650 : vector<4x128xf32>
    %1652 = arith.addf %1643, %1645 : vector<4x128xf32>
    %1653 = arith.addf %1652, %1647 : vector<4x128xf32>
    %1654 = arith.addf %1653, %1649 : vector<4x128xf32>
    %1655 = arith.addf %1654, %1651 : vector<4x128xf32>
    %1656 = tpu.reciprocal %1655 : vector<4x128xf32> -> vector<4x128xf32>
    %1657 = arith.mulf %1643, %1656 : vector<4x128xf32>
    %cst_514 = arith.constant 9.950000e-01 : f32
    %1658 = vector.broadcast %cst_514 : f32 to vector<4x128xf32>
    %1659 = arith.mulf %1658, %1657 : vector<4x128xf32>
    %cst_515 = arith.constant 1.000000e-03 : f32
    %1660 = vector.broadcast %cst_515 : f32 to vector<4x128xf32>
    %1661 = arith.addf %1660, %1659 : vector<4x128xf32>
    %1662 = arith.mulf %1645, %1656 : vector<4x128xf32>
    %cst_516 = arith.constant 9.950000e-01 : f32
    %1663 = vector.broadcast %cst_516 : f32 to vector<4x128xf32>
    %1664 = arith.mulf %1663, %1662 : vector<4x128xf32>
    %cst_517 = arith.constant 1.000000e-03 : f32
    %1665 = vector.broadcast %cst_517 : f32 to vector<4x128xf32>
    %1666 = arith.addf %1665, %1664 : vector<4x128xf32>
    %1667 = arith.mulf %1647, %1656 : vector<4x128xf32>
    %cst_518 = arith.constant 9.950000e-01 : f32
    %1668 = vector.broadcast %cst_518 : f32 to vector<4x128xf32>
    %1669 = arith.mulf %1668, %1667 : vector<4x128xf32>
    %cst_519 = arith.constant 1.000000e-03 : f32
    %1670 = vector.broadcast %cst_519 : f32 to vector<4x128xf32>
    %1671 = arith.addf %1670, %1669 : vector<4x128xf32>
    %1672 = arith.mulf %1649, %1656 : vector<4x128xf32>
    %cst_520 = arith.constant 9.950000e-01 : f32
    %1673 = vector.broadcast %cst_520 : f32 to vector<4x128xf32>
    %1674 = arith.mulf %1673, %1672 : vector<4x128xf32>
    %cst_521 = arith.constant 1.000000e-03 : f32
    %1675 = vector.broadcast %cst_521 : f32 to vector<4x128xf32>
    %1676 = arith.addf %1675, %1674 : vector<4x128xf32>
    %cst_522 = arith.constant -3.000000e+00 : f32
    %1677 = vector.broadcast %cst_522 : f32 to vector<4x128xf32>
    %cst_523 = arith.constant 0.000000e+00 : f32
    %1678 = vector.broadcast %cst_523 : f32 to vector<4x128xf32>
    %1679 = arith.addf %1678, %1661 : vector<4x128xf32>
    %cst_524 = arith.constant 6.000000e+00 : f32
    %1680 = vector.broadcast %cst_524 : f32 to vector<4x128xf32>
    %1681 = arith.mulf %1680, %1679 : vector<4x128xf32>
    %cst_525 = arith.constant 3.000000e+00 : f32
    %1682 = vector.broadcast %cst_525 : f32 to vector<4x128xf32>
    %1683 = arith.subf %1681, %1682 : vector<4x128xf32>
    %1684 = arith.addf %1679, %1666 : vector<4x128xf32>
    %cst_526 = arith.constant 6.000000e+00 : f32
    %1685 = vector.broadcast %cst_526 : f32 to vector<4x128xf32>
    %1686 = arith.mulf %1685, %1684 : vector<4x128xf32>
    %cst_527 = arith.constant 3.000000e+00 : f32
    %1687 = vector.broadcast %cst_527 : f32 to vector<4x128xf32>
    %1688 = arith.subf %1686, %1687 : vector<4x128xf32>
    %1689 = arith.addf %1684, %1671 : vector<4x128xf32>
    %cst_528 = arith.constant 6.000000e+00 : f32
    %1690 = vector.broadcast %cst_528 : f32 to vector<4x128xf32>
    %1691 = arith.mulf %1690, %1689 : vector<4x128xf32>
    %cst_529 = arith.constant 3.000000e+00 : f32
    %1692 = vector.broadcast %cst_529 : f32 to vector<4x128xf32>
    %1693 = arith.subf %1691, %1692 : vector<4x128xf32>
    %1694 = arith.addf %1689, %1676 : vector<4x128xf32>
    %cst_530 = arith.constant 6.000000e+00 : f32
    %1695 = vector.broadcast %cst_530 : f32 to vector<4x128xf32>
    %1696 = arith.mulf %1695, %1694 : vector<4x128xf32>
    %cst_531 = arith.constant 3.000000e+00 : f32
    %1697 = vector.broadcast %cst_531 : f32 to vector<4x128xf32>
    %1698 = arith.subf %1696, %1697 : vector<4x128xf32>
    %cst_532 = arith.constant 3.000000e+00 : f32
    %1699 = vector.broadcast %cst_532 : f32 to vector<4x128xf32>
    %1700 = arith.subf %1683, %1677 : vector<4x128xf32>
    %1701 = arith.subf %1688, %1683 : vector<4x128xf32>
    %1702 = arith.subf %1693, %1688 : vector<4x128xf32>
    %1703 = arith.subf %1698, %1693 : vector<4x128xf32>
    %1704 = arith.subf %1699, %1698 : vector<4x128xf32>
    %1705 = arith.maximumf %1629, %1630 : vector<4x128xf32>
    %1706 = arith.maximumf %1705, %1631 : vector<4x128xf32>
    %1707 = arith.maximumf %1706, %1632 : vector<4x128xf32>
    %1708 = arith.maximumf %1707, %1633 : vector<4x128xf32>
    %1709 = arith.subf %1629, %1708 : vector<4x128xf32>
    %1710 = math.exp %1709 : vector<4x128xf32>
    %1711 = arith.subf %1630, %1708 : vector<4x128xf32>
    %1712 = math.exp %1711 : vector<4x128xf32>
    %1713 = arith.subf %1631, %1708 : vector<4x128xf32>
    %1714 = math.exp %1713 : vector<4x128xf32>
    %1715 = arith.subf %1632, %1708 : vector<4x128xf32>
    %1716 = math.exp %1715 : vector<4x128xf32>
    %1717 = arith.subf %1633, %1708 : vector<4x128xf32>
    %1718 = math.exp %1717 : vector<4x128xf32>
    %1719 = arith.addf %1710, %1712 : vector<4x128xf32>
    %1720 = arith.addf %1719, %1714 : vector<4x128xf32>
    %1721 = arith.addf %1720, %1716 : vector<4x128xf32>
    %1722 = arith.addf %1721, %1718 : vector<4x128xf32>
    %1723 = tpu.reciprocal %1722 : vector<4x128xf32> -> vector<4x128xf32>
    %1724 = arith.mulf %1710, %1723 : vector<4x128xf32>
    %cst_533 = arith.constant 9.950000e-01 : f32
    %1725 = vector.broadcast %cst_533 : f32 to vector<4x128xf32>
    %1726 = arith.mulf %1725, %1724 : vector<4x128xf32>
    %cst_534 = arith.constant 1.000000e-03 : f32
    %1727 = vector.broadcast %cst_534 : f32 to vector<4x128xf32>
    %1728 = arith.addf %1727, %1726 : vector<4x128xf32>
    %1729 = arith.mulf %1712, %1723 : vector<4x128xf32>
    %cst_535 = arith.constant 9.950000e-01 : f32
    %1730 = vector.broadcast %cst_535 : f32 to vector<4x128xf32>
    %1731 = arith.mulf %1730, %1729 : vector<4x128xf32>
    %cst_536 = arith.constant 1.000000e-03 : f32
    %1732 = vector.broadcast %cst_536 : f32 to vector<4x128xf32>
    %1733 = arith.addf %1732, %1731 : vector<4x128xf32>
    %1734 = arith.mulf %1714, %1723 : vector<4x128xf32>
    %cst_537 = arith.constant 9.950000e-01 : f32
    %1735 = vector.broadcast %cst_537 : f32 to vector<4x128xf32>
    %1736 = arith.mulf %1735, %1734 : vector<4x128xf32>
    %cst_538 = arith.constant 1.000000e-03 : f32
    %1737 = vector.broadcast %cst_538 : f32 to vector<4x128xf32>
    %1738 = arith.addf %1737, %1736 : vector<4x128xf32>
    %1739 = arith.mulf %1716, %1723 : vector<4x128xf32>
    %cst_539 = arith.constant 9.950000e-01 : f32
    %1740 = vector.broadcast %cst_539 : f32 to vector<4x128xf32>
    %1741 = arith.mulf %1740, %1739 : vector<4x128xf32>
    %cst_540 = arith.constant 1.000000e-03 : f32
    %1742 = vector.broadcast %cst_540 : f32 to vector<4x128xf32>
    %1743 = arith.addf %1742, %1741 : vector<4x128xf32>
    %cst_541 = arith.constant -3.000000e+00 : f32
    %1744 = vector.broadcast %cst_541 : f32 to vector<4x128xf32>
    %cst_542 = arith.constant 0.000000e+00 : f32
    %1745 = vector.broadcast %cst_542 : f32 to vector<4x128xf32>
    %1746 = arith.addf %1745, %1728 : vector<4x128xf32>
    %cst_543 = arith.constant 6.000000e+00 : f32
    %1747 = vector.broadcast %cst_543 : f32 to vector<4x128xf32>
    %1748 = arith.mulf %1747, %1746 : vector<4x128xf32>
    %cst_544 = arith.constant 3.000000e+00 : f32
    %1749 = vector.broadcast %cst_544 : f32 to vector<4x128xf32>
    %1750 = arith.subf %1748, %1749 : vector<4x128xf32>
    %1751 = arith.addf %1746, %1733 : vector<4x128xf32>
    %cst_545 = arith.constant 6.000000e+00 : f32
    %1752 = vector.broadcast %cst_545 : f32 to vector<4x128xf32>
    %1753 = arith.mulf %1752, %1751 : vector<4x128xf32>
    %cst_546 = arith.constant 3.000000e+00 : f32
    %1754 = vector.broadcast %cst_546 : f32 to vector<4x128xf32>
    %1755 = arith.subf %1753, %1754 : vector<4x128xf32>
    %1756 = arith.addf %1751, %1738 : vector<4x128xf32>
    %cst_547 = arith.constant 6.000000e+00 : f32
    %1757 = vector.broadcast %cst_547 : f32 to vector<4x128xf32>
    %1758 = arith.mulf %1757, %1756 : vector<4x128xf32>
    %cst_548 = arith.constant 3.000000e+00 : f32
    %1759 = vector.broadcast %cst_548 : f32 to vector<4x128xf32>
    %1760 = arith.subf %1758, %1759 : vector<4x128xf32>
    %1761 = arith.addf %1756, %1743 : vector<4x128xf32>
    %cst_549 = arith.constant 6.000000e+00 : f32
    %1762 = vector.broadcast %cst_549 : f32 to vector<4x128xf32>
    %1763 = arith.mulf %1762, %1761 : vector<4x128xf32>
    %cst_550 = arith.constant 3.000000e+00 : f32
    %1764 = vector.broadcast %cst_550 : f32 to vector<4x128xf32>
    %1765 = arith.subf %1763, %1764 : vector<4x128xf32>
    %cst_551 = arith.constant 3.000000e+00 : f32
    %1766 = vector.broadcast %cst_551 : f32 to vector<4x128xf32>
    %1767 = arith.subf %1750, %1744 : vector<4x128xf32>
    %1768 = arith.subf %1755, %1750 : vector<4x128xf32>
    %1769 = arith.subf %1760, %1755 : vector<4x128xf32>
    %1770 = arith.subf %1765, %1760 : vector<4x128xf32>
    %1771 = arith.subf %1766, %1765 : vector<4x128xf32>
    %cst_552 = arith.constant 1.000000e+00 : f32
    %1772 = vector.broadcast %cst_552 : f32 to vector<4x128xf32>
    %cst_553 = arith.constant 0.000000e+00 : f32
    %1773 = vector.broadcast %cst_553 : f32 to vector<4x128xf32>
    %1774 = arith.maximumf %1634, %1773 : vector<4x128xf32>
    %1775 = math.absf %1634 : vector<4x128xf32>
    %cst_554 = arith.constant 0.000000e+00 : f32
    %1776 = vector.broadcast %cst_554 : f32 to vector<4x128xf32>
    %1777 = arith.subf %1776, %1775 : vector<4x128xf32>
    %1778 = math.exp %1777 : vector<4x128xf32>
    %cst_555 = arith.constant 1.000000e+00 : f32
    %1779 = vector.broadcast %cst_555 : f32 to vector<4x128xf32>
    %1780 = arith.addf %1779, %1778 : vector<4x128xf32>
    %1781 = math.log %1780 : vector<4x128xf32>
    %1782 = arith.addf %1774, %1781 : vector<4x128xf32>
    %cst_556 = arith.constant 1.000000e-03 : f32
    %1783 = vector.broadcast %cst_556 : f32 to vector<4x128xf32>
    %1784 = arith.addf %1783, %1782 : vector<4x128xf32>
    %cst_557 = arith.constant 0.000000e+00 : f32
    %1785 = vector.broadcast %cst_557 : f32 to vector<4x128xf32>
    %1786 = arith.maximumf %1635, %1785 : vector<4x128xf32>
    %1787 = math.absf %1635 : vector<4x128xf32>
    %cst_558 = arith.constant 0.000000e+00 : f32
    %1788 = vector.broadcast %cst_558 : f32 to vector<4x128xf32>
    %1789 = arith.subf %1788, %1787 : vector<4x128xf32>
    %1790 = math.exp %1789 : vector<4x128xf32>
    %cst_559 = arith.constant 1.000000e+00 : f32
    %1791 = vector.broadcast %cst_559 : f32 to vector<4x128xf32>
    %1792 = arith.addf %1791, %1790 : vector<4x128xf32>
    %1793 = math.log %1792 : vector<4x128xf32>
    %1794 = arith.addf %1786, %1793 : vector<4x128xf32>
    %cst_560 = arith.constant 1.000000e-03 : f32
    %1795 = vector.broadcast %cst_560 : f32 to vector<4x128xf32>
    %1796 = arith.addf %1795, %1794 : vector<4x128xf32>
    %cst_561 = arith.constant 0.000000e+00 : f32
    %1797 = vector.broadcast %cst_561 : f32 to vector<4x128xf32>
    %1798 = arith.maximumf %1636, %1797 : vector<4x128xf32>
    %1799 = math.absf %1636 : vector<4x128xf32>
    %cst_562 = arith.constant 0.000000e+00 : f32
    %1800 = vector.broadcast %cst_562 : f32 to vector<4x128xf32>
    %1801 = arith.subf %1800, %1799 : vector<4x128xf32>
    %1802 = math.exp %1801 : vector<4x128xf32>
    %cst_563 = arith.constant 1.000000e+00 : f32
    %1803 = vector.broadcast %cst_563 : f32 to vector<4x128xf32>
    %1804 = arith.addf %1803, %1802 : vector<4x128xf32>
    %1805 = math.log %1804 : vector<4x128xf32>
    %1806 = arith.addf %1798, %1805 : vector<4x128xf32>
    %cst_564 = arith.constant 1.000000e-03 : f32
    %1807 = vector.broadcast %cst_564 : f32 to vector<4x128xf32>
    %1808 = arith.addf %1807, %1806 : vector<4x128xf32>
    %cst_565 = arith.constant 0.000000e+00 : f32
    %1809 = vector.broadcast %cst_565 : f32 to vector<4x128xf32>
    %1810 = arith.maximumf %1637, %1809 : vector<4x128xf32>
    %1811 = math.absf %1637 : vector<4x128xf32>
    %cst_566 = arith.constant 0.000000e+00 : f32
    %1812 = vector.broadcast %cst_566 : f32 to vector<4x128xf32>
    %1813 = arith.subf %1812, %1811 : vector<4x128xf32>
    %1814 = math.exp %1813 : vector<4x128xf32>
    %cst_567 = arith.constant 1.000000e+00 : f32
    %1815 = vector.broadcast %cst_567 : f32 to vector<4x128xf32>
    %1816 = arith.addf %1815, %1814 : vector<4x128xf32>
    %1817 = math.log %1816 : vector<4x128xf32>
    %1818 = arith.addf %1810, %1817 : vector<4x128xf32>
    %cst_568 = arith.constant 1.000000e-03 : f32
    %1819 = vector.broadcast %cst_568 : f32 to vector<4x128xf32>
    %1820 = arith.addf %1819, %1818 : vector<4x128xf32>
    %cst_569 = arith.constant 1.000000e+00 : f32
    %1821 = vector.broadcast %cst_569 : f32 to vector<4x128xf32>
    %cst_570 = arith.constant -3.000000e+00 : f32
    %1822 = vector.broadcast %cst_570 : f32 to vector<4x128xf32>
    %1823 = arith.cmpf oge, %1571, %1822 : vector<4x128xf32>
    %cst_571 = arith.constant 3.000000e+00 : f32
    %1824 = vector.broadcast %cst_571 : f32 to vector<4x128xf32>
    %1825 = arith.cmpf ole, %1571, %1824 : vector<4x128xf32>
    %1826 = arith.andi %1823, %1825 : vector<4x128xi1>
    %cst_572 = arith.constant -3.000000e+00 : f32
    %cst_573 = arith.constant 3.000000e+00 : f32
    %1827 = vector.broadcast %cst_572 : f32 to vector<4x128xf32>
    %1828 = arith.maximumf %1827, %1571 : vector<4x128xf32>
    %1829 = vector.broadcast %cst_573 : f32 to vector<4x128xf32>
    %1830 = arith.minimumf %1829, %1828 : vector<4x128xf32>
    %cst_574 = arith.constant 1.000000e+00 : f32
    %1831 = vector.broadcast %cst_574 : f32 to vector<4x128xf32>
    %1832 = arith.cmpf oge, %1830, %1683 : vector<4x128xf32>
    %1833 = arith.extui %1832 : vector<4x128xi1> to vector<4x128xi32>
    %1834 = arith.sitofp %1833 : vector<4x128xi32> to vector<4x128xf32>
    %1835 = arith.cmpf oge, %1830, %1688 : vector<4x128xf32>
    %1836 = arith.extui %1835 : vector<4x128xi1> to vector<4x128xi32>
    %1837 = arith.sitofp %1836 : vector<4x128xi32> to vector<4x128xf32>
    %1838 = arith.cmpf oge, %1830, %1693 : vector<4x128xf32>
    %1839 = arith.extui %1838 : vector<4x128xi1> to vector<4x128xi32>
    %1840 = arith.sitofp %1839 : vector<4x128xi32> to vector<4x128xf32>
    %1841 = arith.cmpf oge, %1830, %1698 : vector<4x128xf32>
    %1842 = arith.extui %1841 : vector<4x128xi1> to vector<4x128xi32>
    %1843 = arith.sitofp %1842 : vector<4x128xi32> to vector<4x128xf32>
    %cst_575 = arith.constant 0.000000e+00 : f32
    %1844 = vector.broadcast %cst_575 : f32 to vector<4x128xf32>
    %cst_576 = arith.constant 0.000000e+00 : f32
    %1845 = vector.broadcast %cst_576 : f32 to vector<4x128xf32>
    %1846 = arith.subf %1831, %1834 : vector<4x128xf32>
    %1847 = arith.mulf %1846, %1677 : vector<4x128xf32>
    %1848 = arith.addf %1845, %1847 : vector<4x128xf32>
    %1849 = arith.mulf %1846, %1700 : vector<4x128xf32>
    %1850 = arith.addf %1845, %1849 : vector<4x128xf32>
    %1851 = arith.mulf %1846, %1744 : vector<4x128xf32>
    %1852 = arith.addf %1845, %1851 : vector<4x128xf32>
    %1853 = arith.mulf %1846, %1767 : vector<4x128xf32>
    %1854 = arith.addf %1845, %1853 : vector<4x128xf32>
    %1855 = arith.mulf %1846, %1772 : vector<4x128xf32>
    %1856 = arith.addf %1845, %1855 : vector<4x128xf32>
    %1857 = arith.mulf %1846, %1784 : vector<4x128xf32>
    %1858 = arith.addf %1845, %1857 : vector<4x128xf32>
    %1859 = arith.subf %1834, %1837 : vector<4x128xf32>
    %1860 = arith.mulf %1859, %1683 : vector<4x128xf32>
    %1861 = arith.addf %1848, %1860 : vector<4x128xf32>
    %1862 = arith.mulf %1859, %1701 : vector<4x128xf32>
    %1863 = arith.addf %1850, %1862 : vector<4x128xf32>
    %1864 = arith.mulf %1859, %1750 : vector<4x128xf32>
    %1865 = arith.addf %1852, %1864 : vector<4x128xf32>
    %1866 = arith.mulf %1859, %1768 : vector<4x128xf32>
    %1867 = arith.addf %1854, %1866 : vector<4x128xf32>
    %1868 = arith.mulf %1859, %1784 : vector<4x128xf32>
    %1869 = arith.addf %1856, %1868 : vector<4x128xf32>
    %1870 = arith.mulf %1859, %1796 : vector<4x128xf32>
    %1871 = arith.addf %1858, %1870 : vector<4x128xf32>
    %1872 = arith.subf %1837, %1840 : vector<4x128xf32>
    %1873 = arith.mulf %1872, %1688 : vector<4x128xf32>
    %1874 = arith.addf %1861, %1873 : vector<4x128xf32>
    %1875 = arith.mulf %1872, %1702 : vector<4x128xf32>
    %1876 = arith.addf %1863, %1875 : vector<4x128xf32>
    %1877 = arith.mulf %1872, %1755 : vector<4x128xf32>
    %1878 = arith.addf %1865, %1877 : vector<4x128xf32>
    %1879 = arith.mulf %1872, %1769 : vector<4x128xf32>
    %1880 = arith.addf %1867, %1879 : vector<4x128xf32>
    %1881 = arith.mulf %1872, %1796 : vector<4x128xf32>
    %1882 = arith.addf %1869, %1881 : vector<4x128xf32>
    %1883 = arith.mulf %1872, %1808 : vector<4x128xf32>
    %1884 = arith.addf %1871, %1883 : vector<4x128xf32>
    %1885 = arith.subf %1840, %1843 : vector<4x128xf32>
    %1886 = arith.mulf %1885, %1693 : vector<4x128xf32>
    %1887 = arith.addf %1874, %1886 : vector<4x128xf32>
    %1888 = arith.mulf %1885, %1703 : vector<4x128xf32>
    %1889 = arith.addf %1876, %1888 : vector<4x128xf32>
    %1890 = arith.mulf %1885, %1760 : vector<4x128xf32>
    %1891 = arith.addf %1878, %1890 : vector<4x128xf32>
    %1892 = arith.mulf %1885, %1770 : vector<4x128xf32>
    %1893 = arith.addf %1880, %1892 : vector<4x128xf32>
    %1894 = arith.mulf %1885, %1808 : vector<4x128xf32>
    %1895 = arith.addf %1882, %1894 : vector<4x128xf32>
    %1896 = arith.mulf %1885, %1820 : vector<4x128xf32>
    %1897 = arith.addf %1884, %1896 : vector<4x128xf32>
    %1898 = arith.subf %1843, %1844 : vector<4x128xf32>
    %1899 = arith.mulf %1898, %1698 : vector<4x128xf32>
    %1900 = arith.addf %1887, %1899 : vector<4x128xf32>
    %1901 = arith.mulf %1898, %1704 : vector<4x128xf32>
    %1902 = arith.addf %1889, %1901 : vector<4x128xf32>
    %1903 = arith.mulf %1898, %1765 : vector<4x128xf32>
    %1904 = arith.addf %1891, %1903 : vector<4x128xf32>
    %1905 = arith.mulf %1898, %1771 : vector<4x128xf32>
    %1906 = arith.addf %1893, %1905 : vector<4x128xf32>
    %1907 = arith.mulf %1898, %1820 : vector<4x128xf32>
    %1908 = arith.addf %1895, %1907 : vector<4x128xf32>
    %1909 = arith.mulf %1898, %1821 : vector<4x128xf32>
    %1910 = arith.addf %1897, %1909 : vector<4x128xf32>
    %1911 = tpu.reciprocal %1902 : vector<4x128xf32> -> vector<4x128xf32>
    %1912 = arith.mulf %1906, %1911 : vector<4x128xf32>
    %1913 = arith.subf %1830, %1900 : vector<4x128xf32>
    %1914 = arith.mulf %1913, %1911 : vector<4x128xf32>
    %cst_577 = arith.constant 1.000000e+00 : f32
    %1915 = vector.broadcast %cst_577 : f32 to vector<4x128xf32>
    %1916 = arith.subf %1915, %1914 : vector<4x128xf32>
    %1917 = arith.mulf %1914, %1916 : vector<4x128xf32>
    %1918 = arith.mulf %1912, %1914 : vector<4x128xf32>
    %1919 = arith.mulf %1918, %1914 : vector<4x128xf32>
    %1920 = arith.mulf %1908, %1917 : vector<4x128xf32>
    %1921 = arith.addf %1919, %1920 : vector<4x128xf32>
    %1922 = arith.mulf %1906, %1921 : vector<4x128xf32>
    %1923 = arith.addf %1908, %1910 : vector<4x128xf32>
    %cst_578 = arith.constant 2.000000e+00 : f32
    %1924 = vector.broadcast %cst_578 : f32 to vector<4x128xf32>
    %1925 = arith.mulf %1924, %1912 : vector<4x128xf32>
    %1926 = arith.subf %1923, %1925 : vector<4x128xf32>
    %1927 = arith.mulf %1926, %1917 : vector<4x128xf32>
    %1928 = arith.addf %1912, %1927 : vector<4x128xf32>
    %1929 = tpu.reciprocal %1928 : vector<4x128xf32> -> vector<4x128xf32>
    %1930 = arith.mulf %1922, %1929 : vector<4x128xf32>
    %1931 = arith.addf %1904, %1930 : vector<4x128xf32>
    %1932 = arith.mulf %1912, %1912 : vector<4x128xf32>
    %1933 = arith.mulf %1910, %1914 : vector<4x128xf32>
    %1934 = arith.mulf %1933, %1914 : vector<4x128xf32>
    %cst_579 = arith.constant 2.000000e+00 : f32
    %1935 = vector.broadcast %cst_579 : f32 to vector<4x128xf32>
    %1936 = arith.mulf %1935, %1912 : vector<4x128xf32>
    %1937 = arith.mulf %1936, %1917 : vector<4x128xf32>
    %1938 = arith.addf %1934, %1937 : vector<4x128xf32>
    %1939 = arith.mulf %1908, %1916 : vector<4x128xf32>
    %1940 = arith.mulf %1939, %1916 : vector<4x128xf32>
    %1941 = arith.addf %1938, %1940 : vector<4x128xf32>
    %1942 = arith.mulf %1932, %1941 : vector<4x128xf32>
    %1943 = arith.mulf %1942, %1929 : vector<4x128xf32>
    %1944 = arith.mulf %1943, %1929 : vector<4x128xf32>
    %1945 = math.log %1944 : vector<4x128xf32>
    %1946 = arith.select %1826, %1931, %1571 : vector<4x128xi1>, vector<4x128xf32>
    %cst_580 = arith.constant 0.000000e+00 : f32
    %1947 = vector.broadcast %cst_580 : f32 to vector<4x128xf32>
    %1948 = arith.select %1826, %1945, %1947 : vector<4x128xi1>, vector<4x128xf32>
    %1949 = arith.addf %1557, %1948 : vector<4x128xf32>
    %c0_581 = arith.constant 0 : index
    %c0_582 = arith.constant 0 : index
    %1950 = vector.load %arg14[%c0_581, %c0_582] : memref<8x128xf32, #tpu.memory_space<vmem>>, vector<4x128xf32>
    tpu.vector_store %arg14[%c0_581, %c0_582], %1564 {strides = array<i32>} : memref<8x128xf32, #tpu.memory_space<vmem>>, vector<4x128xf32>,
    %c4_583 = arith.constant 4 : index
    %c0_584 = arith.constant 0 : index
    %1951 = vector.load %arg14[%c4_583, %c0_584] : memref<8x128xf32, #tpu.memory_space<vmem>>, vector<4x128xf32>
    tpu.vector_store %arg14[%c4_583, %c0_584], %1946 {strides = array<i32>} : memref<8x128xf32, #tpu.memory_space<vmem>>, vector<4x128xf32>,
    %cst_585 = arith.constant dense<0.000000e+00> : vector<128xf32>
    %1952 = vector.multi_reduction <add>, %1949, %cst_585 [0] : vector<4x128xf32> to vector<128xf32>
    %1953 = vector.shape_cast %1952 : vector<128xf32> to vector<1x128xf32>
    %c0_586 = arith.constant 0 : index
    %c0_587 = arith.constant 0 : index
    %1954 = vector.load %arg15[%c0_586, %c0_587] : memref<1x128xf32, #tpu.memory_space<vmem>>, vector<1x128xf32>
    tpu.vector_store %arg15[%c0_586, %c0_587], %1953 {strides = array<i32>} : memref<1x128xf32, #tpu.memory_space<vmem>>, vector<1x128xf32>,
    return
  }
  func.func @transform_0(%arg0: i32) -> (i32, i32) {
    %c0_i32 = arith.constant 0 : i32
    %c0_i32_0 = arith.constant 0 : i32
    return %c0_i32, %arg0 : i32, i32
  }
  func.func @transform_1(%arg0: i32) -> (i32, i32, i32) {
    %c0_i32 = arith.constant 0 : i32
    %c0_i32_0 = arith.constant 0 : i32
    %c0_i32_1 = arith.constant 0 : i32
    %c0_i32_2 = arith.constant 0 : i32
    return %c0_i32, %c0_i32_0, %c0_i32_1 : i32, i32, i32
  }
  func.func @transform_2(%arg0: i32) -> (i32, i32, i32) {
    %c0_i32 = arith.constant 0 : i32
    %c0_i32_0 = arith.constant 0 : i32
    %c0_i32_1 = arith.constant 0 : i32
    %c0_i32_2 = arith.constant 0 : i32
    return %c0_i32, %c0_i32_0, %c0_i32_1 : i32, i32, i32
  }
  func.func @transform_3(%arg0: i32) -> (i32, i32, i32) {
    %c0_i32 = arith.constant 0 : i32
    %c0_i32_0 = arith.constant 0 : i32
    %c0_i32_1 = arith.constant 0 : i32
    %c0_i32_2 = arith.constant 0 : i32
    return %c0_i32, %c0_i32_0, %c0_i32_1 : i32, i32, i32
  }
  func.func @transform_4(%arg0: i32) -> (i32, i32, i32) {
    %c0_i32 = arith.constant 0 : i32
    %c0_i32_0 = arith.constant 0 : i32
    %c0_i32_1 = arith.constant 0 : i32
    %c0_i32_2 = arith.constant 0 : i32
    return %c0_i32, %c0_i32_0, %c0_i32_1 : i32, i32, i32
  }
  func.func @transform_5(%arg0: i32) -> (i32, i32, i32) {
    %c0_i32 = arith.constant 0 : i32
    %c0_i32_0 = arith.constant 0 : i32
    %c0_i32_1 = arith.constant 0 : i32
    %c0_i32_2 = arith.constant 0 : i32
    return %c0_i32, %c0_i32_0, %c0_i32_1 : i32, i32, i32
  }
  func.func @transform_6(%arg0: i32) -> (i32, i32, i32) {
    %c0_i32 = arith.constant 0 : i32
    %c0_i32_0 = arith.constant 0 : i32
    %c0_i32_1 = arith.constant 0 : i32
    %c0_i32_2 = arith.constant 0 : i32
    return %c0_i32, %c0_i32_0, %c0_i32_1 : i32, i32, i32
  }
  func.func @transform_7(%arg0: i32) -> (i32, i32, i32) {
    %c0_i32 = arith.constant 0 : i32
    %c0_i32_0 = arith.constant 0 : i32
    %c0_i32_1 = arith.constant 0 : i32
    %c0_i32_2 = arith.constant 0 : i32
    return %c0_i32, %c0_i32_0, %c0_i32_1 : i32, i32, i32
  }
  func.func @transform_8(%arg0: i32) -> (i32, i32, i32) {
    %c0_i32 = arith.constant 0 : i32
    %c0_i32_0 = arith.constant 0 : i32
    %c0_i32_1 = arith.constant 0 : i32
    %c0_i32_2 = arith.constant 0 : i32
    return %c0_i32, %c0_i32_0, %c0_i32_1 : i32, i32, i32
  }
  func.func @transform_9(%arg0: i32) -> (i32, i32, i32) {
    %c0_i32 = arith.constant 0 : i32
    %c0_i32_0 = arith.constant 0 : i32
    %c0_i32_1 = arith.constant 0 : i32
    %c0_i32_2 = arith.constant 0 : i32
    return %c0_i32, %c0_i32_0, %c0_i32_1 : i32, i32, i32
  }
  func.func @transform_10(%arg0: i32) -> (i32, i32, i32) {
    %c0_i32 = arith.constant 0 : i32
    %c0_i32_0 = arith.constant 0 : i32
    %c0_i32_1 = arith.constant 0 : i32
    %c0_i32_2 = arith.constant 0 : i32
    return %c0_i32, %c0_i32_0, %c0_i32_1 : i32, i32, i32
  }
  func.func @transform_11(%arg0: i32) -> (i32, i32, i32) {
    %c0_i32 = arith.constant 0 : i32
    %c0_i32_0 = arith.constant 0 : i32
    %c0_i32_1 = arith.constant 0 : i32
    %c0_i32_2 = arith.constant 0 : i32
    return %c0_i32, %c0_i32_0, %c0_i32_1 : i32, i32, i32
  }
  func.func @transform_12(%arg0: i32) -> (i32, i32, i32) {
    %c0_i32 = arith.constant 0 : i32
    %c0_i32_0 = arith.constant 0 : i32
    %c0_i32_1 = arith.constant 0 : i32
    %c0_i32_2 = arith.constant 0 : i32
    return %c0_i32, %c0_i32_0, %c0_i32_1 : i32, i32, i32
  }
  func.func @transform_13(%arg0: i32) -> (i32, i32) {
    %c0_i32 = arith.constant 0 : i32
    %c0_i32_0 = arith.constant 0 : i32
    return %c0_i32, %arg0 : i32, i32
  }
  func.func @transform_14(%arg0: i32) -> (i32, i32) {
    %c0_i32 = arith.constant 0 : i32
    %c0_i32_0 = arith.constant 0 : i32
    return %c0_i32, %arg0 : i32, i32
  }
}

</mosaic_0001>

<bundles_post_ra>
// kernel: tpu_custom_call.1
= control target key start
LH: loop header
LB: loop body
LE: loop exit
PB: predicated region body
PF: predicated region fallthrough
CT: control target
= control target key end

     0   :  { %20 = vsyncpa [#allocation3], 0  ;;  %vm60_vm0 = vcmask 1043456   ;;  %vm56_vm1 = vcmask 31744   ;;  %v4398_v3 = vmov 0   ;;  %s6019_s0 = inlined_call_operand.vmem [shape: f32[8,128], index: 0, kind: input, shape index: {}]   ;;  %s6020_s1 = inlined_call_operand.vmem [shape: f32[5,8,4], index: 1, kind: input, shape index: {}]   ;;  %s6021_s2 = inlined_call_operand.vmem [shape: f32[5,8,1], index: 2, kind: input, shape index: {}]   ;;  %s6022_s3 = inlined_call_operand.vmem [shape: f32[5,8,8], index: 3, kind: input, shape index: {}]   ;;  %s6023_s4 = inlined_call_operand.vmem [shape: f32[5,8,1], index: 4, kind: input, shape index: {}]   ;;  %s6024_s5 = inlined_call_operand.vmem [shape: f32[5,8,8], index: 5, kind: input, shape index: {}]   ;;  %s6025_s6 = inlined_call_operand.vmem [shape: f32[5,8,1], index: 6, kind: input, shape index: {}]   ;;  %s6026_s7 = inlined_call_operand.vmem [shape: f32[5,112,8], index: 7, kind: input, shape index: {}]   ;;  %s6027_s8 = inlined_call_operand.vmem [shape: f32[5,112,1], index: 8, kind: input, shape index: {}]   ;;  %s6028_s9 = inlined_call_operand.vmem [shape: f32[4,4,4], index: 9, kind: input, shape index: {}]   ;;  %s6029_s10 = inlined_call_operand.vmem [shape: f32[4,4,4], index: 10, kind: input, shape index: {}]   ;;  %s6030_s11 = inlined_call_operand.vmem [shape: f32[4,4,4], index: 11, kind: input, shape index: {}]   ;;  %s6031_s12 = inlined_call_operand.vmem [shape: f32[4,4,4], index: 12, kind: input, shape index: {}]   ;;  %s6032_s13 = inlined_call_operand.hbm [shape: f32[8,128], index: 13, kind: output, shape index: {0}]   ;;  %s6033_s14 = inlined_call_operand.hbm [shape: f32[1,128], index: 14, kind: output, shape index: {1}]  }
   0x1   :  { %v4480_v0 = vld [vmem:[%s6019_s0] sm:$0xff]  ;;  %4082 = vset.pattern.permute.xlu0 %v4398_v3 }
   0x2   :  { %v50_v1 = vld [vmem:[%s6021_s2] sm:$0xff]  ;;  %3716 = vmatpush.msk.msra.mxu0 %vm60_vm0, %v4480_v0 }
   0x3   :  { %v49_v2 = vld [vmem:[%s6020_s1] sm:$0xff]  ;;  %53 = vperm.xlu0 %4082, %v50_v1  }
   0x4   :  { %3717 = vmatmul.msk.f32.vlgmr.msra.gmra.mxu0 %vm56_vm1, %v49_v2 }
   0x5   :  { %21 = vsyncpa [#allocation5], 0  ;;  %4083 = vset.pattern.permute.xlu1 %v4398_v3  ;;  %4084 = vset.pattern.permute.xlu2 %v4398_v3  ;;  %v91_v4 = vld [vmem:[%s6023_s4] sm:$0xff]  ;;  %v180_v5 = vld [vmem:[%s6027_s8 + $0x18] sm:$0xff]  ;;  %vm97_vm3 = vcmask 64512   ;;  %s3691_s28 = sshll.u32 %s6032_s13, 4  ;;  %s3692_s28 = int_to_ptr.hbm [resolvable:$true] %s3691_s28 }
   0x6   :  { %3754 = vmatpush.msk.msra.mxu1 %vm60_vm0, %v4480_v0  ;;  %v183_v6 = vld [vmem:[%s6027_s8 + $0x30] sm:$0xff]  ;;  %v186_v7 = vld [vmem:[%s6027_s8 + $0x48] sm:$0xff]  ;;  %v189_v8 = vld [vmem:[%s6027_s8 + $0x60] sm:$0xff]  ;;  %s4401_s13 = smov [#allocation4]   ;;  %s3702_s30 = sshll.u32 %s6033_s14, 4  ;;  %s3703_s30 = int_to_ptr.hbm [resolvable:$true] %s3702_s30 }
   0x7   :  { %v3766_v9 = vld [vmem:[%s6023_s4 + $0x8] sm:$0xff]  ;;  %v128_v10 = vld [vmem:[%s6025_s6] sm:$0xff]  ;;  %v3788_v11 = vld [vmem:[%s6027_s8 + $0x78] sm:$0xff] }
   0x8   :  { %131 = vperm.xlu1 %4083, %v128_v10   ;;  %v177_v12 = vld [vmem:[%s6027_s8] sm:$0xff]  ;;  %v3791_v13 = vld [vmem:[%s6027_s8 + $0x90] sm:$0xff]  ;;  %v3794_v15 = vld [vmem:[%s6027_s8 + $0xa8] sm:$0xff] }
   0x9   :  { %v181_v14 = vld [vmem:[%s6027_s8 + $0x20] sm:$0xff]  ;;  %v184_v16 = vld [vmem:[%s6027_s8 + $0x38] sm:$0xff]  ;;  %v187_v18 = vld [vmem:[%s6027_s8 + $0x50] sm:$0xff] }
   0xa   :  { %v3797_v17 = vld [vmem:[%s6027_s8 + $0xc0] sm:$0xff]  ;;  %v3800_v19 = vld [vmem:[%s6027_s8 + $0xd8] sm:$0xff]  ;;  %v190_v20 = vld [vmem:[%s6027_s8 + $0x68] sm:$0xff] }
   0xb   :  { %94 = vperm.xlu0 %4082, %v91_v4   ;;  %v3852_v21 = vld [vmem:[%s6025_s6 + $0x10] sm:$0xff]  ;;  %v3770_v22 = vld [vmem:[%s6025_s6 + $0x8] sm:$0xff]  ;;  %v3789_v24 = vld [vmem:[%s6027_s8 + $0x80] sm:$0xff] }
   0xc   :  { %v3871_v23 = vld [vmem:[%s6027_s8 + $0xf0] sm:$0xff]  ;;  %v3874_v25 = vld [vmem:[%s6027_s8 + $0x108] sm:$0xff]  ;;  %v3792_v26 = vld [vmem:[%s6027_s8 + $0x98] sm:$0xff] }
   0xd   :  { %v3877_v27 = vld [vmem:[%s6027_s8 + $0x120] sm:$0xff]  ;;  %v3795_v28 = vld [vmem:[%s6027_s8 + $0xb0] sm:$0xff]  ;;  %v3880_v31 = vld [vmem:[%s6027_s8 + $0x138] sm:$0xff] }
   0xe   :  { %v3798_v34 = vld [vmem:[%s6027_s8 + $0xc8] sm:$0xff]  ;;  %v3925_v36 = vld [vmem:[%s6021_s2 + $0x18] sm:$0xff]  ;;  %v3843_v37 = vld [vmem:[%s6021_s2 + $0x10] sm:$0xff] }
   0xf   :  { %v90_v40 = vld [vmem:[%s6022_s3] sm:$0xff]  ;;  %v3951_v42 = vld [vmem:[%s6027_s8 + $0x150] sm:$0xff]  ;;  %v3954_v44 = vld [vmem:[%s6027_s8 + $0x168] sm:$0xff] }
  0x10   :  { %193 = vperm.xlu1 %4083, %v177_v12   ;;  %v3869_v43 = vld [vmem:[%s6027_s8 + $0xe0] sm:$0xff]  ;;  %v3872_v45 = vld [vmem:[%s6027_s8 + $0xf8] sm:$0xff]  ;;  %v3875_v47 = vld [vmem:[%s6027_s8 + $0x110] sm:$0xff] }
  0x11   :  { %v3957_v46 = vld [vmem:[%s6027_s8 + $0x180] sm:$0xff]  ;;  %v3960_v48 = vld [vmem:[%s6027_s8 + $0x198] sm:$0xff]  ;;  %v3878_v49 = vld [vmem:[%s6027_s8 + $0x128] sm:$0xff] }
  0x12   :  { %v3963_v50 = vld [vmem:[%s6027_s8 + $0x1b0] sm:$0xff]  ;;  %v3881_v51 = vld [vmem:[%s6027_s8 + $0x140] sm:$0xff]  ;;  %v3930_v53 = vld [vmem:[%s6023_s4 + $0x18] sm:$0xff] }
  0x13   :  { %208 = vperm.xlu0 %4082, %v180_v5   ;;  %v4012_v52 = vld [vmem:[%s6023_s4 + $0x20] sm:$0xff]  ;;  %v4034_v54 = vld [vmem:[%s6027_s8 + $0x1c8] sm:$0xff]  ;;  %v3952_v55 = vld [vmem:[%s6027_s8 + $0x158] sm:$0xff] }
  0x14   :  { %v4037_v56 = vld [vmem:[%s6027_s8 + $0x1e0] sm:$0xff]  ;;  %v3955_v57 = vld [vmem:[%s6027_s8 + $0x170] sm:$0xff]  ;;  %v4040_v58 = vld [vmem:[%s6027_s8 + $0x1f8] sm:$0xff] }
  0x15   :  { %v3958_v59 = vld [vmem:[%s6027_s8 + $0x188] sm:$0xff]  ;;  %v4043_v60 = vld [vmem:[%s6027_s8 + $0x210] sm:$0xff]  ;;  %v3961_v61 = vld [vmem:[%s6027_s8 + $0x1a0] sm:$0xff] }
  0x16   :  { %v4046_v62 = vld [vmem:[%s6027_s8 + $0x228] sm:$0xff]  ;;  %v3964_v63 = vld [vmem:[%s6027_s8 + $0x1b8] sm:$0xff]  ;;  %v4016_v1 = vld [vmem:[%s6025_s6 + $0x20] sm:$0xff] }
  0x17   :  { %v4035_v2 = vld [vmem:[%s6027_s8 + $0x1d0] sm:$0xff]  ;;  %v4038_v3 = vld [vmem:[%s6027_s8 + $0x1e8] sm:$0xff]  ;;  %v4041_v4 = vld [vmem:[%s6027_s8 + $0x200] sm:$0xff] }
  0x18   :  { %213 = vperm.xlu1 %4083, %v181_v14   ;;  %v178_v5 = vld [vmem:[%s6027_s8 + $0x8] sm:$0xff] }
  0x19   :  { %198 = vperm.xlu2 %4084, %v178_v5  }
  0x1b   :  { %223 = vperm.xlu0 %4082, %v183_v6   ;;  %v4044_v6 = vld [vmem:[%s6027_s8 + $0x218] sm:$0xff] }
  0x20   :  { %228 = vperm.xlu1 %4083, %v184_v16   ;;  %v185_v16 = vld [vmem:[%s6027_s8 + $0x40] sm:$0xff] }
  0x23   :  { %238 = vperm.xlu0 %4082, %v186_v7   ;;  %v179_v7 = vld [vmem:[%s6027_s8 + $0x10] sm:$0xff] }
  0x24   :  { %203 = vperm.xlu2 %4084, %v179_v7  }
  0x28   :  { %243 = vperm.xlu1 %4083, %v187_v18  }
  0x2b   :  { %253 = vperm.xlu0 %4082, %v189_v8  }
  0x30   :  { %258 = vperm.xlu1 %4083, %v190_v20   ;;  %v3761_v20 = vld [vmem:[%s6021_s2 + $0x8] sm:$0xff] }
  0x33   :  { %885 = vperm.xlu0 %4082, %v3766_v9  }
  0x38   :  { %923 = vperm.xlu1 %4083, %v3770_v22   ;;  %v3790_v22 = vld [vmem:[%s6027_s8 + $0x88] sm:$0xff] }
  0x3b   :  { %992 = vperm.xlu0 %4082, %v3788_v11  }
  0x40   :  { %997 = vperm.xlu1 %4083, %v3789_v24   ;;  %v3796_v24 = vld [vmem:[%s6027_s8 + $0xb8] sm:$0xff] }
  0x43   :  { %1007 = vperm.xlu0 %4082, %v3791_v13   ;;  %v182_v13 = vld [vmem:[%s6027_s8 + $0x28] sm:$0xff] }
  0x44   :  { %218 = vperm.xlu2 %4084, %v182_v13  }
  0x48   :  { %1012 = vperm.xlu1 %4083, %v3792_v26   ;;  %v3848_v26 = vld [vmem:[%s6023_s4 + $0x10] sm:$0xff] }
  0x4b   :  { %1022 = vperm.xlu0 %4082, %v3794_v15  }
  0x4c   :  { %233 = vperm.xlu2 %4084, %v185_v16  }
  0x50   :  { %1027 = vperm.xlu1 %4083, %v3795_v28   ;;  %v3873_v28 = vld [vmem:[%s6027_s8 + $0x100] sm:$0xff] }
  0x53   :  { %1037 = vperm.xlu0 %4082, %v3797_v17   ;;  %v127_v17 = vld [vmem:[%s6024_s5] sm:$0xff] }
  0x58   :  { %1042 = vperm.xlu1 %4083, %v3798_v34  }
  0x5b   :  { %1052 = vperm.xlu0 %4082, %v3800_v19   ;;  %v188_v19 = vld [vmem:[%s6027_s8 + $0x58] sm:$0xff] }
  0x5c   :  { %248 = vperm.xlu2 %4084, %v188_v19  }
  0x60   :  { %1578 = vperm.xlu1 %4083, %v3843_v37  }
  0x63   :  { %1657 = vperm.xlu0 %4082, %v3852_v21   ;;  %v3787_v21 = vld [vmem:[%s6027_s8 + $0x70] sm:$0xff] }
  0x64   :  { %844 = vperm.xlu2 %4084, %v3761_v20  }
  0x68   :  { %1721 = vperm.xlu1 %4083, %v3869_v43   ;;  %v163_v43 = vld [vmem:[%s6026_s7] sm:$0xff] }
  0x6b   :  { %1731 = vperm.xlu0 %4082, %v3871_v23   ;;  %v3793_v23 = vld [vmem:[%s6027_s8 + $0xa0] sm:$0xff] }
  0x6c   :  { %987 = vperm.xlu2 %4084, %v3787_v21  }
  0x70   :  { %1736 = vperm.xlu1 %4083, %v3872_v45   ;;  %v3962_v45 = vld [vmem:[%s6027_s8 + $0x1a8] sm:$0xff] }
  0x73   :  { %1746 = vperm.xlu0 %4082, %v3874_v25   ;;  %v3799_v25 = vld [vmem:[%s6027_s8 + $0xd0] sm:$0xff] }
  0x74   :  { %1002 = vperm.xlu2 %4084, %v3790_v22  }
  0x75   :  { %v54_v29 = vpop.permute.xlu0 %53 }
  0x78   :  { %1751 = vperm.xlu1 %4083, %v3875_v47   ;;  %v4007_v47 = vld [vmem:[%s6021_s2 + $0x20] sm:$0xff] }
  0x7a   :  { %v132_v34 = vpop.permute.xlu1 %131 }
  0x7b   :  { %1761 = vperm.xlu0 %4082, %v3877_v27   ;;  %v3870_v27 = vld [vmem:[%s6027_s8 + $0xe8] sm:$0xff] }
  0x7c   :  { %1017 = vperm.xlu2 %4084, %v3793_v23  }
  0x7d   :  { %v95_v8 = vpop.permute.xlu0 %94 }
  0x80   :  { %1766 = vperm.xlu1 %4083, %v3878_v49   ;;  %v4033_v49 = vld [vmem:[%s6027_s8 + $0x1c0] sm:$0xff] }
  0x81   :  { %v81_v30 = vpop.f32.mrf.mxu0 }
  0x82   :  { %v82_v32 = vadd.f32 %v81_v30, %v54_v29  ;;  %v3876_v29 = vld [vmem:[%s6027_s8 + $0x118] sm:$0xff]  ;;  %v3879_v30 = vld [vmem:[%s6027_s8 + $0x130] sm:$0xff] }
  0x83   :  { %1776 = vperm.xlu0 %4082, %v3880_v31   ;;  %v3882_v31 = vld [vmem:[%s6027_s8 + $0x148] sm:$0xff] }
  0x84   :  { %v85_v33 = vmin.f32 %v82_v32, 0.0  ;;  %vm84_vm2 = vcmp.gt.f32.partialorder %v82_v32, 0.0  ;;  %1032 = vperm.xlu2 %4084, %v3796_v24  }
  0x86   :  { %v86_v35 = vmul.f32 1.442695, %v85_v33  ;;  %v3953_v33 = vld [vmem:[%s6027_s8 + $0x160] sm:$0xff] }
  0x88   :  { %4085 = vpow2.f32 %v86_v35  ;;  %1781 = vperm.xlu1 %4083, %v3881_v51   ;;  %v4036_v51 = vld [vmem:[%s6027_s8 + $0x1d8] sm:$0xff] }
  0x8b   :  { %2312 = vperm.xlu0 %4082, %v3925_v36  }
  0x8c   :  { %1047 = vperm.xlu2 %4084, %v3799_v25  }
  0x8e   :  { %v4086_v38 = vpop.eup %4085 }
  0x8f   :  { %v3718_v39 = vadd.f32 -1.0, %v4086_v38  ;;  %v3956_v38 = vld [vmem:[%s6027_s8 + $0x178] sm:$0xff] }
  0x90   :  { %2353 = vperm.xlu1 %4083, %v3930_v53   ;;  %v4039_v53 = vld [vmem:[%s6027_s8 + $0x1f0] sm:$0xff] }
  0x91   :  { %v89_v41 = vsel %vm84_vm2, %v82_v32, %v3718_v39  ;;  %v3934_v32 = vld [vmem:[%s6025_s6 + $0x18] sm:$0xff] }
  0x92   :  { %116 = vmatpush.msrb.mxu0 %v89_v41 }
  0x93   :  { %3719 = vmatmul.msk.f32.vlgmr.msrb.gmra.mxu0 %vm97_vm3, %v90_v40  ;;  %2455 = vperm.xlu0 %4082, %v3951_v42   ;;  %v3959_v40 = vld [vmem:[%s6027_s8 + $0x190] sm:$0xff] }
  0x94   :  { %1619 = vperm.xlu2 %4084, %v3848_v26  }
  0x98   :  { %2460 = vperm.xlu1 %4083, %v3952_v55   ;;  %v4042_v55 = vld [vmem:[%s6027_s8 + $0x208] sm:$0xff] }
  0x9b   :  { %2470 = vperm.xlu0 %4082, %v3954_v44  }
  0x9c   :  { %1726 = vperm.xlu2 %4084, %v3870_v27  }
  0xa0   :  { %2475 = vperm.xlu1 %4083, %v3955_v57   ;;  %v4045_v57 = vld [vmem:[%s6027_s8 + $0x220] sm:$0xff]  ;;  %s3700_s8 = sshll.u32 %s4401_s13, 4  ;;  %s3701_s8 = int_to_ptr.vmem [resolvable:$true] %s3700_s8 }
  0xa3   :  { %2485 = vperm.xlu0 %4082, %v3957_v46   ;;  %v164_v46 = vld [vmem:[%s6026_s7 + $0x8] sm:$0xff] }
  0xa4   :  { %1741 = vperm.xlu2 %4084, %v3873_v28  }
  0xa8   :  { %2490 = vperm.xlu1 %4083, %v3958_v59   ;;  %v171_v59 = vld [vmem:[%s6026_s7 + $0x40] sm:$0xff] }
  0xab   :  { %2500 = vperm.xlu0 %4082, %v3960_v48   ;;  %v165_v48 = vld [vmem:[%s6026_s7 + $0x10] sm:$0xff] }
  0xac   :  { %1756 = vperm.xlu2 %4084, %v3876_v29  }
  0xb0   :  { %2505 = vperm.xlu1 %4083, %v3961_v61   ;;  %v173_v61 = vld [vmem:[%s6026_s7 + $0x50] sm:$0xff] }
  0xb3   :  { %2515 = vperm.xlu0 %4082, %v3963_v50   ;;  %v166_v50 = vld [vmem:[%s6026_s7 + $0x18] sm:$0xff] }
  0xb4   :  { %1771 = vperm.xlu2 %4084, %v3879_v30  }
  0xb8   :  { %2520 = vperm.xlu1 %4083, %v3964_v63   ;;  %v175_v63 = vld [vmem:[%s6026_s7 + $0x60] sm:$0xff] }
  0xbb   :  { %3087 = vperm.xlu0 %4082, %v4012_v52   ;;  %v167_v52 = vld [vmem:[%s6026_s7 + $0x20] sm:$0xff] }
  0xbc   :  { %1786 = vperm.xlu2 %4084, %v3882_v31  }
  0xc0   :  { %3125 = vperm.xlu1 %4083, %v4016_v1   ;;  %v176_v1 = vld [vmem:[%s6026_s7 + $0x68] sm:$0xff] }
  0xc3   :  { %3194 = vperm.xlu0 %4082, %v4034_v54   ;;  %v168_v54 = vld [vmem:[%s6026_s7 + $0x28] sm:$0xff] }
  0xc4   :  { %2391 = vperm.xlu2 %4084, %v3934_v32  }
  0xc8   :  { %3199 = vperm.xlu1 %4083, %v4035_v2  }
  0xcb   :  { %3209 = vperm.xlu0 %4082, %v4037_v56   ;;  %v169_v56 = vld [vmem:[%s6026_s7 + $0x30] sm:$0xff] }
  0xcc   :  { %2465 = vperm.xlu2 %4084, %v3953_v33  }
  0xd0   :  { %3214 = vperm.xlu1 %4083, %v4038_v3  }
  0xd3   :  { %3224 = vperm.xlu0 %4082, %v4040_v58   ;;  %v170_v58 = vld [vmem:[%s6026_s7 + $0x38] sm:$0xff] }
  0xd4   :  { %2480 = vperm.xlu2 %4084, %v3956_v38  }
  0xd8   :  { %3229 = vperm.xlu1 %4083, %v4041_v4   ;;  %v199_v4 = vpop.permute.xlu2 %198 }
  0xdb   :  { %3239 = vperm.xlu0 %4082, %v4043_v60   ;;  %v172_v60 = vld [vmem:[%s6026_s7 + $0x48] sm:$0xff] }
  0xdc   :  { %2495 = vperm.xlu2 %4084, %v3959_v40  }
  0xe0   :  { %3244 = vperm.xlu1 %4083, %v4044_v6   ;;  %v194_v6 = vpop.permute.xlu1 %193 }
  0xe3   :  { %3254 = vperm.xlu0 %4082, %v4046_v62   ;;  %v174_v62 = vld [vmem:[%s6026_s7 + $0x58] sm:$0xff] }
  0xe4   :  { %2510 = vperm.xlu2 %4084, %v3962_v45  }
  0xe8   :  { %v214_v16 = vpop.permute.xlu1 %213 }
  0xec   :  { %3046 = vperm.xlu2 %4084, %v4007_v47  }
  0xf4   :  { %3189 = vperm.xlu2 %4084, %v4033_v49   ;;  %v229_v49 = vpop.permute.xlu1 %228 }
  0xfc   :  { %3204 = vperm.xlu2 %4084, %v4036_v51  }
 0x104   :  { %3219 = vperm.xlu2 %4084, %v4039_v53  }
 0x10c   :  { %3234 = vperm.xlu2 %4084, %v4042_v55  }
 0x110   :  { %v118_v9 = vpop.f32.mrf.mxu0 }
 0x111   :  { %v119_v10 = vadd.f32 %v118_v9, %v95_v8  ;;  %v204_v9 = vpop.permute.xlu2 %203 }
 0x113   :  { %v122_v11 = vmin.f32 %v119_v10, 0.0  ;;  %vm121_vm4 = vcmp.gt.f32.partialorder %v119_v10, 0.0 }
 0x114   :  { %3249 = vperm.xlu2 %4084, %v4045_v57  }
 0x115   :  { %v123_v12 = vmul.f32 1.442695, %v122_v11 }
 0x117   :  { %4087 = vpow2.f32 %v123_v12  ;;  %v209_v12 = vpop.permute.xlu0 %208 }
 0x11d   :  { %v4088_v14 = vpop.eup %4087 }
 0x11e   :  { %v3720_v15 = vadd.f32 -1.0, %v4088_v14 }
 0x120   :  { %v126_v18 = vsel %vm121_vm4, %v119_v10, %v3720_v15 }
 0x121   :  { %152 = vmatpush.msra.mxu0 %v126_v18 }
 0x122   :  { %3721 = vmatmul.msk.f32.vlgmr.msra.gmra.mxu0 %vm97_vm3, %v127_v17 }
 0x19f   :  { %v154_v35 = vpop.f32.mrf.mxu0 }
 0x1a0   :  { %v155_v36 = vadd.f32 %v154_v35, %v132_v34 }
 0x1a2   :  { %v158_v37 = vmin.f32 %v155_v36, 0.0  ;;  %vm157_vm5 = vcmp.gt.f32.partialorder %v155_v36, 0.0 }
 0x1a4   :  { %v159_v39 = vmul.f32 1.442695, %v158_v37 }
 0x1a6   :  { %4089 = vpow2.f32 %v159_v39 }
 0x1ac   :  { %v4090_v41 = vpop.eup %4089 }
 0x1ad   :  { %v3722_v42 = vadd.f32 -1.0, %v4090_v41 }
 0x1af   :  { %v162_v44 = vsel %vm157_vm5, %v155_v36, %v3722_v42 }
 0x1b0   :  { %318 = vmatpush.msra.mxu3 %v162_v44  ;;  %v224_v44 = vpop.permute.xlu0 %223 }
 0x1b1   :  { %3723 = vmatmul.msk.f32.vlgmr.msra.gmra.mxu3 %vm97_vm3, %v163_v43  ;;  %v219_v43 = vpop.permute.xlu2 %218 }
 0x1b9   :  { %3724 = vmatmul.msk.f32.gmra.mxu3 %vm97_vm3, %v164_v46 }
 0x1c1   :  { %3725 = vmatmul.msk.f32.gmra.mxu3 %vm97_vm3, %v165_v48 }
 0x1c9   :  { %3726 = vmatmul.msk.f32.gmra.mxu3 %vm97_vm3, %v166_v50 }
 0x1d1   :  { %3727 = vmatmul.msk.f32.gmra.mxu3 %vm97_vm3, %v167_v52 }
 0x1d9   :  { %3728 = vmatmul.msk.f32.gmra.mxu3 %vm97_vm3, %v168_v54  ;;  %v234_v54 = vpop.permute.xlu2 %233 }
 0x1e1   :  { %3729 = vmatmul.msk.f32.gmra.mxu3 %vm97_vm3, %v169_v56 }
 0x1e9   :  { %3730 = vmatmul.msk.f32.gmra.mxu3 %vm97_vm3, %v170_v58 }
 0x1f1   :  { %3731 = vmatmul.msk.f32.gmra.mxu3 %vm97_vm3, %v171_v59 }
 0x1f9   :  { %3732 = vmatmul.msk.f32.gmra.mxu3 %vm97_vm3, %v172_v60 }
 0x201   :  { %3733 = vmatmul.msk.f32.gmra.mxu3 %vm97_vm3, %v173_v61 }
 0x209   :  { %3734 = vmatmul.msk.f32.gmra.mxu3 %vm97_vm3, %v174_v62  ;;  %v239_v62 = vpop.permute.xlu0 %238 }
 0x211   :  { %3735 = vmatmul.msk.f32.gmra.mxu3 %vm97_vm3, %v175_v63 }
 0x219   :  { %3736 = vmatmul.msk.f32.gmra.mxu3 %vm97_vm3, %v176_v1 }
 0x234   :  { %v320_v2 = vpop.f32.mrf.mxu3 }
 0x235   :  { %v321_v10 = vadd.f32 %v320_v2, %v194_v6 }
 0x23c   :  { %v323_v3 = vpop.f32.mrf.mxu3 }
 0x23d   :  { %v324_v8 = vadd.f32 %v323_v3, %v199_v4 }
 0x23f   :  { %v362_v13 = vmax.f32 %v321_v10, %v324_v8 }
 0x244   :  { %v326_v5 = vpop.f32.mrf.mxu3 }
 0x245   :  { %v327_v11 = vadd.f32 %v326_v5, %v204_v9 }
 0x247   :  { %v363_v15 = vmax.f32 %v362_v13, %v327_v11 }
 0x24c   :  { %v329_v7 = vpop.f32.mrf.mxu3 }
 0x24d   :  { %v330_v14 = vadd.f32 %v329_v7, %v209_v12 }
 0x24f   :  { %v364_v18 = vmax.f32 %v363_v15, %v330_v14 }
 0x254   :  { %v332_v17 = vpop.f32.mrf.mxu3 }
 0x255   :  { %v333_v19 = vadd.f32 %v332_v17, %v214_v16 }
 0x257   :  { %v365_v20 = vmax.f32 %v364_v18, %v333_v19 }
 0x259   :  { %v366_v21 = vsub.f32 %v321_v10, %v365_v20  ;;  %v369_v22 = vsub.f32 %v324_v8, %v365_v20  ;;  %v372_v23 = vsub.f32 %v327_v11, %v365_v20  ;;  %v375_v24 = vsub.f32 %v330_v14, %v365_v20 }
 0x25a   :  { %v378_v28 = vsub.f32 %v333_v19, %v365_v20 }
 0x25b   :  { %v367_v25 = vmul.f32 1.442695, %v366_v21  ;;  %v370_v26 = vmul.f32 1.442695, %v369_v22  ;;  %v373_v27 = vmul.f32 1.442695, %v372_v23  ;;  %v244_v23 = vpop.permute.xlu1 %243 }
 0x25c   :  { %v335_v29 = vpop.f32.mrf.mxu3  ;;  %v376_v30 = vmul.f32 1.442695, %v375_v24  ;;  %v379_v31 = vmul.f32 1.442695, %v378_v28 }
 0x25d   :  { %4091 = vpow2.f32 %v367_v25  ;;  %v336_v52 = vadd.f32 %v335_v29, %v219_v43 }
 0x25e   :  { %4093 = vpow2.f32 %v370_v26 }
 0x25f   :  { %4095 = vpow2.f32 %v373_v27 }
 0x260   :  { %4097 = vpow2.f32 %v376_v30 }
 0x261   :  { %4099 = vpow2.f32 %v379_v31 }
 0x263   :  { %v4092_v32 = vpop.eup %4091 }
 0x264   :  { %v4094_v33 = vpop.eup %4093  ;;  %v338_v34 = vpop.f32.mrf.mxu3 }
 0x265   :  { %v381_v35 = vadd.f32 %v4094_v33, %v4092_v32  ;;  %v4096_v36 = vpop.eup %4095  ;;  %v339_v48 = vadd.f32 %v338_v34, %v224_v44 }
 0x266   :  { %v4098_v38 = vpop.eup %4097 }
 0x267   :  { %v382_v37 = vadd.f32 %v4096_v36, %v381_v35  ;;  %v4100_v40 = vpop.eup %4099  ;;  %v428_v57 = vmax.f32 %v336_v52, %v339_v48  ;;  %v4814_v35 = vclamps-f32 %v4480_v0, 3.0 }
 0x269   :  { %v383_v39 = vadd.f32 %v4098_v38, %v382_v37 }
 0x26b   :  { %v384_v41 = vadd.f32 %v4100_v40, %v383_v39 }
 0x26c   :  { %v341_v42 = vpop.f32.mrf.mxu3 }
 0x26d   :  { %4101 = vrcp.f32 %v384_v41  ;;  %v396_v51 = vand.u32 2147483648, %v384_v41  ;;  %v342_v53 = vadd.f32 %v341_v42, %v229_v49  ;;  %v394_v56 = vand.u32 2147483647, %v384_v41 }
 0x26e   :  { %vm390_vm7 = vweird.f32 %v384_v41 }
 0x26f   :  { %v397_v60 = vor.u32 1.1754944e-38, %v396_v51  ;;  %v429_v61 = vmax.f32 %v428_v57, %v342_v53  ;;  %vm395_vm9 = vcmp.eq.f32.partialorder %v394_v56, 8.507059e+37 }
 0x273   :  { %v4102_v45 = vpop.eup %4101 }
 0x274   :  { %v386_v46 = vmul.f32 %v4102_v45, %v384_v41  ;;  %v344_v47 = vpop.f32.mrf.mxu3  ;;  %vm391_vm6 = vweird.f32 %v4102_v45 }
 0x275   :  { %v345_v58 = vadd.f32 %v344_v47, %v234_v54  ;;  %vm392_vm8 = vmor %vm390_vm7, %vm391_vm6 }
 0x276   :  { %v387_v50 = vsub.f32 1.0, %v386_v46 }
 0x277   :  { %v430_v3 = vmax.f32 %v429_v61, %v345_v58 }
 0x278   :  { %v388_v55 = vmul.f32 %v4102_v45, %v387_v50  ;;  %v4399_v50 = vmov 0.0  }
 0x27a   :  { %v389_v59 = vadd.f32 %v4102_v45, %v388_v55 }
 0x27c   :  { %v393_v63 = vsel %vm392_vm8, %v4102_v45, %v389_v59  ;;  %v347_v1 = vpop.f32.mrf.mxu3 }
 0x27d   :  { %v398_v2 = vsel %vm395_vm9, %v397_v60, %v393_v63  ;;  %v348_v4 = vadd.f32 %v347_v1, %v239_v62 }
 0x27e   :  { %v399_v5 = vmul.f32 %v4092_v32, %v398_v2  ;;  %v402_v6 = vmul.f32 %v4094_v33, %v398_v2  ;;  %v405_v7 = vmul.f32 %v4096_v36, %v398_v2  ;;  %v408_v8 = vmul.f32 %v4098_v38, %v398_v2 }
 0x27f   :  { %v431_v9 = vmax.f32 %v430_v3, %v348_v4 }
 0x280   :  { %v400_v10 = vmul.f32 0.995, %v399_v5  ;;  %v403_v11 = vmul.f32 0.995, %v402_v6  ;;  %v406_v12 = vmul.f32 0.995, %v405_v7 }
 0x281   :  { %v409_v13 = vmul.f32 0.995, %v408_v8  ;;  %v432_v14 = vsub.f32 %v336_v52, %v431_v9  ;;  %v435_v15 = vsub.f32 %v339_v48, %v431_v9  ;;  %v438_v16 = vsub.f32 %v342_v53, %v431_v9 }
 0x282   :  { %v401_v17 = vadd.f32 0.001, %v400_v10  ;;  %v404_v18 = vadd.f32 0.001, %v403_v11  ;;  %v441_v19 = vsub.f32 %v345_v58, %v431_v9  ;;  %v444_v22 = vsub.f32 %v348_v4, %v431_v9  ;;  %v249_v4 = vpop.permute.xlu2 %248 }
 0x283   :  { %v433_v20 = vmul.f32 1.442695, %v432_v14  ;;  %v436_v21 = vmul.f32 1.442695, %v435_v15  ;;  %v407_v24 = vadd.f32 0.001, %v406_v12 }
 0x284   :  { %v412_v25 = vmul.f32 6.0, %v401_v17  ;;  %v414_v26 = vadd.f32 %v404_v18, %v401_v17  ;;  %v439_v27 = vmul.f32 1.442695, %v438_v16  ;;  %v350_v28 = vpop.f32.mrf.mxu3  ;;  %v410_v29 = vadd.f32 0.001, %v409_v13 }
 0x285   :  { %4103 = vpow2.f32 %v433_v20  ;;  %v442_v30 = vmul.f32 1.442695, %v441_v19  ;;  %v4809_v31 = vadd.f32 %v350_v28, %v244_v23  ;;  %v445_v36 = vmul.f32 1.442695, %v444_v22  ;;  %v254_v22 = vpop.permute.xlu0 %253 }
 0x286   :  { %v4811_v32 = vadd.f32 -3.0, %v412_v25  ;;  %v415_v33 = vmul.f32 6.0, %v414_v26  ;;  %v417_v34 = vadd.f32 %v414_v26, %v407_v24  ;;  %4105 = vpow2.f32 %v436_v21 }
 0x287   :  { %v495_v37 = vand.u32 2147483647, %v4809_v31  ;;  %4107 = vpow2.f32 %v439_v27 }
 0x288   :  { %v4817_v38 = vadd.f32 -3.0, %v415_v33  ;;  %v418_v39 = vmul.f32 6.0, %v417_v34  ;;  %v420_v40 = vadd.f32 %v417_v34, %v410_v29  ;;  %v540_v42 = vrot.slane %v4811_v32, 4 }
 0x289   :  { %v496_v41 = vsub.f32 0.0, %v495_v37  ;;  %4109 = vpow2.f32 %v442_v30  ;;  %v3741_v49 = vadd.f32 3.0, %v4811_v32 }
 0x28a   :  { %v4820_v43 = vadd.f32 -3.0, %v418_v39  ;;  %v421_v44 = vmul.f32 6.0, %v420_v40  ;;  %vm542_vm10 = vcmp.ge.f32.partialorder %v4814_v35, %v540_v42  ;;  %v546_v0 = vrot.slane %v4817_v38, 4  ;;  %v259_v39 = vpop.permute.xlu1 %258 }
 0x28b   :  { %v4822_v45 = vpop.eup %4103  ;;  %v497_v46 = vmul.f32 1.442695, %v496_v41  ;;  %4111 = vpow2.f32 %v445_v36  ;;  %v3748_v51 = vsel %vm542_vm10, 1.0, %v4399_v50  ;;  %v424_v56 = vsub.f32 %v4817_v38, %v4811_v32 }
 0x28c   :  { %v4828_v47 = vpop.eup %4105  ;;  %v4830_v48 = vadd.f32 -3.0, %v421_v44  ;;  %v353_v52 = vpop.f32.mrf.mxu3  ;;  %vm548_vm11 = vcmp.ge.f32.partialorder %v4814_v35, %v546_v0  ;;  %v552_v54 = vrot.slane %v4820_v43, 4  ;;  %v425_v61 = vsub.f32 %v4820_v43, %v4817_v38 }
 0x28d   :  { %v447_v53 = vadd.f32 %v4828_v47, %v4822_v45  ;;  %4113 = vpow2.f32 %v497_v46  ;;  %v4840_v55 = vpop.eup %4107  ;;  %v3749_v59 = vsel %vm548_vm11, 1.0, %v4399_v50  ;;  %v4858_v63 = vsub.f32 1.0, %v3748_v51 }
 0x28e   :  { %v558_v57 = vrot.slane %v4830_v48, 4  ;;  %vm554_vm12 = vcmp.ge.f32.partialorder %v4814_v35, %v552_v54  ;;  %v567_v1 = vrot.slane %v3741_v49, 4  ;;  %v586_v6 = vrot.slane %v424_v56, 4 }
 0x28f   :  { %v448_v58 = vadd.f32 %v4840_v55, %v447_v53  ;;  %v4850_v60 = vpop.eup %4109  ;;  %v3750_v62 = vsel %vm554_vm12, 1.0, %v4399_v50  ;;  %v4864_v7 = vsub.f32 %v3748_v51, %v3749_v59  ;;  %v426_v10 = vsub.f32 %v4830_v48, %v4820_v43 }
 0x290   :  { %vm560_vm13 = vcmp.ge.f32.partialorder %v4814_v35, %v558_v57  ;;  %v4866_v8 = vsub.f32 %v3749_v59, %v3750_v62  ;;  %v427_v11 = vsub.f32 3.0, %v4830_v48  ;;  %v4871_v13 = vadd.f32 %v353_v52, %v249_v4 }
 0x291   :  { %v449_v2 = vadd.f32 %v4850_v60, %v448_v58  ;;  %v4112_v3 = vpop.eup %4111  ;;  %v4862_v5 = vsel %vm560_vm13, 1.0, %v4399_v50  ;;  %v611_v14 = vrot.slane %v425_v61, 4  ;;  %v569_v15 = vmul.f32 %v567_v1, %v4858_v63 }
 0x292   :  { %v588_v16 = vmul.f32 %v586_v6, %v4864_v7  ;;  %v4876_v18 = vsub.f32 %v3750_v62, %v4862_v5  ;;  %v636_v23 = vrot.slane %v426_v10, 4  ;;  %v660_v24 = vrot.slane %v427_v11, 4 }
 0x293   :  { %v4114_v9 = vpop.eup %4113  ;;  %v450_v12 = vadd.f32 %v4112_v3, %v449_v2  ;;  %v613_v21 = vmul.f32 %v611_v14, %v4866_v8  ;;  %v505_v25 = vand.u32 2147483647, %v4871_v13  ;;  %v583_v46 = vmul.f32 %v4864_v7, %v540_v42 }
 0x294   :  { %v356_v17 = vpop.f32.mrf.mxu3  ;;  %v499_v19 = vadd.f32 1.0, %v4114_v9  ;;  %v589_v20 = vadd.f32 %v588_v16, %v569_v15  ;;  %v638_v29 = vmul.f32 %v636_v23, %v4876_v18  ;;  %v662_v34 = vmul.f32 %v4862_v5, %v660_v24 }
 0x295   :  { %4115 = vrcp.f32 %v450_v12  ;;  %v4880_v27 = vadd.f32 %v356_v17, %v254_v22  ;;  %v506_v28 = vsub.f32 0.0, %v505_v25  ;;  %v462_v56 = vand.u32 2147483648, %v450_v12 }
 0x296   :  { %v614_v26 = vadd.f32 %v613_v21, %v589_v20  ;;  %4117 = vlog2.f32 %v499_v19  ;;  %v4893_v58 = vmul.f32 -3.0, %v4858_v63  ;;  %v460_v32 = vand.u32 2147483647, %v450_v12 }
 0x297   :  { %v515_v30 = vand.u32 2147483647, %v4880_v27  ;;  %v507_v36 = vmul.f32 1.442695, %v506_v28  ;;  %v608_v1 = vmul.f32 %v4866_v8, %v546_v0  ;;  %vm456_vm15 = vweird.f32 %v450_v12 }
 0x298   :  { %v639_v37 = vadd.f32 %v638_v29, %v614_v26  ;;  %v584_v42 = vadd.f32 %v583_v46, %v4893_v58  ;;  %v463_v6 = vor.u32 1.1754944e-38, %v462_v56  ;;  %vm461_vm4 = vcmp.eq.f32.partialorder %v460_v32, 8.507059e+37 }
 0x299   :  { %v516_v41 = vsub.f32 0.0, %v515_v30  ;;  %4119 = vpow2.f32 %v507_v36  ;;  %v494_v14 = vmax.f32 %v4809_v31, 0.0  ;;  %v633_v38 = vmul.f32 %v4876_v18, %v552_v54 }
 0x29a   :  { %v4890_v51 = vadd.f32 %v662_v34, %v639_v37  ;;  %v609_v19 = vadd.f32 %v608_v1, %v584_v42 }
 0x29b   :  { %v4116_v33 = vpop.eup %4115  ;;  %v517_v53 = vmul.f32 1.442695, %v516_v41 }
 0x29c   :  { %v452_v40 = vmul.f32 %v4116_v33, %v450_v12  ;;  %v359_v44 = vpop.f32.mrf.mxu3  ;;  %4121 = vrcp.f32 %v4890_v51  ;;  %v4118_v61 = vpop.eup %4117  ;;  %vm457_vm14 = vweird.f32 %v4116_v33  ;;  %v634_v54 = vadd.f32 %v633_v38, %v609_v19 }
 0x29d   :  { %v4888_v49 = vadd.f32 %v359_v44, %v259_v39  ;;  %4123 = vpow2.f32 %v517_v53  ;;  %vm458_vm2 = vmor %vm456_vm15, %vm457_vm14  ;;  %v501_v9 = vmul.f32 0.6931472, %v4118_v61  ;;  %v514_v44 = vmax.f32 %v4880_v27, 0.0 }
 0x29e   :  { %v453_v52 = vsub.f32 1.0, %v452_v40  ;;  %vm682_vm6 = vweird.f32 %v4890_v51 }
 0x29f   :  { %v525_v59 = vand.u32 2147483647, %v4888_v49  ;;  %v4120_v4 = vpop.eup %4119  ;;  %v502_v31 = vadd.f32 %v501_v9, %v494_v14 }
 0x2a0   :  { %v454_v62 = vmul.f32 %v4116_v33, %v453_v52  ;;  %v509_v15 = vadd.f32 1.0, %v4120_v4 }
 0x2a1   :  { %v526_v2 = vsub.f32 0.0, %v525_v59 }
 0x2a2   :  { %v455_v3 = vadd.f32 %v4116_v33, %v454_v62  ;;  %v4902_v16 = vpop.eup %4121  ;;  %v688_v62 = vand.u32 2147483648, %v4890_v51 }
 0x2a3   :  { %v527_v10 = vmul.f32 1.442695, %v526_v2  ;;  %v4124_v0 = vpop.eup %4123  ;;  %v678_v24 = vmul.f32 %v4902_v16, %v4890_v51  ;;  %vm683_vm5 = vweird.f32 %v4902_v16 }
 0x2a4   :  { %v459_v11 = vsel %vm458_vm2, %v4116_v33, %v455_v3  ;;  %v519_v23 = vadd.f32 1.0, %v4124_v0  ;;  %v4913_v33 = vadd.f32 0.001, %v502_v31  ;;  %vm4941_vm7 = vmor %vm682_vm6, %vm683_vm5  ;;  %v689_v31 = vor.u32 1.1754944e-38, %v688_v62 }
 0x2a5   :  { %v464_v17 = vsel %vm461_vm4, %v463_v6, %v459_v11  ;;  %4125 = vpow2.f32 %v527_v10  ;;  %v679_v29 = vsub.f32 1.0, %v678_v24 }
 0x2a6   :  { %v465_v12 = vmul.f32 %v4822_v45, %v464_v17  ;;  %v468_v20 = vmul.f32 %v4828_v47, %v464_v17  ;;  %v471_v21 = vmul.f32 %v4840_v55, %v464_v17  ;;  %v474_v22 = vmul.f32 %v4850_v60, %v464_v17 }
 0x2a7   :  { %4127 = vlog2.f32 %v509_v15  ;;  %v504_v55 = vmax.f32 %v4871_v13, 0.0  ;;  %v657_v60 = vmul.f32 %v4862_v5, %v558_v57  ;;  %v680_v52 = vmul.f32 %v4902_v16, %v679_v29 }
 0x2a8   :  { %v466_v25 = vmul.f32 0.995, %v465_v12  ;;  %v469_v26 = vmul.f32 0.995, %v468_v20  ;;  %v472_v43 = vmul.f32 0.995, %v471_v21  ;;  %4129 = vlog2.f32 %v519_v23 }
 0x2a9   :  { %v475_v28 = vmul.f32 0.995, %v474_v22  ;;  %v658_v46 = vadd.f32 %v657_v60, %v634_v54  ;;  %v578_v48 = vrot.slane %v4913_v33, 4  ;;  %v686_v57 = vand.u32 2147483647, %v4890_v51 }
 0x2aa   :  { %v467_v45 = vadd.f32 0.001, %v466_v25  ;;  %v470_v30 = vadd.f32 0.001, %v469_v26  ;;  %v473_v34 = vadd.f32 0.001, %v472_v43  ;;  %v681_v4 = vadd.f32 %v4902_v16, %v680_v52 }
 0x2ab   :  { %v4126_v47 = vpop.eup %4125  ;;  %v476_v41 = vadd.f32 0.001, %v475_v28  ;;  %v524_v15 = vmax.f32 %v4888_v49, 0.0  ;;  %vm687_vm8 = vcmp.eq.f32.partialorder %v686_v57, 8.507059e+37  ;;  %v600_v51 = vmul.f32 %v4864_v7, %v578_v48 }
 0x2ac   :  { %v478_v36 = vmul.f32 6.0, %v467_v45  ;;  %v480_v37 = vadd.f32 %v470_v30, %v467_v45  ;;  %v529_v39 = vadd.f32 1.0, %v4126_v47  ;;  %v685_v49 = vsel %vm4941_vm7, %v4902_v16, %v681_v4 }
 0x2ad   :  { %v4128_v40 = vpop.eup %4127  ;;  %v690_v45 = vsel %vm687_vm8, %v689_v31, %v685_v49  ;;  %v692_v30 = vsub.f32 %v4814_v35, %v658_v46  ;;  %v580_v60 = vmul.f32 %v578_v48, %v4858_v63 }
 0x2ae   :  { %v4921_v53 = vadd.f32 -3.0, %v478_v36  ;;  %v481_v56 = vmul.f32 6.0, %v480_v37  ;;  %v483_v59 = vadd.f32 %v480_v37, %v473_v34  ;;  %v511_v13 = vmul.f32 0.6931472, %v4128_v40  ;;  %v4130_v61 = vpop.eup %4129 }
 0x2af   :  { %4131 = vlog2.f32 %v529_v39  ;;  %v521_v2 = vmul.f32 0.6931472, %v4130_v61  ;;  %v601_v39 = vadd.f32 %v600_v51, %v4858_v63  ;;  %v693_v46 = vmul.f32 %v692_v30, %v690_v45 }
 0x2b0   :  { %v4926_v32 = vadd.f32 -3.0, %v481_v56  ;;  %v484_v42 = vmul.f32 6.0, %v483_v59  ;;  %v486_v27 = vadd.f32 %v483_v59, %v476_v41  ;;  %v512_v1 = vadd.f32 %v511_v13, %v504_v55 }
 0x2b1   :  { %v3746_v3 = vadd.f32 3.0, %v4921_v53  ;;  %v522_v14 = vadd.f32 %v521_v2, %v514_v44  ;;  %v591_v49 = vrot.slane %v4921_v53, 4 }
 0x2b2   :  { %v4931_v6 = vadd.f32 -3.0, %v484_v42  ;;  %v487_v9 = vmul.f32 6.0, %v486_v27  ;;  %v513_v10 = vadd.f32 0.001, %v512_v1  ;;  %v490_v11 = vsub.f32 %v4926_v32, %v4921_v53 }
 0x2b3   :  { %v572_v17 = vrot.slane %v3746_v3, 4  ;;  %v523_v22 = vadd.f32 0.001, %v522_v14  ;;  %v694_v27 = vsub.f32 1.0, %v693_v46 }
 0x2b4   :  { %v4937_v19 = vadd.f32 -3.0, %v487_v9  ;;  %v491_v38 = vsub.f32 %v4931_v6, %v4926_v32  ;;  %v596_v0 = vrot.slane %v490_v11, 4  ;;  %v603_v21 = vrot.slane %v513_v10, 4 }
 0x2b5   :  { %v4132_v20 = vpop.eup %4131  ;;  %v574_v25 = vmul.f32 %v572_v17, %v4858_v63  ;;  %v628_v26 = vrot.slane %v523_v22, 4  ;;  %v695_v10 = vmul.f32 %v694_v27, %v693_v46 }
 0x2b6   :  { %v492_v23 = vsub.f32 %v4937_v19, %v4931_v6  ;;  %v493_v24 = vsub.f32 3.0, %v4937_v19  ;;  %v531_v43 = vmul.f32 0.6931472, %v4132_v20  ;;  %v598_v28 = vmul.f32 %v596_v0, %v4864_v7  ;;  %v738_v0 = vld [vmem:[%s6028_s9] sm:$0xf] }
 0x2b7   :  { %v621_v54 = vrot.slane %v491_v38, 4  ;;  %v605_v16 = vmul.f32 %v603_v21, %v4864_v7  ;;  %v625_v47 = vmul.f32 %v4866_v8, %v603_v21  ;;  %v630_v40 = vmul.f32 %v628_v26, %v4866_v8  ;;  %3755 = vmatmul.msk.f32.vlgmr.msra.gmra.mxu1 %vm56_vm1, %v738_v0 }
 0x2b8   :  { %v646_v29 = vrot.slane %v492_v23, 4  ;;  %v532_v33 = vadd.f32 %v531_v43, %v524_v15  ;;  %v599_v55 = vadd.f32 %v598_v28, %v574_v25  ;;  %v670_v37 = vrot.slane %v493_v24, 4 }
 0x2b9   :  { %v623_v34 = vmul.f32 %v621_v54, %v4866_v8  ;;  %v650_v41 = vmul.f32 %v4876_v18, %v628_v26  ;;  %v606_v52 = vadd.f32 %v605_v16, %v580_v60  ;;  %v626_v56 = vadd.f32 %v625_v47, %v601_v39 }
 0x2ba   :  { %v648_v36 = vmul.f32 %v646_v29, %v4876_v18  ;;  %v533_v35 = vadd.f32 0.001, %v532_v33  ;;  %v672_v61 = vmul.f32 %v4862_v5, %v670_v37  ;;  %v593_v25 = vmul.f32 %v591_v49, %v4864_v7 }
 0x2bb   :  { %v624_v44 = vadd.f32 %v623_v34, %v599_v55  ;;  %v631_v48 = vadd.f32 %v630_v40, %v606_v52  ;;  %v651_v57 = vadd.f32 %v650_v41, %v626_v56  ;;  %v616_v26 = vrot.slane %v4926_v32, 4 }
 0x2bc   :  { %v653_v59 = vrot.slane %v533_v35, 4  ;;  %v594_v28 = vadd.f32 %v593_v25, %v4893_v58  ;;  %v641_v29 = vrot.slane %v4931_v6, 4  ;;  %v665_v53 = vrot.slane %v4937_v19, 4  ;;  %v4345_v6 = vld [vmem:[%s6019_s0] sm:$0xff] }
 0x2bd   :  { %v649_v13 = vadd.f32 %v648_v36, %v624_v44  ;;  %v618_v54 = vmul.f32 %v616_v26, %v4866_v8  ;;  %vm534_vm11 = vcmp.ge.f32.partialorder %v4345_v6, -3.0  ;;  %vm535_vm13 = vcmp.le.f32.partialorder %v4345_v6, 3.0  ;;  %v924_v26 = vpop.permute.xlu1 %923 }
 0x2be   :  { %v655_v62 = vmul.f32 %v653_v59, %v4876_v18  ;;  %v674_v42 = vmul.f32 %v4862_v5, %v653_v59  ;;  %v643_v55 = vmul.f32 %v641_v29, %v4876_v18  ;;  %v667_v8 = vmul.f32 %v4862_v5, %v665_v53  ;;  %vm4983_vm15 = vmand %vm534_vm11, %vm535_vm13  ;;  %v3780_v53 = vld [vmem:[%s6026_s7 + $0xa8] sm:$0xff] }
 0x2bf   :  { %v673_v63 = vadd.f32 %v672_v61, %v649_v13  ;;  %v619_v33 = vadd.f32 %v618_v54, %v594_v28  ;;  %v739_v13 = vld [vmem:[%s6029_s10] sm:$0xf] }
 0x2c0   :  { %v656_v1 = vadd.f32 %v655_v62, %v631_v48  ;;  %v675_v2 = vadd.f32 %v674_v42, %v651_v57 }
 0x2c1   :  { %v691_v3 = vmul.f32 %v690_v45, %v673_v63  ;;  %v644_v58 = vadd.f32 %v643_v55, %v619_v33  ;;  %v3774_v33 = vld [vmem:[%s6026_s7 + $0x78] sm:$0xff]  ;;  %v3781_v55 = vld [vmem:[%s6026_s7 + $0xb0] sm:$0xff] }
 0x2c2   :  { %v676_v4 = vadd.f32 %v4862_v5, %v656_v1  ;;  %v727_v9 = vmul.f32 %v694_v27, %v675_v2  ;;  %v698_v47 = vmul.f32 %v695_v10, %v675_v2  ;;  %v791_v1 = vld [vmem:[%s6031_s12] sm:$0xf] }
 0x2c3   :  { %v702_v11 = vmul.f32 2.0, %v691_v3  ;;  %v722_v51 = vmul.f32 %v691_v3, %v691_v3  ;;  %v696_v43 = vmul.f32 %v693_v46, %v691_v3  ;;  %v668_v41 = vadd.f32 %v667_v8, %v644_v58  ;;  %v3784_v58 = vld [vmem:[%s6026_s7 + $0xc8] sm:$0xff]  ;;  %v3778_v8 = vld [vmem:[%s6026_s7 + $0x98] sm:$0xff] }
 0x2c4   :  { %v701_v14 = vadd.f32 %v676_v4, %v675_v2  ;;  %v723_v15 = vmul.f32 %v693_v46, %v676_v4  ;;  %v728_v17 = vmul.f32 %v727_v9, %v694_v27  ;;  %v3760_v27 = vld [vmem:[%s6020_s1 + $0x8] sm:$0xff]  ;;  %v790_v2 = vld [vmem:[%s6030_s11] sm:$0xf] }
 0x2c5   :  { %v725_v38 = vmul.f32 %v702_v11, %v695_v10  ;;  %v697_v30 = vmul.f32 %v696_v43, %v693_v46 }
 0x2c6   :  { %v703_v12 = vsub.f32 %v701_v14, %v702_v11  ;;  %v724_v20 = vmul.f32 %v723_v15, %v693_v46 }
 0x2c7   :  { %v699_v34 = vadd.f32 %v698_v47, %v697_v30 }
 0x2c8   :  { %v704_v21 = vmul.f32 %v703_v12, %v695_v10  ;;  %v726_v22 = vadd.f32 %v725_v38, %v724_v20  ;;  %v886_v12 = vpop.permute.xlu0 %885 }
 0x2c9   :  { %v700_v39 = vmul.f32 %v699_v34, %v673_v63  ;;  %v3776_v34 = vld [vmem:[%s6026_s7 + $0x88] sm:$0xff] }
 0x2ca   :  { %v705_v31 = vadd.f32 %v704_v21, %v691_v3  ;;  %v729_v23 = vadd.f32 %v728_v17, %v726_v22  ;;  %v845_v3 = vpop.permute.xlu2 %844  ;;  %v3765_v17 = vld [vmem:[%s6022_s3 + $0x8] sm:$0xff] }
 0x2cc   :  { %4133 = vrcp.f32 %v705_v31  ;;  %v730_v24 = vmul.f32 %v729_v23, %v722_v51  ;;  %v717_v7 = vand.u32 2147483648, %v705_v31  ;;  %v715_v36 = vand.u32 2147483647, %v705_v31  ;;  %v3769_v23 = vld [vmem:[%s6024_s5 + $0x8] sm:$0xff] }
 0x2cd   :  { %vm711_vm10 = vweird.f32 %v705_v31 }
 0x2ce   :  { %v718_v19 = vor.u32 1.1754944e-38, %v717_v7  ;;  %vm716_vm14 = vcmp.eq.f32.partialorder %v715_v36, 8.507059e+37  ;;  %v3782_v7 = vld [vmem:[%s6026_s7 + $0xb8] sm:$0xff]  ;;  %v3777_v36 = vld [vmem:[%s6026_s7 + $0x90] sm:$0xff] }
 0x2d2   :  { %v4134_v45 = vpop.eup %4133 }
 0x2d3   :  { %v707_v16 = vmul.f32 %v4134_v45, %v705_v31  ;;  %vm712_vm9 = vweird.f32 %v4134_v45 }
 0x2d4   :  { %vm713_vm12 = vmor %vm711_vm10, %vm712_vm9 }
 0x2d5   :  { %v708_v60 = vsub.f32 1.0, %v707_v16  ;;  %v3773_v16 = vld [vmem:[%s6026_s7 + $0x70] sm:$0xff] }
 0x2d7   :  { %v709_v32 = vmul.f32 %v4134_v45, %v708_v60  ;;  %v3775_v60 = vld [vmem:[%s6026_s7 + $0x80] sm:$0xff] }
 0x2d9   :  { %v710_v37 = vadd.f32 %v4134_v45, %v709_v32  ;;  %v3783_v32 = vld [vmem:[%s6026_s7 + $0xc0] sm:$0xff] }
 0x2db   :  { %v714_v18 = vsel %vm713_vm12, %v4134_v45, %v710_v37  ;;  %v3785_v37 = vld [vmem:[%s6026_s7 + $0xd0] sm:$0xff] }
 0x2dc   :  { %v719_v40 = vsel %vm716_vm14, %v718_v19, %v714_v18  ;;  %v3786_v19 = vld [vmem:[%s6026_s7 + $0xd8] sm:$0xff] }
 0x2dd   :  { %v720_v35 = vmul.f32 %v719_v40, %v700_v39  ;;  %v731_v44 = vmul.f32 %v730_v24, %v719_v40 }
 0x2df   :  { %v721_v5 = vadd.f32 %v720_v35, %v668_v41  ;;  %v732_v52 = vmul.f32 %v731_v44, %v719_v40  ;;  %v988_v41 = vpop.permute.xlu2 %987  ;;  %v993_v44 = vpop.permute.xlu0 %992 }
 0x2e1   :  { %v735_v56 = vsel %vm4983_vm15, %v721_v5, %v4345_v6  ;;  %4135 = vlog2.f32 %v732_v52  ;;  %v998_v52 = vpop.permute.xlu1 %997 }
 0x2e2   :  { %v741_v59 = vrot.slane %v735_v56, 4 }
 0x2e4   :  { %3752 = vmatpush.msk.msrb.mxu0 %vm60_vm0, %v741_v59  ;;  %3756 = vmatpush.msk.msra.mxu2 %vm60_vm0, %v741_v59 }
 0x2e5   :  { %3753 = vmatmul.msk.f32.vlgmr.msrb.gmra.mxu0 %vm56_vm1, %v739_v13  ;;  %3757 = vmatmul.msk.f32.vlgmr.msra.gmra.mxu2 %vm56_vm1, %v791_v1 }
 0x2e6   :  { %3758 = vmatpush.msk.msra.mxu0 %vm60_vm0, %v4345_v6  ;;  %v3779_v6 = vld [vmem:[%s6026_s7 + $0xa0] sm:$0xff] }
 0x2e7   :  { %v4136_v61 = vpop.eup %4135  ;;  %v1003_v56 = vpop.permute.xlu2 %1002 }
 0x2e8   :  { %v4996_v48 = vmul.f32 0.6931472, %v4136_v61 }
 0x2ea   :  { %v736_v57 = vsel %vm4983_vm15, %v4996_v48, 0.0 }
 0x2ed   :  { %3759 = vmatmul.msk.f32.vlgmr.msra.gmra.mxu0 %vm56_vm1, %v790_v2 }
 0x334   :  { %v787_v62 = vpop.f32.mrf.mxu1 }
 0x362   :  { %v764_v42 = vpop.f32.mrf.mxu0 }
 0x363   :  { %v788_v63 = vadd.f32 %v787_v62, %v764_v42  ;;  %v1008_v62 = vpop.permute.xlu0 %1007  ;;  %v1013_v42 = vpop.permute.xlu1 %1012 }
 0x365   :  { %3762 = vmatpush.msk.msrb.mxu1 %vm60_vm0, %v788_v63 }
 0x366   :  { %3763 = vmatmul.msk.f32.vlgmr.msrb.gmra.mxu1 %vm56_vm1, %v3760_v27 }
 0x368   :  { %v5018_v0 = vpop.f32.mrf.mxu2 }
 0x36a   :  { %v5026_v25 = vpop.f32.mrf.mxu0 }
 0x3e3   :  { %v870_v4 = vpop.f32.mrf.mxu1 }
 0x3e4   :  { %v871_v9 = vadd.f32 %v870_v4, %v845_v3  ;;  %v1018_v3 = vpop.permute.xlu2 %1017 }
 0x3e6   :  { %v874_v10 = vmin.f32 %v871_v9, 0.0  ;;  %vm873_vm2 = vcmp.gt.f32.partialorder %v871_v9, 0.0 }
 0x3e8   :  { %v875_v11 = vmul.f32 1.442695, %v874_v10 }
 0x3ea   :  { %4137 = vpow2.f32 %v875_v11 }
 0x3f0   :  { %v4138_v14 = vpop.eup %4137 }
 0x3f1   :  { %v3764_v15 = vadd.f32 -1.0, %v4138_v14 }
 0x3f3   :  { %v878_v38 = vsel %vm873_vm2, %v871_v9, %v3764_v15 }
 0x3f4   :  { %906 = vmatpush.msrb.mxu2 %v878_v38  ;;  %v1028_v38 = vpop.permute.xlu1 %1027 }
 0x3f5   :  { %3767 = vmatmul.msk.f32.vlgmr.msrb.gmra.mxu2 %vm97_vm3, %v3765_v17  ;;  %v1023_v17 = vpop.permute.xlu0 %1022 }
 0x478   :  { %v908_v20 = vpop.f32.mrf.mxu2 }
 0x479   :  { %v909_v21 = vadd.f32 %v908_v20, %v886_v12 }
 0x47b   :  { %v912_v22 = vmin.f32 %v909_v21, 0.0  ;;  %vm911_vm4 = vcmp.gt.f32.partialorder %v909_v21, 0.0 }
 0x47d   :  { %v913_v49 = vmul.f32 1.442695, %v912_v22 }
 0x47f   :  { %4139 = vpow2.f32 %v913_v49 }
 0x485   :  { %v4140_v31 = vpop.eup %4139 }
 0x486   :  { %v3768_v51 = vadd.f32 -1.0, %v4140_v31 }
 0x488   :  { %v916_v24 = vsel %vm911_vm4, %v909_v21, %v3768_v51 }
 0x489   :  { %944 = vmatpush.msrb.mxu0 %v916_v24 }
 0x48a   :  { %3771 = vmatmul.msk.f32.vlgmr.msrb.gmra.mxu0 %vm97_vm3, %v3769_v23  ;;  %v1033_v23 = vpop.permute.xlu2 %1032 }
 0x48b   :  { %3834 = vmatpush.msk.msra.mxu0 %vm60_vm0, %v788_v63 }
 0x48d   :  { %3840 = vmatpush.msk.msrb.mxu0 %vm60_vm0, %v788_v63 }
 0x507   :  { %v946_v43 = vpop.f32.mrf.mxu0 }
 0x508   :  { %v947_v28 = vadd.f32 %v946_v43, %v924_v26 }
 0x50a   :  { %v950_v54 = vmin.f32 %v947_v28, 0.0  ;;  %vm949_vm5 = vcmp.gt.f32.partialorder %v947_v28, 0.0 }
 0x50c   :  { %v951_v29 = vmul.f32 1.442695, %v950_v54 }
 0x50e   :  { %4141 = vpow2.f32 %v951_v29  ;;  %v1038_v29 = vpop.permute.xlu0 %1037 }
 0x514   :  { %v4142_v45 = vpop.eup %4141 }
 0x515   :  { %v3772_v30 = vadd.f32 -1.0, %v4142_v45 }
 0x517   :  { %v954_v47 = vsel %vm949_vm5, %v947_v28, %v3772_v30  ;;  %v1043_v30 = vpop.permute.xlu1 %1042 }
 0x518   :  { %1112 = vmatpush.msra.mxu1 %v954_v47  ;;  %4076 = vmatpush.msrb.mxu3 %v954_v47 }
 0x519   :  { %3801 = vmatmul.msk.f32.vlgmr.msra.gmra.mxu1 %vm97_vm3, %v3773_v16  ;;  %3808 = vmatmul.msk.f32.vlgmr.msrb.gmra.mxu3 %vm97_vm3, %v3780_v53 }
 0x51f   :  { %v1579_v48 = vpop.permute.xlu1 %1578 }
 0x521   :  { %3802 = vmatmul.msk.f32.gmra.mxu1 %vm97_vm3, %v3774_v33  ;;  %3809 = vmatmul.msk.f32.gmra.mxu3 %vm97_vm3, %v3781_v55 }
 0x529   :  { %3803 = vmatmul.msk.f32.gmra.mxu1 %vm97_vm3, %v3775_v60  ;;  %3810 = vmatmul.msk.f32.gmra.mxu3 %vm97_vm3, %v3782_v7 }
 0x531   :  { %3804 = vmatmul.msk.f32.gmra.mxu1 %vm97_vm3, %v3776_v34  ;;  %3811 = vmatmul.msk.f32.gmra.mxu3 %vm97_vm3, %v3783_v32  ;;  %v1048_v34 = vpop.permute.xlu2 %1047 }
 0x539   :  { %3805 = vmatmul.msk.f32.gmra.mxu1 %vm97_vm3, %v3777_v36  ;;  %3812 = vmatmul.msk.f32.gmra.mxu3 %vm97_vm3, %v3784_v58 }
 0x541   :  { %3806 = vmatmul.msk.f32.gmra.mxu1 %vm97_vm3, %v3778_v8  ;;  %3813 = vmatmul.msk.f32.gmra.mxu3 %vm97_vm3, %v3785_v37 }
 0x549   :  { %3807 = vmatmul.msk.f32.gmra.mxu1 %vm97_vm3, %v3779_v6  ;;  %3814 = vmatmul.msk.f32.gmra.mxu3 %vm97_vm3, %v3786_v19 }
 0x596   :  { %v1114_v39 = vpop.f32.mrf.mxu1 }
 0x597   :  { %v1115_v63 = vadd.f32 %v1114_v39, %v988_v41 }
 0x59c   :  { %v1135_v18 = vpop.f32.mrf.mxu3 }
 0x59d   :  { %v1136_v19 = vadd.f32 %v1135_v18, %v1023_v17 }
 0x59e   :  { %v1117_v40 = vpop.f32.mrf.mxu1 }
 0x59f   :  { %v1118_v61 = vadd.f32 %v1117_v40, %v993_v44 }
 0x5a1   :  { %v1156_v1 = vmax.f32 %v1115_v63, %v1118_v61 }
 0x5a4   :  { %v5084_v35 = vpop.f32.mrf.mxu3 }
 0x5a6   :  { %v1120_v5 = vpop.f32.mrf.mxu1 }
 0x5a7   :  { %v1121_v27 = vadd.f32 %v1120_v5, %v998_v52  ;;  %v1139_v5 = vadd.f32 %v5084_v35, %v1028_v38 }
 0x5a9   :  { %v1157_v9 = vmax.f32 %v1156_v1, %v1121_v27 }
 0x5ac   :  { %v5086_v59 = vpop.f32.mrf.mxu3 }
 0x5ae   :  { %v1123_v13 = vpop.f32.mrf.mxu1 }
 0x5af   :  { %v1124_v2 = vadd.f32 %v1123_v13, %v1003_v56 }
 0x5b1   :  { %v1158_v11 = vmax.f32 %v1157_v9, %v1124_v2 }
 0x5b4   :  { %v1144_v4 = vpop.f32.mrf.mxu3 }
 0x5b5   :  { %v5090_v16 = vadd.f32 %v1144_v4, %v1038_v29 }
 0x5b6   :  { %v1126_v10 = vpop.f32.mrf.mxu1 }
 0x5b7   :  { %v1127_v14 = vadd.f32 %v1126_v10, %v1008_v62  ;;  %v1289_v58 = vand.u32 2147483647, %v5090_v16  ;;  %v1142_v62 = vadd.f32 %v5086_v59, %v1033_v23 }
 0x5b9   :  { %v1159_v15 = vmax.f32 %v1158_v11, %v1127_v14  ;;  %v1290_v56 = vsub.f32 0.0, %v1289_v58 }
 0x5bb   :  { %v1160_v12 = vsub.f32 %v1115_v63, %v1159_v15  ;;  %v1163_v20 = vsub.f32 %v1118_v61, %v1159_v15  ;;  %v1166_v21 = vsub.f32 %v1121_v27, %v1159_v15  ;;  %v1169_v22 = vsub.f32 %v1124_v2, %v1159_v15 }
 0x5bc   :  { %v1147_v49 = vpop.f32.mrf.mxu3  ;;  %v1172_v26 = vsub.f32 %v1127_v14, %v1159_v15  ;;  %v1291_v1 = vmul.f32 1.442695, %v1290_v56 }
 0x5bd   :  { %v1161_v31 = vmul.f32 1.442695, %v1160_v12  ;;  %v1164_v51 = vmul.f32 1.442695, %v1163_v20  ;;  %v1167_v24 = vmul.f32 1.442695, %v1166_v21  ;;  %v5094_v47 = vadd.f32 %v1147_v49, %v1043_v30 }
 0x5be   :  { %v1129_v43 = vpop.f32.mrf.mxu1  ;;  %v1170_v28 = vmul.f32 1.442695, %v1169_v22  ;;  %v1173_v54 = vmul.f32 1.442695, %v1172_v26 }
 0x5bf   :  { %4143 = vpow2.f32 %v1161_v31  ;;  %v1130_v32 = vadd.f32 %v1129_v43, %v1013_v42  ;;  %v1299_v39 = vand.u32 2147483647, %v5094_v47 }
 0x5c0   :  { %4145 = vpow2.f32 %v1164_v51 }
 0x5c1   :  { %4147 = vpow2.f32 %v1167_v24  ;;  %v1300_v42 = vsub.f32 0.0, %v1299_v39 }
 0x5c2   :  { %4149 = vpow2.f32 %v1170_v28 }
 0x5c3   :  { %4151 = vpow2.f32 %v1173_v54  ;;  %v1301_v4 = vmul.f32 1.442695, %v1300_v42 }
 0x5c4   :  { %v1150_v33 = vpop.f32.mrf.mxu3 }
 0x5c5   :  { %v5088_v45 = vpop.eup %4143  ;;  %v5102_v37 = vadd.f32 %v1150_v33, %v1048_v34 }
 0x5c6   :  { %v5092_v53 = vpop.eup %4145  ;;  %v1132_v55 = vpop.f32.mrf.mxu1 }
 0x5c7   :  { %v1175_v60 = vadd.f32 %v5092_v53, %v5088_v45  ;;  %v5098_v7 = vpop.eup %4147  ;;  %v1133_v36 = vadd.f32 %v1132_v55, %v1018_v3  ;;  %v1309_v61 = vand.u32 2147483647, %v5102_v37  ;;  %v1053_v3 = vpop.permute.xlu0 %1052 }
 0x5c8   :  { %v5104_v6 = vpop.eup %4149 }
 0x5c9   :  { %v1176_v8 = vadd.f32 %v5098_v7, %v1175_v60  ;;  %v1222_v40 = vmax.f32 %v1130_v32, %v1133_v36  ;;  %v4152_v44 = vpop.eup %4151  ;;  %v1310_v2 = vsub.f32 0.0, %v1309_v61 }
 0x5cb   :  { %v1177_v41 = vadd.f32 %v5104_v6, %v1176_v8  ;;  %v1223_v52 = vmax.f32 %v1222_v40, %v1136_v19  ;;  %v1311_v59 = vmul.f32 1.442695, %v1310_v2 }
 0x5cc   :  { %v1153_v18 = vpop.f32.mrf.mxu3 }
 0x5cd   :  { %v1178_v13 = vadd.f32 %v4152_v44, %v1177_v41  ;;  %v1224_v63 = vmax.f32 %v1223_v52, %v1139_v5  ;;  %v5111_v35 = vadd.f32 %v1153_v18, %v1053_v3 }
 0x5cf   :  { %4153 = vrcp.f32 %v1178_v13  ;;  %v1225_v27 = vmax.f32 %v1224_v63, %v1142_v62  ;;  %v1319_v22 = vand.u32 2147483647, %v5111_v35  ;;  %v1190_v51 = vand.u32 2147483648, %v1178_v13 }
 0x5d0   :  { %4155 = vpow2.f32 %v1291_v1  ;;  %v1188_v24 = vand.u32 2147483647, %v1178_v13  ;;  %vm1184_vm7 = vweird.f32 %v1178_v13 }
 0x5d1   :  { %v1226_v9 = vsub.f32 %v1130_v32, %v1225_v27  ;;  %v1229_v10 = vsub.f32 %v1133_v36, %v1225_v27  ;;  %v1232_v11 = vsub.f32 %v1136_v19, %v1225_v27  ;;  %v1235_v17 = vsub.f32 %v1139_v5, %v1225_v27 }
 0x5d2   :  { %4157 = vpow2.f32 %v1301_v4  ;;  %v1238_v21 = vsub.f32 %v1142_v62, %v1225_v27  ;;  %v1320_v28 = vsub.f32 0.0, %v1319_v22  ;;  %v1191_v33 = vor.u32 1.1754944e-38, %v1190_v51 }
 0x5d3   :  { %v1227_v14 = vmul.f32 1.442695, %v1226_v9  ;;  %v1230_v15 = vmul.f32 1.442695, %v1229_v10  ;;  %v1233_v20 = vmul.f32 1.442695, %v1232_v11 }
 0x5d4   :  { %v1236_v31 = vmul.f32 1.442695, %v1235_v17  ;;  %v1239_v43 = vmul.f32 1.442695, %v1238_v21  ;;  %vm1189_vm9 = vcmp.eq.f32.partialorder %v1188_v24, 8.507059e+37 }
 0x5d5   :  { %v4154_v38 = vpop.eup %4153  ;;  %4159 = vpow2.f32 %v1227_v14  ;;  %v1321_v8 = vmul.f32 1.442695, %v1320_v28 }
 0x5d6   :  { %v1180_v12 = vmul.f32 %v4154_v38, %v1178_v13  ;;  %4161 = vpow2.f32 %v1230_v15  ;;  %vm1185_vm6 = vweird.f32 %v4154_v38  ;;  %v4156_v26 = vpop.eup %4155 }
 0x5d7   :  { %4163 = vpow2.f32 %v1311_v59  ;;  %vm1186_vm8 = vmor %vm1184_vm7, %vm1185_vm6  ;;  %v1293_v60 = vadd.f32 1.0, %v4156_v26 }
 0x5d8   :  { %v1181_v49 = vsub.f32 1.0, %v1180_v12  ;;  %4165 = vpow2.f32 %v1233_v20  ;;  %v4158_v54 = vpop.eup %4157  ;;  %v1288_v12 = vmax.f32 %v5090_v16, 0.0 }
 0x5d9   :  { %4167 = vpow2.f32 %v1236_v31  ;;  %v1303_v5 = vadd.f32 1.0, %v4158_v54 }
 0x5da   :  { %v1182_v23 = vmul.f32 %v4154_v38, %v1181_v49  ;;  %4169 = vpow2.f32 %v1239_v43 }
 0x5db   :  { %v5114_v30 = vpop.eup %4159  ;;  %4171 = vlog2.f32 %v1293_v60 }
 0x5dc   :  { %v1183_v29 = vadd.f32 %v4154_v38, %v1182_v23  ;;  %v5116_v55 = vpop.eup %4161  ;;  %4173 = vpow2.f32 %v1321_v8 }
 0x5dd   :  { %v4164_v32 = vpop.eup %4163  ;;  %v1241_v58 = vadd.f32 %v5116_v55, %v5114_v30  ;;  %4175 = vlog2.f32 %v1303_v5 }
 0x5de   :  { %v1187_v34 = vsel %vm1186_vm8, %v4154_v38, %v1183_v29  ;;  %v5120_v19 = vpop.eup %4165  ;;  %v1313_v42 = vadd.f32 1.0, %v4164_v32 }
 0x5df   :  { %v1192_v36 = vsel %vm1189_vm9, %v1191_v33, %v1187_v34  ;;  %v1242_v52 = vadd.f32 %v5120_v19, %v1241_v58  ;;  %v5127_v56 = vpop.eup %4167 }
 0x5e0   :  { %v1193_v39 = vmul.f32 %v5088_v45, %v1192_v36  ;;  %v1196_v40 = vmul.f32 %v5092_v53, %v1192_v36  ;;  %v1199_v41 = vmul.f32 %v5098_v7, %v1192_v36  ;;  %v1202_v44 = vmul.f32 %v5104_v6, %v1192_v36  ;;  %v4170_v53 = vpop.eup %4169 }
 0x5e1   :  { %v1243_v63 = vadd.f32 %v5127_v56, %v1242_v52  ;;  %v5132_v7 = vadd.f32 %v5026_v25, %v5018_v0  ;;  %4177 = vlog2.f32 %v1313_v42  ;;  %v4172_v14 = vpop.eup %4171 }
 0x5e2   :  { %v1194_v13 = vmul.f32 0.995, %v1193_v39  ;;  %v1197_v61 = vmul.f32 0.995, %v1196_v40  ;;  %v1200_v62 = vmul.f32 0.995, %v1199_v41  ;;  %v4174_v17 = vpop.eup %4173 }
 0x5e3   :  { %v1203_v18 = vmul.f32 0.995, %v1202_v44  ;;  %v5134_v3 = vadd.f32 %v4170_v53, %v1243_v63  ;;  %v5137_v15 = vclamps-f32 %v5132_v7, 3.0  ;;  %v4176_v59 = vpop.eup %4175  ;;  %v1295_v31 = vmul.f32 0.6931472, %v4172_v14 }
 0x5e4   :  { %v1195_v27 = vadd.f32 0.001, %v1194_v13  ;;  %v1198_v45 = vadd.f32 0.001, %v1197_v61  ;;  %v1201_v6 = vadd.f32 0.001, %v1200_v62 }
 0x5e5   :  { %v1204_v4 = vadd.f32 0.001, %v1203_v18  ;;  %4179 = vrcp.f32 %v5134_v3  ;;  %v1323_v23 = vadd.f32 1.0, %v4174_v17  ;;  %v1305_v26 = vmul.f32 0.6931472, %v4176_v59 }
 0x5e6   :  { %v1206_v1 = vmul.f32 6.0, %v1195_v27  ;;  %v1208_v2 = vadd.f32 %v1198_v45, %v1195_v27  ;;  %v1296_v39 = vadd.f32 %v1295_v31, %v1288_v12  ;;  %v1298_v40 = vmax.f32 %v5094_v47, 0.0 }
 0x5e7   :  { %v4178_v49 = vpop.eup %4177  ;;  %4181 = vlog2.f32 %v1323_v23  ;;  %v1308_v44 = vmax.f32 %v5102_v37, 0.0  ;;  %v1256_v18 = vand.u32 2147483648, %v5134_v3  ;;  %vm1250_vm2 = vweird.f32 %v5134_v3 }
 0x5e8   :  { %v3815_v9 = vadd.f32 -3.0, %v1206_v1  ;;  %v1209_v10 = vmul.f32 6.0, %v1208_v2  ;;  %v1211_v11 = vadd.f32 %v1208_v2, %v1201_v6  ;;  %v1315_v34 = vmul.f32 0.6931472, %v4178_v49 }
 0x5e9   :  { %v1306_v62 = vadd.f32 %v1305_v26, %v1298_v40  ;;  %v1297_v53 = vadd.f32 0.001, %v1296_v39  ;;  %v1257_v12 = vor.u32 1.1754944e-38, %v1256_v18  ;;  %v1318_v26 = vmax.f32 %v5111_v35, 0.0 }
 0x5ea   :  { %v5139_v38 = vadd.f32 -3.0, %v1209_v10  ;;  %v1212_v0 = vmul.f32 6.0, %v1211_v11  ;;  %v1214_v25 = vadd.f32 %v1211_v11, %v1204_v4  ;;  %vm1333_vm10 = vcmp.ge.f32.partialorder %v5137_v15, %v3815_v9 }
 0x5eb   :  { %v3826_v22 = vsel %vm1333_vm10, 1.0, %v4399_v50  ;;  %v3819_v16 = vadd.f32 3.0, %v3815_v9  ;;  %v4180_v32 = vpop.eup %4179  ;;  %v1316_v27 = vadd.f32 %v1315_v34, %v1308_v44  ;;  %v1307_v4 = vadd.f32 0.001, %v1306_v62 }
 0x5ec   :  { %v5144_v20 = vadd.f32 -3.0, %v1212_v0  ;;  %v1215_v21 = vmul.f32 6.0, %v1214_v25  ;;  %vm1336_vm11 = vcmp.ge.f32.partialorder %v5137_v15, %v5139_v38  ;;  %v5149_v51 = vsub.f32 1.0, %v3826_v22 }
 0x5ed   :  { %v3827_v43 = vsel %vm1336_vm11, 1.0, %v4399_v50  ;;  %v1218_v28 = vsub.f32 %v5139_v38, %v3815_v9  ;;  %v1246_v42 = vmul.f32 %v4180_v32, %v5134_v3  ;;  %v4182_v37 = vpop.eup %4181  ;;  %vm1251_vm14 = vweird.f32 %v4180_v32 }
 0x5ee   :  { %v5151_v24 = vadd.f32 -3.0, %v1215_v21  ;;  %vm1339_vm12 = vcmp.ge.f32.partialorder %v5137_v15, %v5144_v20  ;;  %v5158_v29 = vsub.f32 %v3826_v22, %v3827_v43  ;;  %v1219_v33 = vsub.f32 %v5144_v20, %v5139_v38  ;;  %vm1252_vm4 = vmor %vm1250_vm2, %vm1251_vm14 }
 0x5ef   :  { %v3828_v54 = vsel %vm1339_vm12, 1.0, %v4399_v50  ;;  %v1348_v58 = vmul.f32 %v3819_v16, %v5149_v51  ;;  %v1247_v45 = vsub.f32 1.0, %v1246_v42  ;;  %v1254_v11 = vand.u32 2147483647, %v5134_v3 }
 0x5f0   :  { %vm1342_vm13 = vcmp.ge.f32.partialorder %v5137_v15, %v5151_v24  ;;  %v5164_v60 = vsub.f32 %v3827_v43, %v3828_v54  ;;  %v1358_v8 = vmul.f32 %v5158_v29, %v1218_v28  ;;  %v1220_v5 = vsub.f32 %v5151_v24, %v5144_v20 }
 0x5f1   :  { %v5167_v36 = vsel %vm1342_vm13, 1.0, %v4399_v50  ;;  %v1221_v52 = vsub.f32 3.0, %v5151_v24  ;;  %v1356_v1 = vmul.f32 %v3815_v9, %v5158_v29  ;;  %v1248_v10 = vmul.f32 %v4180_v32, %v1247_v45 }
 0x5f2   :  { %v1371_v41 = vmul.f32 %v5164_v60, %v1219_v33  ;;  %v1359_v13 = vadd.f32 %v1358_v8, %v1348_v58  ;;  %v5178_v61 = vsub.f32 %v3828_v54, %v5167_v36  ;;  %v1364_v14 = vmul.f32 %v5158_v29, %v1297_v53 }
 0x5f3   :  { %v1396_v6 = vmul.f32 %v5167_v36, %v1221_v52  ;;  %v1317_v17 = vadd.f32 0.001, %v1316_v27  ;;  %v5188_v0 = vmul.f32 -3.0, %v5149_v51  ;;  %v1249_v59 = vadd.f32 %v4180_v32, %v1248_v10 }
 0x5f4   :  { %v1372_v63 = vadd.f32 %v1371_v41, %v1359_v13  ;;  %v1384_v47 = vmul.f32 %v5178_v61, %v1220_v5  ;;  %v1325_v21 = vmul.f32 0.6931472, %v4182_v37  ;;  %v1366_v9 = vmul.f32 %v5158_v29, %v1307_v4 }
 0x5f5   :  { %v1357_v22 = vadd.f32 %v1356_v1, %v5188_v0  ;;  %v1369_v49 = vmul.f32 %v5139_v38, %v5164_v60  ;;  %v1353_v31 = vmul.f32 %v5149_v51, %v1297_v53  ;;  %v1253_v23 = vsel %vm1252_vm4, %v4180_v32, %v1249_v59 }
 0x5f6   :  { %v1385_v2 = vadd.f32 %v1384_v47, %v1372_v63  ;;  %vm1255_vm5 = vcmp.eq.f32.partialorder %v1254_v11, 8.507059e+37  ;;  %v1365_v3 = vadd.f32 %v1364_v14, %v5149_v51  ;;  %v1377_v43 = vmul.f32 %v5164_v60, %v1307_v4 }
 0x5f7   :  { %v1379_v16 = vmul.f32 %v5164_v60, %v1317_v17  ;;  %v1258_v28 = vsel %vm1255_vm5, %v1257_v12, %v1253_v23  ;;  %v1367_v58 = vadd.f32 %v1366_v9, %v1353_v31  ;;  %v1326_v32 = vadd.f32 %v1325_v21, %v1318_v26 }
 0x5f8   :  { %v5190_v25 = vadd.f32 %v1396_v6, %v1385_v2  ;;  %v1259_v54 = vmul.f32 %v5114_v30, %v1258_v28  ;;  %v1262_v33 = vmul.f32 %v5116_v55, %v1258_v28  ;;  %v1265_v38 = vmul.f32 %v5120_v19, %v1258_v28 }
 0x5f9   :  { %v1268_v34 = vmul.f32 %v5127_v56, %v1258_v28  ;;  %v1370_v8 = vadd.f32 %v1369_v49, %v1357_v22  ;;  %v1382_v35 = vmul.f32 %v5144_v20, %v5178_v61  ;;  %v1378_v52 = vadd.f32 %v1377_v43, %v1365_v3 }
 0x5fa   :  { %4183 = vrcp.f32 %v5190_v25  ;;  %v1260_v39 = vmul.f32 0.995, %v1259_v54  ;;  %v1263_v40 = vmul.f32 0.995, %v1262_v33  ;;  %v1266_v41 = vmul.f32 0.995, %v1265_v38 }
 0x5fb   :  { %v1269_v5 = vmul.f32 0.995, %v1268_v34  ;;  %v1380_v62 = vadd.f32 %v1379_v16, %v1367_v58  ;;  %v1390_v19 = vmul.f32 %v5178_v61, %v1317_v17  ;;  %v1327_v56 = vadd.f32 0.001, %v1326_v32 }
 0x5fc   :  { %v1261_v13 = vadd.f32 0.001, %v1260_v39  ;;  %v1264_v30 = vadd.f32 0.001, %v1263_v40  ;;  %v1383_v42 = vadd.f32 %v1382_v35, %v1370_v8  ;;  %v1267_v63 = vadd.f32 0.001, %v1266_v41 }
 0x5fd   :  { %v1270_v20 = vadd.f32 0.001, %v1269_v5  ;;  %v1392_v18 = vmul.f32 %v5178_v61, %v1327_v56  ;;  %v1394_v37 = vmul.f32 %v5167_v36, %v5151_v24  ;;  %v1416_v53 = vand.u32 2147483648, %v5190_v25 }
 0x5fe   :  { %v1272_v27 = vmul.f32 6.0, %v1261_v13  ;;  %v1274_v47 = vadd.f32 %v1264_v30, %v1261_v13  ;;  %v1414_v11 = vand.u32 2147483647, %v5190_v25  ;;  %v1391_v21 = vadd.f32 %v1390_v19, %v1378_v52 }
 0x5ff   :  { %v1395_v10 = vadd.f32 %v1394_v37, %v1383_v42  ;;  %v1393_v9 = vadd.f32 %v1392_v18, %v1380_v62  ;;  %vm1410_vm7 = vweird.f32 %v5190_v25  ;;  %v1417_v23 = vor.u32 1.1754944e-38, %v1416_v53  ;;  %v3830_v53 = vld [vmem:[%s6028_s9 + $0x4] sm:$0xf] }
 0x600   :  { %v4184_v44 = vpop.eup %4183  ;;  %v3820_v6 = vadd.f32 -3.0, %v1272_v27  ;;  %v1275_v1 = vmul.f32 6.0, %v1274_v47  ;;  %v1277_v2 = vadd.f32 %v1274_v47, %v1267_v63  ;;  %vm1415_vm9 = vcmp.eq.f32.partialorder %v1414_v11, 8.507059e+37  ;;  %3835 = vmatmul.msk.f32.vlgmr.msra.gmra.mxu0 %vm56_vm1, %v3830_v53 }
 0x601   :  { %v1406_v55 = vmul.f32 %v4184_v44, %v5190_v25  ;;  %vm1411_vm6 = vweird.f32 %v4184_v44  ;;  %v1420_v43 = vsub.f32 %v5137_v15, %v1395_v10  ;;  %v1402_v38 = vmul.f32 %v5167_v36, %v1327_v56 }
 0x602   :  { %v3821_v14 = vadd.f32 -3.0, %v1275_v1  ;;  %v1278_v17 = vmul.f32 6.0, %v1277_v2  ;;  %v1280_v59 = vadd.f32 %v1277_v2, %v1270_v20  ;;  %v3824_v12 = vadd.f32 3.0, %v3820_v6  ;;  %vm1412_vm8 = vmor %vm1410_vm7, %vm1411_vm6 }
 0x603   :  { %v1407_v45 = vsub.f32 1.0, %v1406_v55  ;;  %v1404_v25 = vadd.f32 %v5167_v36, %v1393_v9  ;;  %v1360_v1 = vmul.f32 %v3820_v6, %v5158_v29  ;;  %vm1328_vm14 = vcmp.ge.f32.partialorder %v5132_v7, -3.0 }
 0x604   :  { %v3822_v24 = vadd.f32 -3.0, %v1278_v17  ;;  %v1281_v49 = vmul.f32 6.0, %v1280_v59  ;;  %v1284_v31 = vsub.f32 %v3821_v14, %v3820_v6  ;;  %v1350_v26 = vmul.f32 %v3824_v12, %v5149_v51 }
 0x605   :  { %v1408_v4 = vmul.f32 %v4184_v44, %v1407_v45  ;;  %v1403_v51 = vadd.f32 %v1402_v38, %v1391_v21  ;;  %v1361_v10 = vadd.f32 %v1360_v1, %v5188_v0  ;;  %v1373_v11 = vmul.f32 %v3821_v14, %v5164_v60 }
 0x606   :  { %v3823_v16 = vadd.f32 -3.0, %v1281_v49  ;;  %v1285_v28 = vsub.f32 %v3822_v24, %v3821_v14  ;;  %v1362_v54 = vmul.f32 %v5158_v29, %v1284_v31  ;;  %vm1329_vm2 = vcmp.le.f32.partialorder %v5132_v7, 3.0 }
 0x607   :  { %v1409_v22 = vadd.f32 %v4184_v44, %v1408_v4  ;;  %v1429_v56 = vadd.f32 %v1404_v25, %v1403_v51  ;;  %v1374_v9 = vadd.f32 %v1373_v11, %v1361_v10  ;;  %vm1330_vm4 = vmand %vm1328_vm14, %vm1329_vm2 }
 0x608   :  { %v1286_v58 = vsub.f32 %v3823_v16, %v3822_v24  ;;  %v1287_v32 = vsub.f32 3.0, %v3823_v16  ;;  %v1363_v8 = vadd.f32 %v1362_v54, %v1350_v26  ;;  %v1375_v35 = vmul.f32 %v5164_v60, %v1285_v28 }
 0x609   :  { %v1413_v3 = vsel %vm1412_vm8, %v4184_v44, %v1409_v22  ;;  %v1386_v22 = vmul.f32 %v3822_v24, %v5178_v61 }
 0x60a   :  { %v1418_v33 = vsel %vm1415_vm9, %v1417_v23, %v1413_v3  ;;  %v1376_v41 = vadd.f32 %v1375_v35, %v1363_v8  ;;  %v1388_v15 = vmul.f32 %v5178_v61, %v1286_v58  ;;  %v1400_v13 = vmul.f32 %v5167_v36, %v1287_v32  ;;  %v3837_v58 = vld [vmem:[%s6031_s12 + $0x4] sm:$0xf] }
 0x60b   :  { %v1421_v34 = vmul.f32 %v1420_v43, %v1418_v33  ;;  %v1387_v6 = vadd.f32 %v1386_v22, %v1374_v9  ;;  %v1398_v3 = vmul.f32 %v5167_v36, %v3823_v16  ;;  %v3831_v36 = vld [vmem:[%s6029_s10 + $0x4] sm:$0xf]  ;;  %v3858_v9 = vld [vmem:[%s6026_s7 + $0xf8] sm:$0xff] }
 0x60c   :  { %v1389_v52 = vadd.f32 %v1388_v15, %v1376_v41  ;;  %v3836_v35 = vld [vmem:[%s6030_s11 + $0x4] sm:$0xf]  ;;  %v3842_v41 = vld [vmem:[%s6020_s1 + $0x10] sm:$0xff] }
 0x60d   :  { %v1422_v39 = vsub.f32 1.0, %v1421_v34  ;;  %v1451_v40 = vmul.f32 %v1421_v34, %v1404_v25  ;;  %v1399_v61 = vadd.f32 %v1398_v3, %v1387_v6  ;;  %3841 = vmatmul.msk.f32.vlgmr.msrb.gmra.mxu0 %vm56_vm1, %v3836_v35  ;;  %v3859_v22 = vld [vmem:[%s6026_s7 + $0x100] sm:$0xff]  ;;  %v3865_v6 = vld [vmem:[%s6026_s7 + $0x130] sm:$0xff]  ;;  %v3866_v3 = vld [vmem:[%s6026_s7 + $0x138] sm:$0xff] }
 0x60e   :  { %v1401_v55 = vadd.f32 %v1400_v13, %v1389_v52 }
 0x60f   :  { %v1452_v44 = vmul.f32 %v1451_v40, %v1421_v34  ;;  %v1455_v5 = vmul.f32 %v1422_v39, %v1403_v51  ;;  %v1423_v19 = vmul.f32 %v1422_v39, %v1421_v34 }
 0x610   :  { %v1419_v62 = vmul.f32 %v1418_v33, %v1401_v55 }
 0x611   :  { %v1456_v30 = vmul.f32 %v1455_v5, %v1422_v39  ;;  %v1426_v12 = vmul.f32 %v1423_v19, %v1403_v51 }
 0x612   :  { %v1430_v42 = vmul.f32 2.0, %v1419_v62  ;;  %v1450_v37 = vmul.f32 %v1419_v62, %v1419_v62  ;;  %v1424_v4 = vmul.f32 %v1421_v34, %v1419_v62 }
 0x614   :  { %v1431_v63 = vsub.f32 %v1429_v56, %v1430_v42  ;;  %v1453_v27 = vmul.f32 %v1430_v42, %v1423_v19  ;;  %v1425_v59 = vmul.f32 %v1424_v4, %v1421_v34 }
 0x616   :  { %v1432_v47 = vmul.f32 %v1431_v63, %v1423_v19  ;;  %v1454_v45 = vadd.f32 %v1453_v27, %v1452_v44  ;;  %v1427_v23 = vadd.f32 %v1426_v12, %v1425_v59  ;;  %v1620_v19 = vpop.permute.xlu2 %1619  ;;  %v3856_v12 = vld [vmem:[%s6026_s7 + $0xe8] sm:$0xff] }
 0x618   :  { %v1433_v20 = vadd.f32 %v1432_v47, %v1419_v62  ;;  %v1457_v18 = vadd.f32 %v1456_v30, %v1454_v45  ;;  %v1428_v0 = vmul.f32 %v1427_v23, %v1401_v55  ;;  %v3847_v30 = vld [vmem:[%s6022_s3 + $0x10] sm:$0xff]  ;;  %v3862_v23 = vld [vmem:[%s6026_s7 + $0x118] sm:$0xff] }
 0x61a   :  { %4185 = vrcp.f32 %v1433_v20  ;;  %v1458_v2 = vmul.f32 %v1457_v18, %v1450_v37  ;;  %v1445_v31 = vand.u32 2147483648, %v1433_v20  ;;  %v1443_v29 = vand.u32 2147483647, %v1433_v20  ;;  %v1658_v37 = vpop.permute.xlu0 %1657 }
 0x61b   :  { %vm1439_vm11 = vweird.f32 %v1433_v20 }
 0x61c   :  { %v1446_v60 = vor.u32 1.1754944e-38, %v1445_v31  ;;  %vm1444_vm13 = vcmp.eq.f32.partialorder %v1443_v29, 8.507059e+37  ;;  %v3861_v31 = vld [vmem:[%s6026_s7 + $0x110] sm:$0xff]  ;;  %v3864_v29 = vld [vmem:[%s6026_s7 + $0x128] sm:$0xff] }
 0x620   :  { %v4186_v17 = vpop.eup %4185 }
 0x621   :  { %v1435_v21 = vmul.f32 %v4186_v17, %v1433_v20  ;;  %vm1440_vm10 = vweird.f32 %v4186_v17  ;;  %v3851_v20 = vld [vmem:[%s6024_s5 + $0x10] sm:$0xff] }
 0x622   :  { %vm1441_vm12 = vmor %vm1439_vm11, %vm1440_vm10 }
 0x623   :  { %v1436_v49 = vsub.f32 1.0, %v1435_v21  ;;  %v3857_v21 = vld [vmem:[%s6026_s7 + $0xf0] sm:$0xff] }
 0x625   :  { %v1437_v26 = vmul.f32 %v4186_v17, %v1436_v49  ;;  %v3860_v49 = vld [vmem:[%s6026_s7 + $0x108] sm:$0xff] }
 0x627   :  { %v1438_v43 = vadd.f32 %v4186_v17, %v1437_v26  ;;  %v3863_v26 = vld [vmem:[%s6026_s7 + $0x120] sm:$0xff] }
 0x629   :  { %v1442_v14 = vsel %vm1441_vm12, %v4186_v17, %v1438_v43  ;;  %v3855_v17 = vld [vmem:[%s6026_s7 + $0xe0] sm:$0xff] }
 0x62a   :  { %v1447_v28 = vsel %vm1444_vm13, %v1446_v60, %v1442_v14  ;;  %v3867_v43 = vld [vmem:[%s6026_s7 + $0x140] sm:$0xff]  ;;  %v3868_v60 = vld [vmem:[%s6026_s7 + $0x148] sm:$0xff] }
 0x62b   :  { %v1448_v24 = vmul.f32 %v1447_v28, %v1428_v0  ;;  %v1459_v54 = vmul.f32 %v1458_v2, %v1447_v28 }
 0x62d   :  { %v1449_v33 = vadd.f32 %v1448_v24, %v1399_v61  ;;  %v1460_v38 = vmul.f32 %v1459_v54, %v1447_v28  ;;  %v1722_v61 = vpop.permute.xlu1 %1721  ;;  %v1727_v24 = vpop.permute.xlu2 %1726 }
 0x62f   :  { %4187 = vlog2.f32 %v1460_v38  ;;  %v1463_v16 = vsel %vm1330_vm4, %v1449_v33, %v5132_v7  ;;  %v1732_v38 = vpop.permute.xlu0 %1731 }
 0x630   :  { %3832 = vmatpush.msk.msra.mxu2 %vm60_vm0, %v1463_v16 }
 0x631   :  { %3833 = vmatmul.msk.f32.vlgmr.msra.gmra.mxu2 %vm56_vm1, %v3831_v36 }
 0x632   :  { %3838 = vmatpush.msk.msrb.mxu2 %vm60_vm0, %v1463_v16 }
 0x635   :  { %v4188_v25 = vpop.eup %4187 }
 0x636   :  { %v1462_v34 = vmul.f32 0.6931472, %v4188_v25  ;;  %v1737_v25 = vpop.permute.xlu1 %1736 }
 0x638   :  { %v1464_v32 = vsel %vm1330_vm4, %v1462_v34, 0.0 }
 0x639   :  { %v1466_v8 = vrot.slane %v1464_v32, 4  ;;  %3839 = vmatmul.msk.f32.vlgmr.msrb.gmra.mxu2 %vm56_vm1, %v3837_v58 }
 0x63b   :  { %v5251_v7 = vadd.f32 %v1466_v8, %v736_v57  ;;  %v1742_v8 = vpop.permute.xlu2 %1741 }
 0x67d   :  { %v1519_v51 = vpop.f32.mrf.mxu0 }
 0x68a   :  { %v5271_v62 = vpop.f32.mrf.mxu0 }
 0x6b4   :  { %v1496_v39 = vpop.f32.mrf.mxu2 }
 0x6b5   :  { %v5257_v40 = vadd.f32 %v1519_v51, %v1496_v39 }
 0x6b7   :  { %3844 = vmatpush.msk.msra.mxu2 %vm60_vm0, %v5257_v40 }
 0x6b8   :  { %3845 = vmatmul.msk.f32.vlgmr.msra.gmra.mxu2 %vm56_vm1, %v3842_v41 }
 0x6bc   :  { %v5265_v46 = vpop.f32.mrf.mxu2 }
 0x73b   :  { %v1604_v57 = vpop.f32.mrf.mxu2 }
 0x73c   :  { %v1605_v15 = vadd.f32 %v1604_v57, %v1579_v48 }
 0x73e   :  { %v1608_v44 = vmin.f32 %v1605_v15, 0.0  ;;  %vm1607_vm15 = vcmp.gt.f32.partialorder %v1605_v15, 0.0 }
 0x740   :  { %v1609_v5 = vmul.f32 1.442695, %v1608_v44 }
 0x742   :  { %4189 = vpow2.f32 %v1609_v5 }
 0x748   :  { %v4190_v52 = vpop.eup %4189 }
 0x749   :  { %v3846_v13 = vadd.f32 -1.0, %v4190_v52 }
 0x74b   :  { %v1612_v55 = vsel %vm1607_vm15, %v1605_v15, %v3846_v13 }
 0x74c   :  { %1640 = vmatpush.msra.mxu0 %v1612_v55 }
 0x74d   :  { %3849 = vmatmul.msk.f32.vlgmr.msra.gmra.mxu0 %vm97_vm3, %v3847_v30 }
 0x7ca   :  { %v1642_v56 = vpop.f32.mrf.mxu0 }
 0x7cb   :  { %v1643_v42 = vadd.f32 %v1642_v56, %v1620_v19 }
 0x7cd   :  { %v1646_v63 = vmin.f32 %v1643_v42, 0.0  ;;  %vm1645_vm5 = vcmp.gt.f32.partialorder %v1643_v42, 0.0 }
 0x7cf   :  { %v1647_v27 = vmul.f32 1.442695, %v1646_v63 }
 0x7d1   :  { %4191 = vpow2.f32 %v1647_v27 }
 0x7d7   :  { %v4192_v47 = vpop.eup %4191 }
 0x7d8   :  { %v3850_v45 = vadd.f32 -1.0, %v4192_v47 }
 0x7da   :  { %v1650_v18 = vsel %vm1645_vm5, %v1643_v42, %v3850_v45 }
 0x7db   :  { %1678 = vmatpush.msrb.mxu2 %v1650_v18 }
 0x7dc   :  { %3853 = vmatmul.msk.f32.vlgmr.msrb.gmra.mxu2 %vm97_vm3, %v3851_v20 }
 0x85f   :  { %v1680_v53 = vpop.f32.mrf.mxu2 }
 0x860   :  { %v1681_v1 = vadd.f32 %v1680_v53, %v1658_v37 }
 0x862   :  { %v1684_v2 = vmin.f32 %v1681_v1, 0.0  ;;  %vm1683_vm6 = vcmp.gt.f32.partialorder %v1681_v1, 0.0 }
 0x864   :  { %v1685_v4 = vmul.f32 1.442695, %v1684_v2 }
 0x866   :  { %4193 = vpow2.f32 %v1685_v4  ;;  %v1747_v4 = vpop.permute.xlu0 %1746 }
 0x86c   :  { %v4194_v10 = vpop.eup %4193 }
 0x86d   :  { %v3854_v11 = vadd.f32 -1.0, %v4194_v10  ;;  %v1752_v10 = vpop.permute.xlu1 %1751 }
 0x86f   :  { %v1688_v59 = vsel %vm1683_vm6, %v1681_v1, %v3854_v11 }
 0x870   :  { %1846 = vmatpush.msrb.mxu0 %v1688_v59 }
 0x871   :  { %3883 = vmatmul.msk.f32.vlgmr.msrb.gmra.mxu0 %vm97_vm3, %v3855_v17 }
 0x879   :  { %3884 = vmatmul.msk.f32.gmra.mxu0 %vm97_vm3, %v3856_v12 }
 0x881   :  { %3885 = vmatmul.msk.f32.gmra.mxu0 %vm97_vm3, %v3857_v21  ;;  %v1757_v21 = vpop.permute.xlu2 %1756 }
 0x889   :  { %3886 = vmatmul.msk.f32.gmra.mxu0 %vm97_vm3, %v3858_v9 }
 0x891   :  { %3887 = vmatmul.msk.f32.gmra.mxu0 %vm97_vm3, %v3859_v22 }
 0x899   :  { %3888 = vmatmul.msk.f32.gmra.mxu0 %vm97_vm3, %v3860_v49 }
 0x8a1   :  { %3889 = vmatmul.msk.f32.gmra.mxu0 %vm97_vm3, %v3861_v31 }
 0x8a9   :  { %3890 = vmatmul.msk.f32.gmra.mxu0 %vm97_vm3, %v3862_v23  ;;  %v1762_v23 = vpop.permute.xlu0 %1761 }
 0x8b1   :  { %3891 = vmatmul.msk.f32.gmra.mxu0 %vm97_vm3, %v3863_v26 }
 0x8b9   :  { %3892 = vmatmul.msk.f32.gmra.mxu0 %vm97_vm3, %v3864_v29 }
 0x8c1   :  { %3893 = vmatmul.msk.f32.gmra.mxu0 %vm97_vm3, %v3865_v6 }
 0x8c9   :  { %3894 = vmatmul.msk.f32.gmra.mxu0 %vm97_vm3, %v3866_v3 }
 0x8d1   :  { %3895 = vmatmul.msk.f32.gmra.mxu0 %vm97_vm3, %v3867_v43 }
 0x8d9   :  { %3896 = vmatmul.msk.f32.gmra.mxu0 %vm97_vm3, %v3868_v60 }
 0x8ee   :  { %v1848_v0 = vpop.f32.mrf.mxu0 }
 0x8ef   :  { %v1849_v36 = vadd.f32 %v1848_v0, %v1722_v61 }
 0x8f6   :  { %v1851_v14 = vpop.f32.mrf.mxu0 }
 0x8f7   :  { %v1852_v33 = vadd.f32 %v1851_v14, %v1727_v24  ;;  %v1767_v14 = vpop.permute.xlu1 %1766 }
 0x8f9   :  { %v1890_v34 = vmax.f32 %v1849_v36, %v1852_v33 }
 0x8fe   :  { %v1854_v28 = vpop.f32.mrf.mxu0 }
 0x8ff   :  { %v1855_v16 = vadd.f32 %v1854_v28, %v1732_v38 }
 0x901   :  { %v1891_v32 = vmax.f32 %v1890_v34, %v1855_v16 }
 0x906   :  { %v1857_v54 = vpop.f32.mrf.mxu0 }
 0x907   :  { %v1858_v58 = vadd.f32 %v1857_v54, %v1737_v25 }
 0x909   :  { %v1892_v51 = vmax.f32 %v1891_v32, %v1858_v58 }
 0x90e   :  { %v1860_v35 = vpop.f32.mrf.mxu0 }
 0x90f   :  { %v1861_v39 = vadd.f32 %v1860_v35, %v1742_v8 }
 0x911   :  { %v1893_v41 = vmax.f32 %v1892_v51, %v1861_v39 }
 0x913   :  { %v1894_v48 = vsub.f32 %v1849_v36, %v1893_v41  ;;  %v1897_v57 = vsub.f32 %v1852_v33, %v1893_v41  ;;  %v1900_v15 = vsub.f32 %v1855_v16, %v1893_v41  ;;  %v1903_v44 = vsub.f32 %v1858_v58, %v1893_v41 }
 0x914   :  { %v1906_v30 = vsub.f32 %v1861_v39, %v1893_v41 }
 0x915   :  { %v1895_v5 = vmul.f32 1.442695, %v1894_v48  ;;  %v1898_v52 = vmul.f32 1.442695, %v1897_v57  ;;  %v1901_v13 = vmul.f32 1.442695, %v1900_v15 }
 0x916   :  { %v1863_v55 = vpop.f32.mrf.mxu0  ;;  %v1904_v19 = vmul.f32 1.442695, %v1903_v44  ;;  %v1907_v56 = vmul.f32 1.442695, %v1906_v30  ;;  %v5335_v44 = vadd.f32 %v5271_v62, %v5265_v46  ;;  %v1772_v30 = vpop.permute.xlu2 %1771 }
 0x917   :  { %4195 = vpow2.f32 %v1895_v5  ;;  %v1864_v49 = vadd.f32 %v1863_v55, %v1747_v4 }
 0x918   :  { %4197 = vpow2.f32 %v1898_v52  ;;  %v5342_v46 = vclamps-f32 %v5335_v44, 3.0 }
 0x919   :  { %4199 = vpow2.f32 %v1901_v13 }
 0x91a   :  { %4201 = vpow2.f32 %v1904_v19 }
 0x91b   :  { %4203 = vpow2.f32 %v1907_v56 }
 0x91d   :  { %v4196_v42 = vpop.eup %4195 }
 0x91e   :  { %v4198_v63 = vpop.eup %4197  ;;  %v1866_v27 = vpop.f32.mrf.mxu0 }
 0x91f   :  { %v1909_v47 = vadd.f32 %v4198_v63, %v4196_v42  ;;  %v4200_v45 = vpop.eup %4199  ;;  %v1867_v12 = vadd.f32 %v1866_v27, %v1752_v10 }
 0x920   :  { %v4202_v18 = vpop.eup %4201 }
 0x921   :  { %v1910_v20 = vadd.f32 %v4200_v45, %v1909_v47  ;;  %v4204_v53 = vpop.eup %4203  ;;  %v1956_v6 = vmax.f32 %v1864_v49, %v1867_v12 }
 0x923   :  { %v1911_v37 = vadd.f32 %v4202_v18, %v1910_v20 }
 0x925   :  { %v1912_v1 = vadd.f32 %v4204_v53, %v1911_v37 }
 0x926   :  { %v1869_v2 = vpop.f32.mrf.mxu0 }
 0x927   :  { %4205 = vrcp.f32 %v1912_v1  ;;  %v1924_v22 = vand.u32 2147483648, %v1912_v1  ;;  %v1870_v31 = vadd.f32 %v1869_v2, %v1757_v21  ;;  %v1922_v29 = vand.u32 2147483647, %v1912_v1 }
 0x928   :  { %vm1918_vm8 = vweird.f32 %v1912_v1 }
 0x929   :  { %v1925_v60 = vor.u32 1.1754944e-38, %v1924_v22  ;;  %v1957_v0 = vmax.f32 %v1956_v6, %v1870_v31  ;;  %vm1923_vm10 = vcmp.eq.f32.partialorder %v1922_v29, 8.507059e+37 }
 0x92d   :  { %v4206_v11 = vpop.eup %4205 }
 0x92e   :  { %v1914_v17 = vmul.f32 %v4206_v11, %v1912_v1  ;;  %v1872_v59 = vpop.f32.mrf.mxu0  ;;  %vm1919_vm7 = vweird.f32 %v4206_v11 }
 0x92f   :  { %v1873_v3 = vadd.f32 %v1872_v59, %v1762_v23  ;;  %vm1920_vm9 = vmor %vm1918_vm8, %vm1919_vm7 }
 0x930   :  { %v1915_v9 = vsub.f32 1.0, %v1914_v17 }
 0x931   :  { %v1958_v54 = vmax.f32 %v1957_v0, %v1873_v3 }
 0x932   :  { %v1916_v26 = vmul.f32 %v4206_v11, %v1915_v9 }
 0x934   :  { %v1917_v43 = vadd.f32 %v4206_v11, %v1916_v26 }
 0x936   :  { %v1921_v28 = vsel %vm1920_vm9, %v4206_v11, %v1917_v43  ;;  %v1875_v61 = vpop.f32.mrf.mxu0 }
 0x937   :  { %v1926_v24 = vsel %vm1923_vm10, %v1925_v60, %v1921_v28  ;;  %v1876_v33 = vadd.f32 %v1875_v61, %v1767_v14  ;;  %v1777_v60 = vpop.permute.xlu0 %1776 }
 0x938   :  { %v1927_v38 = vmul.f32 %v4196_v42, %v1926_v24  ;;  %v1930_v36 = vmul.f32 %v4198_v63, %v1926_v24  ;;  %v1933_v16 = vmul.f32 %v4200_v45, %v1926_v24  ;;  %v1936_v25 = vmul.f32 %v4202_v18, %v1926_v24 }
 0x939   :  { %v1959_v34 = vmax.f32 %v1958_v54, %v1876_v33 }
 0x93a   :  { %v1928_v58 = vmul.f32 0.995, %v1927_v38  ;;  %v1931_v32 = vmul.f32 0.995, %v1930_v36  ;;  %v1934_v8 = vmul.f32 0.995, %v1933_v16 }
 0x93b   :  { %v1937_v35 = vmul.f32 0.995, %v1936_v25  ;;  %v1960_v51 = vsub.f32 %v1864_v49, %v1959_v34  ;;  %v1963_v39 = vsub.f32 %v1867_v12, %v1959_v34  ;;  %v1966_v41 = vsub.f32 %v1870_v31, %v1959_v34 }
 0x93c   :  { %v1929_v48 = vadd.f32 0.001, %v1928_v58  ;;  %v1932_v57 = vadd.f32 0.001, %v1931_v32  ;;  %v1969_v15 = vsub.f32 %v1873_v3, %v1959_v34  ;;  %v1972_v13 = vsub.f32 %v1876_v33, %v1959_v34 }
 0x93d   :  { %v1961_v5 = vmul.f32 1.442695, %v1960_v51  ;;  %v1964_v52 = vmul.f32 1.442695, %v1963_v39  ;;  %v1935_v55 = vadd.f32 0.001, %v1934_v8 }
 0x93e   :  { %v1940_v19 = vmul.f32 6.0, %v1929_v48  ;;  %v1942_v56 = vadd.f32 %v1932_v57, %v1929_v48  ;;  %v1967_v42 = vmul.f32 1.442695, %v1966_v41  ;;  %v1878_v63 = vpop.f32.mrf.mxu0  ;;  %v1938_v27 = vadd.f32 0.001, %v1937_v35 }
 0x93f   :  { %4207 = vpow2.f32 %v1961_v5  ;;  %v1970_v47 = vmul.f32 1.442695, %v1969_v15  ;;  %v5337_v45 = vadd.f32 %v1878_v63, %v1772_v30  ;;  %v1973_v62 = vmul.f32 1.442695, %v1972_v13  ;;  %v1782_v15 = vpop.permute.xlu1 %1781 }
 0x940   :  { %v5339_v20 = vadd.f32 -3.0, %v1940_v19  ;;  %v1943_v18 = vmul.f32 6.0, %v1942_v56  ;;  %v1945_v37 = vadd.f32 %v1942_v56, %v1935_v55  ;;  %4209 = vpow2.f32 %v1964_v52 }
 0x941   :  { %v2023_v53 = vand.u32 2147483647, %v5337_v45  ;;  %4211 = vpow2.f32 %v1967_v42 }
 0x942   :  { %v5345_v1 = vadd.f32 -3.0, %v1943_v18  ;;  %v1946_v2 = vmul.f32 6.0, %v1945_v37  ;;  %v1948_v4 = vadd.f32 %v1945_v37, %v1938_v27  ;;  %vm2067_vm11 = vcmp.ge.f32.partialorder %v5342_v46, %v5339_v20  ;;  %v1787_v18 = vpop.permute.xlu2 %1786 }
 0x943   :  { %v2024_v10 = vsub.f32 0.0, %v2023_v53  ;;  %4213 = vpow2.f32 %v1970_v47  ;;  %v3908_v59 = vsel %vm2067_vm11, 1.0, %v4399_v50  ;;  %v3901_v43 = vadd.f32 3.0, %v5339_v20 }
 0x944   :  { %v5349_v11 = vadd.f32 -3.0, %v1946_v2  ;;  %v1949_v17 = vmul.f32 6.0, %v1948_v4  ;;  %4215 = vpow2.f32 %v1973_v62  ;;  %vm2070_vm12 = vcmp.ge.f32.partialorder %v5342_v46, %v5345_v1 }
 0x945   :  { %v5352_v12 = vpop.eup %4207  ;;  %v2025_v22 = vmul.f32 1.442695, %v2024_v10  ;;  %v3909_v49 = vsel %vm2070_vm12, 1.0, %v4399_v50  ;;  %v5366_v29 = vsub.f32 1.0, %v3908_v59  ;;  %v1952_v3 = vsub.f32 %v5345_v1, %v5339_v20 }
 0x946   :  { %v5356_v21 = vpop.eup %4209  ;;  %v5358_v9 = vadd.f32 -3.0, %v1949_v17  ;;  %vm2073_vm13 = vcmp.ge.f32.partialorder %v5342_v46, %v5349_v11  ;;  %v1881_v31 = vpop.f32.mrf.mxu0  ;;  %v5379_v28 = vsub.f32 %v3908_v59, %v3909_v49  ;;  %v1953_v54 = vsub.f32 %v5349_v11, %v5345_v1 }
 0x947   :  { %v1975_v23 = vadd.f32 %v5356_v21, %v5352_v12  ;;  %v3910_v26 = vsel %vm2073_vm13, 1.0, %v4399_v50  ;;  %v5368_v6 = vpop.eup %4211  ;;  %4217 = vpow2.f32 %v2025_v22  ;;  %v5387_v33 = vadd.f32 %v1881_v31, %v1777_v60 }
 0x948   :  { %vm2076_vm14 = vcmp.ge.f32.partialorder %v5342_v46, %v5358_v9  ;;  %v5381_v61 = vsub.f32 %v3909_v49, %v3910_v26  ;;  %v2082_v25 = vmul.f32 %v3901_v43, %v5366_v29  ;;  %v2092_v34 = vmul.f32 %v5379_v28, %v1952_v3 }
 0x949   :  { %v5376_v0 = vsel %vm2076_vm14, 1.0, %v4399_v50  ;;  %v1976_v14 = vadd.f32 %v5368_v6, %v1975_v23  ;;  %v5383_v24 = vpop.eup %4213  ;;  %v1954_v58 = vsub.f32 %v5358_v9, %v5349_v11  ;;  %v2033_v8 = vand.u32 2147483647, %v5387_v33 }
 0x94a   :  { %v5390_v38 = vsub.f32 %v3910_v26, %v5376_v0  ;;  %v4216_v36 = vpop.eup %4215  ;;  %v2105_v32 = vmul.f32 %v5381_v61, %v1953_v54  ;;  %v2093_v51 = vadd.f32 %v2092_v34, %v2082_v25  ;;  %v1955_v39 = vsub.f32 3.0, %v5358_v9 }
 0x94b   :  { %v1977_v16 = vadd.f32 %v5383_v24, %v1976_v14  ;;  %v2034_v41 = vsub.f32 0.0, %v2033_v8  ;;  %v2090_v2 = vmul.f32 %v5339_v20, %v5379_v28  ;;  %v5413_v22 = vmul.f32 -3.0, %v5366_v29 }
 0x94c   :  { %v2118_v57 = vmul.f32 %v5390_v38, %v1954_v58  ;;  %v2106_v52 = vadd.f32 %v2105_v32, %v2093_v51  ;;  %v2130_v55 = vmul.f32 %v5376_v0, %v1955_v39  ;;  %v2103_v20 = vmul.f32 %v5345_v1, %v5381_v61 }
 0x94d   :  { %v1978_v35 = vadd.f32 %v4216_v36, %v1977_v16  ;;  %v4218_v5 = vpop.eup %4217  ;;  %v2035_v13 = vmul.f32 1.442695, %v2034_v41  ;;  %v2091_v3 = vadd.f32 %v2090_v2, %v5413_v22  ;;  %v2116_v32 = vmul.f32 %v5349_v11, %v5390_v38 }
 0x94e   :  { %v1884_v48 = vpop.f32.mrf.mxu0  ;;  %v2119_v56 = vadd.f32 %v2118_v57, %v2106_v52  ;;  %v2027_v42 = vadd.f32 1.0, %v4218_v5  ;;  %vm2062_vm14 = vcmp.ge.f32.partialorder %v5335_v44, -3.0 }
 0x94f   :  { %4219 = vrcp.f32 %v1978_v35  ;;  %v5401_v30 = vadd.f32 %v1884_v48, %v1782_v15  ;;  %v1990_v59 = vand.u32 2147483648, %v1978_v35  ;;  %v1988_v26 = vand.u32 2147483647, %v1978_v35 }
 0x950   :  { %4221 = vpow2.f32 %v2035_v13  ;;  %v5405_v27 = vadd.f32 %v2130_v55, %v2119_v56  ;;  %vm1984_vm4 = vweird.f32 %v1978_v35  ;;  %v2104_v1 = vadd.f32 %v2103_v20, %v2091_v3 }
 0x951   :  { %v2043_v19 = vand.u32 2147483647, %v5401_v30  ;;  %v1991_v36 = vor.u32 1.1754944e-38, %v1990_v59  ;;  %vm1989_vm5 = vcmp.eq.f32.partialorder %v1988_v26, 8.507059e+37 }
 0x952   :  { %4223 = vrcp.f32 %v5405_v27  ;;  %vm2144_vm7 = vweird.f32 %v5405_v27 }
 0x953   :  { %v2044_v63 = vsub.f32 0.0, %v2043_v19  ;;  %4225 = vlog2.f32 %v2027_v42  ;;  %v2022_v19 = vmax.f32 %v5337_v45, 0.0  ;;  %v2117_v42 = vadd.f32 %v2116_v32, %v2104_v1 }
 0x955   :  { %v4220_v47 = vpop.eup %4219  ;;  %v2045_v62 = vmul.f32 1.442695, %v2044_v63 }
 0x956   :  { %v1980_v37 = vmul.f32 %v4220_v47, %v1978_v35  ;;  %v1887_v53 = vpop.f32.mrf.mxu0  ;;  %v4222_v10 = vpop.eup %4221  ;;  %vm1985_vm2 = vweird.f32 %v4220_v47 }
 0x957   :  { %v5410_v4 = vadd.f32 %v1887_v53, %v1787_v18  ;;  %4227 = vpow2.f32 %v2045_v62  ;;  %v2037_v49 = vadd.f32 1.0, %v4222_v10  ;;  %vm1986_vm15 = vmor %vm1984_vm4, %vm1985_vm2  ;;  %v2042_v18 = vmax.f32 %v5401_v30, 0.0 }
 0x958   :  { %v1981_v17 = vsub.f32 1.0, %v1980_v37  ;;  %v5419_v60 = vpop.eup %4223  ;;  %vm2063_vm2 = vcmp.le.f32.partialorder %v5335_v44, 3.0 }
 0x959   :  { %v2053_v31 = vand.u32 2147483647, %v5410_v4  ;;  %4229 = vlog2.f32 %v2037_v49  ;;  %v4226_v54 = vpop.eup %4225  ;;  %v2140_v25 = vmul.f32 %v5419_v60, %v5405_v27  ;;  %vm2145_vm6 = vweird.f32 %v5419_v60  ;;  %vm2064_vm4 = vmand %vm2062_vm14, %vm2063_vm2 }
 0x95a   :  { %v1982_v23 = vmul.f32 %v4220_v47, %v1981_v17  ;;  %v2029_v15 = vmul.f32 0.6931472, %v4226_v54  ;;  %vm5449_vm8 = vmor %vm2144_vm7, %vm2145_vm6 }
 0x95b   :  { %v2054_v43 = vsub.f32 0.0, %v2053_v31  ;;  %v2141_v5 = vsub.f32 1.0, %v2140_v25  ;;  %v2150_v31 = vand.u32 2147483648, %v5405_v27  ;;  %v2148_v25 = vand.u32 2147483647, %v5405_v27 }
 0x95c   :  { %v1983_v14 = vadd.f32 %v4220_v47, %v1982_v23 }
 0x95d   :  { %v2055_v16 = vmul.f32 1.442695, %v2054_v43  ;;  %v4228_v34 = vpop.eup %4227  ;;  %v2142_v37 = vmul.f32 %v5419_v60, %v2141_v5  ;;  %vm2149_vm9 = vcmp.eq.f32.partialorder %v2148_v25, 8.507059e+37 }
 0x95e   :  { %v1987_v58 = vsel %vm1986_vm15, %v4220_v47, %v1983_v14  ;;  %v2047_v51 = vadd.f32 1.0, %v4228_v34  ;;  %v2030_v47 = vadd.f32 %v2029_v15, %v2022_v19 }
 0x95f   :  { %v1992_v8 = vsel %vm1989_vm5, %v1991_v36, %v1987_v58  ;;  %4231 = vpow2.f32 %v2055_v16  ;;  %v4230_v57 = vpop.eup %4229  ;;  %v2143_v30 = vadd.f32 %v5419_v60, %v2142_v37 }
 0x960   :  { %v1993_v39 = vmul.f32 %v5352_v12, %v1992_v8  ;;  %v1996_v35 = vmul.f32 %v5356_v21, %v1992_v8  ;;  %v1999_v41 = vmul.f32 %v5368_v6, %v1992_v8  ;;  %v2002_v48 = vmul.f32 %v5383_v24, %v1992_v8 }
 0x961   :  { %4233 = vlog2.f32 %v2047_v51  ;;  %v2039_v56 = vmul.f32 0.6931472, %v4230_v57  ;;  %v2128_v21 = vmul.f32 %v5376_v0, %v5358_v9  ;;  %v2032_v24 = vmax.f32 %v5387_v33, 0.0 }
 0x962   :  { %v1994_v52 = vmul.f32 0.995, %v1993_v39  ;;  %v1997_v13 = vmul.f32 0.995, %v1996_v35  ;;  %v2000_v55 = vmul.f32 0.995, %v1999_v41  ;;  %v2147_v27 = vsel %vm5449_vm8, %v5419_v60, %v2143_v30 }
 0x963   :  { %v2003_v11 = vmul.f32 0.995, %v2002_v48  ;;  %v2040_v59 = vadd.f32 %v2039_v56, %v2032_v24  ;;  %v2129_v49 = vadd.f32 %v2128_v21, %v2117_v42  ;;  %v2031_v33 = vadd.f32 0.001, %v2030_v47 }
 0x964   :  { %v1995_v63 = vadd.f32 0.001, %v1994_v52  ;;  %v1998_v12 = vadd.f32 0.001, %v1997_v13  ;;  %v2001_v62 = vadd.f32 0.001, %v2000_v55 }
 0x965   :  { %v4232_v6 = vpop.eup %4231  ;;  %v2004_v17 = vadd.f32 0.001, %v2003_v11  ;;  %v2041_v36 = vadd.f32 0.001, %v2040_v59  ;;  %v2154_v51 = vsub.f32 %v5342_v46, %v2129_v49  ;;  %v2098_v39 = vmul.f32 %v5379_v28, %v2031_v33 }
 0x966   :  { %v2006_v53 = vmul.f32 6.0, %v1995_v63  ;;  %v2008_v2 = vadd.f32 %v1998_v12, %v1995_v63  ;;  %v2057_v10 = vadd.f32 1.0, %v4232_v6  ;;  %v2151_v35 = vor.u32 1.1754944e-38, %v2150_v31 }
 0x967   :  { %v4234_v45 = vpop.eup %4233  ;;  %v2100_v46 = vmul.f32 %v5379_v28, %v2041_v36  ;;  %v2111_v52 = vmul.f32 %v5381_v61, %v2041_v36  ;;  %v2052_v13 = vmax.f32 %v5410_v4, 0.0  ;;  %v2087_v56 = vmul.f32 %v5366_v29, %v2031_v33 }
 0x968   :  { %v5436_v23 = vadd.f32 -3.0, %v2006_v53  ;;  %v2009_v9 = vmul.f32 6.0, %v2008_v2  ;;  %v2011_v26 = vadd.f32 %v2008_v2, %v2001_v62  ;;  %v2049_v3 = vmul.f32 0.6931472, %v4234_v45 }
 0x969   :  { %4235 = vlog2.f32 %v2057_v10  ;;  %v2152_v19 = vsel %vm2149_vm9, %v2151_v35, %v2147_v27  ;;  %v2099_v42 = vadd.f32 %v2098_v39, %v5366_v29  ;;  %v2101_v37 = vadd.f32 %v2100_v46, %v2087_v56 }
 0x96a   :  { %v5440_v43 = vadd.f32 -3.0, %v2009_v9  ;;  %v2012_v20 = vmul.f32 6.0, %v2011_v26  ;;  %v2014_v14 = vadd.f32 %v2011_v26, %v2004_v17  ;;  %v3906_v54 = vadd.f32 3.0, %v5436_v23 }
 0x96b   :  { %v2050_v16 = vadd.f32 %v2049_v3, %v2042_v18  ;;  %v2155_v18 = vmul.f32 %v2154_v51, %v2152_v19  ;;  %v2112_v62 = vadd.f32 %v2111_v52, %v2099_v42  ;;  %v2094_v35 = vmul.f32 %v5436_v23, %v5379_v28 }
 0x96c   :  { %v5445_v34 = vadd.f32 -3.0, %v2012_v20  ;;  %v2015_v58 = vmul.f32 6.0, %v2014_v14  ;;  %v2018_v32 = vsub.f32 %v5440_v43, %v5436_v23  ;;  %v2084_v1 = vmul.f32 %v3906_v54, %v5366_v29 }
 0x96d   :  { %v2051_v57 = vadd.f32 0.001, %v2050_v16  ;;  %v2156_v31 = vsub.f32 1.0, %v2155_v18 }
 0x96e   :  { %v5459_v41 = vadd.f32 -3.0, %v2015_v58  ;;  %v2019_v48 = vsub.f32 %v5445_v34, %v5440_v43  ;;  %v2096_v15 = vmul.f32 %v5379_v28, %v2018_v32 }
 0x96f   :  { %v4236_v5 = vpop.eup %4235  ;;  %v2113_v21 = vmul.f32 %v5381_v61, %v2051_v57  ;;  %v2124_v6 = vmul.f32 %v5390_v38, %v2051_v57  ;;  %v2157_v20 = vmul.f32 %v2156_v31, %v2155_v18 }
 0x970   :  { %v2020_v60 = vsub.f32 %v5459_v41, %v5445_v34  ;;  %v2059_v55 = vmul.f32 0.6931472, %v4236_v5  ;;  %v2097_v11 = vadd.f32 %v2096_v15, %v2084_v1  ;;  %v2021_v63 = vsub.f32 3.0, %v5459_v41 }
 0x971   :  { %v2109_v12 = vmul.f32 %v5381_v61, %v2019_v48  ;;  %v2114_v29 = vadd.f32 %v2113_v21, %v2101_v37  ;;  %v2125_v45 = vadd.f32 %v2124_v6, %v2112_v62  ;;  %v2095_v15 = vadd.f32 %v2094_v35, %v5413_v22  ;;  %v3912_v62 = vld [vmem:[%s6028_s9 + $0x8] sm:$0xf] }
 0x972   :  { %v2060_v4 = vadd.f32 %v2059_v55, %v2052_v13  ;;  %v2122_v47 = vmul.f32 %v5390_v38, %v2020_v60  ;;  %v2134_v10 = vmul.f32 %v5376_v0, %v2021_v63  ;;  %v2107_v5 = vmul.f32 %v5440_v43, %v5381_v61 }
 0x973   :  { %v2110_v24 = vadd.f32 %v2109_v12, %v2097_v11  ;;  %v2120_v11 = vmul.f32 %v5445_v34, %v5390_v38  ;;  %v2132_v22 = vmul.f32 %v5376_v0, %v5459_v41 }
 0x974   :  { %v2061_v53 = vadd.f32 0.001, %v2060_v4  ;;  %v2108_v55 = vadd.f32 %v2107_v5, %v2095_v15 }
 0x975   :  { %v2123_v2 = vadd.f32 %v2122_v47, %v2110_v24 }
 0x976   :  { %v2126_v17 = vmul.f32 %v5390_v38, %v2061_v53  ;;  %v2136_v59 = vmul.f32 %v5376_v0, %v2061_v53  ;;  %v2121_v23 = vadd.f32 %v2120_v11, %v2108_v55  ;;  %v3938_v55 = vld [vmem:[%s6026_s7 + $0x158] sm:$0xff]  ;;  %v3940_v11 = vld [vmem:[%s6026_s7 + $0x168] sm:$0xff] }
 0x977   :  { %v2135_v49 = vadd.f32 %v2134_v10, %v2123_v2  ;;  %v3919_v10 = vld [vmem:[%s6031_s12 + $0x8] sm:$0xf] }
 0x978   :  { %v2127_v9 = vadd.f32 %v2126_v17, %v2114_v29  ;;  %v2137_v26 = vadd.f32 %v2136_v59, %v2125_v45  ;;  %v2133_v34 = vadd.f32 %v2132_v22, %v2121_v23  ;;  %v3918_v29 = vld [vmem:[%s6030_s11 + $0x8] sm:$0xf]  ;;  %v3946_v23 = vld [vmem:[%s6026_s7 + $0x198] sm:$0xff]  ;;  %v3947_v22 = vld [vmem:[%s6026_s7 + $0x1a0] sm:$0xff] }
 0x979   :  { %v2153_v3 = vmul.f32 %v2152_v19, %v2135_v49 }
 0x97a   :  { %v2138_v33 = vadd.f32 %v5376_v0, %v2127_v9  ;;  %v2189_v30 = vmul.f32 %v2156_v31, %v2137_v26  ;;  %v2160_v60 = vmul.f32 %v2157_v20, %v2137_v26  ;;  %v3913_v0 = vld [vmem:[%s6029_s10 + $0x8] sm:$0xf] }
 0x97b   :  { %v2164_v14 = vmul.f32 2.0, %v2153_v3  ;;  %v2184_v27 = vmul.f32 %v2153_v3, %v2153_v3  ;;  %v2158_v57 = vmul.f32 %v2155_v18, %v2153_v3 }
 0x97c   :  { %v2163_v54 = vadd.f32 %v2138_v33, %v2137_v26  ;;  %v2185_v36 = vmul.f32 %v2155_v18, %v2138_v33  ;;  %v2190_v16 = vmul.f32 %v2189_v30, %v2156_v31  ;;  %v2313_v31 = vpop.permute.xlu0 %2312 }
 0x97d   :  { %v2187_v25 = vmul.f32 %v2164_v14, %v2157_v20  ;;  %v2159_v52 = vmul.f32 %v2158_v57, %v2155_v18 }
 0x97e   :  { %v2165_v58 = vsub.f32 %v2163_v54, %v2164_v14  ;;  %v2186_v32 = vmul.f32 %v2185_v36, %v2155_v18  ;;  %v3929_v14 = vld [vmem:[%s6022_s3 + $0x18] sm:$0xff]  ;;  %v2354_v36 = vpop.permute.xlu1 %2353 }
 0x97f   :  { %v2161_v42 = vadd.f32 %v2160_v60, %v2159_v52  ;;  %v3937_v52 = vld [vmem:[%s6026_s7 + $0x150] sm:$0xff] }
 0x980   :  { %v2166_v8 = vmul.f32 %v2165_v58, %v2157_v20  ;;  %v2188_v51 = vadd.f32 %v2187_v25, %v2186_v32 }
 0x981   :  { %v2162_v43 = vmul.f32 %v2161_v42, %v2135_v49  ;;  %v3943_v42 = vld [vmem:[%s6026_s7 + $0x180] sm:$0xff] }
 0x982   :  { %v2167_v1 = vadd.f32 %v2166_v8, %v2153_v3  ;;  %v2191_v39 = vadd.f32 %v2190_v16, %v2188_v51 }
 0x984   :  { %4237 = vrcp.f32 %v2167_v1  ;;  %v2192_v48 = vmul.f32 %v2191_v39, %v2184_v27  ;;  %v2179_v56 = vand.u32 2147483648, %v2167_v1  ;;  %v2177_v28 = vand.u32 2147483647, %v2167_v1  ;;  %v2392_v27 = vpop.permute.xlu2 %2391 }
 0x985   :  { %vm2173_vm11 = vweird.f32 %v2167_v1 }
 0x986   :  { %v2180_v61 = vor.u32 1.1754944e-38, %v2179_v56  ;;  %vm2178_vm13 = vcmp.eq.f32.partialorder %v2177_v28, 8.507059e+37  ;;  %v3942_v56 = vld [vmem:[%s6026_s7 + $0x178] sm:$0xff]  ;;  %v3945_v28 = vld [vmem:[%s6026_s7 + $0x190] sm:$0xff] }
 0x98a   :  { %v4238_v46 = vpop.eup %4237 }
 0x98b   :  { %v2169_v13 = vmul.f32 %v4238_v46, %v2167_v1  ;;  %vm2174_vm10 = vweird.f32 %v4238_v46  ;;  %v3933_v1 = vld [vmem:[%s6024_s5 + $0x18] sm:$0xff] }
 0x98c   :  { %vm2175_vm12 = vmor %vm2173_vm11, %vm2174_vm10 }
 0x98d   :  { %v2170_v19 = vsub.f32 1.0, %v2169_v13  ;;  %v3939_v13 = vld [vmem:[%s6026_s7 + $0x160] sm:$0xff] }
 0x98f   :  { %v2171_v63 = vmul.f32 %v4238_v46, %v2170_v19  ;;  %v3941_v19 = vld [vmem:[%s6026_s7 + $0x170] sm:$0xff] }
 0x991   :  { %v2172_v12 = vadd.f32 %v4238_v46, %v2171_v63  ;;  %v3944_v63 = vld [vmem:[%s6026_s7 + $0x188] sm:$0xff] }
 0x993   :  { %v2176_v21 = vsel %vm2175_vm12, %v4238_v46, %v2172_v12  ;;  %v3948_v12 = vld [vmem:[%s6026_s7 + $0x1a8] sm:$0xff] }
 0x994   :  { %v2181_v38 = vsel %vm2178_vm13, %v2180_v61, %v2176_v21  ;;  %v3949_v61 = vld [vmem:[%s6026_s7 + $0x1b0] sm:$0xff] }
 0x995   :  { %v2182_v6 = vmul.f32 %v2181_v38, %v2162_v43  ;;  %v2193_v4 = vmul.f32 %v2192_v48, %v2181_v38  ;;  %v3950_v43 = vld [vmem:[%s6026_s7 + $0x1b8] sm:$0xff] }
 0x997   :  { %v2183_v47 = vadd.f32 %v2182_v6, %v2133_v34  ;;  %v2194_v24 = vmul.f32 %v2193_v4, %v2181_v38  ;;  %v2456_v34 = vpop.permute.xlu0 %2455  ;;  %v2461_v4 = vpop.permute.xlu1 %2460 }
 0x999   :  { %4239 = vlog2.f32 %v2194_v24  ;;  %v2197_v41 = vsel %vm2064_vm4, %v2183_v47, %v5335_v44 }
 0x99a   :  { %3914 = vmatpush.msk.msra.mxu2 %vm60_vm0, %v2197_v41 }
 0x99b   :  { %3915 = vmatmul.msk.f32.vlgmr.msra.gmra.mxu2 %vm56_vm1, %v3913_v0 }
 0x99c   :  { %3916 = vmatpush.msk.msrb.mxu2 %vm60_vm0, %v5257_v40 }
 0x99e   :  { %3920 = vmatpush.msk.msra.mxu2 %vm60_vm0, %v2197_v41 }
 0x99f   :  { %v4240_v18 = vpop.eup %4239 }
 0x9a0   :  { %v2196_v37 = vmul.f32 0.6931472, %v4240_v18  ;;  %v2471_v18 = vpop.permute.xlu0 %2470 }
 0x9a2   :  { %v2198_v53 = vsel %vm2064_vm4, %v2196_v37, 0.0  ;;  %v2466_v37 = vpop.permute.xlu2 %2465 }
 0x9a3   :  { %v2200_v2 = vrot.slane %v2198_v53, 4  ;;  %3917 = vmatmul.msk.f32.vlgmr.msrb.gmra.mxu2 %vm56_vm1, %v3912_v62 }
 0x9a4   :  { %3922 = vmatpush.msk.msrb.mxu2 %vm60_vm0, %v5257_v40 }
 0x9a5   :  { %v5507_v44 = vadd.f32 %v2200_v2, %v5251_v7  ;;  %v3924_v7 = vld [vmem:[%s6020_s1 + $0x18] sm:$0xff] }
 0x9ab   :  { %3921 = vmatmul.msk.f32.vlgmr.msra.gmra.mxu2 %vm56_vm1, %v3919_v10  ;;  %v2476_v10 = vpop.permute.xlu1 %2475 }
 0x9b3   :  { %3923 = vmatmul.msk.f32.vlgmr.msrb.gmra.mxu2 %vm56_vm1, %v3918_v29 }
 0xa1e   :  { %v2230_v45 = vpop.f32.mrf.mxu2 }
 0xa26   :  { %v2253_v17 = vpop.f32.mrf.mxu2 }
 0xa27   :  { %v5517_v59 = vadd.f32 %v2253_v17, %v2230_v45 }
 0xa29   :  { %3926 = vmatpush.msk.msra.mxu2 %vm60_vm0, %v5517_v59  ;;  %4004 = vmatpush.msk.msrb.mxu1 %vm60_vm0, %v5517_v59 }
 0xa2a   :  { %3927 = vmatmul.msk.f32.vlgmr.msra.gmra.mxu2 %vm56_vm1, %v3924_v7 }
 0xa2e   :  { %v5527_v40 = vpop.f32.mrf.mxu2 }
 0xa36   :  { %v5529_v49 = vpop.f32.mrf.mxu2 }
 0xaad   :  { %v2338_v9 = vpop.f32.mrf.mxu2 }
 0xaae   :  { %v2339_v26 = vadd.f32 %v2338_v9, %v2313_v31 }
 0xab0   :  { %v2342_v3 = vmin.f32 %v2339_v26, 0.0  ;;  %vm2341_vm15 = vcmp.gt.f32.partialorder %v2339_v26, 0.0 }
 0xab2   :  { %v2343_v33 = vmul.f32 1.442695, %v2342_v3 }
 0xab4   :  { %4241 = vpow2.f32 %v2343_v33 }
 0xaba   :  { %v4242_v30 = vpop.eup %4241 }
 0xabb   :  { %v3928_v20 = vadd.f32 -1.0, %v4242_v30 }
 0xabd   :  { %v2346_v54 = vsel %vm2341_vm15, %v2339_v26, %v3928_v20 }
 0xabe   :  { %2374 = vmatpush.msrb.mxu2 %v2346_v54 }
 0xabf   :  { %3931 = vmatmul.msk.f32.vlgmr.msrb.gmra.mxu2 %vm97_vm3, %v3929_v14 }
 0xb42   :  { %v2376_v16 = vpop.f32.mrf.mxu2 }
 0xb43   :  { %v2377_v25 = vadd.f32 %v2376_v16, %v2354_v36 }
 0xb45   :  { %v2380_v58 = vmin.f32 %v2377_v25, 0.0  ;;  %vm2379_vm5 = vcmp.gt.f32.partialorder %v2377_v25, 0.0 }
 0xb47   :  { %v2381_v32 = vmul.f32 1.442695, %v2380_v58 }
 0xb49   :  { %4243 = vpow2.f32 %v2381_v32 }
 0xb4f   :  { %v4244_v8 = vpop.eup %4243 }
 0xb50   :  { %v3932_v51 = vadd.f32 -1.0, %v4244_v8 }
 0xb52   :  { %v2384_v39 = vsel %vm2379_vm5, %v2377_v25, %v3932_v51 }
 0xb53   :  { %2412 = vmatpush.msra.mxu2 %v2384_v39 }
 0xb54   :  { %3935 = vmatmul.msk.f32.vlgmr.msra.gmra.mxu2 %vm97_vm3, %v3933_v1 }
 0xbd7   :  { %v2414_v35 = vpop.f32.mrf.mxu2 }
 0xbd8   :  { %v2415_v48 = vadd.f32 %v2414_v35, %v2392_v27 }
 0xbda   :  { %v2418_v57 = vmin.f32 %v2415_v48, 0.0  ;;  %vm2417_vm6 = vcmp.gt.f32.partialorder %v2415_v48, 0.0 }
 0xbdc   :  { %v2419_v15 = vmul.f32 1.442695, %v2418_v57 }
 0xbde   :  { %4245 = vpow2.f32 %v2419_v15  ;;  %v2481_v15 = vpop.permute.xlu2 %2480 }
 0xbe4   :  { %v4246_v5 = vpop.eup %4245 }
 0xbe5   :  { %v3936_v46 = vadd.f32 -1.0, %v4246_v5  ;;  %v2486_v5 = vpop.permute.xlu0 %2485 }
 0xbe7   :  { %v2422_v60 = vsel %vm2417_vm6, %v2415_v48, %v3936_v46 }
 0xbe8   :  { %2580 = vmatpush.msra.mxu0 %v2422_v60  ;;  %4077 = vmatpush.msrb.mxu2 %v2422_v60 }
 0xbe9   :  { %3965 = vmatmul.msk.f32.vlgmr.msra.gmra.mxu0 %vm97_vm3, %v3937_v52  ;;  %3967 = vmatmul.msk.f32.vlgmr.msrb.gmra.mxu2 %vm97_vm3, %v3939_v13 }
 0xbf1   :  { %3966 = vmatmul.msk.f32.gmra.mxu0 %vm97_vm3, %v3938_v55  ;;  %3968 = vmatmul.msk.f32.gmra.mxu2 %vm97_vm3, %v3940_v11  ;;  %v2491_v55 = vpop.permute.xlu1 %2490 }
 0xbf9   :  { %3969 = vmatmul.msk.f32.gmra.mxu2 %vm97_vm3, %v3941_v19 }
 0xc01   :  { %3970 = vmatmul.msk.f32.gmra.mxu2 %vm97_vm3, %v3942_v56 }
 0xc09   :  { %3971 = vmatmul.msk.f32.gmra.mxu2 %vm97_vm3, %v3943_v42 }
 0xc11   :  { %3972 = vmatmul.msk.f32.gmra.mxu2 %vm97_vm3, %v3944_v63  ;;  %v2496_v63 = vpop.permute.xlu2 %2495 }
 0xc19   :  { %3973 = vmatmul.msk.f32.gmra.mxu2 %vm97_vm3, %v3945_v28 }
 0xc21   :  { %3974 = vmatmul.msk.f32.gmra.mxu2 %vm97_vm3, %v3946_v23 }
 0xc29   :  { %3975 = vmatmul.msk.f32.gmra.mxu2 %vm97_vm3, %v3947_v22 }
 0xc31   :  { %3976 = vmatmul.msk.f32.gmra.mxu2 %vm97_vm3, %v3948_v12 }
 0xc39   :  { %3977 = vmatmul.msk.f32.gmra.mxu2 %vm97_vm3, %v3949_v61 }
 0xc41   :  { %3978 = vmatmul.msk.f32.gmra.mxu2 %vm97_vm3, %v3950_v43 }
 0xc66   :  { %v2582_v21 = vpop.f32.mrf.mxu0 }
 0xc67   :  { %v2583_v0 = vadd.f32 %v2582_v21, %v2456_v34 }
 0xc6c   :  { %v2588_v38 = vpop.f32.mrf.mxu2 }
 0xc6d   :  { %v2589_v62 = vadd.f32 %v2588_v38, %v2466_v37  ;;  %v2501_v38 = vpop.permute.xlu0 %2500 }
 0xc6e   :  { %v2585_v6 = vpop.f32.mrf.mxu0 }
 0xc6f   :  { %v2586_v47 = vadd.f32 %v2585_v6, %v2461_v4 }
 0xc71   :  { %v2624_v41 = vmax.f32 %v2583_v0, %v2586_v47 }
 0xc73   :  { %v2625_v2 = vmax.f32 %v2624_v41, %v2589_v62 }
 0xc74   :  { %v2591_v24 = vpop.f32.mrf.mxu2 }
 0xc75   :  { %v2592_v53 = vadd.f32 %v2591_v24, %v2471_v18 }
 0xc77   :  { %v2626_v45 = vmax.f32 %v2625_v2, %v2592_v53 }
 0xc7c   :  { %v2594_v29 = vpop.f32.mrf.mxu2 }
 0xc7d   :  { %v2595_v17 = vadd.f32 %v2594_v29, %v2476_v10 }
 0xc7f   :  { %v2627_v7 = vmax.f32 %v2626_v45, %v2595_v17 }
 0xc81   :  { %v2628_v31 = vsub.f32 %v2583_v0, %v2627_v7  ;;  %v2631_v9 = vsub.f32 %v2586_v47, %v2627_v7  ;;  %v2634_v26 = vsub.f32 %v2589_v62, %v2627_v7  ;;  %v2637_v3 = vsub.f32 %v2592_v53, %v2627_v7 }
 0xc82   :  { %v2640_v14 = vsub.f32 %v2595_v17, %v2627_v7 }
 0xc83   :  { %v2629_v33 = vmul.f32 1.442695, %v2628_v31  ;;  %v2632_v30 = vmul.f32 1.442695, %v2631_v9  ;;  %v2635_v20 = vmul.f32 1.442695, %v2634_v26 }
 0xc84   :  { %v2597_v54 = vpop.f32.mrf.mxu2  ;;  %v2638_v36 = vmul.f32 1.442695, %v2637_v3  ;;  %v2641_v16 = vmul.f32 1.442695, %v2640_v14  ;;  %v5597_v3 = vadd.f32 %v5529_v49, %v5527_v40  ;;  %v2506_v14 = vpop.permute.xlu1 %2505 }
 0xc85   :  { %4247 = vpow2.f32 %v2629_v33  ;;  %v2598_v56 = vadd.f32 %v2597_v54, %v2481_v15 }
 0xc86   :  { %4249 = vpow2.f32 %v2632_v30  ;;  %v5604_v40 = vclamps-f32 %v5597_v3, 3.0 }
 0xc87   :  { %4251 = vpow2.f32 %v2635_v20 }
 0xc88   :  { %4253 = vpow2.f32 %v2638_v36 }
 0xc89   :  { %4255 = vpow2.f32 %v2641_v16 }
 0xc8b   :  { %v4248_v25 = vpop.eup %4247 }
 0xc8c   :  { %v4250_v58 = vpop.eup %4249  ;;  %v2600_v32 = vpop.f32.mrf.mxu2 }
 0xc8d   :  { %v2643_v8 = vadd.f32 %v4250_v58, %v4248_v25  ;;  %v4252_v51 = vpop.eup %4251  ;;  %v2601_v60 = vadd.f32 %v2600_v32, %v2486_v5 }
 0xc8e   :  { %v4254_v39 = vpop.eup %4253 }
 0xc8f   :  { %v2644_v1 = vadd.f32 %v4252_v51, %v2643_v8  ;;  %v4256_v35 = vpop.eup %4255  ;;  %v2690_v22 = vmax.f32 %v2598_v56, %v2601_v60 }
 0xc91   :  { %v2645_v27 = vadd.f32 %v4254_v39, %v2644_v1 }
 0xc93   :  { %v2646_v48 = vadd.f32 %v4256_v35, %v2645_v27 }
 0xc94   :  { %v2603_v57 = vpop.f32.mrf.mxu2 }
 0xc95   :  { %4257 = vrcp.f32 %v2646_v48  ;;  %v2658_v19 = vand.u32 2147483648, %v2646_v48  ;;  %v2604_v42 = vadd.f32 %v2603_v57, %v2491_v55  ;;  %v2656_v23 = vand.u32 2147483647, %v2646_v48 }
 0xc96   :  { %vm2652_vm8 = vweird.f32 %v2646_v48 }
 0xc97   :  { %v2659_v43 = vor.u32 1.1754944e-38, %v2658_v19  ;;  %v2691_v21 = vmax.f32 %v2690_v22, %v2604_v42  ;;  %vm2657_vm10 = vcmp.eq.f32.partialorder %v2656_v23, 8.507059e+37 }
 0xc9b   :  { %v4258_v46 = vpop.eup %4257 }
 0xc9c   :  { %v2648_v52 = vmul.f32 %v4258_v46, %v2646_v48  ;;  %v2606_v13 = vpop.f32.mrf.mxu2  ;;  %vm2653_vm7 = vweird.f32 %v4258_v46 }
 0xc9d   :  { %v2607_v12 = vadd.f32 %v2606_v13, %v2496_v63  ;;  %vm2654_vm9 = vmor %vm2652_vm8, %vm2653_vm7 }
 0xc9e   :  { %v2649_v11 = vsub.f32 1.0, %v2648_v52 }
 0xc9f   :  { %v2692_v47 = vmax.f32 %v2691_v21, %v2607_v12 }
 0xca0   :  { %v2650_v28 = vmul.f32 %v4258_v46, %v2649_v11 }
 0xca2   :  { %v2651_v61 = vadd.f32 %v4258_v46, %v2650_v28 }
 0xca4   :  { %v2655_v34 = vsel %vm2654_vm9, %v4258_v46, %v2651_v61  ;;  %v2609_v6 = vpop.f32.mrf.mxu2 }
 0xca5   :  { %v2660_v4 = vsel %vm2657_vm10, %v2659_v43, %v2655_v34  ;;  %v2610_v24 = vadd.f32 %v2609_v6, %v2501_v38  ;;  %v2511_v43 = vpop.permute.xlu2 %2510 }
 0xca6   :  { %v2661_v0 = vmul.f32 %v4248_v25, %v2660_v4  ;;  %v2664_v41 = vmul.f32 %v4250_v58, %v2660_v4  ;;  %v2667_v18 = vmul.f32 %v4252_v51, %v2660_v4  ;;  %v2670_v37 = vmul.f32 %v4254_v39, %v2660_v4 }
 0xca7   :  { %v2693_v62 = vmax.f32 %v2692_v47, %v2610_v24 }
 0xca8   :  { %v2662_v53 = vmul.f32 0.995, %v2661_v0  ;;  %v2665_v2 = vmul.f32 0.995, %v2664_v41  ;;  %v2668_v10 = vmul.f32 0.995, %v2667_v18 }
 0xca9   :  { %v2671_v29 = vmul.f32 0.995, %v2670_v37  ;;  %v2694_v45 = vsub.f32 %v2598_v56, %v2693_v62  ;;  %v2697_v17 = vsub.f32 %v2601_v60, %v2693_v62  ;;  %v2700_v7 = vsub.f32 %v2604_v42, %v2693_v62 }
 0xcaa   :  { %v2663_v31 = vadd.f32 0.001, %v2662_v53  ;;  %v2666_v9 = vadd.f32 0.001, %v2665_v2  ;;  %v2703_v26 = vsub.f32 %v2607_v12, %v2693_v62  ;;  %v2706_v20 = vsub.f32 %v2610_v24, %v2693_v62 }
 0xcab   :  { %v2695_v33 = vmul.f32 1.442695, %v2694_v45  ;;  %v2698_v30 = vmul.f32 1.442695, %v2697_v17  ;;  %v2669_v54 = vadd.f32 0.001, %v2668_v10 }
 0xcac   :  { %v2674_v36 = vmul.f32 6.0, %v2663_v31  ;;  %v2676_v16 = vadd.f32 %v2666_v9, %v2663_v31  ;;  %v2701_v25 = vmul.f32 1.442695, %v2700_v7  ;;  %v2612_v58 = vpop.f32.mrf.mxu2  ;;  %v2672_v32 = vadd.f32 0.001, %v2671_v29 }
 0xcad   :  { %4259 = vpow2.f32 %v2695_v33  ;;  %v2704_v8 = vmul.f32 1.442695, %v2703_v26  ;;  %v5599_v51 = vadd.f32 %v2612_v58, %v2506_v14  ;;  %v2707_v49 = vmul.f32 1.442695, %v2706_v20  ;;  %v2516_v26 = vpop.permute.xlu0 %2515 }
 0xcae   :  { %v5601_v1 = vadd.f32 -3.0, %v2674_v36  ;;  %v2677_v39 = vmul.f32 6.0, %v2676_v16  ;;  %v2679_v27 = vadd.f32 %v2676_v16, %v2669_v54  ;;  %4261 = vpow2.f32 %v2698_v30 }
 0xcaf   :  { %v2757_v35 = vand.u32 2147483647, %v5599_v51  ;;  %4263 = vpow2.f32 %v2701_v25 }
 0xcb0   :  { %v5607_v48 = vadd.f32 -3.0, %v2677_v39  ;;  %v2680_v57 = vmul.f32 6.0, %v2679_v27  ;;  %v2682_v15 = vadd.f32 %v2679_v27, %v2672_v32  ;;  %vm2801_vm11 = vcmp.ge.f32.partialorder %v5604_v40, %v5601_v1  ;;  %v2521_v39 = vpop.permute.xlu1 %2520 }
 0xcb1   :  { %v2758_v5 = vsub.f32 0.0, %v2757_v35  ;;  %4265 = vpow2.f32 %v2704_v8  ;;  %v3990_v13 = vsel %vm2801_vm11, 1.0, %v4399_v50  ;;  %v3983_v61 = vadd.f32 3.0, %v5601_v1 }
 0xcb2   :  { %v5611_v46 = vadd.f32 -3.0, %v2680_v57  ;;  %v2683_v52 = vmul.f32 6.0, %v2682_v15  ;;  %4267 = vpow2.f32 %v2707_v49  ;;  %vm2804_vm12 = vcmp.ge.f32.partialorder %v5604_v40, %v5607_v48 }
 0xcb3   :  { %v5614_v60 = vpop.eup %4259  ;;  %v2759_v19 = vmul.f32 1.442695, %v2758_v5  ;;  %v3991_v56 = vsel %vm2804_vm12, 1.0, %v4399_v50  ;;  %v5628_v23 = vsub.f32 1.0, %v3990_v13  ;;  %v2686_v12 = vsub.f32 %v5607_v48, %v5601_v1 }
 0xcb4   :  { %v5618_v55 = vpop.eup %4261  ;;  %v5620_v11 = vadd.f32 -3.0, %v2683_v52  ;;  %vm2807_vm13 = vcmp.ge.f32.partialorder %v5604_v40, %v5611_v46  ;;  %v2615_v42 = vpop.f32.mrf.mxu2  ;;  %v5641_v34 = vsub.f32 %v3990_v13, %v3991_v56  ;;  %v2687_v47 = vsub.f32 %v5611_v46, %v5607_v48 }
 0xcb5   :  { %v2709_v63 = vadd.f32 %v5618_v55, %v5614_v60  ;;  %v3992_v28 = vsel %vm2807_vm13, 1.0, %v4399_v50  ;;  %v5630_v22 = vpop.eup %4263  ;;  %4269 = vpow2.f32 %v2759_v19  ;;  %v5649_v24 = vadd.f32 %v2615_v42, %v2511_v43 }
 0xcb6   :  { %vm2810_vm14 = vcmp.ge.f32.partialorder %v5604_v40, %v5620_v11  ;;  %v5643_v6 = vsub.f32 %v3991_v56, %v3992_v28  ;;  %v2816_v37 = vmul.f32 %v3983_v61, %v5628_v23  ;;  %v2826_v62 = vmul.f32 %v5641_v34, %v2686_v12 }
 0xcb7   :  { %v5638_v21 = vsel %vm2810_vm14, 1.0, %v4399_v50  ;;  %v2710_v38 = vadd.f32 %v5630_v22, %v2709_v63  ;;  %v5645_v4 = vpop.eup %4265  ;;  %v2688_v53 = vsub.f32 %v5620_v11, %v5611_v46  ;;  %v2767_v10 = vand.u32 2147483647, %v5649_v24 }
 0xcb8   :  { %v5652_v0 = vsub.f32 %v3992_v28, %v5638_v21  ;;  %v4268_v41 = vpop.eup %4267  ;;  %v2839_v2 = vmul.f32 %v5643_v6, %v2687_v47  ;;  %v2827_v45 = vadd.f32 %v2826_v62, %v2816_v37  ;;  %v2689_v17 = vsub.f32 3.0, %v5620_v11 }
 0xcb9   :  { %v2711_v18 = vadd.f32 %v5645_v4, %v2710_v38  ;;  %v2768_v7 = vsub.f32 0.0, %v2767_v10  ;;  %v2824_v57 = vmul.f32 %v5601_v1, %v5641_v34  ;;  %v5675_v19 = vmul.f32 -3.0, %v5628_v23 }
 0xcba   :  { %v2852_v9 = vmul.f32 %v5652_v0, %v2688_v53  ;;  %v2840_v30 = vadd.f32 %v2839_v2, %v2827_v45  ;;  %v2864_v54 = vmul.f32 %v5638_v21, %v2689_v17  ;;  %v2837_v1 = vmul.f32 %v5607_v48, %v5643_v6 }
 0xcbb   :  { %v2712_v29 = vadd.f32 %v4268_v41, %v2711_v18  ;;  %v4270_v33 = vpop.eup %4269  ;;  %v2769_v20 = vmul.f32 1.442695, %v2768_v7  ;;  %v2825_v12 = vadd.f32 %v2824_v57, %v5675_v19  ;;  %v2850_v2 = vmul.f32 %v5611_v46, %v5652_v0 }
 0xcbc   :  { %v2618_v31 = vpop.f32.mrf.mxu2  ;;  %v2853_v16 = vadd.f32 %v2852_v9, %v2840_v30  ;;  %v2761_v25 = vadd.f32 1.0, %v4270_v33  ;;  %vm2796_vm14 = vcmp.ge.f32.partialorder %v5597_v3, -3.0 }
 0xcbd   :  { %4271 = vrcp.f32 %v2712_v29  ;;  %v5663_v14 = vadd.f32 %v2618_v31, %v2516_v26  ;;  %v2724_v13 = vand.u32 2147483648, %v2712_v29  ;;  %v2722_v28 = vand.u32 2147483647, %v2712_v29 }
 0xcbe   :  { %4273 = vpow2.f32 %v2769_v20  ;;  %v5667_v32 = vadd.f32 %v2864_v54, %v2853_v16  ;;  %vm2718_vm4 = vweird.f32 %v2712_v29  ;;  %v2838_v48 = vadd.f32 %v2837_v1, %v2825_v12 }
 0xcbf   :  { %v2777_v36 = vand.u32 2147483647, %v5663_v14  ;;  %v2725_v41 = vor.u32 1.1754944e-38, %v2724_v13  ;;  %vm2723_vm5 = vcmp.eq.f32.partialorder %v2722_v28, 8.507059e+37 }
 0xcc0   :  { %4275 = vrcp.f32 %v5667_v32  ;;  %vm2878_vm7 = vweird.f32 %v5667_v32 }
 0xcc1   :  { %v2778_v58 = vsub.f32 0.0, %v2777_v36  ;;  %4277 = vlog2.f32 %v2761_v25  ;;  %v2756_v36 = vmax.f32 %v5599_v51, 0.0  ;;  %v2851_v25 = vadd.f32 %v2850_v2, %v2838_v48 }
 0xcc3   :  { %v4272_v8 = vpop.eup %4271  ;;  %v2779_v49 = vmul.f32 1.442695, %v2778_v58 }
 0xcc4   :  { %v2714_v27 = vmul.f32 %v4272_v8, %v2712_v29  ;;  %v2621_v35 = vpop.f32.mrf.mxu2  ;;  %v4274_v5 = vpop.eup %4273  ;;  %vm2719_vm2 = vweird.f32 %v4272_v8 }
 0xcc5   :  { %v5672_v15 = vadd.f32 %v2621_v35, %v2521_v39  ;;  %4279 = vpow2.f32 %v2779_v49  ;;  %v2771_v56 = vadd.f32 1.0, %v4274_v5  ;;  %vm2720_vm15 = vmor %vm2718_vm4, %vm2719_vm2  ;;  %v2776_v39 = vmax.f32 %v5663_v14, 0.0 }
 0xcc6   :  { %v2715_v52 = vsub.f32 1.0, %v2714_v27  ;;  %v5681_v43 = vpop.eup %4275  ;;  %vm2797_vm2 = vcmp.le.f32.partialorder %v5597_v3, 3.0 }
 0xcc7   :  { %v2787_v42 = vand.u32 2147483647, %v5672_v15  ;;  %4281 = vlog2.f32 %v2771_v56  ;;  %v4278_v47 = vpop.eup %4277  ;;  %v2874_v37 = vmul.f32 %v5681_v43, %v5667_v32  ;;  %vm2879_vm6 = vweird.f32 %v5681_v43  ;;  %vm2798_vm4 = vmand %vm2796_vm14, %vm2797_vm2 }
 0xcc8   :  { %v2716_v63 = vmul.f32 %v4272_v8, %v2715_v52  ;;  %v2763_v26 = vmul.f32 0.6931472, %v4278_v47  ;;  %vm5711_vm8 = vmor %vm2878_vm7, %vm2879_vm6 }
 0xcc9   :  { %v2788_v61 = vsub.f32 0.0, %v2787_v42  ;;  %v2875_v33 = vsub.f32 1.0, %v2874_v37  ;;  %v2884_v42 = vand.u32 2147483648, %v5667_v32  ;;  %v2882_v37 = vand.u32 2147483647, %v5667_v32 }
 0xcca   :  { %v2717_v38 = vadd.f32 %v4272_v8, %v2716_v63 }
 0xccb   :  { %v2789_v18 = vmul.f32 1.442695, %v2788_v61  ;;  %v4280_v62 = vpop.eup %4279  ;;  %v2876_v27 = vmul.f32 %v5681_v43, %v2875_v33  ;;  %vm2883_vm9 = vcmp.eq.f32.partialorder %v2882_v37, 8.507059e+37 }
 0xccc   :  { %v2721_v53 = vsel %vm2720_vm15, %v4272_v8, %v2717_v38  ;;  %v2781_v45 = vadd.f32 1.0, %v4280_v62  ;;  %v2764_v8 = vadd.f32 %v2763_v26, %v2756_v36 }
 0xccd   :  { %v2726_v10 = vsel %vm2723_vm5, %v2725_v41, %v2721_v53  ;;  %4283 = vpow2.f32 %v2789_v18  ;;  %v4282_v9 = vpop.eup %4281  ;;  %v2877_v14 = vadd.f32 %v5681_v43, %v2876_v27 }
 0xcce   :  { %v2727_v17 = vmul.f32 %v5614_v60, %v2726_v10  ;;  %v2730_v29 = vmul.f32 %v5618_v55, %v2726_v10  ;;  %v2733_v7 = vmul.f32 %v5630_v22, %v2726_v10  ;;  %v2736_v31 = vmul.f32 %v5645_v4, %v2726_v10 }
 0xccf   :  { %4285 = vlog2.f32 %v2781_v45  ;;  %v2773_v16 = vmul.f32 0.6931472, %v4282_v9  ;;  %v2862_v55 = vmul.f32 %v5638_v21, %v5620_v11  ;;  %v2766_v4 = vmax.f32 %v5649_v24, 0.0 }
 0xcd0   :  { %v2728_v30 = vmul.f32 0.995, %v2727_v17  ;;  %v2731_v20 = vmul.f32 0.995, %v2730_v29  ;;  %v2734_v54 = vmul.f32 0.995, %v2733_v7  ;;  %v2881_v32 = vsel %vm5711_vm8, %v5681_v43, %v2877_v14 }
 0xcd1   :  { %v2737_v46 = vmul.f32 0.995, %v2736_v31  ;;  %v2774_v13 = vadd.f32 %v2773_v16, %v2766_v4  ;;  %v2863_v56 = vadd.f32 %v2862_v55, %v2851_v25  ;;  %v2765_v24 = vadd.f32 0.001, %v2764_v8 }
 0xcd2   :  { %v2729_v58 = vadd.f32 0.001, %v2728_v30  ;;  %v2732_v60 = vadd.f32 0.001, %v2731_v20  ;;  %v2735_v49 = vadd.f32 0.001, %v2734_v54 }
 0xcd3   :  { %v4284_v22 = vpop.eup %4283  ;;  %v2738_v52 = vadd.f32 0.001, %v2737_v46  ;;  %v2775_v41 = vadd.f32 0.001, %v2774_v13  ;;  %v2888_v45 = vsub.f32 %v5604_v40, %v2863_v56  ;;  %v2832_v17 = vmul.f32 %v5641_v34, %v2765_v24 }
 0xcd4   :  { %v2740_v35 = vmul.f32 6.0, %v2729_v58  ;;  %v2742_v57 = vadd.f32 %v2732_v60, %v2729_v58  ;;  %v2791_v5 = vadd.f32 1.0, %v4284_v22  ;;  %v2885_v29 = vor.u32 1.1754944e-38, %v2884_v42 }
 0xcd5   :  { %v4286_v51 = vpop.eup %4285  ;;  %v2834_v40 = vmul.f32 %v5641_v34, %v2775_v41  ;;  %v2845_v30 = vmul.f32 %v5643_v6, %v2775_v41  ;;  %v2786_v20 = vmax.f32 %v5672_v15, 0.0  ;;  %v2821_v16 = vmul.f32 %v5628_v23, %v2765_v24 }
 0xcd6   :  { %v5698_v63 = vadd.f32 -3.0, %v2740_v35  ;;  %v2743_v11 = vmul.f32 6.0, %v2742_v57  ;;  %v2745_v28 = vadd.f32 %v2742_v57, %v2735_v49  ;;  %v2783_v12 = vmul.f32 0.6931472, %v4286_v51 }
 0xcd7   :  { %4287 = vlog2.f32 %v2791_v5  ;;  %v2886_v36 = vsel %vm2883_vm9, %v2885_v29, %v2881_v32  ;;  %v2833_v25 = vadd.f32 %v2832_v17, %v5628_v23  ;;  %v2835_v27 = vadd.f32 %v2834_v40, %v2821_v16 }
 0xcd8   :  { %v5702_v61 = vadd.f32 -3.0, %v2743_v11  ;;  %v2746_v1 = vmul.f32 6.0, %v2745_v28  ;;  %v2748_v38 = vadd.f32 %v2745_v28, %v2738_v52  ;;  %v3988_v47 = vadd.f32 3.0, %v5698_v63 }
 0xcd9   :  { %v2784_v18 = vadd.f32 %v2783_v12, %v2776_v39  ;;  %v2889_v39 = vmul.f32 %v2888_v45, %v2886_v36  ;;  %v2846_v49 = vadd.f32 %v2845_v30, %v2833_v25  ;;  %v2828_v29 = vmul.f32 %v5698_v63, %v5641_v34 }
 0xcda   :  { %v5707_v62 = vadd.f32 -3.0, %v2746_v1  ;;  %v2749_v53 = vmul.f32 6.0, %v2748_v38  ;;  %v2752_v2 = vsub.f32 %v5702_v61, %v5698_v63  ;;  %v2818_v48 = vmul.f32 %v3988_v47, %v5628_v23 }
 0xcdb   :  { %v2785_v9 = vadd.f32 0.001, %v2784_v18  ;;  %v2890_v42 = vsub.f32 1.0, %v2889_v39 }
 0xcdc   :  { %v5721_v7 = vadd.f32 -3.0, %v2749_v53  ;;  %v2753_v31 = vsub.f32 %v5707_v62, %v5702_v61  ;;  %v2830_v26 = vmul.f32 %v5641_v34, %v2752_v2 }
 0xcdd   :  { %v4288_v33 = vpop.eup %4287  ;;  %v2847_v55 = vmul.f32 %v5643_v6, %v2785_v9  ;;  %v2858_v22 = vmul.f32 %v5652_v0, %v2785_v9  ;;  %v2891_v1 = vmul.f32 %v2890_v42, %v2889_v39 }
 0xcde   :  { %v2754_v43 = vsub.f32 %v5721_v7, %v5707_v62  ;;  %v2793_v54 = vmul.f32 0.6931472, %v4288_v33  ;;  %v2831_v46 = vadd.f32 %v2830_v26, %v2818_v48  ;;  %v2755_v58 = vsub.f32 3.0, %v5721_v7 }
 0xcdf   :  { %v2843_v60 = vmul.f32 %v5643_v6, %v2753_v31  ;;  %v2848_v23 = vadd.f32 %v2847_v55, %v2835_v27  ;;  %v2859_v51 = vadd.f32 %v2858_v22, %v2846_v49  ;;  %v2829_v26 = vadd.f32 %v2828_v29, %v5675_v19  ;;  %v3994_v49 = vld [vmem:[%s6028_s9 + $0xc] sm:$0xf] }
 0xce0   :  { %v2794_v15 = vadd.f32 %v2793_v54, %v2786_v20  ;;  %v2856_v8 = vmul.f32 %v5652_v0, %v2754_v43  ;;  %v2868_v5 = vmul.f32 %v5638_v21, %v2755_v58  ;;  %v2841_v33 = vmul.f32 %v5702_v61, %v5643_v6 }
 0xce1   :  { %v2844_v4 = vadd.f32 %v2843_v60, %v2831_v46  ;;  %v2854_v46 = vmul.f32 %v5707_v62, %v5652_v0  ;;  %v2866_v19 = vmul.f32 %v5638_v21, %v5721_v7 }
 0xce2   :  { %v2795_v35 = vadd.f32 0.001, %v2794_v15  ;;  %v2842_v54 = vadd.f32 %v2841_v33, %v2829_v26 }
 0xce3   :  { %v2857_v57 = vadd.f32 %v2856_v8, %v2844_v4 }
 0xce4   :  { %v2860_v52 = vmul.f32 %v5652_v0, %v2795_v35  ;;  %v2870_v13 = vmul.f32 %v5638_v21, %v2795_v35  ;;  %v2855_v63 = vadd.f32 %v2854_v46, %v2842_v54  ;;  %v4021_v54 = vld [vmem:[%s6026_s7 + $0x1d0] sm:$0xff]  ;;  %v4022_v46 = vld [vmem:[%s6026_s7 + $0x1d8] sm:$0xff] }
 0xce5   :  { %v2869_v56 = vadd.f32 %v2868_v5, %v2857_v57  ;;  %v4001_v5 = vld [vmem:[%s6031_s12 + $0xc] sm:$0xf] }
 0xce6   :  { %v2861_v11 = vadd.f32 %v2860_v52, %v2848_v23  ;;  %v2871_v28 = vadd.f32 %v2870_v13, %v2859_v51  ;;  %v2867_v62 = vadd.f32 %v2866_v19, %v2855_v63  ;;  %v4028_v63 = vld [vmem:[%s6026_s7 + $0x208] sm:$0xff]  ;;  %v4029_v19 = vld [vmem:[%s6026_s7 + $0x210] sm:$0xff] }
 0xce7   :  { %v2887_v12 = vmul.f32 %v2886_v36, %v2869_v56 }
 0xce8   :  { %v2872_v24 = vadd.f32 %v5638_v21, %v2861_v11  ;;  %v2923_v14 = vmul.f32 %v2890_v42, %v2871_v28  ;;  %v2894_v43 = vmul.f32 %v2891_v1, %v2871_v28  ;;  %v3995_v21 = vld [vmem:[%s6029_s10 + $0xc] sm:$0xf] }
 0xce9   :  { %v2898_v38 = vmul.f32 2.0, %v2887_v12  ;;  %v2918_v32 = vmul.f32 %v2887_v12, %v2887_v12  ;;  %v2892_v9 = vmul.f32 %v2889_v39, %v2887_v12 }
 0xcea   :  { %v2897_v47 = vadd.f32 %v2872_v24, %v2871_v28  ;;  %v2919_v41 = vmul.f32 %v2889_v39, %v2872_v24  ;;  %v2924_v18 = vmul.f32 %v2923_v14, %v2890_v42 }
 0xceb   :  { %v2921_v37 = vmul.f32 %v2898_v38, %v2891_v1  ;;  %v2893_v30 = vmul.f32 %v2892_v9, %v2889_v39 }
 0xcec   :  { %v2899_v53 = vsub.f32 %v2897_v47, %v2898_v38  ;;  %v2920_v2 = vmul.f32 %v2919_v41, %v2889_v39  ;;  %v3088_v41 = vpop.permute.xlu0 %3087 }
 0xced   :  { %v2895_v25 = vadd.f32 %v2894_v43, %v2893_v30  ;;  %v4019_v30 = vld [vmem:[%s6026_s7 + $0x1c0] sm:$0xff]  ;;  %v4020_v43 = vld [vmem:[%s6026_s7 + $0x1c8] sm:$0xff] }
 0xcee   :  { %v2900_v10 = vmul.f32 %v2899_v53, %v2891_v1  ;;  %v2922_v45 = vadd.f32 %v2921_v37, %v2920_v2  ;;  %v4011_v1 = vld [vmem:[%s6022_s3 + $0x20] sm:$0xff] }
 0xcef   :  { %v2896_v61 = vmul.f32 %v2895_v25, %v2869_v56  ;;  %v3047_v56 = vpop.permute.xlu2 %3046  ;;  %v4025_v25 = vld [vmem:[%s6026_s7 + $0x1f0] sm:$0xff] }
 0xcf0   :  { %v2901_v48 = vadd.f32 %v2900_v10, %v2887_v12  ;;  %v2925_v17 = vadd.f32 %v2924_v18, %v2922_v45 }
 0xcf2   :  { %4289 = vrcp.f32 %v2901_v48  ;;  %v2926_v31 = vmul.f32 %v2925_v17, %v2918_v32  ;;  %v2913_v16 = vand.u32 2147483648, %v2901_v48  ;;  %v2911_v34 = vand.u32 2147483647, %v2901_v48  ;;  %v3126_v32 = vpop.permute.xlu1 %3125 }
 0xcf3   :  { %vm2907_vm11 = vweird.f32 %v2901_v48 }
 0xcf4   :  { %v2914_v6 = vor.u32 1.1754944e-38, %v2913_v16  ;;  %vm2912_vm13 = vcmp.eq.f32.partialorder %v2911_v34, 8.507059e+37  ;;  %v4024_v16 = vld [vmem:[%s6026_s7 + $0x1e8] sm:$0xff]  ;;  %v4027_v34 = vld [vmem:[%s6026_s7 + $0x200] sm:$0xff] }
 0xcf8   :  { %v4290_v40 = vpop.eup %4289 }
 0xcf9   :  { %v2903_v20 = vmul.f32 %v4290_v40, %v2901_v48  ;;  %vm2908_vm10 = vweird.f32 %v4290_v40  ;;  %v4015_v48 = vld [vmem:[%s6024_s5 + $0x20] sm:$0xff] }
 0xcfa   :  { %vm2909_vm12 = vmor %vm2907_vm11, %vm2908_vm10 }
 0xcfb   :  { %v2904_v36 = vsub.f32 1.0, %v2903_v20 }
 0xcfd   :  { %v2905_v58 = vmul.f32 %v4290_v40, %v2904_v36  ;;  %v4023_v36 = vld [vmem:[%s6026_s7 + $0x1e0] sm:$0xff] }
 0xcff   :  { %v2906_v60 = vadd.f32 %v4290_v40, %v2905_v58  ;;  %v4026_v58 = vld [vmem:[%s6026_s7 + $0x1f8] sm:$0xff] }
 0xd01   :  { %v2910_v55 = vsel %vm2909_vm12, %v4290_v40, %v2906_v60  ;;  %v4030_v60 = vld [vmem:[%s6026_s7 + $0x218] sm:$0xff] }
 0xd02   :  { %v2915_v0 = vsel %vm2912_vm13, %v2914_v6, %v2910_v55  ;;  %v4031_v6 = vld [vmem:[%s6026_s7 + $0x220] sm:$0xff] }
 0xd03   :  { %v2916_v22 = vmul.f32 %v2915_v0, %v2896_v61  ;;  %v2927_v15 = vmul.f32 %v2926_v31, %v2915_v0  ;;  %v4032_v61 = vld [vmem:[%s6026_s7 + $0x228] sm:$0xff]  ;;  %s4400_s7 = smov [#allocation2]  }
 0xd04   :  { %s3689_s3 = sshll.u32 %s4400_s7, 4  ;;  %s3690_s3 = int_to_ptr.vmem [resolvable:$true] %s3689_s3 }
 0xd05   :  { %v2917_v8 = vadd.f32 %v2916_v22, %v2867_v62  ;;  %v2928_v4 = vmul.f32 %v2927_v15, %v2915_v0  ;;  %v3190_v22 = vpop.permute.xlu2 %3189  ;;  %v3195_v15 = vpop.permute.xlu0 %3194 }
 0xd07   :  { %4291 = vlog2.f32 %v2928_v4  ;;  %v2931_v7 = vsel %vm2798_vm4, %v2917_v8, %v5597_v3 }
 0xd08   :  { %3996 = vmatpush.msk.msra.mxu3 %vm60_vm0, %v2931_v7 }
 0xd09   :  { %3997 = vmatmul.msk.f32.vlgmr.msra.gmra.mxu3 %vm56_vm1, %v3995_v21  ;;  %v3200_v21 = vpop.permute.xlu1 %3199 }
 0xd0a   :  { %3998 = vmatpush.msk.msrb.mxu3 %vm60_vm0, %v5517_v59  ;;  %v4000_v59 = vld [vmem:[%s6030_s11 + $0xc] sm:$0xf] }
 0xd0b   :  { %4005 = vmatmul.msk.f32.vlgmr.msrb.gmra.mxu1 %vm56_vm1, %v4000_v59 }
 0xd0c   :  { %4002 = vmatpush.msk.msra.mxu3 %vm60_vm0, %v2931_v7 }
 0xd0d   :  { %v4292_v39 = vpop.eup %4291 }
 0xd0e   :  { %v2930_v27 = vmul.f32 0.6931472, %v4292_v39 }
 0xd10   :  { %v2932_v35 = vsel %vm2798_vm4, %v2930_v27, 0.0  ;;  %v3205_v27 = vpop.permute.xlu2 %3204 }
 0xd11   :  { %v2934_v57 = vrot.slane %v2932_v35, 4  ;;  %3999 = vmatmul.msk.f32.vlgmr.msrb.gmra.mxu3 %vm56_vm1, %v3994_v49 }
 0xd13   :  { %v5767_v3 = vadd.f32 %v2934_v57, %v5507_v44  ;;  %v4006_v44 = vld [vmem:[%s6020_s1 + $0x20] sm:$0xff] }
 0xd19   :  { %4003 = vmatmul.msk.f32.vlgmr.msra.gmra.mxu3 %vm56_vm1, %v4001_v5  ;;  %v3210_v5 = vpop.permute.xlu0 %3209 }
 0xd88   :  { %v5788_v47 = vpop.f32.mrf.mxu1 }
 0xd8c   :  { %v2964_v23 = vpop.f32.mrf.mxu3 }
 0xd94   :  { %v2987_v51 = vpop.f32.mrf.mxu3 }
 0xd95   :  { %v2988_v52 = vadd.f32 %v2987_v51, %v2964_v23 }
 0xd97   :  { %3671 = vst [vmem:[#allocation2] sm:$0xf] %v2988_v52  ;;  %4008 = vmatpush.msk.msrb.mxu3 %vm60_vm0, %v2988_v52 }
 0xd98   :  { %4009 = vmatmul.msk.f32.vlgmr.msrb.gmra.mxu3 %vm56_vm1, %v4006_v44 }
 0xd9c   :  { %v5782_v13 = vpop.f32.mrf.mxu3 }
 0xe1b   :  { %v3072_v42 = vpop.f32.mrf.mxu3 }
 0xe1c   :  { %v3073_v11 = vadd.f32 %v3072_v42, %v3047_v56 }
 0xe1e   :  { %v3076_v28 = vmin.f32 %v3073_v11, 0.0  ;;  %vm3075_vm15 = vcmp.gt.f32.partialorder %v3073_v11, 0.0 }
 0xe20   :  { %v3077_v12 = vmul.f32 1.442695, %v3076_v28 }
 0xe22   :  { %4293 = vpow2.f32 %v3077_v12 }
 0xe28   :  { %v4294_v24 = vpop.eup %4293 }
 0xe29   :  { %v4010_v14 = vadd.f32 -1.0, %v4294_v24 }
 0xe2b   :  { %v3080_v38 = vsel %vm3075_vm15, %v3073_v11, %v4010_v14 }
 0xe2c   :  { %3108 = vmatpush.msra.mxu1 %v3080_v38 }
 0xe2d   :  { %4013 = vmatmul.msk.f32.vlgmr.msra.gmra.mxu1 %vm97_vm3, %v4011_v1 }
 0xeaa   :  { %v3110_v18 = vpop.f32.mrf.mxu1 }
 0xeab   :  { %v3111_v37 = vadd.f32 %v3110_v18, %v3088_v41 }
 0xead   :  { %v3114_v53 = vmin.f32 %v3111_v37, 0.0  ;;  %vm3113_vm1 = vcmp.gt.f32.partialorder %v3111_v37, 0.0 }
 0xeaf   :  { %v3115_v2 = vmul.f32 1.442695, %v3114_v53 }
 0xeb1   :  { %4295 = vpow2.f32 %v3115_v2 }
 0xeb7   :  { %v4296_v10 = vpop.eup %4295 }
 0xeb8   :  { %v4014_v45 = vadd.f32 -1.0, %v4296_v10 }
 0xeba   :  { %v3118_v17 = vsel %vm3113_vm1, %v3111_v37, %v4014_v45 }
 0xebb   :  { %3146 = vmatpush.msra.mxu3 %v3118_v17 }
 0xebc   :  { %4017 = vmatmul.msk.f32.vlgmr.msra.gmra.mxu3 %vm97_vm3, %v4015_v48 }
 0xf3f   :  { %v3148_v29 = vpop.f32.mrf.mxu3 }
 0xf40   :  { %v3149_v31 = vadd.f32 %v3148_v29, %v3126_v32 }
 0xf42   :  { %v3152_v9 = vmin.f32 %v3149_v31, 0.0  ;;  %vm3151_vm5 = vcmp.gt.f32.partialorder %v3149_v31, 0.0 }
 0xf44   :  { %v3153_v26 = vmul.f32 1.442695, %v3152_v9  ;;  %v3215_v9 = vpop.permute.xlu1 %3214 }
 0xf46   :  { %4297 = vpow2.f32 %v3153_v26  ;;  %v3220_v26 = vpop.permute.xlu2 %3219 }
 0xf4c   :  { %v4298_v33 = vpop.eup %4297 }
 0xf4d   :  { %v4018_v40 = vadd.f32 -1.0, %v4298_v33 }
 0xf4f   :  { %v3156_v20 = vsel %vm3151_vm5, %v3149_v31, %v4018_v40 }
 0xf50   :  { %3314 = vmatpush.msrb.mxu1 %v3156_v20 }
 0xf51   :  { %4047 = vmatmul.msk.f32.vlgmr.msrb.gmra.mxu1 %vm97_vm3, %v4019_v30 }
 0xf59   :  { %4048 = vmatmul.msk.f32.gmra.mxu1 %vm97_vm3, %v4020_v43  ;;  %v3225_v43 = vpop.permute.xlu0 %3224 }
 0xf61   :  { %4049 = vmatmul.msk.f32.gmra.mxu1 %vm97_vm3, %v4021_v54 }
 0xf69   :  { %4050 = vmatmul.msk.f32.gmra.mxu1 %vm97_vm3, %v4022_v46 }
 0xf71   :  { %4051 = vmatmul.msk.f32.gmra.mxu1 %vm97_vm3, %v4023_v36 }
 0xf79   :  { %4052 = vmatmul.msk.f32.gmra.mxu1 %vm97_vm3, %v4024_v16 }
 0xf81   :  { %4053 = vmatmul.msk.f32.gmra.mxu1 %vm97_vm3, %v4025_v25  ;;  %v3230_v25 = vpop.permute.xlu1 %3229 }
 0xf89   :  { %4054 = vmatmul.msk.f32.gmra.mxu1 %vm97_vm3, %v4026_v58 }
 0xf91   :  { %4055 = vmatmul.msk.f32.gmra.mxu1 %vm97_vm3, %v4027_v34 }
 0xf99   :  { %4056 = vmatmul.msk.f32.gmra.mxu1 %vm97_vm3, %v4028_v63 }
 0xfa1   :  { %4057 = vmatmul.msk.f32.gmra.mxu1 %vm97_vm3, %v4029_v19 }
 0xfa9   :  { %4058 = vmatmul.msk.f32.gmra.mxu1 %vm97_vm3, %v4030_v60 }
 0xfb1   :  { %4059 = vmatmul.msk.f32.gmra.mxu1 %vm97_vm3, %v4031_v6 }
 0xfb9   :  { %4060 = vmatmul.msk.f32.gmra.mxu1 %vm97_vm3, %v4032_v61 }
 0xfce   :  { %v3316_v55 = vpop.f32.mrf.mxu1 }
 0xfcf   :  { %v3317_v7 = vadd.f32 %v3316_v55, %v3190_v22  ;;  %v3235_v55 = vpop.permute.xlu2 %3234 }
 0xfd6   :  { %v3319_v0 = vpop.f32.mrf.mxu1 }
 0xfd7   :  { %v3320_v4 = vadd.f32 %v3319_v0, %v3195_v15 }
 0xfd9   :  { %v3358_v49 = vmax.f32 %v3317_v7, %v3320_v4 }
 0xfde   :  { %v3322_v62 = vpop.f32.mrf.mxu1 }
 0xfdf   :  { %v3323_v39 = vadd.f32 %v3322_v62, %v3200_v21 }
 0xfe1   :  { %v3359_v57 = vmax.f32 %v3358_v49, %v3323_v39 }
 0xfe6   :  { %v3325_v8 = vpop.f32.mrf.mxu1 }
 0xfe7   :  { %v3326_v35 = vadd.f32 %v3325_v8, %v3205_v27 }
 0xfe9   :  { %v3360_v23 = vmax.f32 %v3359_v57, %v3326_v35 }
 0xfee   :  { %v3328_v59 = vpop.f32.mrf.mxu1 }
 0xfef   :  { %v3329_v51 = vadd.f32 %v3328_v59, %v3210_v5 }
 0xff1   :  { %v3361_v52 = vmax.f32 %v3360_v23, %v3329_v51 }
 0xff3   :  { %v3362_v44 = vsub.f32 %v3317_v7, %v3361_v52  ;;  %v3365_v56 = vsub.f32 %v3320_v4, %v3361_v52  ;;  %v3368_v42 = vsub.f32 %v3323_v39, %v3361_v52  ;;  %v3371_v11 = vsub.f32 %v3326_v35, %v3361_v52 }
 0xff4   :  { %v3374_v14 = vsub.f32 %v3329_v51, %v3361_v52 }
 0xff5   :  { %v3363_v28 = vmul.f32 1.442695, %v3362_v44  ;;  %v3366_v12 = vmul.f32 1.442695, %v3365_v56  ;;  %v3369_v24 = vmul.f32 1.442695, %v3368_v42  ;;  %v5852_v42 = vadd.f32 %v5788_v47, %v5782_v13 }
 0xff6   :  { %v3331_v1 = vpop.f32.mrf.mxu1  ;;  %v3372_v38 = vmul.f32 1.442695, %v3371_v11  ;;  %v3375_v41 = vmul.f32 1.442695, %v3374_v14 }
 0xff7   :  { %4299 = vpow2.f32 %v3363_v28  ;;  %v3332_v36 = vadd.f32 %v3331_v1, %v3215_v9  ;;  %v5859_v13 = vclamps-f32 %v5852_v42, 3.0 }
 0xff8   :  { %4301 = vpow2.f32 %v3366_v12 }
 0xff9   :  { %4303 = vpow2.f32 %v3369_v24  ;;  %v3240_v24 = vpop.permute.xlu0 %3239 }
 0xffa   :  { %4305 = vpow2.f32 %v3372_v38 }
 0xffb   :  { %4307 = vpow2.f32 %v3375_v41 }
 0xffd   :  { %v4300_v18 = vpop.eup %4299 }
 0xffe   :  { %v4302_v37 = vpop.eup %4301  ;;  %v3334_v53 = vpop.f32.mrf.mxu1 }
 0xfff   :  { %v3377_v2 = vadd.f32 %v4302_v37, %v4300_v18  ;;  %v4304_v10 = vpop.eup %4303  ;;  %v3335_v20 = vadd.f32 %v3334_v53, %v3220_v26 }
0x1000   :  { %v4306_v48 = vpop.eup %4305 }
0x1001   :  { %v3378_v45 = vadd.f32 %v4304_v10, %v3377_v2  ;;  %v4308_v32 = vpop.eup %4307  ;;  %v3424_v63 = vmax.f32 %v3332_v36, %v3335_v20 }
0x1003   :  { %v3379_v17 = vadd.f32 %v4306_v48, %v3378_v45 }
0x1005   :  { %v3380_v29 = vadd.f32 %v4308_v32, %v3379_v17 }
0x1006   :  { %v3337_v31 = vpop.f32.mrf.mxu1 }
0x1007   :  { %4309 = vrcp.f32 %v3380_v29  ;;  %v3392_v46 = vand.u32 2147483648, %v3380_v29  ;;  %v3338_v16 = vadd.f32 %v3337_v31, %v3225_v43  ;;  %v3390_v34 = vand.u32 2147483647, %v3380_v29 }
0x1008   :  { %vm3386_vm6 = vweird.f32 %v3380_v29 }
0x1009   :  { %v3393_v6 = vor.u32 1.1754944e-38, %v3392_v46  ;;  %v3425_v61 = vmax.f32 %v3424_v63, %v3338_v16  ;;  %vm3391_vm8 = vcmp.eq.f32.partialorder %v3390_v34, 8.507059e+37 }
0x100d   :  { %v4310_v33 = vpop.eup %4309 }
0x100e   :  { %v3382_v40 = vmul.f32 %v4310_v33, %v3380_v29  ;;  %v3340_v30 = vpop.f32.mrf.mxu1  ;;  %vm3387_vm3 = vweird.f32 %v4310_v33 }
0x100f   :  { %v3341_v19 = vadd.f32 %v3340_v30, %v3230_v25  ;;  %vm3388_vm7 = vmor %vm3386_vm6, %vm3387_vm3 }
0x1010   :  { %v3383_v54 = vsub.f32 1.0, %v3382_v40 }
0x1011   :  { %v3426_v15 = vmax.f32 %v3425_v61, %v3341_v19 }
0x1012   :  { %v3384_v58 = vmul.f32 %v4310_v33, %v3383_v54 }
0x1014   :  { %v3385_v60 = vadd.f32 %v4310_v33, %v3384_v58 }
0x1016   :  { %v3389_v0 = vsel %vm3388_vm7, %v4310_v33, %v3385_v60  ;;  %v3343_v62 = vpop.f32.mrf.mxu1 }
0x1017   :  { %v3394_v22 = vsel %vm3391_vm8, %v3393_v6, %v3389_v0  ;;  %v3344_v8 = vadd.f32 %v3343_v62, %v3235_v55 }
0x1018   :  { %v3395_v4 = vmul.f32 %v4300_v18, %v3394_v22  ;;  %v3398_v21 = vmul.f32 %v4302_v37, %v3394_v22  ;;  %v3401_v7 = vmul.f32 %v4304_v10, %v3394_v22  ;;  %v3404_v39 = vmul.f32 %v4306_v48, %v3394_v22 }
0x1019   :  { %v3427_v27 = vmax.f32 %v3426_v15, %v3344_v8 }
0x101a   :  { %v3396_v49 = vmul.f32 0.995, %v3395_v4  ;;  %v3399_v35 = vmul.f32 0.995, %v3398_v21  ;;  %v3402_v57 = vmul.f32 0.995, %v3401_v7 }
0x101b   :  { %v3405_v5 = vmul.f32 0.995, %v3404_v39  ;;  %v3428_v59 = vsub.f32 %v3332_v36, %v3427_v27  ;;  %v3431_v23 = vsub.f32 %v3335_v20, %v3427_v27  ;;  %v3434_v51 = vsub.f32 %v3338_v16, %v3427_v27 }
0x101c   :  { %v3397_v52 = vadd.f32 0.001, %v3396_v49  ;;  %v3400_v44 = vadd.f32 0.001, %v3399_v35  ;;  %v3437_v56 = vsub.f32 %v3341_v19, %v3427_v27  ;;  %v3440_v12 = vsub.f32 %v3344_v8, %v3427_v27  ;;  %v3245_v19 = vpop.permute.xlu1 %3244 }
0x101d   :  { %v3429_v11 = vmul.f32 1.442695, %v3428_v59  ;;  %v3432_v28 = vmul.f32 1.442695, %v3431_v23  ;;  %v3403_v14 = vadd.f32 0.001, %v3402_v57 }
0x101e   :  { %v3408_v1 = vmul.f32 6.0, %v3397_v52  ;;  %v3410_v38 = vadd.f32 %v3400_v44, %v3397_v52  ;;  %v3435_v41 = vmul.f32 1.442695, %v3434_v51  ;;  %v3346_v18 = vpop.f32.mrf.mxu1  ;;  %v3406_v37 = vadd.f32 0.001, %v3405_v5  ;;  %v3250_v44 = vpop.permute.xlu2 %3249 }
0x101f   :  { %4311 = vpow2.f32 %v3429_v11  ;;  %v3438_v53 = vmul.f32 1.442695, %v3437_v56  ;;  %v5854_v2 = vadd.f32 %v3346_v18, %v3240_v24  ;;  %v3441_v47 = vmul.f32 1.442695, %v3440_v12 }
0x1020   :  { %v5856_v10 = vadd.f32 -3.0, %v3408_v1  ;;  %v3411_v45 = vmul.f32 6.0, %v3410_v38  ;;  %v3413_v48 = vadd.f32 %v3410_v38, %v3403_v14  ;;  %4313 = vpow2.f32 %v3432_v28 }
0x1021   :  { %v3491_v17 = vand.u32 2147483647, %v5854_v2  ;;  %4315 = vpow2.f32 %v3435_v41 }
0x1022   :  { %v5862_v32 = vadd.f32 -3.0, %v3411_v45  ;;  %v3414_v29 = vmul.f32 6.0, %v3413_v48  ;;  %v3416_v31 = vadd.f32 %v3413_v48, %v3406_v37  ;;  %vm3535_vm9 = vcmp.ge.f32.partialorder %v5859_v13, %v5856_v10  ;;  %v3255_v37 = vpop.permute.xlu0 %3254 }
0x1023   :  { %v3492_v9 = vsub.f32 0.0, %v3491_v17  ;;  %4317 = vpow2.f32 %v3438_v53  ;;  %v4072_v40 = vsel %vm3535_vm9, 1.0, %v4399_v50  ;;  %v4065_v58 = vadd.f32 3.0, %v5856_v10 }
0x1024   :  { %v5866_v26 = vadd.f32 -3.0, %v3414_v29  ;;  %v3417_v33 = vmul.f32 6.0, %v3416_v31  ;;  %4319 = vpow2.f32 %v3441_v47  ;;  %vm3538_vm10 = vcmp.ge.f32.partialorder %v5859_v13, %v5862_v32 }
0x1025   :  { %v5869_v30 = vpop.eup %4311  ;;  %v3493_v20 = vmul.f32 1.442695, %v3492_v9  ;;  %v4073_v46 = vsel %vm3538_vm10, 1.0, %v4399_v50  ;;  %v5880_v36 = vsub.f32 1.0, %v4072_v40  ;;  %v3420_v60 = vsub.f32 %v5862_v32, %v5856_v10 }
0x1026   :  { %v5873_v43 = vpop.eup %4313  ;;  %v5875_v54 = vadd.f32 -3.0, %v3417_v33  ;;  %vm3541_vm11 = vcmp.ge.f32.partialorder %v5859_v13, %v5866_v26  ;;  %v3349_v16 = vpop.f32.mrf.mxu1  ;;  %v3421_v6 = vsub.f32 %v5866_v26, %v5862_v32  ;;  %v5894_v61 = vsub.f32 %v4072_v40, %v4073_v46 }
0x1027   :  { %v3443_v25 = vadd.f32 %v5873_v43, %v5869_v30  ;;  %v4074_v34 = vsel %vm3541_vm11, 1.0, %v4399_v50  ;;  %v5886_v63 = vpop.eup %4315  ;;  %v5902_v22 = vadd.f32 %v3349_v16, %v3245_v19  ;;  %4321 = vpow2.f32 %v3493_v20 }
0x1028   :  { %vm3544_vm12 = vcmp.ge.f32.partialorder %v5859_v13, %v5875_v54  ;;  %v5900_v62 = vsub.f32 %v4073_v46, %v4074_v34  ;;  %v3550_v8 = vmul.f32 %v4065_v58, %v5880_v36  ;;  %v3560_v4 = vmul.f32 %v5894_v61, %v3420_v60 }
0x1029   :  { %v5897_v55 = vsel %vm3544_vm12, 1.0, %v4399_v50  ;;  %v3444_v0 = vadd.f32 %v5886_v63, %v3443_v25  ;;  %v5904_v15 = vpop.eup %4317  ;;  %v3501_v50 = vand.u32 2147483647, %v5902_v22  ;;  %v3422_v27 = vsub.f32 %v5875_v54, %v5866_v26 }
0x102a   :  { %v4320_v21 = vpop.eup %4319  ;;  %v3573_v39 = vmul.f32 %v5900_v62, %v3421_v6  ;;  %v3423_v49 = vsub.f32 3.0, %v5875_v54  ;;  %v3561_v35 = vadd.f32 %v3560_v4, %v3550_v8  ;;  %v5915_v57 = vsub.f32 %v4074_v34, %v5897_v55 }
0x102b   :  { %v3445_v7 = vadd.f32 %v5904_v15, %v3444_v0  ;;  %v3502_v59 = vsub.f32 0.0, %v3501_v50  ;;  %v3558_v16 = vmul.f32 %v5856_v10, %v5894_v61  ;;  %v5933_v6 = vmul.f32 -3.0, %v5880_v36 }
0x102c   :  { %v3574_v23 = vadd.f32 %v3573_v39, %v3561_v35  ;;  %v3586_v52 = vmul.f32 %v5915_v57, %v3422_v27  ;;  %v3598_v11 = vmul.f32 %v5897_v55, %v3423_v49  ;;  %v3571_v10 = vmul.f32 %v5862_v32, %v5900_v62 }
0x102d   :  { %v3446_v5 = vadd.f32 %v4320_v21, %v3445_v7  ;;  %v4322_v56 = vpop.eup %4321  ;;  %v3503_v28 = vmul.f32 1.442695, %v3502_v59  ;;  %v3559_v39 = vadd.f32 %v3558_v16, %v5933_v6  ;;  %v3490_v59 = vmax.f32 %v5854_v2, 0.0 }
0x102e   :  { %v3352_v51 = vpop.f32.mrf.mxu1  ;;  %v3587_v24 = vadd.f32 %v3586_v52, %v3574_v23  ;;  %v3495_v38 = vadd.f32 1.0, %v4322_v56  ;;  %v3596_v2 = vmul.f32 %v5897_v55, %v5875_v54  ;;  %vm3530_vm10 = vcmp.ge.f32.partialorder %v5852_v42, -3.0 }
0x102f   :  { %4323 = vrcp.f32 %v3446_v5  ;;  %v5919_v12 = vadd.f32 %v3352_v51, %v3250_v44  ;;  %v3458_v31 = vand.u32 2147483648, %v3446_v5  ;;  %v3456_v46 = vand.u32 2147483647, %v3446_v5 }
0x1030   :  { %4325 = vpow2.f32 %v3503_v28  ;;  %v5922_v1 = vadd.f32 %v3598_v11, %v3587_v24  ;;  %vm3452_vm14 = vweird.f32 %v3446_v5  ;;  %v3572_v56 = vadd.f32 %v3571_v10, %v3559_v39 }
0x1031   :  { %v3511_v14 = vand.u32 2147483647, %v5919_v12  ;;  %v3459_v19 = vor.u32 1.1754944e-38, %v3458_v31  ;;  %vm3457_vm4 = vcmp.eq.f32.partialorder %v3456_v46, 8.507059e+37  ;;  %v3584_v11 = vmul.f32 %v5866_v26, %v5915_v57 }
0x1032   :  { %4327 = vrcp.f32 %v5922_v1  ;;  %vm3612_vm15 = vweird.f32 %v5922_v1  ;;  %vm3531_vm11 = vcmp.le.f32.partialorder %v5852_v42, 3.0 }
0x1033   :  { %v3512_v41 = vsub.f32 0.0, %v3511_v14  ;;  %4329 = vlog2.f32 %v3495_v38  ;;  %v3585_v26 = vadd.f32 %v3584_v11, %v3572_v56  ;;  %vm3532_vm12 = vmand %vm3530_vm10, %vm3531_vm11 }
0x1035   :  { %v4324_v18 = vpop.eup %4323  ;;  %v3513_v45 = vmul.f32 1.442695, %v3512_v41 }
0x1036   :  { %v3448_v53 = vmul.f32 %v4324_v18, %v3446_v5  ;;  %v3355_v48 = vpop.f32.mrf.mxu1  ;;  %v4326_v17 = vpop.eup %4325  ;;  %vm3453_vm13 = vweird.f32 %v4324_v18 }
0x1037   :  { %v5925_v47 = vadd.f32 %v3355_v48, %v3255_v37  ;;  %4331 = vpow2.f32 %v3513_v45  ;;  %v3505_v9 = vadd.f32 1.0, %v4326_v17  ;;  %vm3454_vm2 = vmor %vm3452_vm14, %vm3453_vm13  ;;  %v3510_v45 = vmax.f32 %v5919_v12, 0.0 }
0x1038   :  { %v3449_v29 = vsub.f32 1.0, %v3448_v53  ;;  %v5928_v40 = vpop.eup %4327  ;;  %v3616_v12 = vand.u32 2147483647, %v5922_v1 }
0x1039   :  { %v3521_v33 = vand.u32 2147483647, %v5925_v47  ;;  %4333 = vlog2.f32 %v3505_v9  ;;  %v4330_v34 = vpop.eup %4329  ;;  %v3608_v0 = vmul.f32 %v5928_v40, %v5922_v1  ;;  %vm3613_vm1 = vweird.f32 %v5928_v40 }
0x103a   :  { %v3450_v20 = vmul.f32 %v4324_v18, %v3449_v29  ;;  %v3497_v49 = vmul.f32 0.6931472, %v4330_v34  ;;  %vm5965_vm5 = vmor %vm3612_vm15, %vm3613_vm1  ;;  %vm3617_vm3 = vcmp.eq.f32.partialorder %v3616_v12, 8.507059e+37 }
0x103b   :  { %v3522_v25 = vsub.f32 0.0, %v3521_v33  ;;  %v3609_v23 = vsub.f32 1.0, %v3608_v0  ;;  %v3618_v0 = vand.u32 2147483648, %v5922_v1 }
0x103c   :  { %v3451_v58 = vadd.f32 %v4324_v18, %v3450_v20  ;;  %v3498_v28 = vadd.f32 %v3497_v49, %v3490_v59 }
0x103d   :  { %v3523_v60 = vmul.f32 1.442695, %v3522_v25  ;;  %v4332_v8 = vpop.eup %4331 }
0x103e   :  { %v3455_v4 = vsel %vm3454_vm2, %v4324_v18, %v3451_v58  ;;  %v3515_v7 = vadd.f32 1.0, %v4332_v8  ;;  %v3610_v18 = vmul.f32 %v5928_v40, %v3609_v23  ;;  %v3499_v29 = vadd.f32 0.001, %v3498_v28 }
0x103f   :  { %v3460_v21 = vsel %vm3457_vm4, %v3459_v19, %v3455_v4  ;;  %4335 = vpow2.f32 %v3523_v60  ;;  %v4334_v5 = vpop.eup %4333  ;;  %v3520_v19 = vmax.f32 %v5925_v47, 0.0  ;;  %v3597_v60 = vadd.f32 %v3596_v2, %v3585_v26 }
0x1040   :  { %v3461_v50 = vmul.f32 %v5869_v30, %v3460_v21  ;;  %v3464_v27 = vmul.f32 %v5873_v43, %v3460_v21  ;;  %v3467_v35 = vmul.f32 %v5886_v63, %v3460_v21  ;;  %4337 = vlog2.f32 %v3515_v7 }
0x1041   :  { %v3470_v51 = vmul.f32 %v5904_v15, %v3460_v21  ;;  %v3507_v44 = vmul.f32 0.6931472, %v4334_v5  ;;  %v3500_v43 = vmax.f32 %v5902_v22, 0.0  ;;  %v3611_v16 = vadd.f32 %v5928_v40, %v3610_v18 }
0x1042   :  { %v3462_v32 = vmul.f32 0.995, %v3461_v50  ;;  %v3465_v52 = vmul.f32 0.995, %v3464_v27  ;;  %v3468_v30 = vmul.f32 0.995, %v3467_v35  ;;  %v3566_v47 = vmul.f32 %v5894_v61, %v3499_v29 }
0x1043   :  { %v3471_v38 = vmul.f32 0.995, %v3470_v51  ;;  %v3508_v41 = vadd.f32 %v3507_v44, %v3500_v43  ;;  %v3615_v49 = vsel %vm5965_vm5, %v5928_v40, %v3611_v16  ;;  %v3555_v51 = vmul.f32 %v5880_v36, %v3499_v29 }
0x1044   :  { %v3463_v24 = vadd.f32 0.001, %v3462_v32  ;;  %v3466_v63 = vadd.f32 0.001, %v3465_v52  ;;  %v3469_v48 = vadd.f32 0.001, %v3468_v30  ;;  %v3567_v30 = vadd.f32 %v3566_v47, %v5880_v36 }
0x1045   :  { %v4336_v14 = vpop.eup %4335  ;;  %v3472_v31 = vadd.f32 0.001, %v3471_v38  ;;  %v3509_v20 = vadd.f32 0.001, %v3508_v41  ;;  %v3619_v52 = vor.u32 1.1754944e-38, %v3618_v0  ;;  %v3622_v41 = vsub.f32 %v5859_v13, %v3597_v60 }
0x1046   :  { %v3525_v15 = vadd.f32 1.0, %v4336_v14  ;;  %v3474_v37 = vmul.f32 6.0, %v3463_v24  ;;  %v4338_v53 = vpop.eup %4337  ;;  %v3476_v17 = vadd.f32 %v3466_v63, %v3463_v24 }
0x1047   :  { %v3517_v22 = vmul.f32 0.6931472, %v4338_v53  ;;  %v3568_v27 = vmul.f32 %v5894_v61, %v3509_v20  ;;  %v3579_v32 = vmul.f32 %v5900_v62, %v3509_v20  ;;  %v3620_v28 = vsel %vm3617_vm3, %v3619_v52, %v3615_v49 }
0x1048   :  { %4339 = vlog2.f32 %v3525_v15  ;;  %v5953_v9 = vadd.f32 -3.0, %v3474_v37  ;;  %v3477_v54 = vmul.f32 6.0, %v3476_v17  ;;  %v3479_v33 = vadd.f32 %v3476_v17, %v3469_v48 }
0x1049   :  { %v3518_v46 = vadd.f32 %v3517_v22, %v3510_v45  ;;  %v3569_v63 = vadd.f32 %v3568_v27, %v3555_v51  ;;  %v3580_v18 = vadd.f32 %v3579_v32, %v3567_v30  ;;  %v3623_v45 = vmul.f32 %v3622_v41, %v3620_v28 }
0x104a   :  { %v5958_v25 = vadd.f32 -3.0, %v3477_v54  ;;  %v3480_v58 = vmul.f32 6.0, %v3479_v33  ;;  %v3482_v34 = vadd.f32 %v3479_v33, %v3472_v31  ;;  %v4070_v8 = vadd.f32 3.0, %v5953_v9 }
0x104b   :  { %v3519_v4 = vadd.f32 0.001, %v3518_v46  ;;  %v3624_v33 = vsub.f32 1.0, %v3623_v45  ;;  %v3562_v60 = vmul.f32 %v5953_v9, %v5894_v61 }
0x104c   :  { %v5969_v21 = vadd.f32 -3.0, %v3480_v58  ;;  %v3483_v7 = vmul.f32 6.0, %v3482_v34  ;;  %v3486_v39 = vsub.f32 %v5958_v25, %v5953_v9  ;;  %v3552_v1 = vmul.f32 %v4070_v8, %v5880_v36 }
0x104d   :  { %v3581_v44 = vmul.f32 %v5900_v62, %v3519_v4  ;;  %v3592_v14 = vmul.f32 %v5915_v57, %v3519_v4  ;;  %v3625_v16 = vmul.f32 %v3624_v33, %v3623_v45  ;;  %v3563_v4 = vadd.f32 %v3562_v60, %v5933_v6 }
0x104e   :  { %v4340_v50 = vpop.eup %4339  ;;  %v5979_v5 = vadd.f32 -3.0, %v3483_v7  ;;  %v3487_v59 = vsub.f32 %v5969_v21, %v5958_v25  ;;  %v3564_v23 = vmul.f32 %v5894_v61, %v3486_v39  ;;  %v3575_v10 = vmul.f32 %v5958_v25, %v5900_v62 }
0x104f   :  { %v3527_v35 = vmul.f32 0.6931472, %v4340_v50  ;;  %v3582_v37 = vadd.f32 %v3581_v44, %v3569_v63  ;;  %v3593_v17 = vadd.f32 %v3592_v14, %v3580_v18 }
0x1050   :  { %v3488_v40 = vsub.f32 %v5979_v5, %v5969_v21  ;;  %v3565_v11 = vadd.f32 %v3564_v23, %v3552_v1  ;;  %v3489_v43 = vsub.f32 3.0, %v5979_v5  ;;  %v3577_v24 = vmul.f32 %v5900_v62, %v3487_v59 }
0x1051   :  { %v3528_v56 = vadd.f32 %v3527_v35, %v3520_v19  ;;  %v3576_v35 = vadd.f32 %v3575_v10, %v3563_v4  ;;  %v3588_v59 = vmul.f32 %v5969_v21, %v5915_v57  ;;  %v3600_v25 = vmul.f32 %v5897_v55, %v5979_v5 }
0x1052   :  { %v3590_v38 = vmul.f32 %v5915_v57, %v3488_v40  ;;  %v3578_v15 = vadd.f32 %v3577_v24, %v3565_v11  ;;  %v3602_v48 = vmul.f32 %v5897_v55, %v3489_v43 }
0x1053   :  { %v3529_v2 = vadd.f32 0.001, %v3528_v56  ;;  %v3589_v62 = vadd.f32 %v3588_v59, %v3576_v35 }
0x1054   :  { %v3591_v26 = vadd.f32 %v3590_v38, %v3578_v15 }
0x1055   :  { %v3594_v53 = vmul.f32 %v5915_v57, %v3529_v2  ;;  %v3604_v36 = vmul.f32 %v5897_v55, %v3529_v2 }
0x1056   :  { %v3603_v22 = vadd.f32 %v3602_v48, %v3591_v26 }
0x1057   :  { %v3595_v29 = vadd.f32 %v3594_v53, %v3582_v37  ;;  %v3605_v31 = vadd.f32 %v3604_v36, %v3593_v17 }
0x1058   :  { %v3621_v20 = vmul.f32 %v3620_v28, %v3603_v22  ;;  %v3601_v28 = vadd.f32 %v3600_v25, %v3589_v62 }
0x1059   :  { %v3606_v54 = vadd.f32 %v5897_v55, %v3595_v29  ;;  %v3657_v7 = vmul.f32 %v3624_v33, %v3605_v31  ;;  %v3628_v1 = vmul.f32 %v3625_v16, %v3605_v31 }
0x105a   :  { %v3632_v46 = vmul.f32 2.0, %v3621_v20  ;;  %v3626_v0 = vmul.f32 %v3623_v45, %v3621_v20  ;;  %v3652_v56 = vmul.f32 %v3621_v20, %v3621_v20 }
0x105b   :  { %v3631_v13 = vadd.f32 %v3606_v54, %v3605_v31  ;;  %v3653_v19 = vmul.f32 %v3623_v45, %v3606_v54  ;;  %v3658_v61 = vmul.f32 %v3657_v7, %v3624_v33 }
0x105c   :  { %v3655_v39 = vmul.f32 %v3632_v46, %v3625_v16  ;;  %v3627_v47 = vmul.f32 %v3626_v0, %v3623_v45 }
0x105d   :  { %v3633_v12 = vsub.f32 %v3631_v13, %v3632_v46  ;;  %v3654_v8 = vmul.f32 %v3653_v19, %v3623_v45 }
0x105e   :  { %v3629_v23 = vadd.f32 %v3628_v1, %v3627_v47 }
0x105f   :  { %v3634_v58 = vmul.f32 %v3633_v12, %v3625_v16  ;;  %v3656_v49 = vadd.f32 %v3655_v39, %v3654_v8 }
0x1060   :  { %v3630_v11 = vmul.f32 %v3629_v23, %v3603_v22 }
0x1061   :  { %v3635_v34 = vadd.f32 %v3634_v58, %v3621_v20  ;;  %v3659_v52 = vadd.f32 %v3658_v61, %v3656_v49 }
0x1063   :  { %4341 = vrcp.f32 %v3635_v34  ;;  %v3647_v51 = vand.u32 2147483648, %v3635_v34  ;;  %v3645_v6 = vand.u32 2147483647, %v3635_v34  ;;  %vm3641_vm7 = vweird.f32 %v3635_v34 }
0x1064   :  { %v3660_v57 = vmul.f32 %v3659_v52, %v3652_v56 }
0x1065   :  { %v3648_v40 = vor.u32 1.1754944e-38, %v3647_v51  ;;  %vm3646_vm9 = vcmp.eq.f32.partialorder %v3645_v6, 8.507059e+37 }
0x1069   :  { %v4342_v50 = vpop.eup %4341 }
0x106a   :  { %v3637_v27 = vmul.f32 %v4342_v50, %v3635_v34  ;;  %vm3642_vm6 = vweird.f32 %v4342_v50 }
0x106b   :  { %vm3643_vm8 = vmor %vm3641_vm7, %vm3642_vm6 }
0x106c   :  { %v3638_v9 = vsub.f32 1.0, %v3637_v27 }
0x106e   :  { %v3639_v32 = vmul.f32 %v4342_v50, %v3638_v9 }
0x1070   :  { %v3640_v44 = vadd.f32 %v4342_v50, %v3639_v32 }
0x1072   :  { %v3644_v30 = vsel %vm3643_vm8, %v4342_v50, %v3640_v44 }
0x1073   :  { %v3649_v21 = vsel %vm3646_vm9, %v3648_v40, %v3644_v30 }
0x1074   :  { %v3650_v43 = vmul.f32 %v3649_v21, %v3630_v11  ;;  %v3661_v24 = vmul.f32 %v3660_v57, %v3649_v21 }
0x1076   :  { %v3651_v55 = vadd.f32 %v3650_v43, %v3601_v28  ;;  %v3662_v5 = vmul.f32 %v3661_v24, %v3649_v21 }
0x1078   :  { %4343 = vlog2.f32 %v3662_v5  ;;  %v3665_v63 = vsel %vm3532_vm12, %v3651_v55, %v5852_v42 }
0x1079   :  { %3672 = vst [vmem:[#allocation2 + $0x4] sm:$0xf] %v3665_v63 }
0x107a   :  { %3694 = dma.vmem_to_hbm [thread:$0]  %s3690_s3, 128, %s3692_s28, [#allocation3]  }
0x107e   :  { %v4344_v14 = vpop.eup %4343 }
0x107f   :  { %v3664_v2 = vmul.f32 0.6931472, %v4344_v14 }
0x1081   :  { %v3666_v38 = vsel %vm3532_vm12, %v3664_v2, 0.0 }
0x1082   :  { %v3668_v41 = vrot.slane %v3666_v38, 4 }
0x1084   :  { %v3670_v15 = vadd.f32 %v3668_v41, %v5767_v3 }
0x1086   :  { %v3674_v18 = vrot.slane %v3670_v15, 4 }
0x1088   :  { %v3676_v37 = vsel %vm60_vm0, %v3674_v18, 0.0 }
0x1089   :  { %v3677_v53 = vrot.slane %v3676_v37, 4 }
0x108b   :  { %v3678_v36 = vadd.f32 %v3677_v53, %v3676_v37 }
0x108d   :  { %v3679_v45 = vrot.slane %v3678_v36, 2 }
0x108f   :  { %v3680_v26 = vadd.f32 %v3679_v45, %v3678_v36 }
0x1091   :  { %v3681_v42 = vrot.slane %v3680_v26, 1 }
0x1093   :  { %v3682_v48 = vadd.f32 %v3681_v42, %v3680_v26 }
0x1095   :  { %3683 = vst [vmem:[#allocation4] sm:$0x1] %v3682_v48 }
0x1096   :  { %3705 = dma.vmem_to_hbm [thread:$0]  %s3701_s8, 16, %s3703_s30, [#allocation5]  }
0x1097   :  { %4394 = dma.done.wait [#allocation3], 128  }
0x1098   :  { %4395 = vsyncadd [#allocation3], 4294967168 }
0x1099   :  { %4396 = dma.done.wait [#allocation5], 16  }
0x109a   :  { %4397 = vsyncadd [#allocation5], 4294967280 }
0x109b   :  { %3714 = vsyncpa [#allocation3], 1 }
0x109c   :  { %3715 = vsyncpa [#allocation5], 1 }

</bundles_post_ra>
